<compile_context>
chip_gen: v7x
topology: tpu7x:2x2x1
jax: 0.10.0
libtpu: 0.0.40
codegen_flags: <defaults>
</compile_context>

<pallas_src>
import functools

import jax
import jax.numpy as jnp
from jax.experimental import pallas as pl
from jax.experimental.pallas import tpu as pltpu

_MM_DTYPE = jnp.bfloat16    # MXU input dtype; weights pre-cast to this in HBM.
_ACT_DTYPE = jnp.bfloat16   # inter-block activation dtype in HBM.
_LN_EPS = 1e-5


@functools.lru_cache(maxsize=None)
def _vmem_limit_bytes():
    # Per-generation scoped VMEM: ~75% of physical (96 MiB on v5e/v6e,
    # 48 MiB on v7x); fall back to a v7x-safe value if the query fails.
    try:
        cap = pltpu.get_tpu_info().vmem_capacity_bytes
    except Exception:  # noqa: BLE001 - any failure -> conservative default
        cap = 64 * 1024 * 1024
    return int(min(cap * 3 // 4, 100 * 1024 * 1024))


def _cparams(sem):
    return pltpu.CompilerParams(dimension_semantics=sem,
                                vmem_limit_bytes=_vmem_limit_bytes())


def _full_map(ndim):
    # Weight / bias blocks: whole (small) array, same block every grid step.
    # TODO(synk): mark these pipeline_mode=pl.Buffered(1) (single-buffer the
    # grid-invariant weights) once verified end-to-end on this jax version.
    return lambda *_: (0,) * ndim


# ---------------------------------------------------------------------------
# In-kernel helpers (operate on VMEM-resident values).
# ---------------------------------------------------------------------------
def _mm(a, b):
    """a @ b on the MXU: bf16 inputs, f32 accumulation."""
    return jnp.dot(a.astype(_MM_DTYPE), b.astype(_MM_DTYPE),
                   preferred_element_type=jnp.float32)


def _layernorm(x, g, b):
    x = x.astype(jnp.float32)
    mean = jnp.mean(x, axis=-1, keepdims=True)
    var = jnp.mean(jnp.square(x - mean), axis=-1, keepdims=True)
    return (x - mean) * jax.lax.rsqrt(var + _LN_EPS) * g + b


def _mha(q, k, v, wo, bo, num_heads, causal):
    """All-heads attention + output projection, batched over heads.

    q: (T, D) f32, k/v: (S, D) f32, wo: (D, D).  One batched (H,T,S) score
    matmul, one batched (H,T,Dh) context matmul, and a single full-K
    (T,D)@(D,D) out-projection (no per-head slices / per-head matmuls).
    """
    T, D = q.shape
    S = k.shape[0]
    H = num_heads
    Dh = D // H
    scale = 1.0 / float(Dh) ** 0.5
    q3 = jnp.transpose((q * scale).reshape(T, H, Dh), (1, 0, 2)).astype(_MM_DTYPE)
    k3 = jnp.transpose(k.reshape(S, H, Dh), (1, 0, 2)).astype(_MM_DTYPE)
    v3 = jnp.transpose(v.reshape(S, H, Dh), (1, 0, 2)).astype(_MM_DTYPE)
    s = jnp.einsum('htd,hsd->hts', q3, k3,
                   preferred_element_type=jnp.float32)            # (H, T, S)
    if causal:
        row = jax.lax.broadcasted_iota(jnp.int32, (T, S), 0)
        col = jax.lax.broadcasted_iota(jnp.int32, (T, S), 1)
        s = s + jnp.where(col <= row, 0.0, -1e30)[None, :, :]
    m = jnp.max(s, axis=-1, keepdims=True)
    p = jnp.exp(s - m)
    p = p * pl.reciprocal(jnp.sum(p, axis=-1, keepdims=True), approx=True)
    ctx = jnp.einsum('hts,hsd->htd', p.astype(_MM_DTYPE), v3,
                     preferred_element_type=jnp.float32)          # (H, T, Dh)
    ctx = jnp.transpose(ctx, (1, 0, 2)).reshape(T, D)
    return _mm(ctx, wo) + bo


# ---------------------------------------------------------------------------
# Kernels
# ---------------------------------------------------------------------------
def _patch_embed_kernel(x_ref, w_ref, b_ref, pos_ref, o_ref):
    x = x_ref[0]                                          # (N_patch, C*p*p)
    y = _mm(x, w_ref[...]) + b_ref[...] + pos_ref[...]
    o_ref[0] = y.astype(o_ref.dtype)


def _enc_block_kernel(x_ref, ln1_g, ln1_b, wq, bq, wk, bk, wv, bv, wo, bo,
                      ln2_g, ln2_b, w1, b1, w2, b2, lnf_g, lnf_b,
                      o_ref, *, num_heads, apply_final_ln):
    x = x_ref[0].astype(jnp.float32)                      # (N, D)
    # --- pre-norm self attention ---
    h = _layernorm(x, ln1_g[...], ln1_b[...])
    q = _mm(h, wq[...]) + bq[...]
    k = _mm(h, wk[...]) + bk[...]
    v = _mm(h, wv[...]) + bv[...]
    x = x + _mha(q, k, v, wo[...], bo[...], num_heads, causal=False)
    # --- pre-norm MLP ---
    h = _layernorm(x, ln2_g[...], ln2_b[...])
    h = jax.nn.gelu(_mm(h, w1[...]) + b1[...])
    x = x + _mm(h, w2[...]) + b2[...]
    if apply_final_ln:                                    # encoder final LN fused here
        x = _layernorm(x, lnf_g[...], lnf_b[...])
    o_ref[0] = x.astype(o_ref.dtype)


def _dec_block_kernel(x_ref, mem_ref,
                      ln1_g, ln1_b, s_wq, s_bq, s_wk, s_bk, s_wv, s_bv, s_wo, s_bo,
                      ln2_g, ln2_b, c_wq, c_bq, c_wk, c_bk, c_wv, c_bv, c_wo, c_bo,
                      ln3_g, ln3_b, w1, b1, w2, b2, lnf_g, lnf_b,
                      o_ref, *, num_heads, apply_final_ln):
    # TODO(synk): for D >= ~768 / long sequences on v7x (64 MiB VMEM) split this
    # fused block (or stream w1/w2 with pltpu.emit_pipeline) instead of holding
    # every weight + activation resident.
    x = x_ref[0].astype(jnp.float32)                      # (T, D)
    mem = mem_ref[0].astype(jnp.float32)                  # (S, D)
    # --- causal self attention ---
    h = _layernorm(x, ln1_g[...], ln1_b[...])
    q = _mm(h, s_wq[...]) + s_bq[...]
    k = _mm(h, s_wk[...]) + s_bk[...]
    v = _mm(h, s_wv[...]) + s_bv[...]
    x = x + _mha(q, k, v, s_wo[...], s_bo[...], num_heads, causal=True)
    # --- cross attention over encoder memory ---
    h = _layernorm(x, ln2_g[...], ln2_b[...])
    q = _mm(h, c_wq[...]) + c_bq[...]
    k = _mm(mem, c_wk[...]) + c_bk[...]
    v = _mm(mem, c_wv[...]) + c_bv[...]
    x = x + _mha(q, k, v, c_wo[...], c_bo[...], num_heads, causal=False)
    # --- pre-norm MLP ---
    h = _layernorm(x, ln3_g[...], ln3_b[...])
    h = jax.nn.gelu(_mm(h, w1[...]) + b1[...])
    x = x + _mm(h, w2[...]) + b2[...]
    if apply_final_ln:                                    # decoder final LN fused here
        x = _layernorm(x, lnf_g[...], lnf_b[...])
    o_ref[0] = x.astype(o_ref.dtype)


def _lm_head_kernel(x_ref, w_ref, b_ref, o_ref):
    # Pure tiled vocab projection (final LN already applied in the last block).
    o_ref[...] = (_mm(x_ref[...], w_ref[...]) + b_ref[...]).astype(o_ref.dtype)


# ---------------------------------------------------------------------------
# Wrappers
# ---------------------------------------------------------------------------
def patch_embed(x_patches, w, b, pos):
    B, N, P = x_patches.shape
    D = w.shape[1]
    return pl.pallas_call(
        _patch_embed_kernel,
        out_shape=jax.ShapeDtypeStruct((B, N, D), _ACT_DTYPE),
        grid=(B,),
        in_specs=[
            pl.BlockSpec((1, N, P), lambda bi: (bi, 0, 0)),
            pl.BlockSpec((P, D), _full_map(2)),
            pl.BlockSpec((1, D), _full_map(2)),
            pl.BlockSpec((N, D), _full_map(2)),
        ],
        out_specs=pl.BlockSpec((1, N, D), lambda bi: (bi, 0, 0)),
        compiler_params=_cparams(("parallel",)),
    )(x_patches, w, b, pos)


def encoder_block(x, blk, num_heads, final_ln=None):
    B, N, D = x.shape
    attn, mlp_p = blk["attn"], blk["mlp"]
    apply_final = final_ln is not None
    lnf_g, lnf_b = final_ln if apply_final else (blk["ln1_g"], blk["ln1_b"])
    inputs = [x,
              blk["ln1_g"], blk["ln1_b"],
              attn["wq"], attn["bq"], attn["wk"], attn["bk"],
              attn["wv"], attn["bv"], attn["wo"], attn["bo"],
              blk["ln2_g"], blk["ln2_b"],
              mlp_p["w1"], mlp_p["b1"], mlp_p["w2"], mlp_p["b2"],
              lnf_g, lnf_b]
    in_specs = [pl.BlockSpec((1, N, D), lambda bi: (bi, 0, 0))]
    in_specs += [pl.BlockSpec(a.shape, _full_map(a.ndim)) for a in inputs[1:]]
    kern = functools.partial(_enc_block_kernel, num_heads=num_heads,
                             apply_final_ln=apply_final)
    return pl.pallas_call(
        kern,
        out_shape=jax.ShapeDtypeStruct((B, N, D), _ACT_DTYPE),
        grid=(B,),
        in_specs=in_specs,
        out_specs=pl.BlockSpec((1, N, D), lambda bi: (bi, 0, 0)),
        compiler_params=_cparams(("parallel",)),
    )(*inputs)


def decoder_block(x, memory, blk, num_heads, final_ln=None):
    B, T, D = x.shape
    S = memory.shape[1]
    sa, ca, mlp_p = blk["self_attn"], blk["cross_attn"], blk["mlp"]
    apply_final = final_ln is not None
    lnf_g, lnf_b = final_ln if apply_final else (blk["ln1_g"], blk["ln1_b"])
    inputs = [x, memory,
              blk["ln1_g"], blk["ln1_b"],
              sa["wq"], sa["bq"], sa["wk"], sa["bk"],
              sa["wv"], sa["bv"], sa["wo"], sa["bo"],
              blk["ln2_g"], blk["ln2_b"],
              ca["wq"], ca["bq"], ca["wk"], ca["bk"],
              ca["wv"], ca["bv"], ca["wo"], ca["bo"],
              blk["ln3_g"], blk["ln3_b"],
              mlp_p["w1"], mlp_p["b1"], mlp_p["w2"], mlp_p["b2"],
              lnf_g, lnf_b]
    in_specs = [pl.BlockSpec((1, T, D), lambda bi: (bi, 0, 0)),
                pl.BlockSpec((1, S, D), lambda bi: (bi, 0, 0))]
    in_specs += [pl.BlockSpec(a.shape, _full_map(a.ndim)) for a in inputs[2:]]
    kern = functools.partial(_dec_block_kernel, num_heads=num_heads,
                             apply_final_ln=apply_final)
    return pl.pallas_call(
        kern,
        out_shape=jax.ShapeDtypeStruct((B, T, D), _ACT_DTYPE),
        grid=(B,),
        in_specs=in_specs,
        out_specs=pl.BlockSpec((1, T, D), lambda bi: (bi, 0, 0)),
        compiler_params=_cparams(("parallel",)),
    )(*inputs)


def lm_head(x, w, b):
    """Tiled vocab projection: x (M, D) bf16 (already LayerNorm'd) @ w (D, V).

    Vocab tiles are up to 512 lanes wide (lane-dense unmasked stores, 4x fewer
    grid steps than 128 at real vocab sizes); both grid axes are 'parallel'.
    """
    M, D = x.shape
    V = w.shape[1]
    tn = min(512, pl.cdiv(V, 128) * 128)
    Vpad = pl.cdiv(V, tn) * tn
    if Vpad != V:
        w = jnp.pad(w, ((0, 0), (0, Vpad - V)))
        b = jnp.pad(b, ((0, 0), (0, Vpad - V)))
    tm = min(256, ((M + 7) // 8) * 8)
    Mpad = pl.cdiv(M, tm) * tm
    if Mpad != M:
        x = jnp.pad(x, ((0, Mpad - M), (0, 0)))
    # TODO(synk): for very large model dims also tile K with an f32 accumulator.
    out = pl.pallas_call(
        _lm_head_kernel,
        out_shape=jax.ShapeDtypeStruct((Mpad, Vpad), jnp.float32),
        grid=(Mpad // tm, Vpad // tn),
        in_specs=[
            pl.BlockSpec((tm, D), lambda i, j: (i, 0)),
            pl.BlockSpec((D, tn), lambda i, j: (0, j)),
            pl.BlockSpec((1, tn), lambda i, j: (0, j)),
        ],
        out_specs=pl.BlockSpec((tm, tn), lambda i, j: (i, j)),
        compiler_params=_cparams(("parallel", "parallel")),
    )(x, w, b)
    return out[:M, :V]


# ---------------------------------------------------------------------------
# Model
# ---------------------------------------------------------------------------
def vit_encoder(image, params, cfg):
    B, C, H, W = image.shape
    p = cfg["patch_size"]
    # Patchify (Conv2d(kernel=stride=patch) rewritten as a matmul); layout glue.
    x = image.reshape(B, C, H // p, p, W // p, p)
    x = x.transpose(0, 2, 4, 1, 3, 5).reshape(B, (H // p) * (W // p), C * p * p)
    x = patch_embed(x, params["patch_w"], params["patch_b"], params["pos_embed"])
    n_blk = len(params["blocks"])
    for li, blk in enumerate(params["blocks"]):
        fin = (params["ln_g"], params["ln_b"]) if li == n_blk - 1 else None
        x = encoder_block(x, blk, cfg["num_heads"], final_ln=fin)
    return x   # memory: (B, num_patches, D) bf16


def text_decoder(tgt, memory, params, cfg):
    B, T = tgt.shape
    D = cfg["embed_dim"]
    # Token embedding gather + positional add (JAX glue), then bf16 for HBM.
    x = jnp.take(params["tok_embed"], tgt, axis=0) + params["pos_embed"][:T][None]
    x = x.astype(_ACT_DTYPE)
    n_blk = len(params["blocks"])
    for li, blk in enumerate(params["blocks"]):
        fin = (params["ln_g"], params["ln_b"]) if li == n_blk - 1 else None
        x = decoder_block(x, memory, blk, cfg["num_heads"], final_ln=fin)
    logits = lm_head(x.reshape(B * T, D), params["out_w"], params["out_b"])
    return logits.reshape(B, T, cfg["vocab_size"])


def image_to_text_forward(image, tgt, params, encoder_cfg, decoder_cfg):
    memory = vit_encoder(image, params["encoder"], encoder_cfg)
    return text_decoder(tgt, memory, params["decoder"], decoder_cfg)

# TODO(synk): autoregressive `generate` (greedy argmax loop) is host-side control
# flow around this same forward pass; not reproduced here.


# ---------------------------------------------------------------------------
# Deterministic parameter construction (matmul weights pre-cast to bf16 in HBM)
# ---------------------------------------------------------------------------
def _dense(key, shape, scale=0.02, dtype=_MM_DTYPE):
    return (scale * jax.random.normal(key, shape)).astype(dtype)


def _ones(d):
    return jnp.ones((1, d), jnp.float32)


def _zeros(d):
    return jnp.zeros((1, d), jnp.float32)


def _attn_params(key, dim):
    k1, k2, k3, k4 = jax.random.split(key, 4)
    return {"wq": _dense(k1, (dim, dim)), "bq": _zeros(dim),
            "wk": _dense(k2, (dim, dim)), "bk": _zeros(dim),
            "wv": _dense(k3, (dim, dim)), "bv": _zeros(dim),
            "wo": _dense(k4, (dim, dim)), "bo": _zeros(dim)}


def _mlp_params(key, dim, hidden):
    k1, k2 = jax.random.split(key)
    return {"w1": _dense(k1, (dim, hidden)), "b1": _zeros(hidden),
            "w2": _dense(k2, (hidden, dim)), "b2": _zeros(dim)}


def init_params(key, encoder_cfg, decoder_cfg):
    D = encoder_cfg["embed_dim"]
    p = encoder_cfg["patch_size"]
    C = encoder_cfg["in_chans"]
    n_patch = (encoder_cfg["img_size"] // p) ** 2
    hidden_e = int(D * encoder_cfg["mlp_ratio"])

    keys = jax.random.split(key, 8)
    enc_blocks = []
    for bk in jax.random.split(keys[0], encoder_cfg["depth"]):
        k1, k2 = jax.random.split(bk)
        enc_blocks.append({
            "ln1_g": _ones(D), "ln1_b": _zeros(D),
            "attn": _attn_params(k1, D),
            "ln2_g": _ones(D), "ln2_b": _zeros(D),
            "mlp": _mlp_params(k2, D, hidden_e),
        })
    encoder = {
        "patch_w": _dense(keys[1], (C * p * p, D)),
        "patch_b": _zeros(D),
        "pos_embed": _dense(keys[2], (n_patch, D), dtype=jnp.float32),
        "blocks": enc_blocks,
        "ln_g": _ones(D), "ln_b": _zeros(D),
    }

    V = decoder_cfg["vocab_size"]
    hidden_d = int(D * decoder_cfg["mlp_ratio"])
    dec_blocks = []
    for bk in jax.random.split(keys[3], decoder_cfg["depth"]):
        k1, k2, k3 = jax.random.split(bk, 3)
        dec_blocks.append({
            "ln1_g": _ones(D), "ln1_b": _zeros(D),
            "self_attn": _attn_params(k1, D),
            "ln2_g": _ones(D), "ln2_b": _zeros(D),
            "cross_attn": _attn_params(k2, D),
            "ln3_g": _ones(D), "ln3_b": _zeros(D),
            "mlp": _mlp_params(k3, D, hidden_d),
        })
    decoder = {
        "tok_embed": _dense(keys[4], (V, D), dtype=jnp.float32),
        "pos_embed": _dense(keys[5], (decoder_cfg["max_len"], D), dtype=jnp.float32),
        "blocks": dec_blocks,
        "ln_g": _ones(D), "ln_b": _zeros(D),
        "out_w": _dense(keys[6], (D, V)),
        "out_b": _zeros(V),
    }
    return {"encoder": encoder, "decoder": decoder}


# ---------------------------------------------------------------------------
if __name__ == "__main__":
    encoder_cfg = dict(img_size=16, patch_size=4, in_chans=3, embed_dim=32,
                       depth=2, num_heads=4, mlp_ratio=4.0)
    decoder_cfg = dict(vocab_size=50, embed_dim=32, depth=2, num_heads=4,
                       max_len=8, mlp_ratio=4.0)

    root = jax.random.PRNGKey(0)
    k_param, k_img, k_tgt = jax.random.split(root, 3)
    params = init_params(k_param, encoder_cfg, decoder_cfg)

    B = 2
    image = jax.random.normal(
        k_img, (B, encoder_cfg["in_chans"], encoder_cfg["img_size"],
                encoder_cfg["img_size"]), dtype=jnp.float32)      # NCHW
    tgt = jax.random.randint(k_tgt, (B, decoder_cfg["max_len"]), 0,
                             decoder_cfg["vocab_size"], dtype=jnp.int32)

    fwd = jax.jit(functools.partial(image_to_text_forward,
                                    encoder_cfg=encoder_cfg,
                                    decoder_cfg=decoder_cfg))
    logits = fwd(image, tgt, params)
    jax.block_until_ready(logits)

    assert logits.shape == (B, decoder_cfg["max_len"], decoder_cfg["vocab_size"])
    assert bool(jnp.all(jnp.isfinite(logits)))
    print("KERNEL_OK")
</pallas_src>

<mosaic_0001>
module attributes {stable_mosaic.version = 11 : i64} {
  func.func @_patch_embed_kernel(%arg0: i32, %arg1: memref<1x16x48xf32, #tpu.memory_space<vmem>>, %arg2: memref<48x32xbf16, #tpu.memory_space<vmem>>, %arg3: memref<1x32xf32, #tpu.memory_space<vmem>>, %arg4: memref<16x32xf32, #tpu.memory_space<vmem>>, %arg5: memref<1x16x32xbf16, #tpu.memory_space<vmem>>) attributes {dimension_semantics = [#tpu.dimension_semantics<parallel>], iteration_bounds = array<i64: 2>, scalar_prefetch = 0 : i64, scratch_operands = 0 : i64, tpu.core_type = #tpu.core_type<tc>, window_params = [{transform_indices = @transform_0, window_bounds = array<i64: 1, 16, 48>}, {pipeline_mode = #tpu.pipeline_mode<synchronous>, transform_indices = @transform_1, window_bounds = array<i64: 48, 32>}, {pipeline_mode = #tpu.pipeline_mode<synchronous>, transform_indices = @transform_2, window_bounds = array<i64: 1, 32>}, {pipeline_mode = #tpu.pipeline_mode<synchronous>, transform_indices = @transform_3, window_bounds = array<i64: 16, 32>}, {transform_indices = @transform_4, window_bounds = array<i64: 1, 16, 32>}]} {
    %c0 = arith.constant 0 : index
    %c0_0 = arith.constant 0 : index
    %c0_1 = arith.constant 0 : index
    %0 = vector.load %arg1[%c0, %c0_0, %c0_1] : memref<1x16x48xf32, #tpu.memory_space<vmem>>, vector<1x16x48xf32>
    %1 = vector.shape_cast %0 : vector<1x16x48xf32> to vector<16x48xf32>
    %c0_2 = arith.constant 0 : index
    %c0_3 = arith.constant 0 : index
    %2 = vector.load %arg2[%c0_2, %c0_3] : memref<48x32xbf16, #tpu.memory_space<vmem>>, vector<48x32xbf16>
    %3 = arith.truncf %1 : vector<16x48xf32> to vector<16x48xbf16>
    %cst = arith.constant dense<0.000000e+00> : vector<16x32xf32>
    %4 = tpu.matmul %3, %2, %cst {dimension_numbers = #tpu.dot_dimension_numbers<[1], [0], [0], [1], [0, 0, 1, 1], [], []>} : vector<16x48xbf16>, vector<48x32xbf16>, vector<16x32xf32> -> vector<16x32xf32>
    %c0_4 = arith.constant 0 : index
    %c0_5 = arith.constant 0 : index
    %5 = vector.load %arg3[%c0_4, %c0_5] : memref<1x32xf32, #tpu.memory_space<vmem>>, vector<1x32xf32>
    %6 = vector.broadcast %5 : vector<1x32xf32> to vector<16x32xf32>
    %7 = arith.addf %4, %6 : vector<16x32xf32>
    %c0_6 = arith.constant 0 : index
    %c0_7 = arith.constant 0 : index
    %8 = vector.load %arg4[%c0_6, %c0_7] : memref<16x32xf32, #tpu.memory_space<vmem>>, vector<16x32xf32>
    %9 = arith.addf %7, %8 : vector<16x32xf32>
    %10 = arith.truncf %9 : vector<16x32xf32> to vector<16x32xbf16>
    %c0_8 = arith.constant 0 : index
    %c0_9 = arith.constant 0 : index
    %c0_10 = arith.constant 0 : index
    %11 = vector.load %arg5[%c0_8, %c0_9, %c0_10] : memref<1x16x32xbf16, #tpu.memory_space<vmem>>, vector<1x16x32xbf16>
    %12 = vector.shape_cast %11 : vector<1x16x32xbf16> to vector<16x32xbf16>
    %13 = vector.shape_cast %10 : vector<16x32xbf16> to vector<1x16x32xbf16>
    tpu.vector_store %arg5[%c0_8, %c0_9, %c0_10], %13 {strides = array<i32>} : memref<1x16x32xbf16, #tpu.memory_space<vmem>>, vector<1x16x32xbf16>,
    return
  }
  func.func @transform_0(%arg0: i32) -> (i32, i32, i32) {
    %c0_i32 = arith.constant 0 : i32
    %c0_i32_0 = arith.constant 0 : i32
    %c0_i32_1 = arith.constant 0 : i32
    return %arg0, %c0_i32, %c0_i32_0 : i32, i32, i32
  }
  func.func @transform_1(%arg0: i32) -> (i32, i32) {
    %c0_i32 = arith.constant 0 : i32
    %c0_i32_0 = arith.constant 0 : i32
    %c0_i32_1 = arith.constant 0 : i32
    return %c0_i32, %c0_i32_0 : i32, i32
  }
  func.func @transform_2(%arg0: i32) -> (i32, i32) {
    %c0_i32 = arith.constant 0 : i32
    %c0_i32_0 = arith.constant 0 : i32
    %c0_i32_1 = arith.constant 0 : i32
    return %c0_i32, %c0_i32_0 : i32, i32
  }
  func.func @transform_3(%arg0: i32) -> (i32, i32) {
    %c0_i32 = arith.constant 0 : i32
    %c0_i32_0 = arith.constant 0 : i32
    %c0_i32_1 = arith.constant 0 : i32
    return %c0_i32, %c0_i32_0 : i32, i32
  }
  func.func @transform_4(%arg0: i32) -> (i32, i32, i32) {
    %c0_i32 = arith.constant 0 : i32
    %c0_i32_0 = arith.constant 0 : i32
    %c0_i32_1 = arith.constant 0 : i32
    return %arg0, %c0_i32, %c0_i32_0 : i32, i32, i32
  }
}

module attributes {stable_mosaic.version = 11 : i64} {
  func.func @_enc_block_kernel(%arg0: i32, %arg1: memref<1x16x32xbf16, #tpu.memory_space<vmem>>, %arg2: memref<1x32xf32, #tpu.memory_space<vmem>>, %arg3: memref<1x32xf32, #tpu.memory_space<vmem>>, %arg4: memref<32x32xbf16, #tpu.memory_space<vmem>>, %arg5: memref<1x32xf32, #tpu.memory_space<vmem>>, %arg6: memref<32x32xbf16, #tpu.memory_space<vmem>>, %arg7: memref<1x32xf32, #tpu.memory_space<vmem>>, %arg8: memref<32x32xbf16, #tpu.memory_space<vmem>>, %arg9: memref<1x32xf32, #tpu.memory_space<vmem>>, %arg10: memref<32x32xbf16, #tpu.memory_space<vmem>>, %arg11: memref<1x32xf32, #tpu.memory_space<vmem>>, %arg12: memref<1x32xf32, #tpu.memory_space<vmem>>, %arg13: memref<1x32xf32, #tpu.memory_space<vmem>>, %arg14: memref<32x128xbf16, #tpu.memory_space<vmem>>, %arg15: memref<1x128xf32, #tpu.memory_space<vmem>>, %arg16: memref<128x32xbf16, #tpu.memory_space<vmem>>, %arg17: memref<1x32xf32, #tpu.memory_space<vmem>>, %arg18: memref<1x32xf32, #tpu.memory_space<vmem>>, %arg19: memref<1x32xf32, #tpu.memory_space<vmem>>, %arg20: memref<1x16x32xbf16, #tpu.memory_space<vmem>>) attributes {dimension_semantics = [#tpu.dimension_semantics<parallel>], iteration_bounds = array<i64: 2>, scalar_prefetch = 0 : i64, scratch_operands = 0 : i64, tpu.core_type = #tpu.core_type<tc>, window_params = [{transform_indices = @transform_0, window_bounds = array<i64: 1, 16, 32>}, {pipeline_mode = #tpu.pipeline_mode<synchronous>, transform_indices = @transform_1, window_bounds = array<i64: 1, 32>}, {pipeline_mode = #tpu.pipeline_mode<synchronous>, transform_indices = @transform_2, window_bounds = array<i64: 1, 32>}, {pipeline_mode = #tpu.pipeline_mode<synchronous>, transform_indices = @transform_3, window_bounds = array<i64: 32, 32>}, {pipeline_mode = #tpu.pipeline_mode<synchronous>, transform_indices = @transform_4, window_bounds = array<i64: 1, 32>}, {pipeline_mode = #tpu.pipeline_mode<synchronous>, transform_indices = @transform_5, window_bounds = array<i64: 32, 32>}, {pipeline_mode = #tpu.pipeline_mode<synchronous>, transform_indices = @transform_6, window_bounds = array<i64: 1, 32>}, {pipeline_mode = #tpu.pipeline_mode<synchronous>, transform_indices = @transform_7, window_bounds = array<i64: 32, 32>}, {pipeline_mode = #tpu.pipeline_mode<synchronous>, transform_indices = @transform_8, window_bounds = array<i64: 1, 32>}, {pipeline_mode = #tpu.pipeline_mode<synchronous>, transform_indices = @transform_9, window_bounds = array<i64: 32, 32>}, {pipeline_mode = #tpu.pipeline_mode<synchronous>, transform_indices = @transform_10, window_bounds = array<i64: 1, 32>}, {pipeline_mode = #tpu.pipeline_mode<synchronous>, transform_indices = @transform_11, window_bounds = array<i64: 1, 32>}, {pipeline_mode = #tpu.pipeline_mode<synchronous>, transform_indices = @transform_12, window_bounds = array<i64: 1, 32>}, {pipeline_mode = #tpu.pipeline_mode<synchronous>, transform_indices = @transform_13, window_bounds = array<i64: 32, 128>}, {pipeline_mode = #tpu.pipeline_mode<synchronous>, transform_indices = @transform_14, window_bounds = array<i64: 1, 128>}, {pipeline_mode = #tpu.pipeline_mode<synchronous>, transform_indices = @transform_15, window_bounds = array<i64: 128, 32>}, {pipeline_mode = #tpu.pipeline_mode<synchronous>, transform_indices = @transform_16, window_bounds = array<i64: 1, 32>}, {pipeline_mode = #tpu.pipeline_mode<synchronous>, transform_indices = @transform_17, window_bounds = array<i64: 1, 32>}, {pipeline_mode = #tpu.pipeline_mode<synchronous>, transform_indices = @transform_18, window_bounds = array<i64: 1, 32>}, {transform_indices = @transform_19, window_bounds = array<i64: 1, 16, 32>}]} {
    %c0 = arith.constant 0 : index
    %c0_0 = arith.constant 0 : index
    %c0_1 = arith.constant 0 : index
    %0 = vector.load %arg1[%c0, %c0_0, %c0_1] : memref<1x16x32xbf16, #tpu.memory_space<vmem>>, vector<1x16x32xbf16>
    %1 = vector.shape_cast %0 : vector<1x16x32xbf16> to vector<16x32xbf16>
    %2 = arith.extf %1 : vector<16x32xbf16> to vector<16x32xf32>
    %c0_2 = arith.constant 0 : index
    %c0_3 = arith.constant 0 : index
    %3 = vector.load %arg2[%c0_2, %c0_3] : memref<1x32xf32, #tpu.memory_space<vmem>>, vector<1x32xf32>
    %c0_4 = arith.constant 0 : index
    %c0_5 = arith.constant 0 : index
    %4 = vector.load %arg3[%c0_4, %c0_5] : memref<1x32xf32, #tpu.memory_space<vmem>>, vector<1x32xf32>
    %cst = arith.constant dense<0.000000e+00> : vector<16xf32>
    %5 = vector.multi_reduction <add>, %2, %cst [1] : vector<16x32xf32> to vector<16xf32>
    %6 = vector.shape_cast %5 : vector<16xf32> to vector<16x1xf32>
    %cst_6 = arith.constant 3.200000e+01 : f32
    %7 = vector.broadcast %cst_6 : f32 to vector<16x1xf32>
    %8 = arith.divf %6, %7 : vector<16x1xf32>
    %9 = vector.broadcast %8 : vector<16x1xf32> to vector<16x32xf32>
    %10 = arith.subf %2, %9 : vector<16x32xf32>
    %11 = arith.mulf %10, %10 : vector<16x32xf32>
    %cst_7 = arith.constant dense<0.000000e+00> : vector<16xf32>
    %12 = vector.multi_reduction <add>, %11, %cst_7 [1] : vector<16x32xf32> to vector<16xf32>
    %13 = vector.shape_cast %12 : vector<16xf32> to vector<16x1xf32>
    %cst_8 = arith.constant 3.200000e+01 : f32
    %14 = vector.broadcast %cst_8 : f32 to vector<16x1xf32>
    %15 = arith.divf %13, %14 : vector<16x1xf32>
    %16 = vector.broadcast %8 : vector<16x1xf32> to vector<16x32xf32>
    %17 = arith.subf %2, %16 : vector<16x32xf32>
    %cst_9 = arith.constant 9.99999974E-6 : f32
    %18 = vector.broadcast %cst_9 : f32 to vector<16x1xf32>
    %19 = arith.addf %15, %18 : vector<16x1xf32>
    %20 = math.rsqrt %19 : vector<16x1xf32>
    %21 = vector.broadcast %20 : vector<16x1xf32> to vector<16x32xf32>
    %22 = arith.mulf %17, %21 : vector<16x32xf32>
    %23 = vector.broadcast %3 : vector<1x32xf32> to vector<16x32xf32>
    %24 = arith.mulf %22, %23 : vector<16x32xf32>
    %25 = vector.broadcast %4 : vector<1x32xf32> to vector<16x32xf32>
    %26 = arith.addf %24, %25 : vector<16x32xf32>
    %c0_10 = arith.constant 0 : index
    %c0_11 = arith.constant 0 : index
    %27 = vector.load %arg4[%c0_10, %c0_11] : memref<32x32xbf16, #tpu.memory_space<vmem>>, vector<32x32xbf16>
    %28 = arith.truncf %26 : vector<16x32xf32> to vector<16x32xbf16>
    %cst_12 = arith.constant dense<0.000000e+00> : vector<16x32xf32>
    %29 = tpu.matmul %28, %27, %cst_12 {dimension_numbers = #tpu.dot_dimension_numbers<[1], [0], [0], [1], [0, 0, 1, 1], [], []>} : vector<16x32xbf16>, vector<32x32xbf16>, vector<16x32xf32> -> vector<16x32xf32>
    %c0_13 = arith.constant 0 : index
    %c0_14 = arith.constant 0 : index
    %30 = vector.load %arg5[%c0_13, %c0_14] : memref<1x32xf32, #tpu.memory_space<vmem>>, vector<1x32xf32>
    %31 = vector.broadcast %30 : vector<1x32xf32> to vector<16x32xf32>
    %32 = arith.addf %29, %31 : vector<16x32xf32>
    %c0_15 = arith.constant 0 : index
    %c0_16 = arith.constant 0 : index
    %33 = vector.load %arg6[%c0_15, %c0_16] : memref<32x32xbf16, #tpu.memory_space<vmem>>, vector<32x32xbf16>
    %34 = arith.truncf %26 : vector<16x32xf32> to vector<16x32xbf16>
    %cst_17 = arith.constant dense<0.000000e+00> : vector<16x32xf32>
    %35 = tpu.matmul %34, %33, %cst_17 {dimension_numbers = #tpu.dot_dimension_numbers<[1], [0], [0], [1], [0, 0, 1, 1], [], []>} : vector<16x32xbf16>, vector<32x32xbf16>, vector<16x32xf32> -> vector<16x32xf32>
    %c0_18 = arith.constant 0 : index
    %c0_19 = arith.constant 0 : index
    %36 = vector.load %arg7[%c0_18, %c0_19] : memref<1x32xf32, #tpu.memory_space<vmem>>, vector<1x32xf32>
    %37 = vector.broadcast %36 : vector<1x32xf32> to vector<16x32xf32>
    %38 = arith.addf %35, %37 : vector<16x32xf32>
    %c0_20 = arith.constant 0 : index
    %c0_21 = arith.constant 0 : index
    %39 = vector.load %arg8[%c0_20, %c0_21] : memref<32x32xbf16, #tpu.memory_space<vmem>>, vector<32x32xbf16>
    %40 = arith.truncf %26 : vector<16x32xf32> to vector<16x32xbf16>
    %cst_22 = arith.constant dense<0.000000e+00> : vector<16x32xf32>
    %41 = tpu.matmul %40, %39, %cst_22 {dimension_numbers = #tpu.dot_dimension_numbers<[1], [0], [0], [1], [0, 0, 1, 1], [], []>} : vector<16x32xbf16>, vector<32x32xbf16>, vector<16x32xf32> -> vector<16x32xf32>
    %c0_23 = arith.constant 0 : index
    %c0_24 = arith.constant 0 : index
    %42 = vector.load %arg9[%c0_23, %c0_24] : memref<1x32xf32, #tpu.memory_space<vmem>>, vector<1x32xf32>
    %43 = vector.broadcast %42 : vector<1x32xf32> to vector<16x32xf32>
    %44 = arith.addf %41, %43 : vector<16x32xf32>
    %c0_25 = arith.constant 0 : index
    %c0_26 = arith.constant 0 : index
    %45 = vector.load %arg10[%c0_25, %c0_26] : memref<32x32xbf16, #tpu.memory_space<vmem>>, vector<32x32xbf16>
    %c0_27 = arith.constant 0 : index
    %c0_28 = arith.constant 0 : index
    %46 = vector.load %arg11[%c0_27, %c0_28] : memref<1x32xf32, #tpu.memory_space<vmem>>, vector<1x32xf32>
    %cst_29 = arith.constant 0.353553385 : f32
    %47 = vector.broadcast %cst_29 : f32 to vector<16x32xf32>
    %48 = arith.mulf %32, %47 : vector<16x32xf32>
    %49 = vector.shape_cast %48 : vector<16x32xf32> to vector<16x4x8xf32>
    %50 = tpu.transpose %49, [1, 0, 2] : vector<16x4x8xf32> -> vector<4x16x8xf32>
    %51 = arith.truncf %50 : vector<4x16x8xf32> to vector<4x16x8xbf16>
    %52 = vector.shape_cast %38 : vector<16x32xf32> to vector<16x4x8xf32>
    %53 = tpu.transpose %52, [1, 0, 2] : vector<16x4x8xf32> -> vector<4x16x8xf32>
    %54 = arith.truncf %53 : vector<4x16x8xf32> to vector<4x16x8xbf16>
    %55 = vector.shape_cast %44 : vector<16x32xf32> to vector<16x4x8xf32>
    %56 = tpu.transpose %55, [1, 0, 2] : vector<16x4x8xf32> -> vector<4x16x8xf32>
    %57 = arith.truncf %56 : vector<4x16x8xf32> to vector<4x16x8xbf16>
    "tpu.trace_start"() <{level = 10 : i32, message = "htd,hsd->hts"}> : () -> ()
    %cst_30 = arith.constant dense<0.000000e+00> : vector<4x16x16xf32>
    %58 = tpu.matmul %51, %54, %cst_30 {dimension_numbers = #tpu.dot_dimension_numbers<[2], [2], [1], [1], [0, 0, 0, 1, 1, 1], [0], [0]>} : vector<4x16x8xbf16>, vector<4x16x8xbf16>, vector<4x16x16xf32> -> vector<4x16x16xf32>
    "tpu.trace_stop"() : () -> ()
    %cst_31 = arith.constant dense<0xFF800000> : vector<4x16xf32>
    %59 = vector.multi_reduction <maximumf>, %58, %cst_31 [2] : vector<4x16x16xf32> to vector<4x16xf32>
    %60 = vector.shape_cast %59 : vector<4x16xf32> to vector<4x16x1xf32>
    %61 = vector.broadcast %60 : vector<4x16x1xf32> to vector<4x16x16xf32>
    %62 = arith.subf %58, %61 : vector<4x16x16xf32>
    %63 = math.exp %62 : vector<4x16x16xf32>
    %cst_32 = arith.constant dense<0.000000e+00> : vector<4x16xf32>
    %64 = vector.multi_reduction <add>, %63, %cst_32 [2] : vector<4x16x16xf32> to vector<4x16xf32>
    %65 = vector.shape_cast %64 : vector<4x16xf32> to vector<4x16x1xf32>
    %66 = tpu.reciprocal %65 {approx = true} : vector<4x16x1xf32> -> vector<4x16x1xf32>
    %67 = vector.broadcast %66 : vector<4x16x1xf32> to vector<4x16x16xf32>
    %68 = arith.mulf %63, %67 : vector<4x16x16xf32>
    %69 = arith.truncf %68 : vector<4x16x16xf32> to vector<4x16x16xbf16>
    "tpu.trace_start"() <{level = 10 : i32, message = "hts,hsd->htd"}> : () -> ()
    %cst_33 = arith.constant dense<0.000000e+00> : vector<4x16x8xf32>
    %70 = tpu.matmul %69, %57, %cst_33 {dimension_numbers = #tpu.dot_dimension_numbers<[2], [1], [1], [2], [0, 0, 0, 1, 1, 2], [0], [0]>} : vector<4x16x16xbf16>, vector<4x16x8xbf16>, vector<4x16x8xf32> -> vector<4x16x8xf32>
    "tpu.trace_stop"() : () -> ()
    %71 = tpu.transpose %70, [1, 0, 2] : vector<4x16x8xf32> -> vector<16x4x8xf32>
    %72 = vector.shape_cast %71 : vector<16x4x8xf32> to vector<16x32xf32>
    %73 = arith.truncf %72 : vector<16x32xf32> to vector<16x32xbf16>
    %cst_34 = arith.constant dense<0.000000e+00> : vector<16x32xf32>
    %74 = tpu.matmul %73, %45, %cst_34 {dimension_numbers = #tpu.dot_dimension_numbers<[1], [0], [0], [1], [0, 0, 1, 1], [], []>} : vector<16x32xbf16>, vector<32x32xbf16>, vector<16x32xf32> -> vector<16x32xf32>
    %75 = vector.broadcast %46 : vector<1x32xf32> to vector<16x32xf32>
    %76 = arith.addf %74, %75 : vector<16x32xf32>
    %77 = arith.addf %2, %76 : vector<16x32xf32>
    %c0_35 = arith.constant 0 : index
    %c0_36 = arith.constant 0 : index
    %78 = vector.load %arg12[%c0_35, %c0_36] : memref<1x32xf32, #tpu.memory_space<vmem>>, vector<1x32xf32>
    %c0_37 = arith.constant 0 : index
    %c0_38 = arith.constant 0 : index
    %79 = vector.load %arg13[%c0_37, %c0_38] : memref<1x32xf32, #tpu.memory_space<vmem>>, vector<1x32xf32>
    %cst_39 = arith.constant dense<0.000000e+00> : vector<16xf32>
    %80 = vector.multi_reduction <add>, %77, %cst_39 [1] : vector<16x32xf32> to vector<16xf32>
    %81 = vector.shape_cast %80 : vector<16xf32> to vector<16x1xf32>
    %cst_40 = arith.constant 3.200000e+01 : f32
    %82 = vector.broadcast %cst_40 : f32 to vector<16x1xf32>
    %83 = arith.divf %81, %82 : vector<16x1xf32>
    %84 = vector.broadcast %83 : vector<16x1xf32> to vector<16x32xf32>
    %85 = arith.subf %77, %84 : vector<16x32xf32>
    %86 = arith.mulf %85, %85 : vector<16x32xf32>
    %cst_41 = arith.constant dense<0.000000e+00> : vector<16xf32>
    %87 = vector.multi_reduction <add>, %86, %cst_41 [1] : vector<16x32xf32> to vector<16xf32>
    %88 = vector.shape_cast %87 : vector<16xf32> to vector<16x1xf32>
    %cst_42 = arith.constant 3.200000e+01 : f32
    %89 = vector.broadcast %cst_42 : f32 to vector<16x1xf32>
    %90 = arith.divf %88, %89 : vector<16x1xf32>
    %91 = vector.broadcast %83 : vector<16x1xf32> to vector<16x32xf32>
    %92 = arith.subf %77, %91 : vector<16x32xf32>
    %cst_43 = arith.constant 9.99999974E-6 : f32
    %93 = vector.broadcast %cst_43 : f32 to vector<16x1xf32>
    %94 = arith.addf %90, %93 : vector<16x1xf32>
    %95 = math.rsqrt %94 : vector<16x1xf32>
    %96 = vector.broadcast %95 : vector<16x1xf32> to vector<16x32xf32>
    %97 = arith.mulf %92, %96 : vector<16x32xf32>
    %98 = vector.broadcast %78 : vector<1x32xf32> to vector<16x32xf32>
    %99 = arith.mulf %97, %98 : vector<16x32xf32>
    %100 = vector.broadcast %79 : vector<1x32xf32> to vector<16x32xf32>
    %101 = arith.addf %99, %100 : vector<16x32xf32>
    %c0_44 = arith.constant 0 : index
    %c0_45 = arith.constant 0 : index
    %102 = vector.load %arg14[%c0_44, %c0_45] : memref<32x128xbf16, #tpu.memory_space<vmem>>, vector<32x128xbf16>
    %103 = arith.truncf %101 : vector<16x32xf32> to vector<16x32xbf16>
    %cst_46 = arith.constant dense<0.000000e+00> : vector<16x128xf32>
    %104 = tpu.matmul %103, %102, %cst_46 {dimension_numbers = #tpu.dot_dimension_numbers<[1], [0], [0], [1], [0, 0, 1, 1], [], []>} : vector<16x32xbf16>, vector<32x128xbf16>, vector<16x128xf32> -> vector<16x128xf32>
    %c0_47 = arith.constant 0 : index
    %c0_48 = arith.constant 0 : index
    %105 = vector.load %arg15[%c0_47, %c0_48] : memref<1x128xf32, #tpu.memory_space<vmem>>, vector<1x128xf32>
    %106 = vector.broadcast %105 : vector<1x128xf32> to vector<16x128xf32>
    %107 = arith.addf %104, %106 : vector<16x128xf32>
    %108 = arith.mulf %107, %107 : vector<16x128xf32>
    %109 = arith.mulf %107, %108 : vector<16x128xf32>
    %cst_49 = arith.constant 4.471500e-02 : f32
    %110 = vector.broadcast %cst_49 : f32 to vector<16x128xf32>
    %111 = arith.mulf %110, %109 : vector<16x128xf32>
    %112 = arith.addf %107, %111 : vector<16x128xf32>
    %cst_50 = arith.constant 0.797884583 : f32
    %113 = vector.broadcast %cst_50 : f32 to vector<16x128xf32>
    %114 = arith.mulf %113, %112 : vector<16x128xf32>
    %115 = math.tanh %114 : vector<16x128xf32>
    %cst_51 = arith.constant 1.000000e+00 : f32
    %116 = vector.broadcast %cst_51 : f32 to vector<16x128xf32>
    %117 = arith.addf %116, %115 : vector<16x128xf32>
    %cst_52 = arith.constant 5.000000e-01 : f32
    %118 = vector.broadcast %cst_52 : f32 to vector<16x128xf32>
    %119 = arith.mulf %118, %117 : vector<16x128xf32>
    %120 = arith.mulf %107, %119 : vector<16x128xf32>
    %c0_53 = arith.constant 0 : index
    %c0_54 = arith.constant 0 : index
    %121 = vector.load %arg16[%c0_53, %c0_54] : memref<128x32xbf16, #tpu.memory_space<vmem>>, vector<128x32xbf16>
    %122 = arith.truncf %120 : vector<16x128xf32> to vector<16x128xbf16>
    %cst_55 = arith.constant dense<0.000000e+00> : vector<16x32xf32>
    %123 = tpu.matmul %122, %121, %cst_55 {dimension_numbers = #tpu.dot_dimension_numbers<[1], [0], [0], [1], [0, 0, 1, 1], [], []>} : vector<16x128xbf16>, vector<128x32xbf16>, vector<16x32xf32> -> vector<16x32xf32>
    %124 = arith.addf %77, %123 : vector<16x32xf32>
    %c0_56 = arith.constant 0 : index
    %c0_57 = arith.constant 0 : index
    %125 = vector.load %arg17[%c0_56, %c0_57] : memref<1x32xf32, #tpu.memory_space<vmem>>, vector<1x32xf32>
    %126 = vector.broadcast %125 : vector<1x32xf32> to vector<16x32xf32>
    %127 = arith.addf %124, %126 : vector<16x32xf32>
    %128 = arith.truncf %127 : vector<16x32xf32> to vector<16x32xbf16>
    %c0_58 = arith.constant 0 : index
    %c0_59 = arith.constant 0 : index
    %c0_60 = arith.constant 0 : index
    %129 = vector.load %arg20[%c0_58, %c0_59, %c0_60] : memref<1x16x32xbf16, #tpu.memory_space<vmem>>, vector<1x16x32xbf16>
    %130 = vector.shape_cast %129 : vector<1x16x32xbf16> to vector<16x32xbf16>
    %131 = vector.shape_cast %128 : vector<16x32xbf16> to vector<1x16x32xbf16>
    tpu.vector_store %arg20[%c0_58, %c0_59, %c0_60], %131 {strides = array<i32>} : memref<1x16x32xbf16, #tpu.memory_space<vmem>>, vector<1x16x32xbf16>,
    return
  }
  func.func @transform_0(%arg0: i32) -> (i32, i32, i32) {
    %c0_i32 = arith.constant 0 : i32
    %c0_i32_0 = arith.constant 0 : i32
    %c0_i32_1 = arith.constant 0 : i32
    return %arg0, %c0_i32, %c0_i32_0 : i32, i32, i32
  }
  func.func @transform_1(%arg0: i32) -> (i32, i32) {
    %c0_i32 = arith.constant 0 : i32
    %c0_i32_0 = arith.constant 0 : i32
    %c0_i32_1 = arith.constant 0 : i32
    return %c0_i32, %c0_i32_0 : i32, i32
  }
  func.func @transform_2(%arg0: i32) -> (i32, i32) {
    %c0_i32 = arith.constant 0 : i32
    %c0_i32_0 = arith.constant 0 : i32
    %c0_i32_1 = arith.constant 0 : i32
    return %c0_i32, %c0_i32_0 : i32, i32
  }
  func.func @transform_3(%arg0: i32) -> (i32, i32) {
    %c0_i32 = arith.constant 0 : i32
    %c0_i32_0 = arith.constant 0 : i32
    %c0_i32_1 = arith.constant 0 : i32
    return %c0_i32, %c0_i32_0 : i32, i32
  }
  func.func @transform_4(%arg0: i32) -> (i32, i32) {
    %c0_i32 = arith.constant 0 : i32
    %c0_i32_0 = arith.constant 0 : i32
    %c0_i32_1 = arith.constant 0 : i32
    return %c0_i32, %c0_i32_0 : i32, i32
  }
  func.func @transform_5(%arg0: i32) -> (i32, i32) {
    %c0_i32 = arith.constant 0 : i32
    %c0_i32_0 = arith.constant 0 : i32
    %c0_i32_1 = arith.constant 0 : i32
    return %c0_i32, %c0_i32_0 : i32, i32
  }
  func.func @transform_6(%arg0: i32) -> (i32, i32) {
    %c0_i32 = arith.constant 0 : i32
    %c0_i32_0 = arith.constant 0 : i32
    %c0_i32_1 = arith.constant 0 : i32
    return %c0_i32, %c0_i32_0 : i32, i32
  }
  func.func @transform_7(%arg0: i32) -> (i32, i32) {
    %c0_i32 = arith.constant 0 : i32
    %c0_i32_0 = arith.constant 0 : i32
    %c0_i32_1 = arith.constant 0 : i32
    return %c0_i32, %c0_i32_0 : i32, i32
  }
  func.func @transform_8(%arg0: i32) -> (i32, i32) {
    %c0_i32 = arith.constant 0 : i32
    %c0_i32_0 = arith.constant 0 : i32
    %c0_i32_1 = arith.constant 0 : i32
    return %c0_i32, %c0_i32_0 : i32, i32
  }
  func.func @transform_9(%arg0: i32) -> (i32, i32) {
    %c0_i32 = arith.constant 0 : i32
    %c0_i32_0 = arith.constant 0 : i32
    %c0_i32_1 = arith.constant 0 : i32
    return %c0_i32, %c0_i32_0 : i32, i32
  }
  func.func @transform_10(%arg0: i32) -> (i32, i32) {
    %c0_i32 = arith.constant 0 : i32
    %c0_i32_0 = arith.constant 0 : i32
    %c0_i32_1 = arith.constant 0 : i32
    return %c0_i32, %c0_i32_0 : i32, i32
  }
  func.func @transform_11(%arg0: i32) -> (i32, i32) {
    %c0_i32 = arith.constant 0 : i32
    %c0_i32_0 = arith.constant 0 : i32
    %c0_i32_1 = arith.constant 0 : i32
    return %c0_i32, %c0_i32_0 : i32, i32
  }
  func.func @transform_12(%arg0: i32) -> (i32, i32) {
    %c0_i32 = arith.constant 0 : i32
    %c0_i32_0 = arith.constant 0 : i32
    %c0_i32_1 = arith.constant 0 : i32
    return %c0_i32, %c0_i32_0 : i32, i32
  }
  func.func @transform_13(%arg0: i32) -> (i32, i32) {
    %c0_i32 = arith.constant 0 : i32
    %c0_i32_0 = arith.constant 0 : i32
    %c0_i32_1 = arith.constant 0 : i32
    return %c0_i32, %c0_i32_0 : i32, i32
  }
  func.func @transform_14(%arg0: i32) -> (i32, i32) {
    %c0_i32 = arith.constant 0 : i32
    %c0_i32_0 = arith.constant 0 : i32
    %c0_i32_1 = arith.constant 0 : i32
    return %c0_i32, %c0_i32_0 : i32, i32
  }
  func.func @transform_15(%arg0: i32) -> (i32, i32) {
    %c0_i32 = arith.constant 0 : i32
    %c0_i32_0 = arith.constant 0 : i32
    %c0_i32_1 = arith.constant 0 : i32
    return %c0_i32, %c0_i32_0 : i32, i32
  }
  func.func @transform_16(%arg0: i32) -> (i32, i32) {
    %c0_i32 = arith.constant 0 : i32
    %c0_i32_0 = arith.constant 0 : i32
    %c0_i32_1 = arith.constant 0 : i32
    return %c0_i32, %c0_i32_0 : i32, i32
  }
  func.func @transform_17(%arg0: i32) -> (i32, i32) {
    %c0_i32 = arith.constant 0 : i32
    %c0_i32_0 = arith.constant 0 : i32
    %c0_i32_1 = arith.constant 0 : i32
    return %c0_i32, %c0_i32_0 : i32, i32
  }
  func.func @transform_18(%arg0: i32) -> (i32, i32) {
    %c0_i32 = arith.constant 0 : i32
    %c0_i32_0 = arith.constant 0 : i32
    %c0_i32_1 = arith.constant 0 : i32
    return %c0_i32, %c0_i32_0 : i32, i32
  }
  func.func @transform_19(%arg0: i32) -> (i32, i32, i32) {
    %c0_i32 = arith.constant 0 : i32
    %c0_i32_0 = arith.constant 0 : i32
    %c0_i32_1 = arith.constant 0 : i32
    return %arg0, %c0_i32, %c0_i32_0 : i32, i32, i32
  }
}

module attributes {stable_mosaic.version = 11 : i64} {
  func.func @_enc_block_kernel(%arg0: i32, %arg1: memref<1x16x32xbf16, #tpu.memory_space<vmem>>, %arg2: memref<1x32xf32, #tpu.memory_space<vmem>>, %arg3: memref<1x32xf32, #tpu.memory_space<vmem>>, %arg4: memref<32x32xbf16, #tpu.memory_space<vmem>>, %arg5: memref<1x32xf32, #tpu.memory_space<vmem>>, %arg6: memref<32x32xbf16, #tpu.memory_space<vmem>>, %arg7: memref<1x32xf32, #tpu.memory_space<vmem>>, %arg8: memref<32x32xbf16, #tpu.memory_space<vmem>>, %arg9: memref<1x32xf32, #tpu.memory_space<vmem>>, %arg10: memref<32x32xbf16, #tpu.memory_space<vmem>>, %arg11: memref<1x32xf32, #tpu.memory_space<vmem>>, %arg12: memref<1x32xf32, #tpu.memory_space<vmem>>, %arg13: memref<1x32xf32, #tpu.memory_space<vmem>>, %arg14: memref<32x128xbf16, #tpu.memory_space<vmem>>, %arg15: memref<1x128xf32, #tpu.memory_space<vmem>>, %arg16: memref<128x32xbf16, #tpu.memory_space<vmem>>, %arg17: memref<1x32xf32, #tpu.memory_space<vmem>>, %arg18: memref<1x32xf32, #tpu.memory_space<vmem>>, %arg19: memref<1x32xf32, #tpu.memory_space<vmem>>, %arg20: memref<1x16x32xbf16, #tpu.memory_space<vmem>>) attributes {dimension_semantics = [#tpu.dimension_semantics<parallel>], iteration_bounds = array<i64: 2>, scalar_prefetch = 0 : i64, scratch_operands = 0 : i64, tpu.core_type = #tpu.core_type<tc>, window_params = [{transform_indices = @transform_0, window_bounds = array<i64: 1, 16, 32>}, {pipeline_mode = #tpu.pipeline_mode<synchronous>, transform_indices = @transform_1, window_bounds = array<i64: 1, 32>}, {pipeline_mode = #tpu.pipeline_mode<synchronous>, transform_indices = @transform_2, window_bounds = array<i64: 1, 32>}, {pipeline_mode = #tpu.pipeline_mode<synchronous>, transform_indices = @transform_3, window_bounds = array<i64: 32, 32>}, {pipeline_mode = #tpu.pipeline_mode<synchronous>, transform_indices = @transform_4, window_bounds = array<i64: 1, 32>}, {pipeline_mode = #tpu.pipeline_mode<synchronous>, transform_indices = @transform_5, window_bounds = array<i64: 32, 32>}, {pipeline_mode = #tpu.pipeline_mode<synchronous>, transform_indices = @transform_6, window_bounds = array<i64: 1, 32>}, {pipeline_mode = #tpu.pipeline_mode<synchronous>, transform_indices = @transform_7, window_bounds = array<i64: 32, 32>}, {pipeline_mode = #tpu.pipeline_mode<synchronous>, transform_indices = @transform_8, window_bounds = array<i64: 1, 32>}, {pipeline_mode = #tpu.pipeline_mode<synchronous>, transform_indices = @transform_9, window_bounds = array<i64: 32, 32>}, {pipeline_mode = #tpu.pipeline_mode<synchronous>, transform_indices = @transform_10, window_bounds = array<i64: 1, 32>}, {pipeline_mode = #tpu.pipeline_mode<synchronous>, transform_indices = @transform_11, window_bounds = array<i64: 1, 32>}, {pipeline_mode = #tpu.pipeline_mode<synchronous>, transform_indices = @transform_12, window_bounds = array<i64: 1, 32>}, {pipeline_mode = #tpu.pipeline_mode<synchronous>, transform_indices = @transform_13, window_bounds = array<i64: 32, 128>}, {pipeline_mode = #tpu.pipeline_mode<synchronous>, transform_indices = @transform_14, window_bounds = array<i64: 1, 128>}, {pipeline_mode = #tpu.pipeline_mode<synchronous>, transform_indices = @transform_15, window_bounds = array<i64: 128, 32>}, {pipeline_mode = #tpu.pipeline_mode<synchronous>, transform_indices = @transform_16, window_bounds = array<i64: 1, 32>}, {pipeline_mode = #tpu.pipeline_mode<synchronous>, transform_indices = @transform_17, window_bounds = array<i64: 1, 32>}, {pipeline_mode = #tpu.pipeline_mode<synchronous>, transform_indices = @transform_18, window_bounds = array<i64: 1, 32>}, {transform_indices = @transform_19, window_bounds = array<i64: 1, 16, 32>}]} {
    %c0 = arith.constant 0 : index
    %c0_0 = arith.constant 0 : index
    %c0_1 = arith.constant 0 : index
    %0 = vector.load %arg1[%c0, %c0_0, %c0_1] : memref<1x16x32xbf16, #tpu.memory_space<vmem>>, vector<1x16x32xbf16>
    %1 = vector.shape_cast %0 : vector<1x16x32xbf16> to vector<16x32xbf16>
    %2 = arith.extf %1 : vector<16x32xbf16> to vector<16x32xf32>
    %c0_2 = arith.constant 0 : index
    %c0_3 = arith.constant 0 : index
    %3 = vector.load %arg2[%c0_2, %c0_3] : memref<1x32xf32, #tpu.memory_space<vmem>>, vector<1x32xf32>
    %c0_4 = arith.constant 0 : index
    %c0_5 = arith.constant 0 : index
    %4 = vector.load %arg3[%c0_4, %c0_5] : memref<1x32xf32, #tpu.memory_space<vmem>>, vector<1x32xf32>
    %cst = arith.constant dense<0.000000e+00> : vector<16xf32>
    %5 = vector.multi_reduction <add>, %2, %cst [1] : vector<16x32xf32> to vector<16xf32>
    %6 = vector.shape_cast %5 : vector<16xf32> to vector<16x1xf32>
    %cst_6 = arith.constant 3.200000e+01 : f32
    %7 = vector.broadcast %cst_6 : f32 to vector<16x1xf32>
    %8 = arith.divf %6, %7 : vector<16x1xf32>
    %9 = vector.broadcast %8 : vector<16x1xf32> to vector<16x32xf32>
    %10 = arith.subf %2, %9 : vector<16x32xf32>
    %11 = arith.mulf %10, %10 : vector<16x32xf32>
    %cst_7 = arith.constant dense<0.000000e+00> : vector<16xf32>
    %12 = vector.multi_reduction <add>, %11, %cst_7 [1] : vector<16x32xf32> to vector<16xf32>
    %13 = vector.shape_cast %12 : vector<16xf32> to vector<16x1xf32>
    %cst_8 = arith.constant 3.200000e+01 : f32
    %14 = vector.broadcast %cst_8 : f32 to vector<16x1xf32>
    %15 = arith.divf %13, %14 : vector<16x1xf32>
    %16 = vector.broadcast %8 : vector<16x1xf32> to vector<16x32xf32>
    %17 = arith.subf %2, %16 : vector<16x32xf32>
    %cst_9 = arith.constant 9.99999974E-6 : f32
    %18 = vector.broadcast %cst_9 : f32 to vector<16x1xf32>
    %19 = arith.addf %15, %18 : vector<16x1xf32>
    %20 = math.rsqrt %19 : vector<16x1xf32>
    %21 = vector.broadcast %20 : vector<16x1xf32> to vector<16x32xf32>
    %22 = arith.mulf %17, %21 : vector<16x32xf32>
    %23 = vector.broadcast %3 : vector<1x32xf32> to vector<16x32xf32>
    %24 = arith.mulf %22, %23 : vector<16x32xf32>
    %25 = vector.broadcast %4 : vector<1x32xf32> to vector<16x32xf32>
    %26 = arith.addf %24, %25 : vector<16x32xf32>
    %c0_10 = arith.constant 0 : index
    %c0_11 = arith.constant 0 : index
    %27 = vector.load %arg4[%c0_10, %c0_11] : memref<32x32xbf16, #tpu.memory_space<vmem>>, vector<32x32xbf16>
    %28 = arith.truncf %26 : vector<16x32xf32> to vector<16x32xbf16>
    %cst_12 = arith.constant dense<0.000000e+00> : vector<16x32xf32>
    %29 = tpu.matmul %28, %27, %cst_12 {dimension_numbers = #tpu.dot_dimension_numbers<[1], [0], [0], [1], [0, 0, 1, 1], [], []>} : vector<16x32xbf16>, vector<32x32xbf16>, vector<16x32xf32> -> vector<16x32xf32>
    %c0_13 = arith.constant 0 : index
    %c0_14 = arith.constant 0 : index
    %30 = vector.load %arg5[%c0_13, %c0_14] : memref<1x32xf32, #tpu.memory_space<vmem>>, vector<1x32xf32>
    %31 = vector.broadcast %30 : vector<1x32xf32> to vector<16x32xf32>
    %32 = arith.addf %29, %31 : vector<16x32xf32>
    %c0_15 = arith.constant 0 : index
    %c0_16 = arith.constant 0 : index
    %33 = vector.load %arg6[%c0_15, %c0_16] : memref<32x32xbf16, #tpu.memory_space<vmem>>, vector<32x32xbf16>
    %34 = arith.truncf %26 : vector<16x32xf32> to vector<16x32xbf16>
    %cst_17 = arith.constant dense<0.000000e+00> : vector<16x32xf32>
    %35 = tpu.matmul %34, %33, %cst_17 {dimension_numbers = #tpu.dot_dimension_numbers<[1], [0], [0], [1], [0, 0, 1, 1], [], []>} : vector<16x32xbf16>, vector<32x32xbf16>, vector<16x32xf32> -> vector<16x32xf32>
    %c0_18 = arith.constant 0 : index
    %c0_19 = arith.constant 0 : index
    %36 = vector.load %arg7[%c0_18, %c0_19] : memref<1x32xf32, #tpu.memory_space<vmem>>, vector<1x32xf32>
    %37 = vector.broadcast %36 : vector<1x32xf32> to vector<16x32xf32>
    %38 = arith.addf %35, %37 : vector<16x32xf32>
    %c0_20 = arith.constant 0 : index
    %c0_21 = arith.constant 0 : index
    %39 = vector.load %arg8[%c0_20, %c0_21] : memref<32x32xbf16, #tpu.memory_space<vmem>>, vector<32x32xbf16>
    %40 = arith.truncf %26 : vector<16x32xf32> to vector<16x32xbf16>
    %cst_22 = arith.constant dense<0.000000e+00> : vector<16x32xf32>
    %41 = tpu.matmul %40, %39, %cst_22 {dimension_numbers = #tpu.dot_dimension_numbers<[1], [0], [0], [1], [0, 0, 1, 1], [], []>} : vector<16x32xbf16>, vector<32x32xbf16>, vector<16x32xf32> -> vector<16x32xf32>
    %c0_23 = arith.constant 0 : index
    %c0_24 = arith.constant 0 : index
    %42 = vector.load %arg9[%c0_23, %c0_24] : memref<1x32xf32, #tpu.memory_space<vmem>>, vector<1x32xf32>
    %43 = vector.broadcast %42 : vector<1x32xf32> to vector<16x32xf32>
    %44 = arith.addf %41, %43 : vector<16x32xf32>
    %c0_25 = arith.constant 0 : index
    %c0_26 = arith.constant 0 : index
    %45 = vector.load %arg10[%c0_25, %c0_26] : memref<32x32xbf16, #tpu.memory_space<vmem>>, vector<32x32xbf16>
    %c0_27 = arith.constant 0 : index
    %c0_28 = arith.constant 0 : index
    %46 = vector.load %arg11[%c0_27, %c0_28] : memref<1x32xf32, #tpu.memory_space<vmem>>, vector<1x32xf32>
    %cst_29 = arith.constant 0.353553385 : f32
    %47 = vector.broadcast %cst_29 : f32 to vector<16x32xf32>
    %48 = arith.mulf %32, %47 : vector<16x32xf32>
    %49 = vector.shape_cast %48 : vector<16x32xf32> to vector<16x4x8xf32>
    %50 = tpu.transpose %49, [1, 0, 2] : vector<16x4x8xf32> -> vector<4x16x8xf32>
    %51 = arith.truncf %50 : vector<4x16x8xf32> to vector<4x16x8xbf16>
    %52 = vector.shape_cast %38 : vector<16x32xf32> to vector<16x4x8xf32>
    %53 = tpu.transpose %52, [1, 0, 2] : vector<16x4x8xf32> -> vector<4x16x8xf32>
    %54 = arith.truncf %53 : vector<4x16x8xf32> to vector<4x16x8xbf16>
    %55 = vector.shape_cast %44 : vector<16x32xf32> to vector<16x4x8xf32>
    %56 = tpu.transpose %55, [1, 0, 2] : vector<16x4x8xf32> -> vector<4x16x8xf32>
    %57 = arith.truncf %56 : vector<4x16x8xf32> to vector<4x16x8xbf16>
    "tpu.trace_start"() <{level = 10 : i32, message = "htd,hsd->hts"}> : () -> ()
    %cst_30 = arith.constant dense<0.000000e+00> : vector<4x16x16xf32>
    %58 = tpu.matmul %51, %54, %cst_30 {dimension_numbers = #tpu.dot_dimension_numbers<[2], [2], [1], [1], [0, 0, 0, 1, 1, 1], [0], [0]>} : vector<4x16x8xbf16>, vector<4x16x8xbf16>, vector<4x16x16xf32> -> vector<4x16x16xf32>
    "tpu.trace_stop"() : () -> ()
    %cst_31 = arith.constant dense<0xFF800000> : vector<4x16xf32>
    %59 = vector.multi_reduction <maximumf>, %58, %cst_31 [2] : vector<4x16x16xf32> to vector<4x16xf32>
    %60 = vector.shape_cast %59 : vector<4x16xf32> to vector<4x16x1xf32>
    %61 = vector.broadcast %60 : vector<4x16x1xf32> to vector<4x16x16xf32>
    %62 = arith.subf %58, %61 : vector<4x16x16xf32>
    %63 = math.exp %62 : vector<4x16x16xf32>
    %cst_32 = arith.constant dense<0.000000e+00> : vector<4x16xf32>
    %64 = vector.multi_reduction <add>, %63, %cst_32 [2] : vector<4x16x16xf32> to vector<4x16xf32>
    %65 = vector.shape_cast %64 : vector<4x16xf32> to vector<4x16x1xf32>
    %66 = tpu.reciprocal %65 {approx = true} : vector<4x16x1xf32> -> vector<4x16x1xf32>
    %67 = vector.broadcast %66 : vector<4x16x1xf32> to vector<4x16x16xf32>
    %68 = arith.mulf %63, %67 : vector<4x16x16xf32>
    %69 = arith.truncf %68 : vector<4x16x16xf32> to vector<4x16x16xbf16>
    "tpu.trace_start"() <{level = 10 : i32, message = "hts,hsd->htd"}> : () -> ()
    %cst_33 = arith.constant dense<0.000000e+00> : vector<4x16x8xf32>
    %70 = tpu.matmul %69, %57, %cst_33 {dimension_numbers = #tpu.dot_dimension_numbers<[2], [1], [1], [2], [0, 0, 0, 1, 1, 2], [0], [0]>} : vector<4x16x16xbf16>, vector<4x16x8xbf16>, vector<4x16x8xf32> -> vector<4x16x8xf32>
    "tpu.trace_stop"() : () -> ()
    %71 = tpu.transpose %70, [1, 0, 2] : vector<4x16x8xf32> -> vector<16x4x8xf32>
    %72 = vector.shape_cast %71 : vector<16x4x8xf32> to vector<16x32xf32>
    %73 = arith.truncf %72 : vector<16x32xf32> to vector<16x32xbf16>
    %cst_34 = arith.constant dense<0.000000e+00> : vector<16x32xf32>
    %74 = tpu.matmul %73, %45, %cst_34 {dimension_numbers = #tpu.dot_dimension_numbers<[1], [0], [0], [1], [0, 0, 1, 1], [], []>} : vector<16x32xbf16>, vector<32x32xbf16>, vector<16x32xf32> -> vector<16x32xf32>
    %75 = vector.broadcast %46 : vector<1x32xf32> to vector<16x32xf32>
    %76 = arith.addf %74, %75 : vector<16x32xf32>
    %77 = arith.addf %2, %76 : vector<16x32xf32>
    %c0_35 = arith.constant 0 : index
    %c0_36 = arith.constant 0 : index
    %78 = vector.load %arg12[%c0_35, %c0_36] : memref<1x32xf32, #tpu.memory_space<vmem>>, vector<1x32xf32>
    %c0_37 = arith.constant 0 : index
    %c0_38 = arith.constant 0 : index
    %79 = vector.load %arg13[%c0_37, %c0_38] : memref<1x32xf32, #tpu.memory_space<vmem>>, vector<1x32xf32>
    %cst_39 = arith.constant dense<0.000000e+00> : vector<16xf32>
    %80 = vector.multi_reduction <add>, %77, %cst_39 [1] : vector<16x32xf32> to vector<16xf32>
    %81 = vector.shape_cast %80 : vector<16xf32> to vector<16x1xf32>
    %cst_40 = arith.constant 3.200000e+01 : f32
    %82 = vector.broadcast %cst_40 : f32 to vector<16x1xf32>
    %83 = arith.divf %81, %82 : vector<16x1xf32>
    %84 = vector.broadcast %83 : vector<16x1xf32> to vector<16x32xf32>
    %85 = arith.subf %77, %84 : vector<16x32xf32>
    %86 = arith.mulf %85, %85 : vector<16x32xf32>
    %cst_41 = arith.constant dense<0.000000e+00> : vector<16xf32>
    %87 = vector.multi_reduction <add>, %86, %cst_41 [1] : vector<16x32xf32> to vector<16xf32>
    %88 = vector.shape_cast %87 : vector<16xf32> to vector<16x1xf32>
    %cst_42 = arith.constant 3.200000e+01 : f32
    %89 = vector.broadcast %cst_42 : f32 to vector<16x1xf32>
    %90 = arith.divf %88, %89 : vector<16x1xf32>
    %91 = vector.broadcast %83 : vector<16x1xf32> to vector<16x32xf32>
    %92 = arith.subf %77, %91 : vector<16x32xf32>
    %cst_43 = arith.constant 9.99999974E-6 : f32
    %93 = vector.broadcast %cst_43 : f32 to vector<16x1xf32>
    %94 = arith.addf %90, %93 : vector<16x1xf32>
    %95 = math.rsqrt %94 : vector<16x1xf32>
    %96 = vector.broadcast %95 : vector<16x1xf32> to vector<16x32xf32>
    %97 = arith.mulf %92, %96 : vector<16x32xf32>
    %98 = vector.broadcast %78 : vector<1x32xf32> to vector<16x32xf32>
    %99 = arith.mulf %97, %98 : vector<16x32xf32>
    %100 = vector.broadcast %79 : vector<1x32xf32> to vector<16x32xf32>
    %101 = arith.addf %99, %100 : vector<16x32xf32>
    %c0_44 = arith.constant 0 : index
    %c0_45 = arith.constant 0 : index
    %102 = vector.load %arg14[%c0_44, %c0_45] : memref<32x128xbf16, #tpu.memory_space<vmem>>, vector<32x128xbf16>
    %103 = arith.truncf %101 : vector<16x32xf32> to vector<16x32xbf16>
    %cst_46 = arith.constant dense<0.000000e+00> : vector<16x128xf32>
    %104 = tpu.matmul %103, %102, %cst_46 {dimension_numbers = #tpu.dot_dimension_numbers<[1], [0], [0], [1], [0, 0, 1, 1], [], []>} : vector<16x32xbf16>, vector<32x128xbf16>, vector<16x128xf32> -> vector<16x128xf32>
    %c0_47 = arith.constant 0 : index
    %c0_48 = arith.constant 0 : index
    %105 = vector.load %arg15[%c0_47, %c0_48] : memref<1x128xf32, #tpu.memory_space<vmem>>, vector<1x128xf32>
    %106 = vector.broadcast %105 : vector<1x128xf32> to vector<16x128xf32>
    %107 = arith.addf %104, %106 : vector<16x128xf32>
    %108 = arith.mulf %107, %107 : vector<16x128xf32>
    %109 = arith.mulf %107, %108 : vector<16x128xf32>
    %cst_49 = arith.constant 4.471500e-02 : f32
    %110 = vector.broadcast %cst_49 : f32 to vector<16x128xf32>
    %111 = arith.mulf %110, %109 : vector<16x128xf32>
    %112 = arith.addf %107, %111 : vector<16x128xf32>
    %cst_50 = arith.constant 0.797884583 : f32
    %113 = vector.broadcast %cst_50 : f32 to vector<16x128xf32>
    %114 = arith.mulf %113, %112 : vector<16x128xf32>
    %115 = math.tanh %114 : vector<16x128xf32>
    %cst_51 = arith.constant 1.000000e+00 : f32
    %116 = vector.broadcast %cst_51 : f32 to vector<16x128xf32>
    %117 = arith.addf %116, %115 : vector<16x128xf32>
    %cst_52 = arith.constant 5.000000e-01 : f32
    %118 = vector.broadcast %cst_52 : f32 to vector<16x128xf32>
    %119 = arith.mulf %118, %117 : vector<16x128xf32>
    %120 = arith.mulf %107, %119 : vector<16x128xf32>
    %c0_53 = arith.constant 0 : index
    %c0_54 = arith.constant 0 : index
    %121 = vector.load %arg16[%c0_53, %c0_54] : memref<128x32xbf16, #tpu.memory_space<vmem>>, vector<128x32xbf16>
    %122 = arith.truncf %120 : vector<16x128xf32> to vector<16x128xbf16>
    %cst_55 = arith.constant dense<0.000000e+00> : vector<16x32xf32>
    %123 = tpu.matmul %122, %121, %cst_55 {dimension_numbers = #tpu.dot_dimension_numbers<[1], [0], [0], [1], [0, 0, 1, 1], [], []>} : vector<16x128xbf16>, vector<128x32xbf16>, vector<16x32xf32> -> vector<16x32xf32>
    %124 = arith.addf %77, %123 : vector<16x32xf32>
    %c0_56 = arith.constant 0 : index
    %c0_57 = arith.constant 0 : index
    %125 = vector.load %arg17[%c0_56, %c0_57] : memref<1x32xf32, #tpu.memory_space<vmem>>, vector<1x32xf32>
    %126 = vector.broadcast %125 : vector<1x32xf32> to vector<16x32xf32>
    %127 = arith.addf %124, %126 : vector<16x32xf32>
    %c0_58 = arith.constant 0 : index
    %c0_59 = arith.constant 0 : index
    %128 = vector.load %arg18[%c0_58, %c0_59] : memref<1x32xf32, #tpu.memory_space<vmem>>, vector<1x32xf32>
    %c0_60 = arith.constant 0 : index
    %c0_61 = arith.constant 0 : index
    %129 = vector.load %arg19[%c0_60, %c0_61] : memref<1x32xf32, #tpu.memory_space<vmem>>, vector<1x32xf32>
    %cst_62 = arith.constant dense<0.000000e+00> : vector<16xf32>
    %130 = vector.multi_reduction <add>, %127, %cst_62 [1] : vector<16x32xf32> to vector<16xf32>
    %131 = vector.shape_cast %130 : vector<16xf32> to vector<16x1xf32>
    %cst_63 = arith.constant 3.200000e+01 : f32
    %132 = vector.broadcast %cst_63 : f32 to vector<16x1xf32>
    %133 = arith.divf %131, %132 : vector<16x1xf32>
    %134 = vector.broadcast %133 : vector<16x1xf32> to vector<16x32xf32>
    %135 = arith.subf %127, %134 : vector<16x32xf32>
    %136 = arith.mulf %135, %135 : vector<16x32xf32>
    %cst_64 = arith.constant dense<0.000000e+00> : vector<16xf32>
    %137 = vector.multi_reduction <add>, %136, %cst_64 [1] : vector<16x32xf32> to vector<16xf32>
    %138 = vector.shape_cast %137 : vector<16xf32> to vector<16x1xf32>
    %cst_65 = arith.constant 3.200000e+01 : f32
    %139 = vector.broadcast %cst_65 : f32 to vector<16x1xf32>
    %140 = arith.divf %138, %139 : vector<16x1xf32>
    %141 = vector.broadcast %133 : vector<16x1xf32> to vector<16x32xf32>
    %142 = arith.subf %127, %141 : vector<16x32xf32>
    %cst_66 = arith.constant 9.99999974E-6 : f32
    %143 = vector.broadcast %cst_66 : f32 to vector<16x1xf32>
    %144 = arith.addf %140, %143 : vector<16x1xf32>
    %145 = math.rsqrt %144 : vector<16x1xf32>
    %146 = vector.broadcast %145 : vector<16x1xf32> to vector<16x32xf32>
    %147 = arith.mulf %142, %146 : vector<16x32xf32>
    %148 = vector.broadcast %128 : vector<1x32xf32> to vector<16x32xf32>
    %149 = arith.mulf %147, %148 : vector<16x32xf32>
    %150 = vector.broadcast %129 : vector<1x32xf32> to vector<16x32xf32>
    %151 = arith.addf %149, %150 : vector<16x32xf32>
    %152 = arith.truncf %151 : vector<16x32xf32> to vector<16x32xbf16>
    %c0_67 = arith.constant 0 : index
    %c0_68 = arith.constant 0 : index
    %c0_69 = arith.constant 0 : index
    %153 = vector.load %arg20[%c0_67, %c0_68, %c0_69] : memref<1x16x32xbf16, #tpu.memory_space<vmem>>, vector<1x16x32xbf16>
    %154 = vector.shape_cast %153 : vector<1x16x32xbf16> to vector<16x32xbf16>
    %155 = vector.shape_cast %152 : vector<16x32xbf16> to vector<1x16x32xbf16>
    tpu.vector_store %arg20[%c0_67, %c0_68, %c0_69], %155 {strides = array<i32>} : memref<1x16x32xbf16, #tpu.memory_space<vmem>>, vector<1x16x32xbf16>,
    return
  }
  func.func @transform_0(%arg0: i32) -> (i32, i32, i32) {
    %c0_i32 = arith.constant 0 : i32
    %c0_i32_0 = arith.constant 0 : i32
    %c0_i32_1 = arith.constant 0 : i32
    return %arg0, %c0_i32, %c0_i32_0 : i32, i32, i32
  }
  func.func @transform_1(%arg0: i32) -> (i32, i32) {
    %c0_i32 = arith.constant 0 : i32
    %c0_i32_0 = arith.constant 0 : i32
    %c0_i32_1 = arith.constant 0 : i32
    return %c0_i32, %c0_i32_0 : i32, i32
  }
  func.func @transform_2(%arg0: i32) -> (i32, i32) {
    %c0_i32 = arith.constant 0 : i32
    %c0_i32_0 = arith.constant 0 : i32
    %c0_i32_1 = arith.constant 0 : i32
    return %c0_i32, %c0_i32_0 : i32, i32
  }
  func.func @transform_3(%arg0: i32) -> (i32, i32) {
    %c0_i32 = arith.constant 0 : i32
    %c0_i32_0 = arith.constant 0 : i32
    %c0_i32_1 = arith.constant 0 : i32
    return %c0_i32, %c0_i32_0 : i32, i32
  }
  func.func @transform_4(%arg0: i32) -> (i32, i32) {
    %c0_i32 = arith.constant 0 : i32
    %c0_i32_0 = arith.constant 0 : i32
    %c0_i32_1 = arith.constant 0 : i32
    return %c0_i32, %c0_i32_0 : i32, i32
  }
  func.func @transform_5(%arg0: i32) -> (i32, i32) {
    %c0_i32 = arith.constant 0 : i32
    %c0_i32_0 = arith.constant 0 : i32
    %c0_i32_1 = arith.constant 0 : i32
    return %c0_i32, %c0_i32_0 : i32, i32
  }
  func.func @transform_6(%arg0: i32) -> (i32, i32) {
    %c0_i32 = arith.constant 0 : i32
    %c0_i32_0 = arith.constant 0 : i32
    %c0_i32_1 = arith.constant 0 : i32
    return %c0_i32, %c0_i32_0 : i32, i32
  }
  func.func @transform_7(%arg0: i32) -> (i32, i32) {
    %c0_i32 = arith.constant 0 : i32
    %c0_i32_0 = arith.constant 0 : i32
    %c0_i32_1 = arith.constant 0 : i32
    return %c0_i32, %c0_i32_0 : i32, i32
  }
  func.func @transform_8(%arg0: i32) -> (i32, i32) {
    %c0_i32 = arith.constant 0 : i32
    %c0_i32_0 = arith.constant 0 : i32
    %c0_i32_1 = arith.constant 0 : i32
    return %c0_i32, %c0_i32_0 : i32, i32
  }
  func.func @transform_9(%arg0: i32) -> (i32, i32) {
    %c0_i32 = arith.constant 0 : i32
    %c0_i32_0 = arith.constant 0 : i32
    %c0_i32_1 = arith.constant 0 : i32
    return %c0_i32, %c0_i32_0 : i32, i32
  }
  func.func @transform_10(%arg0: i32) -> (i32, i32) {
    %c0_i32 = arith.constant 0 : i32
    %c0_i32_0 = arith.constant 0 : i32
    %c0_i32_1 = arith.constant 0 : i32
    return %c0_i32, %c0_i32_0 : i32, i32
  }
  func.func @transform_11(%arg0: i32) -> (i32, i32) {
    %c0_i32 = arith.constant 0 : i32
    %c0_i32_0 = arith.constant 0 : i32
    %c0_i32_1 = arith.constant 0 : i32
    return %c0_i32, %c0_i32_0 : i32, i32
  }
  func.func @transform_12(%arg0: i32) -> (i32, i32) {
    %c0_i32 = arith.constant 0 : i32
    %c0_i32_0 = arith.constant 0 : i32
    %c0_i32_1 = arith.constant 0 : i32
    return %c0_i32, %c0_i32_0 : i32, i32
  }
  func.func @transform_13(%arg0: i32) -> (i32, i32) {
    %c0_i32 = arith.constant 0 : i32
    %c0_i32_0 = arith.constant 0 : i32
    %c0_i32_1 = arith.constant 0 : i32
    return %c0_i32, %c0_i32_0 : i32, i32
  }
  func.func @transform_14(%arg0: i32) -> (i32, i32) {
    %c0_i32 = arith.constant 0 : i32
    %c0_i32_0 = arith.constant 0 : i32
    %c0_i32_1 = arith.constant 0 : i32
    return %c0_i32, %c0_i32_0 : i32, i32
  }
  func.func @transform_15(%arg0: i32) -> (i32, i32) {
    %c0_i32 = arith.constant 0 : i32
    %c0_i32_0 = arith.constant 0 : i32
    %c0_i32_1 = arith.constant 0 : i32
    return %c0_i32, %c0_i32_0 : i32, i32
  }
  func.func @transform_16(%arg0: i32) -> (i32, i32) {
    %c0_i32 = arith.constant 0 : i32
    %c0_i32_0 = arith.constant 0 : i32
    %c0_i32_1 = arith.constant 0 : i32
    return %c0_i32, %c0_i32_0 : i32, i32
  }
  func.func @transform_17(%arg0: i32) -> (i32, i32) {
    %c0_i32 = arith.constant 0 : i32
    %c0_i32_0 = arith.constant 0 : i32
    %c0_i32_1 = arith.constant 0 : i32
    return %c0_i32, %c0_i32_0 : i32, i32
  }
  func.func @transform_18(%arg0: i32) -> (i32, i32) {
    %c0_i32 = arith.constant 0 : i32
    %c0_i32_0 = arith.constant 0 : i32
    %c0_i32_1 = arith.constant 0 : i32
    return %c0_i32, %c0_i32_0 : i32, i32
  }
  func.func @transform_19(%arg0: i32) -> (i32, i32, i32) {
    %c0_i32 = arith.constant 0 : i32
    %c0_i32_0 = arith.constant 0 : i32
    %c0_i32_1 = arith.constant 0 : i32
    return %arg0, %c0_i32, %c0_i32_0 : i32, i32, i32
  }
}

module attributes {stable_mosaic.version = 11 : i64} {
  func.func @_dec_block_kernel(%arg0: i32, %arg1: memref<1x8x32xbf16, #tpu.memory_space<vmem>>, %arg2: memref<1x16x32xbf16, #tpu.memory_space<vmem>>, %arg3: memref<1x32xf32, #tpu.memory_space<vmem>>, %arg4: memref<1x32xf32, #tpu.memory_space<vmem>>, %arg5: memref<32x32xbf16, #tpu.memory_space<vmem>>, %arg6: memref<1x32xf32, #tpu.memory_space<vmem>>, %arg7: memref<32x32xbf16, #tpu.memory_space<vmem>>, %arg8: memref<1x32xf32, #tpu.memory_space<vmem>>, %arg9: memref<32x32xbf16, #tpu.memory_space<vmem>>, %arg10: memref<1x32xf32, #tpu.memory_space<vmem>>, %arg11: memref<32x32xbf16, #tpu.memory_space<vmem>>, %arg12: memref<1x32xf32, #tpu.memory_space<vmem>>, %arg13: memref<1x32xf32, #tpu.memory_space<vmem>>, %arg14: memref<1x32xf32, #tpu.memory_space<vmem>>, %arg15: memref<32x32xbf16, #tpu.memory_space<vmem>>, %arg16: memref<1x32xf32, #tpu.memory_space<vmem>>, %arg17: memref<32x32xbf16, #tpu.memory_space<vmem>>, %arg18: memref<1x32xf32, #tpu.memory_space<vmem>>, %arg19: memref<32x32xbf16, #tpu.memory_space<vmem>>, %arg20: memref<1x32xf32, #tpu.memory_space<vmem>>, %arg21: memref<32x32xbf16, #tpu.memory_space<vmem>>, %arg22: memref<1x32xf32, #tpu.memory_space<vmem>>, %arg23: memref<1x32xf32, #tpu.memory_space<vmem>>, %arg24: memref<1x32xf32, #tpu.memory_space<vmem>>, %arg25: memref<32x128xbf16, #tpu.memory_space<vmem>>, %arg26: memref<1x128xf32, #tpu.memory_space<vmem>>, %arg27: memref<128x32xbf16, #tpu.memory_space<vmem>>, %arg28: memref<1x32xf32, #tpu.memory_space<vmem>>, %arg29: memref<1x32xf32, #tpu.memory_space<vmem>>, %arg30: memref<1x32xf32, #tpu.memory_space<vmem>>, %arg31: memref<1x8x32xbf16, #tpu.memory_space<vmem>>) attributes {dimension_semantics = [#tpu.dimension_semantics<parallel>], iteration_bounds = array<i64: 2>, scalar_prefetch = 0 : i64, scratch_operands = 0 : i64, tpu.core_type = #tpu.core_type<tc>, window_params = [{transform_indices = @transform_0, window_bounds = array<i64: 1, 8, 32>}, {transform_indices = @transform_1, window_bounds = array<i64: 1, 16, 32>}, {pipeline_mode = #tpu.pipeline_mode<synchronous>, transform_indices = @transform_2, window_bounds = array<i64: 1, 32>}, {pipeline_mode = #tpu.pipeline_mode<synchronous>, transform_indices = @transform_3, window_bounds = array<i64: 1, 32>}, {pipeline_mode = #tpu.pipeline_mode<synchronous>, transform_indices = @transform_4, window_bounds = array<i64: 32, 32>}, {pipeline_mode = #tpu.pipeline_mode<synchronous>, transform_indices = @transform_5, window_bounds = array<i64: 1, 32>}, {pipeline_mode = #tpu.pipeline_mode<synchronous>, transform_indices = @transform_6, window_bounds = array<i64: 32, 32>}, {pipeline_mode = #tpu.pipeline_mode<synchronous>, transform_indices = @transform_7, window_bounds = array<i64: 1, 32>}, {pipeline_mode = #tpu.pipeline_mode<synchronous>, transform_indices = @transform_8, window_bounds = array<i64: 32, 32>}, {pipeline_mode = #tpu.pipeline_mode<synchronous>, transform_indices = @transform_9, window_bounds = array<i64: 1, 32>}, {pipeline_mode = #tpu.pipeline_mode<synchronous>, transform_indices = @transform_10, window_bounds = array<i64: 32, 32>}, {pipeline_mode = #tpu.pipeline_mode<synchronous>, transform_indices = @transform_11, window_bounds = array<i64: 1, 32>}, {pipeline_mode = #tpu.pipeline_mode<synchronous>, transform_indices = @transform_12, window_bounds = array<i64: 1, 32>}, {pipeline_mode = #tpu.pipeline_mode<synchronous>, transform_indices = @transform_13, window_bounds = array<i64: 1, 32>}, {pipeline_mode = #tpu.pipeline_mode<synchronous>, transform_indices = @transform_14, window_bounds = array<i64: 32, 32>}, {pipeline_mode = #tpu.pipeline_mode<synchronous>, transform_indices = @transform_15, window_bounds = array<i64: 1, 32>}, {pipeline_mode = #tpu.pipeline_mode<synchronous>, transform_indices = @transform_16, window_bounds = array<i64: 32, 32>}, {pipeline_mode = #tpu.pipeline_mode<synchronous>, transform_indices = @transform_17, window_bounds = array<i64: 1, 32>}, {pipeline_mode = #tpu.pipeline_mode<synchronous>, transform_indices = @transform_18, window_bounds = array<i64: 32, 32>}, {pipeline_mode = #tpu.pipeline_mode<synchronous>, transform_indices = @transform_19, window_bounds = array<i64: 1, 32>}, {pipeline_mode = #tpu.pipeline_mode<synchronous>, transform_indices = @transform_20, window_bounds = array<i64: 32, 32>}, {pipeline_mode = #tpu.pipeline_mode<synchronous>, transform_indices = @transform_21, window_bounds = array<i64: 1, 32>}, {pipeline_mode = #tpu.pipeline_mode<synchronous>, transform_indices = @transform_22, window_bounds = array<i64: 1, 32>}, {pipeline_mode = #tpu.pipeline_mode<synchronous>, transform_indices = @transform_23, window_bounds = array<i64: 1, 32>}, {pipeline_mode = #tpu.pipeline_mode<synchronous>, transform_indices = @transform_24, window_bounds = array<i64: 32, 128>}, {pipeline_mode = #tpu.pipeline_mode<synchronous>, transform_indices = @transform_25, window_bounds = array<i64: 1, 128>}, {pipeline_mode = #tpu.pipeline_mode<synchronous>, transform_indices = @transform_26, window_bounds = array<i64: 128, 32>}, {pipeline_mode = #tpu.pipeline_mode<synchronous>, transform_indices = @transform_27, window_bounds = array<i64: 1, 32>}, {pipeline_mode = #tpu.pipeline_mode<synchronous>, transform_indices = @transform_28, window_bounds = array<i64: 1, 32>}, {pipeline_mode = #tpu.pipeline_mode<synchronous>, transform_indices = @transform_29, window_bounds = array<i64: 1, 32>}, {transform_indices = @transform_30, window_bounds = array<i64: 1, 8, 32>}]} {
    %c0 = arith.constant 0 : index
    %c0_0 = arith.constant 0 : index
    %c0_1 = arith.constant 0 : index
    %0 = vector.load %arg1[%c0, %c0_0, %c0_1] : memref<1x8x32xbf16, #tpu.memory_space<vmem>>, vector<1x8x32xbf16>
    %1 = vector.shape_cast %0 : vector<1x8x32xbf16> to vector<8x32xbf16>
    %2 = arith.extf %1 : vector<8x32xbf16> to vector<8x32xf32>
    %c0_2 = arith.constant 0 : index
    %c0_3 = arith.constant 0 : index
    %c0_4 = arith.constant 0 : index
    %3 = vector.load %arg2[%c0_2, %c0_3, %c0_4] : memref<1x16x32xbf16, #tpu.memory_space<vmem>>, vector<1x16x32xbf16>
    %4 = vector.shape_cast %3 : vector<1x16x32xbf16> to vector<16x32xbf16>
    %5 = arith.extf %4 : vector<16x32xbf16> to vector<16x32xf32>
    %c0_5 = arith.constant 0 : index
    %c0_6 = arith.constant 0 : index
    %6 = vector.load %arg3[%c0_5, %c0_6] : memref<1x32xf32, #tpu.memory_space<vmem>>, vector<1x32xf32>
    %c0_7 = arith.constant 0 : index
    %c0_8 = arith.constant 0 : index
    %7 = vector.load %arg4[%c0_7, %c0_8] : memref<1x32xf32, #tpu.memory_space<vmem>>, vector<1x32xf32>
    %cst = arith.constant dense<0.000000e+00> : vector<8xf32>
    %8 = vector.multi_reduction <add>, %2, %cst [1] : vector<8x32xf32> to vector<8xf32>
    %9 = vector.shape_cast %8 : vector<8xf32> to vector<8x1xf32>
    %cst_9 = arith.constant 3.200000e+01 : f32
    %10 = vector.broadcast %cst_9 : f32 to vector<8x1xf32>
    %11 = arith.divf %9, %10 : vector<8x1xf32>
    %12 = vector.broadcast %11 : vector<8x1xf32> to vector<8x32xf32>
    %13 = arith.subf %2, %12 : vector<8x32xf32>
    %14 = arith.mulf %13, %13 : vector<8x32xf32>
    %cst_10 = arith.constant dense<0.000000e+00> : vector<8xf32>
    %15 = vector.multi_reduction <add>, %14, %cst_10 [1] : vector<8x32xf32> to vector<8xf32>
    %16 = vector.shape_cast %15 : vector<8xf32> to vector<8x1xf32>
    %cst_11 = arith.constant 3.200000e+01 : f32
    %17 = vector.broadcast %cst_11 : f32 to vector<8x1xf32>
    %18 = arith.divf %16, %17 : vector<8x1xf32>
    %19 = vector.broadcast %11 : vector<8x1xf32> to vector<8x32xf32>
    %20 = arith.subf %2, %19 : vector<8x32xf32>
    %cst_12 = arith.constant 9.99999974E-6 : f32
    %21 = vector.broadcast %cst_12 : f32 to vector<8x1xf32>
    %22 = arith.addf %18, %21 : vector<8x1xf32>
    %23 = math.rsqrt %22 : vector<8x1xf32>
    %24 = vector.broadcast %23 : vector<8x1xf32> to vector<8x32xf32>
    %25 = arith.mulf %20, %24 : vector<8x32xf32>
    %26 = vector.broadcast %6 : vector<1x32xf32> to vector<8x32xf32>
    %27 = arith.mulf %25, %26 : vector<8x32xf32>
    %28 = vector.broadcast %7 : vector<1x32xf32> to vector<8x32xf32>
    %29 = arith.addf %27, %28 : vector<8x32xf32>
    %c0_13 = arith.constant 0 : index
    %c0_14 = arith.constant 0 : index
    %30 = vector.load %arg5[%c0_13, %c0_14] : memref<32x32xbf16, #tpu.memory_space<vmem>>, vector<32x32xbf16>
    %31 = arith.truncf %29 : vector<8x32xf32> to vector<8x32xbf16>
    %cst_15 = arith.constant dense<0.000000e+00> : vector<8x32xf32>
    %32 = tpu.matmul %31, %30, %cst_15 {dimension_numbers = #tpu.dot_dimension_numbers<[1], [0], [0], [1], [0, 0, 1, 1], [], []>} : vector<8x32xbf16>, vector<32x32xbf16>, vector<8x32xf32> -> vector<8x32xf32>
    %c0_16 = arith.constant 0 : index
    %c0_17 = arith.constant 0 : index
    %33 = vector.load %arg6[%c0_16, %c0_17] : memref<1x32xf32, #tpu.memory_space<vmem>>, vector<1x32xf32>
    %34 = vector.broadcast %33 : vector<1x32xf32> to vector<8x32xf32>
    %35 = arith.addf %32, %34 : vector<8x32xf32>
    %c0_18 = arith.constant 0 : index
    %c0_19 = arith.constant 0 : index
    %36 = vector.load %arg7[%c0_18, %c0_19] : memref<32x32xbf16, #tpu.memory_space<vmem>>, vector<32x32xbf16>
    %37 = arith.truncf %29 : vector<8x32xf32> to vector<8x32xbf16>
    %cst_20 = arith.constant dense<0.000000e+00> : vector<8x32xf32>
    %38 = tpu.matmul %37, %36, %cst_20 {dimension_numbers = #tpu.dot_dimension_numbers<[1], [0], [0], [1], [0, 0, 1, 1], [], []>} : vector<8x32xbf16>, vector<32x32xbf16>, vector<8x32xf32> -> vector<8x32xf32>
    %c0_21 = arith.constant 0 : index
    %c0_22 = arith.constant 0 : index
    %39 = vector.load %arg8[%c0_21, %c0_22] : memref<1x32xf32, #tpu.memory_space<vmem>>, vector<1x32xf32>
    %40 = vector.broadcast %39 : vector<1x32xf32> to vector<8x32xf32>
    %41 = arith.addf %38, %40 : vector<8x32xf32>
    %c0_23 = arith.constant 0 : index
    %c0_24 = arith.constant 0 : index
    %42 = vector.load %arg9[%c0_23, %c0_24] : memref<32x32xbf16, #tpu.memory_space<vmem>>, vector<32x32xbf16>
    %43 = arith.truncf %29 : vector<8x32xf32> to vector<8x32xbf16>
    %cst_25 = arith.constant dense<0.000000e+00> : vector<8x32xf32>
    %44 = tpu.matmul %43, %42, %cst_25 {dimension_numbers = #tpu.dot_dimension_numbers<[1], [0], [0], [1], [0, 0, 1, 1], [], []>} : vector<8x32xbf16>, vector<32x32xbf16>, vector<8x32xf32> -> vector<8x32xf32>
    %c0_26 = arith.constant 0 : index
    %c0_27 = arith.constant 0 : index
    %45 = vector.load %arg10[%c0_26, %c0_27] : memref<1x32xf32, #tpu.memory_space<vmem>>, vector<1x32xf32>
    %46 = vector.broadcast %45 : vector<1x32xf32> to vector<8x32xf32>
    %47 = arith.addf %44, %46 : vector<8x32xf32>
    %c0_28 = arith.constant 0 : index
    %c0_29 = arith.constant 0 : index
    %48 = vector.load %arg11[%c0_28, %c0_29] : memref<32x32xbf16, #tpu.memory_space<vmem>>, vector<32x32xbf16>
    %c0_30 = arith.constant 0 : index
    %c0_31 = arith.constant 0 : index
    %49 = vector.load %arg12[%c0_30, %c0_31] : memref<1x32xf32, #tpu.memory_space<vmem>>, vector<1x32xf32>
    %cst_32 = arith.constant 0.353553385 : f32
    %50 = vector.broadcast %cst_32 : f32 to vector<8x32xf32>
    %51 = arith.mulf %35, %50 : vector<8x32xf32>
    %52 = vector.shape_cast %51 : vector<8x32xf32> to vector<8x4x8xf32>
    %53 = tpu.transpose %52, [1, 0, 2] : vector<8x4x8xf32> -> vector<4x8x8xf32>
    %54 = arith.truncf %53 : vector<4x8x8xf32> to vector<4x8x8xbf16>
    %55 = vector.shape_cast %41 : vector<8x32xf32> to vector<8x4x8xf32>
    %56 = tpu.transpose %55, [1, 0, 2] : vector<8x4x8xf32> -> vector<4x8x8xf32>
    %57 = arith.truncf %56 : vector<4x8x8xf32> to vector<4x8x8xbf16>
    %58 = vector.shape_cast %47 : vector<8x32xf32> to vector<8x4x8xf32>
    %59 = tpu.transpose %58, [1, 0, 2] : vector<8x4x8xf32> -> vector<4x8x8xf32>
    %60 = arith.truncf %59 : vector<4x8x8xf32> to vector<4x8x8xbf16>
    "tpu.trace_start"() <{level = 10 : i32, message = "htd,hsd->hts"}> : () -> ()
    %cst_33 = arith.constant dense<0.000000e+00> : vector<4x8x8xf32>
    %61 = tpu.matmul %54, %57, %cst_33 {dimension_numbers = #tpu.dot_dimension_numbers<[2], [2], [1], [1], [0, 0, 0, 1, 1, 1], [0], [0]>} : vector<4x8x8xbf16>, vector<4x8x8xbf16>, vector<4x8x8xf32> -> vector<4x8x8xf32>
    "tpu.trace_stop"() : () -> ()
    %62 = tpu.iota {dimensions = array<i32: 0>} : vector<8x8xi32>
    %63 = tpu.iota {dimensions = array<i32: 1>} : vector<8x8xi32>
    %64 = arith.cmpi sle, %63, %62 : vector<8x8xi32>
    %cst_34 = arith.constant 0.000000e+00 : f32
    %cst_35 = arith.constant -1.000000e+30 : f32
    %65 = vector.broadcast %cst_34 : f32 to vector<8x8xf32>
    %66 = vector.broadcast %cst_35 : f32 to vector<8x8xf32>
    %67 = arith.select %64, %65, %66 : vector<8x8xi1>, vector<8x8xf32>
    %68 = vector.shape_cast %67 : vector<8x8xf32> to vector<1x8x8xf32>
    %69 = vector.broadcast %68 : vector<1x8x8xf32> to vector<4x8x8xf32>
    %70 = arith.addf %61, %69 : vector<4x8x8xf32>
    %cst_36 = arith.constant dense<0xFF800000> : vector<4x8xf32>
    %71 = vector.multi_reduction <maximumf>, %70, %cst_36 [2] : vector<4x8x8xf32> to vector<4x8xf32>
    %72 = vector.shape_cast %71 : vector<4x8xf32> to vector<4x8x1xf32>
    %73 = vector.broadcast %72 : vector<4x8x1xf32> to vector<4x8x8xf32>
    %74 = arith.subf %70, %73 : vector<4x8x8xf32>
    %75 = math.exp %74 : vector<4x8x8xf32>
    %cst_37 = arith.constant dense<0.000000e+00> : vector<4x8xf32>
    %76 = vector.multi_reduction <add>, %75, %cst_37 [2] : vector<4x8x8xf32> to vector<4x8xf32>
    %77 = vector.shape_cast %76 : vector<4x8xf32> to vector<4x8x1xf32>
    %78 = tpu.reciprocal %77 {approx = true} : vector<4x8x1xf32> -> vector<4x8x1xf32>
    %79 = vector.broadcast %78 : vector<4x8x1xf32> to vector<4x8x8xf32>
    %80 = arith.mulf %75, %79 : vector<4x8x8xf32>
    %81 = arith.truncf %80 : vector<4x8x8xf32> to vector<4x8x8xbf16>
    "tpu.trace_start"() <{level = 10 : i32, message = "hts,hsd->htd"}> : () -> ()
    %cst_38 = arith.constant dense<0.000000e+00> : vector<4x8x8xf32>
    %82 = tpu.matmul %81, %60, %cst_38 {dimension_numbers = #tpu.dot_dimension_numbers<[2], [1], [1], [2], [0, 0, 0, 1, 1, 2], [0], [0]>} : vector<4x8x8xbf16>, vector<4x8x8xbf16>, vector<4x8x8xf32> -> vector<4x8x8xf32>
    "tpu.trace_stop"() : () -> ()
    %83 = tpu.transpose %82, [1, 0, 2] : vector<4x8x8xf32> -> vector<8x4x8xf32>
    %84 = vector.shape_cast %83 : vector<8x4x8xf32> to vector<8x32xf32>
    %85 = arith.truncf %84 : vector<8x32xf32> to vector<8x32xbf16>
    %cst_39 = arith.constant dense<0.000000e+00> : vector<8x32xf32>
    %86 = tpu.matmul %85, %48, %cst_39 {dimension_numbers = #tpu.dot_dimension_numbers<[1], [0], [0], [1], [0, 0, 1, 1], [], []>} : vector<8x32xbf16>, vector<32x32xbf16>, vector<8x32xf32> -> vector<8x32xf32>
    %87 = vector.broadcast %49 : vector<1x32xf32> to vector<8x32xf32>
    %88 = arith.addf %86, %87 : vector<8x32xf32>
    %89 = arith.addf %2, %88 : vector<8x32xf32>
    %c0_40 = arith.constant 0 : index
    %c0_41 = arith.constant 0 : index
    %90 = vector.load %arg13[%c0_40, %c0_41] : memref<1x32xf32, #tpu.memory_space<vmem>>, vector<1x32xf32>
    %c0_42 = arith.constant 0 : index
    %c0_43 = arith.constant 0 : index
    %91 = vector.load %arg14[%c0_42, %c0_43] : memref<1x32xf32, #tpu.memory_space<vmem>>, vector<1x32xf32>
    %cst_44 = arith.constant dense<0.000000e+00> : vector<8xf32>
    %92 = vector.multi_reduction <add>, %89, %cst_44 [1] : vector<8x32xf32> to vector<8xf32>
    %93 = vector.shape_cast %92 : vector<8xf32> to vector<8x1xf32>
    %cst_45 = arith.constant 3.200000e+01 : f32
    %94 = vector.broadcast %cst_45 : f32 to vector<8x1xf32>
    %95 = arith.divf %93, %94 : vector<8x1xf32>
    %96 = vector.broadcast %95 : vector<8x1xf32> to vector<8x32xf32>
    %97 = arith.subf %89, %96 : vector<8x32xf32>
    %98 = arith.mulf %97, %97 : vector<8x32xf32>
    %cst_46 = arith.constant dense<0.000000e+00> : vector<8xf32>
    %99 = vector.multi_reduction <add>, %98, %cst_46 [1] : vector<8x32xf32> to vector<8xf32>
    %100 = vector.shape_cast %99 : vector<8xf32> to vector<8x1xf32>
    %cst_47 = arith.constant 3.200000e+01 : f32
    %101 = vector.broadcast %cst_47 : f32 to vector<8x1xf32>
    %102 = arith.divf %100, %101 : vector<8x1xf32>
    %103 = vector.broadcast %95 : vector<8x1xf32> to vector<8x32xf32>
    %104 = arith.subf %89, %103 : vector<8x32xf32>
    %cst_48 = arith.constant 9.99999974E-6 : f32
    %105 = vector.broadcast %cst_48 : f32 to vector<8x1xf32>
    %106 = arith.addf %102, %105 : vector<8x1xf32>
    %107 = math.rsqrt %106 : vector<8x1xf32>
    %108 = vector.broadcast %107 : vector<8x1xf32> to vector<8x32xf32>
    %109 = arith.mulf %104, %108 : vector<8x32xf32>
    %110 = vector.broadcast %90 : vector<1x32xf32> to vector<8x32xf32>
    %111 = arith.mulf %109, %110 : vector<8x32xf32>
    %112 = vector.broadcast %91 : vector<1x32xf32> to vector<8x32xf32>
    %113 = arith.addf %111, %112 : vector<8x32xf32>
    %c0_49 = arith.constant 0 : index
    %c0_50 = arith.constant 0 : index
    %114 = vector.load %arg15[%c0_49, %c0_50] : memref<32x32xbf16, #tpu.memory_space<vmem>>, vector<32x32xbf16>
    %115 = arith.truncf %113 : vector<8x32xf32> to vector<8x32xbf16>
    %cst_51 = arith.constant dense<0.000000e+00> : vector<8x32xf32>
    %116 = tpu.matmul %115, %114, %cst_51 {dimension_numbers = #tpu.dot_dimension_numbers<[1], [0], [0], [1], [0, 0, 1, 1], [], []>} : vector<8x32xbf16>, vector<32x32xbf16>, vector<8x32xf32> -> vector<8x32xf32>
    %c0_52 = arith.constant 0 : index
    %c0_53 = arith.constant 0 : index
    %117 = vector.load %arg16[%c0_52, %c0_53] : memref<1x32xf32, #tpu.memory_space<vmem>>, vector<1x32xf32>
    %118 = vector.broadcast %117 : vector<1x32xf32> to vector<8x32xf32>
    %119 = arith.addf %116, %118 : vector<8x32xf32>
    %c0_54 = arith.constant 0 : index
    %c0_55 = arith.constant 0 : index
    %120 = vector.load %arg17[%c0_54, %c0_55] : memref<32x32xbf16, #tpu.memory_space<vmem>>, vector<32x32xbf16>
    %121 = arith.truncf %5 : vector<16x32xf32> to vector<16x32xbf16>
    %cst_56 = arith.constant dense<0.000000e+00> : vector<16x32xf32>
    %122 = tpu.matmul %121, %120, %cst_56 {dimension_numbers = #tpu.dot_dimension_numbers<[1], [0], [0], [1], [0, 0, 1, 1], [], []>} : vector<16x32xbf16>, vector<32x32xbf16>, vector<16x32xf32> -> vector<16x32xf32>
    %c0_57 = arith.constant 0 : index
    %c0_58 = arith.constant 0 : index
    %123 = vector.load %arg18[%c0_57, %c0_58] : memref<1x32xf32, #tpu.memory_space<vmem>>, vector<1x32xf32>
    %124 = vector.broadcast %123 : vector<1x32xf32> to vector<16x32xf32>
    %125 = arith.addf %122, %124 : vector<16x32xf32>
    %c0_59 = arith.constant 0 : index
    %c0_60 = arith.constant 0 : index
    %126 = vector.load %arg19[%c0_59, %c0_60] : memref<32x32xbf16, #tpu.memory_space<vmem>>, vector<32x32xbf16>
    %127 = arith.truncf %5 : vector<16x32xf32> to vector<16x32xbf16>
    %cst_61 = arith.constant dense<0.000000e+00> : vector<16x32xf32>
    %128 = tpu.matmul %127, %126, %cst_61 {dimension_numbers = #tpu.dot_dimension_numbers<[1], [0], [0], [1], [0, 0, 1, 1], [], []>} : vector<16x32xbf16>, vector<32x32xbf16>, vector<16x32xf32> -> vector<16x32xf32>
    %c0_62 = arith.constant 0 : index
    %c0_63 = arith.constant 0 : index
    %129 = vector.load %arg20[%c0_62, %c0_63] : memref<1x32xf32, #tpu.memory_space<vmem>>, vector<1x32xf32>
    %130 = vector.broadcast %129 : vector<1x32xf32> to vector<16x32xf32>
    %131 = arith.addf %128, %130 : vector<16x32xf32>
    %c0_64 = arith.constant 0 : index
    %c0_65 = arith.constant 0 : index
    %132 = vector.load %arg21[%c0_64, %c0_65] : memref<32x32xbf16, #tpu.memory_space<vmem>>, vector<32x32xbf16>
    %c0_66 = arith.constant 0 : index
    %c0_67 = arith.constant 0 : index
    %133 = vector.load %arg22[%c0_66, %c0_67] : memref<1x32xf32, #tpu.memory_space<vmem>>, vector<1x32xf32>
    %cst_68 = arith.constant 0.353553385 : f32
    %134 = vector.broadcast %cst_68 : f32 to vector<8x32xf32>
    %135 = arith.mulf %119, %134 : vector<8x32xf32>
    %136 = vector.shape_cast %135 : vector<8x32xf32> to vector<8x4x8xf32>
    %137 = tpu.transpose %136, [1, 0, 2] : vector<8x4x8xf32> -> vector<4x8x8xf32>
    %138 = arith.truncf %137 : vector<4x8x8xf32> to vector<4x8x8xbf16>
    %139 = vector.shape_cast %125 : vector<16x32xf32> to vector<16x4x8xf32>
    %140 = tpu.transpose %139, [1, 0, 2] : vector<16x4x8xf32> -> vector<4x16x8xf32>
    %141 = arith.truncf %140 : vector<4x16x8xf32> to vector<4x16x8xbf16>
    %142 = vector.shape_cast %131 : vector<16x32xf32> to vector<16x4x8xf32>
    %143 = tpu.transpose %142, [1, 0, 2] : vector<16x4x8xf32> -> vector<4x16x8xf32>
    %144 = arith.truncf %143 : vector<4x16x8xf32> to vector<4x16x8xbf16>
    "tpu.trace_start"() <{level = 10 : i32, message = "htd,hsd->hts"}> : () -> ()
    %cst_69 = arith.constant dense<0.000000e+00> : vector<4x8x16xf32>
    %145 = tpu.matmul %138, %141, %cst_69 {dimension_numbers = #tpu.dot_dimension_numbers<[2], [2], [1], [1], [0, 0, 0, 1, 1, 1], [0], [0]>} : vector<4x8x8xbf16>, vector<4x16x8xbf16>, vector<4x8x16xf32> -> vector<4x8x16xf32>
    "tpu.trace_stop"() : () -> ()
    %cst_70 = arith.constant dense<0xFF800000> : vector<4x8xf32>
    %146 = vector.multi_reduction <maximumf>, %145, %cst_70 [2] : vector<4x8x16xf32> to vector<4x8xf32>
    %147 = vector.shape_cast %146 : vector<4x8xf32> to vector<4x8x1xf32>
    %148 = vector.broadcast %147 : vector<4x8x1xf32> to vector<4x8x16xf32>
    %149 = arith.subf %145, %148 : vector<4x8x16xf32>
    %150 = math.exp %149 : vector<4x8x16xf32>
    %cst_71 = arith.constant dense<0.000000e+00> : vector<4x8xf32>
    %151 = vector.multi_reduction <add>, %150, %cst_71 [2] : vector<4x8x16xf32> to vector<4x8xf32>
    %152 = vector.shape_cast %151 : vector<4x8xf32> to vector<4x8x1xf32>
    %153 = tpu.reciprocal %152 {approx = true} : vector<4x8x1xf32> -> vector<4x8x1xf32>
    %154 = vector.broadcast %153 : vector<4x8x1xf32> to vector<4x8x16xf32>
    %155 = arith.mulf %150, %154 : vector<4x8x16xf32>
    %156 = arith.truncf %155 : vector<4x8x16xf32> to vector<4x8x16xbf16>
    "tpu.trace_start"() <{level = 10 : i32, message = "hts,hsd->htd"}> : () -> ()
    %cst_72 = arith.constant dense<0.000000e+00> : vector<4x8x8xf32>
    %157 = tpu.matmul %156, %144, %cst_72 {dimension_numbers = #tpu.dot_dimension_numbers<[2], [1], [1], [2], [0, 0, 0, 1, 1, 2], [0], [0]>} : vector<4x8x16xbf16>, vector<4x16x8xbf16>, vector<4x8x8xf32> -> vector<4x8x8xf32>
    "tpu.trace_stop"() : () -> ()
    %158 = tpu.transpose %157, [1, 0, 2] : vector<4x8x8xf32> -> vector<8x4x8xf32>
    %159 = vector.shape_cast %158 : vector<8x4x8xf32> to vector<8x32xf32>
    %160 = arith.truncf %159 : vector<8x32xf32> to vector<8x32xbf16>
    %cst_73 = arith.constant dense<0.000000e+00> : vector<8x32xf32>
    %161 = tpu.matmul %160, %132, %cst_73 {dimension_numbers = #tpu.dot_dimension_numbers<[1], [0], [0], [1], [0, 0, 1, 1], [], []>} : vector<8x32xbf16>, vector<32x32xbf16>, vector<8x32xf32> -> vector<8x32xf32>
    %162 = vector.broadcast %133 : vector<1x32xf32> to vector<8x32xf32>
    %163 = arith.addf %161, %162 : vector<8x32xf32>
    %164 = arith.addf %89, %163 : vector<8x32xf32>
    %c0_74 = arith.constant 0 : index
    %c0_75 = arith.constant 0 : index
    %165 = vector.load %arg23[%c0_74, %c0_75] : memref<1x32xf32, #tpu.memory_space<vmem>>, vector<1x32xf32>
    %c0_76 = arith.constant 0 : index
    %c0_77 = arith.constant 0 : index
    %166 = vector.load %arg24[%c0_76, %c0_77] : memref<1x32xf32, #tpu.memory_space<vmem>>, vector<1x32xf32>
    %cst_78 = arith.constant dense<0.000000e+00> : vector<8xf32>
    %167 = vector.multi_reduction <add>, %164, %cst_78 [1] : vector<8x32xf32> to vector<8xf32>
    %168 = vector.shape_cast %167 : vector<8xf32> to vector<8x1xf32>
    %cst_79 = arith.constant 3.200000e+01 : f32
    %169 = vector.broadcast %cst_79 : f32 to vector<8x1xf32>
    %170 = arith.divf %168, %169 : vector<8x1xf32>
    %171 = vector.broadcast %170 : vector<8x1xf32> to vector<8x32xf32>
    %172 = arith.subf %164, %171 : vector<8x32xf32>
    %173 = arith.mulf %172, %172 : vector<8x32xf32>
    %cst_80 = arith.constant dense<0.000000e+00> : vector<8xf32>
    %174 = vector.multi_reduction <add>, %173, %cst_80 [1] : vector<8x32xf32> to vector<8xf32>
    %175 = vector.shape_cast %174 : vector<8xf32> to vector<8x1xf32>
    %cst_81 = arith.constant 3.200000e+01 : f32
    %176 = vector.broadcast %cst_81 : f32 to vector<8x1xf32>
    %177 = arith.divf %175, %176 : vector<8x1xf32>
    %178 = vector.broadcast %170 : vector<8x1xf32> to vector<8x32xf32>
    %179 = arith.subf %164, %178 : vector<8x32xf32>
    %cst_82 = arith.constant 9.99999974E-6 : f32
    %180 = vector.broadcast %cst_82 : f32 to vector<8x1xf32>
    %181 = arith.addf %177, %180 : vector<8x1xf32>
    %182 = math.rsqrt %181 : vector<8x1xf32>
    %183 = vector.broadcast %182 : vector<8x1xf32> to vector<8x32xf32>
    %184 = arith.mulf %179, %183 : vector<8x32xf32>
    %185 = vector.broadcast %165 : vector<1x32xf32> to vector<8x32xf32>
    %186 = arith.mulf %184, %185 : vector<8x32xf32>
    %187 = vector.broadcast %166 : vector<1x32xf32> to vector<8x32xf32>
    %188 = arith.addf %186, %187 : vector<8x32xf32>
    %c0_83 = arith.constant 0 : index
    %c0_84 = arith.constant 0 : index
    %189 = vector.load %arg25[%c0_83, %c0_84] : memref<32x128xbf16, #tpu.memory_space<vmem>>, vector<32x128xbf16>
    %190 = arith.truncf %188 : vector<8x32xf32> to vector<8x32xbf16>
    %cst_85 = arith.constant dense<0.000000e+00> : vector<8x128xf32>
    %191 = tpu.matmul %190, %189, %cst_85 {dimension_numbers = #tpu.dot_dimension_numbers<[1], [0], [0], [1], [0, 0, 1, 1], [], []>} : vector<8x32xbf16>, vector<32x128xbf16>, vector<8x128xf32> -> vector<8x128xf32>
    %c0_86 = arith.constant 0 : index
    %c0_87 = arith.constant 0 : index
    %192 = vector.load %arg26[%c0_86, %c0_87] : memref<1x128xf32, #tpu.memory_space<vmem>>, vector<1x128xf32>
    %193 = vector.broadcast %192 : vector<1x128xf32> to vector<8x128xf32>
    %194 = arith.addf %191, %193 : vector<8x128xf32>
    %195 = arith.mulf %194, %194 : vector<8x128xf32>
    %196 = arith.mulf %194, %195 : vector<8x128xf32>
    %cst_88 = arith.constant 4.471500e-02 : f32
    %197 = vector.broadcast %cst_88 : f32 to vector<8x128xf32>
    %198 = arith.mulf %197, %196 : vector<8x128xf32>
    %199 = arith.addf %194, %198 : vector<8x128xf32>
    %cst_89 = arith.constant 0.797884583 : f32
    %200 = vector.broadcast %cst_89 : f32 to vector<8x128xf32>
    %201 = arith.mulf %200, %199 : vector<8x128xf32>
    %202 = math.tanh %201 : vector<8x128xf32>
    %cst_90 = arith.constant 1.000000e+00 : f32
    %203 = vector.broadcast %cst_90 : f32 to vector<8x128xf32>
    %204 = arith.addf %203, %202 : vector<8x128xf32>
    %cst_91 = arith.constant 5.000000e-01 : f32
    %205 = vector.broadcast %cst_91 : f32 to vector<8x128xf32>
    %206 = arith.mulf %205, %204 : vector<8x128xf32>
    %207 = arith.mulf %194, %206 : vector<8x128xf32>
    %c0_92 = arith.constant 0 : index
    %c0_93 = arith.constant 0 : index
    %208 = vector.load %arg27[%c0_92, %c0_93] : memref<128x32xbf16, #tpu.memory_space<vmem>>, vector<128x32xbf16>
    %209 = arith.truncf %207 : vector<8x128xf32> to vector<8x128xbf16>
    %cst_94 = arith.constant dense<0.000000e+00> : vector<8x32xf32>
    %210 = tpu.matmul %209, %208, %cst_94 {dimension_numbers = #tpu.dot_dimension_numbers<[1], [0], [0], [1], [0, 0, 1, 1], [], []>} : vector<8x128xbf16>, vector<128x32xbf16>, vector<8x32xf32> -> vector<8x32xf32>
    %211 = arith.addf %164, %210 : vector<8x32xf32>
    %c0_95 = arith.constant 0 : index
    %c0_96 = arith.constant 0 : index
    %212 = vector.load %arg28[%c0_95, %c0_96] : memref<1x32xf32, #tpu.memory_space<vmem>>, vector<1x32xf32>
    %213 = vector.broadcast %212 : vector<1x32xf32> to vector<8x32xf32>
    %214 = arith.addf %211, %213 : vector<8x32xf32>
    %c0_97 = arith.constant 0 : index
    %c0_98 = arith.constant 0 : index
    %215 = vector.load %arg29[%c0_97, %c0_98] : memref<1x32xf32, #tpu.memory_space<vmem>>, vector<1x32xf32>
    %c0_99 = arith.constant 0 : index
    %c0_100 = arith.constant 0 : index
    %216 = vector.load %arg30[%c0_99, %c0_100] : memref<1x32xf32, #tpu.memory_space<vmem>>, vector<1x32xf32>
    %cst_101 = arith.constant dense<0.000000e+00> : vector<8xf32>
    %217 = vector.multi_reduction <add>, %214, %cst_101 [1] : vector<8x32xf32> to vector<8xf32>
    %218 = vector.shape_cast %217 : vector<8xf32> to vector<8x1xf32>
    %cst_102 = arith.constant 3.200000e+01 : f32
    %219 = vector.broadcast %cst_102 : f32 to vector<8x1xf32>
    %220 = arith.divf %218, %219 : vector<8x1xf32>
    %221 = vector.broadcast %220 : vector<8x1xf32> to vector<8x32xf32>
    %222 = arith.subf %214, %221 : vector<8x32xf32>
    %223 = arith.mulf %222, %222 : vector<8x32xf32>
    %cst_103 = arith.constant dense<0.000000e+00> : vector<8xf32>
    %224 = vector.multi_reduction <add>, %223, %cst_103 [1] : vector<8x32xf32> to vector<8xf32>
    %225 = vector.shape_cast %224 : vector<8xf32> to vector<8x1xf32>
    %cst_104 = arith.constant 3.200000e+01 : f32
    %226 = vector.broadcast %cst_104 : f32 to vector<8x1xf32>
    %227 = arith.divf %225, %226 : vector<8x1xf32>
    %228 = vector.broadcast %220 : vector<8x1xf32> to vector<8x32xf32>
    %229 = arith.subf %214, %228 : vector<8x32xf32>
    %cst_105 = arith.constant 9.99999974E-6 : f32
    %230 = vector.broadcast %cst_105 : f32 to vector<8x1xf32>
    %231 = arith.addf %227, %230 : vector<8x1xf32>
    %232 = math.rsqrt %231 : vector<8x1xf32>
    %233 = vector.broadcast %232 : vector<8x1xf32> to vector<8x32xf32>
    %234 = arith.mulf %229, %233 : vector<8x32xf32>
    %235 = vector.broadcast %215 : vector<1x32xf32> to vector<8x32xf32>
    %236 = arith.mulf %234, %235 : vector<8x32xf32>
    %237 = vector.broadcast %216 : vector<1x32xf32> to vector<8x32xf32>
    %238 = arith.addf %236, %237 : vector<8x32xf32>
    %239 = arith.truncf %238 : vector<8x32xf32> to vector<8x32xbf16>
    %c0_106 = arith.constant 0 : index
    %c0_107 = arith.constant 0 : index
    %c0_108 = arith.constant 0 : index
    %240 = vector.load %arg31[%c0_106, %c0_107, %c0_108] : memref<1x8x32xbf16, #tpu.memory_space<vmem>>, vector<1x8x32xbf16>
    %241 = vector.shape_cast %240 : vector<1x8x32xbf16> to vector<8x32xbf16>
    %242 = vector.shape_cast %239 : vector<8x32xbf16> to vector<1x8x32xbf16>
    tpu.vector_store %arg31[%c0_106, %c0_107, %c0_108], %242 {strides = array<i32>} : memref<1x8x32xbf16, #tpu.memory_space<vmem>>, vector<1x8x32xbf16>,
    return
  }
  func.func @transform_0(%arg0: i32) -> (i32, i32, i32) {
    %c0_i32 = arith.constant 0 : i32
    %c0_i32_0 = arith.constant 0 : i32
    %c0_i32_1 = arith.constant 0 : i32
    return %arg0, %c0_i32, %c0_i32_0 : i32, i32, i32
  }
  func.func @transform_1(%arg0: i32) -> (i32, i32, i32) {
    %c0_i32 = arith.constant 0 : i32
    %c0_i32_0 = arith.constant 0 : i32
    %c0_i32_1 = arith.constant 0 : i32
    return %arg0, %c0_i32, %c0_i32_0 : i32, i32, i32
  }
  func.func @transform_2(%arg0: i32) -> (i32, i32) {
    %c0_i32 = arith.constant 0 : i32
    %c0_i32_0 = arith.constant 0 : i32
    %c0_i32_1 = arith.constant 0 : i32
    return %c0_i32, %c0_i32_0 : i32, i32
  }
  func.func @transform_3(%arg0: i32) -> (i32, i32) {
    %c0_i32 = arith.constant 0 : i32
    %c0_i32_0 = arith.constant 0 : i32
    %c0_i32_1 = arith.constant 0 : i32
    return %c0_i32, %c0_i32_0 : i32, i32
  }
  func.func @transform_4(%arg0: i32) -> (i32, i32) {
    %c0_i32 = arith.constant 0 : i32
    %c0_i32_0 = arith.constant 0 : i32
    %c0_i32_1 = arith.constant 0 : i32
    return %c0_i32, %c0_i32_0 : i32, i32
  }
  func.func @transform_5(%arg0: i32) -> (i32, i32) {
    %c0_i32 = arith.constant 0 : i32
    %c0_i32_0 = arith.constant 0 : i32
    %c0_i32_1 = arith.constant 0 : i32
    return %c0_i32, %c0_i32_0 : i32, i32
  }
  func.func @transform_6(%arg0: i32) -> (i32, i32) {
    %c0_i32 = arith.constant 0 : i32
    %c0_i32_0 = arith.constant 0 : i32
    %c0_i32_1 = arith.constant 0 : i32
    return %c0_i32, %c0_i32_0 : i32, i32
  }
  func.func @transform_7(%arg0: i32) -> (i32, i32) {
    %c0_i32 = arith.constant 0 : i32
    %c0_i32_0 = arith.constant 0 : i32
    %c0_i32_1 = arith.constant 0 : i32
    return %c0_i32, %c0_i32_0 : i32, i32
  }
  func.func @transform_8(%arg0: i32) -> (i32, i32) {
    %c0_i32 = arith.constant 0 : i32
    %c0_i32_0 = arith.constant 0 : i32
    %c0_i32_1 = arith.constant 0 : i32
    return %c0_i32, %c0_i32_0 : i32, i32
  }
  func.func @transform_9(%arg0: i32) -> (i32, i32) {
    %c0_i32 = arith.constant 0 : i32
    %c0_i32_0 = arith.constant 0 : i32
    %c0_i32_1 = arith.constant 0 : i32
    return %c0_i32, %c0_i32_0 : i32, i32
  }
  func.func @transform_10(%arg0: i32) -> (i32, i32) {
    %c0_i32 = arith.constant 0 : i32
    %c0_i32_0 = arith.constant 0 : i32
    %c0_i32_1 = arith.constant 0 : i32
    return %c0_i32, %c0_i32_0 : i32, i32
  }
  func.func @transform_11(%arg0: i32) -> (i32, i32) {
    %c0_i32 = arith.constant 0 : i32
    %c0_i32_0 = arith.constant 0 : i32
    %c0_i32_1 = arith.constant 0 : i32
    return %c0_i32, %c0_i32_0 : i32, i32
  }
  func.func @transform_12(%arg0: i32) -> (i32, i32) {
    %c0_i32 = arith.constant 0 : i32
    %c0_i32_0 = arith.constant 0 : i32
    %c0_i32_1 = arith.constant 0 : i32
    return %c0_i32, %c0_i32_0 : i32, i32
  }
  func.func @transform_13(%arg0: i32) -> (i32, i32) {
    %c0_i32 = arith.constant 0 : i32
    %c0_i32_0 = arith.constant 0 : i32
    %c0_i32_1 = arith.constant 0 : i32
    return %c0_i32, %c0_i32_0 : i32, i32
  }
  func.func @transform_14(%arg0: i32) -> (i32, i32) {
    %c0_i32 = arith.constant 0 : i32
    %c0_i32_0 = arith.constant 0 : i32
    %c0_i32_1 = arith.constant 0 : i32
    return %c0_i32, %c0_i32_0 : i32, i32
  }
  func.func @transform_15(%arg0: i32) -> (i32, i32) {
    %c0_i32 = arith.constant 0 : i32
    %c0_i32_0 = arith.constant 0 : i32
    %c0_i32_1 = arith.constant 0 : i32
    return %c0_i32, %c0_i32_0 : i32, i32
  }
  func.func @transform_16(%arg0: i32) -> (i32, i32) {
    %c0_i32 = arith.constant 0 : i32
    %c0_i32_0 = arith.constant 0 : i32
    %c0_i32_1 = arith.constant 0 : i32
    return %c0_i32, %c0_i32_0 : i32, i32
  }
  func.func @transform_17(%arg0: i32) -> (i32, i32) {
    %c0_i32 = arith.constant 0 : i32
    %c0_i32_0 = arith.constant 0 : i32
    %c0_i32_1 = arith.constant 0 : i32
    return %c0_i32, %c0_i32_0 : i32, i32
  }
  func.func @transform_18(%arg0: i32) -> (i32, i32) {
    %c0_i32 = arith.constant 0 : i32
    %c0_i32_0 = arith.constant 0 : i32
    %c0_i32_1 = arith.constant 0 : i32
    return %c0_i32, %c0_i32_0 : i32, i32
  }
  func.func @transform_19(%arg0: i32) -> (i32, i32) {
    %c0_i32 = arith.constant 0 : i32
    %c0_i32_0 = arith.constant 0 : i32
    %c0_i32_1 = arith.constant 0 : i32
    return %c0_i32, %c0_i32_0 : i32, i32
  }
  func.func @transform_20(%arg0: i32) -> (i32, i32) {
    %c0_i32 = arith.constant 0 : i32
    %c0_i32_0 = arith.constant 0 : i32
    %c0_i32_1 = arith.constant 0 : i32
    return %c0_i32, %c0_i32_0 : i32, i32
  }
  func.func @transform_21(%arg0: i32) -> (i32, i32) {
    %c0_i32 = arith.constant 0 : i32
    %c0_i32_0 = arith.constant 0 : i32
    %c0_i32_1 = arith.constant 0 : i32
    return %c0_i32, %c0_i32_0 : i32, i32
  }
  func.func @transform_22(%arg0: i32) -> (i32, i32) {
    %c0_i32 = arith.constant 0 : i32
    %c0_i32_0 = arith.constant 0 : i32
    %c0_i32_1 = arith.constant 0 : i32
    return %c0_i32, %c0_i32_0 : i32, i32
  }
  func.func @transform_23(%arg0: i32) -> (i32, i32) {
    %c0_i32 = arith.constant 0 : i32
    %c0_i32_0 = arith.constant 0 : i32
    %c0_i32_1 = arith.constant 0 : i32
    return %c0_i32, %c0_i32_0 : i32, i32
  }
  func.func @transform_24(%arg0: i32) -> (i32, i32) {
    %c0_i32 = arith.constant 0 : i32
    %c0_i32_0 = arith.constant 0 : i32
    %c0_i32_1 = arith.constant 0 : i32
    return %c0_i32, %c0_i32_0 : i32, i32
  }
  func.func @transform_25(%arg0: i32) -> (i32, i32) {
    %c0_i32 = arith.constant 0 : i32
    %c0_i32_0 = arith.constant 0 : i32
    %c0_i32_1 = arith.constant 0 : i32
    return %c0_i32, %c0_i32_0 : i32, i32
  }
  func.func @transform_26(%arg0: i32) -> (i32, i32) {
    %c0_i32 = arith.constant 0 : i32
    %c0_i32_0 = arith.constant 0 : i32
    %c0_i32_1 = arith.constant 0 : i32
    return %c0_i32, %c0_i32_0 : i32, i32
  }
  func.func @transform_27(%arg0: i32) -> (i32, i32) {
    %c0_i32 = arith.constant 0 : i32
    %c0_i32_0 = arith.constant 0 : i32
    %c0_i32_1 = arith.constant 0 : i32
    return %c0_i32, %c0_i32_0 : i32, i32
  }
  func.func @transform_28(%arg0: i32) -> (i32, i32) {
    %c0_i32 = arith.constant 0 : i32
    %c0_i32_0 = arith.constant 0 : i32
    %c0_i32_1 = arith.constant 0 : i32
    return %c0_i32, %c0_i32_0 : i32, i32
  }
  func.func @transform_29(%arg0: i32) -> (i32, i32) {
    %c0_i32 = arith.constant 0 : i32
    %c0_i32_0 = arith.constant 0 : i32
    %c0_i32_1 = arith.constant 0 : i32
    return %c0_i32, %c0_i32_0 : i32, i32
  }
  func.func @transform_30(%arg0: i32) -> (i32, i32, i32) {
    %c0_i32 = arith.constant 0 : i32
    %c0_i32_0 = arith.constant 0 : i32
    %c0_i32_1 = arith.constant 0 : i32
    return %arg0, %c0_i32, %c0_i32_0 : i32, i32, i32
  }
}

module attributes {stable_mosaic.version = 11 : i64} {
  func.func @_dec_block_kernel(%arg0: i32, %arg1: memref<1x8x32xbf16, #tpu.memory_space<vmem>>, %arg2: memref<1x16x32xbf16, #tpu.memory_space<vmem>>, %arg3: memref<1x32xf32, #tpu.memory_space<vmem>>, %arg4: memref<1x32xf32, #tpu.memory_space<vmem>>, %arg5: memref<32x32xbf16, #tpu.memory_space<vmem>>, %arg6: memref<1x32xf32, #tpu.memory_space<vmem>>, %arg7: memref<32x32xbf16, #tpu.memory_space<vmem>>, %arg8: memref<1x32xf32, #tpu.memory_space<vmem>>, %arg9: memref<32x32xbf16, #tpu.memory_space<vmem>>, %arg10: memref<1x32xf32, #tpu.memory_space<vmem>>, %arg11: memref<32x32xbf16, #tpu.memory_space<vmem>>, %arg12: memref<1x32xf32, #tpu.memory_space<vmem>>, %arg13: memref<1x32xf32, #tpu.memory_space<vmem>>, %arg14: memref<1x32xf32, #tpu.memory_space<vmem>>, %arg15: memref<32x32xbf16, #tpu.memory_space<vmem>>, %arg16: memref<1x32xf32, #tpu.memory_space<vmem>>, %arg17: memref<32x32xbf16, #tpu.memory_space<vmem>>, %arg18: memref<1x32xf32, #tpu.memory_space<vmem>>, %arg19: memref<32x32xbf16, #tpu.memory_space<vmem>>, %arg20: memref<1x32xf32, #tpu.memory_space<vmem>>, %arg21: memref<32x32xbf16, #tpu.memory_space<vmem>>, %arg22: memref<1x32xf32, #tpu.memory_space<vmem>>, %arg23: memref<1x32xf32, #tpu.memory_space<vmem>>, %arg24: memref<1x32xf32, #tpu.memory_space<vmem>>, %arg25: memref<32x128xbf16, #tpu.memory_space<vmem>>, %arg26: memref<1x128xf32, #tpu.memory_space<vmem>>, %arg27: memref<128x32xbf16, #tpu.memory_space<vmem>>, %arg28: memref<1x32xf32, #tpu.memory_space<vmem>>, %arg29: memref<1x32xf32, #tpu.memory_space<vmem>>, %arg30: memref<1x32xf32, #tpu.memory_space<vmem>>, %arg31: memref<1x8x32xbf16, #tpu.memory_space<vmem>>) attributes {dimension_semantics = [#tpu.dimension_semantics<parallel>], iteration_bounds = array<i64: 2>, scalar_prefetch = 0 : i64, scratch_operands = 0 : i64, tpu.core_type = #tpu.core_type<tc>, window_params = [{transform_indices = @transform_0, window_bounds = array<i64: 1, 8, 32>}, {transform_indices = @transform_1, window_bounds = array<i64: 1, 16, 32>}, {pipeline_mode = #tpu.pipeline_mode<synchronous>, transform_indices = @transform_2, window_bounds = array<i64: 1, 32>}, {pipeline_mode = #tpu.pipeline_mode<synchronous>, transform_indices = @transform_3, window_bounds = array<i64: 1, 32>}, {pipeline_mode = #tpu.pipeline_mode<synchronous>, transform_indices = @transform_4, window_bounds = array<i64: 32, 32>}, {pipeline_mode = #tpu.pipeline_mode<synchronous>, transform_indices = @transform_5, window_bounds = array<i64: 1, 32>}, {pipeline_mode = #tpu.pipeline_mode<synchronous>, transform_indices = @transform_6, window_bounds = array<i64: 32, 32>}, {pipeline_mode = #tpu.pipeline_mode<synchronous>, transform_indices = @transform_7, window_bounds = array<i64: 1, 32>}, {pipeline_mode = #tpu.pipeline_mode<synchronous>, transform_indices = @transform_8, window_bounds = array<i64: 32, 32>}, {pipeline_mode = #tpu.pipeline_mode<synchronous>, transform_indices = @transform_9, window_bounds = array<i64: 1, 32>}, {pipeline_mode = #tpu.pipeline_mode<synchronous>, transform_indices = @transform_10, window_bounds = array<i64: 32, 32>}, {pipeline_mode = #tpu.pipeline_mode<synchronous>, transform_indices = @transform_11, window_bounds = array<i64: 1, 32>}, {pipeline_mode = #tpu.pipeline_mode<synchronous>, transform_indices = @transform_12, window_bounds = array<i64: 1, 32>}, {pipeline_mode = #tpu.pipeline_mode<synchronous>, transform_indices = @transform_13, window_bounds = array<i64: 1, 32>}, {pipeline_mode = #tpu.pipeline_mode<synchronous>, transform_indices = @transform_14, window_bounds = array<i64: 32, 32>}, {pipeline_mode = #tpu.pipeline_mode<synchronous>, transform_indices = @transform_15, window_bounds = array<i64: 1, 32>}, {pipeline_mode = #tpu.pipeline_mode<synchronous>, transform_indices = @transform_16, window_bounds = array<i64: 32, 32>}, {pipeline_mode = #tpu.pipeline_mode<synchronous>, transform_indices = @transform_17, window_bounds = array<i64: 1, 32>}, {pipeline_mode = #tpu.pipeline_mode<synchronous>, transform_indices = @transform_18, window_bounds = array<i64: 32, 32>}, {pipeline_mode = #tpu.pipeline_mode<synchronous>, transform_indices = @transform_19, window_bounds = array<i64: 1, 32>}, {pipeline_mode = #tpu.pipeline_mode<synchronous>, transform_indices = @transform_20, window_bounds = array<i64: 32, 32>}, {pipeline_mode = #tpu.pipeline_mode<synchronous>, transform_indices = @transform_21, window_bounds = array<i64: 1, 32>}, {pipeline_mode = #tpu.pipeline_mode<synchronous>, transform_indices = @transform_22, window_bounds = array<i64: 1, 32>}, {pipeline_mode = #tpu.pipeline_mode<synchronous>, transform_indices = @transform_23, window_bounds = array<i64: 1, 32>}, {pipeline_mode = #tpu.pipeline_mode<synchronous>, transform_indices = @transform_24, window_bounds = array<i64: 32, 128>}, {pipeline_mode = #tpu.pipeline_mode<synchronous>, transform_indices = @transform_25, window_bounds = array<i64: 1, 128>}, {pipeline_mode = #tpu.pipeline_mode<synchronous>, transform_indices = @transform_26, window_bounds = array<i64: 128, 32>}, {pipeline_mode = #tpu.pipeline_mode<synchronous>, transform_indices = @transform_27, window_bounds = array<i64: 1, 32>}, {pipeline_mode = #tpu.pipeline_mode<synchronous>, transform_indices = @transform_28, window_bounds = array<i64: 1, 32>}, {pipeline_mode = #tpu.pipeline_mode<synchronous>, transform_indices = @transform_29, window_bounds = array<i64: 1, 32>}, {transform_indices = @transform_30, window_bounds = array<i64: 1, 8, 32>}]} {
    %c0 = arith.constant 0 : index
    %c0_0 = arith.constant 0 : index
    %c0_1 = arith.constant 0 : index
    %0 = vector.load %arg1[%c0, %c0_0, %c0_1] : memref<1x8x32xbf16, #tpu.memory_space<vmem>>, vector<1x8x32xbf16>
    %1 = vector.shape_cast %0 : vector<1x8x32xbf16> to vector<8x32xbf16>
    %2 = arith.extf %1 : vector<8x32xbf16> to vector<8x32xf32>
    %c0_2 = arith.constant 0 : index
    %c0_3 = arith.constant 0 : index
    %c0_4 = arith.constant 0 : index
    %3 = vector.load %arg2[%c0_2, %c0_3, %c0_4] : memref<1x16x32xbf16, #tpu.memory_space<vmem>>, vector<1x16x32xbf16>
    %4 = vector.shape_cast %3 : vector<1x16x32xbf16> to vector<16x32xbf16>
    %5 = arith.extf %4 : vector<16x32xbf16> to vector<16x32xf32>
    %c0_5 = arith.constant 0 : index
    %c0_6 = arith.constant 0 : index
    %6 = vector.load %arg3[%c0_5, %c0_6] : memref<1x32xf32, #tpu.memory_space<vmem>>, vector<1x32xf32>
    %c0_7 = arith.constant 0 : index
    %c0_8 = arith.constant 0 : index
    %7 = vector.load %arg4[%c0_7, %c0_8] : memref<1x32xf32, #tpu.memory_space<vmem>>, vector<1x32xf32>
    %cst = arith.constant dense<0.000000e+00> : vector<8xf32>
    %8 = vector.multi_reduction <add>, %2, %cst [1] : vector<8x32xf32> to vector<8xf32>
    %9 = vector.shape_cast %8 : vector<8xf32> to vector<8x1xf32>
    %cst_9 = arith.constant 3.200000e+01 : f32
    %10 = vector.broadcast %cst_9 : f32 to vector<8x1xf32>
    %11 = arith.divf %9, %10 : vector<8x1xf32>
    %12 = vector.broadcast %11 : vector<8x1xf32> to vector<8x32xf32>
    %13 = arith.subf %2, %12 : vector<8x32xf32>
    %14 = arith.mulf %13, %13 : vector<8x32xf32>
    %cst_10 = arith.constant dense<0.000000e+00> : vector<8xf32>
    %15 = vector.multi_reduction <add>, %14, %cst_10 [1] : vector<8x32xf32> to vector<8xf32>
    %16 = vector.shape_cast %15 : vector<8xf32> to vector<8x1xf32>
    %cst_11 = arith.constant 3.200000e+01 : f32
    %17 = vector.broadcast %cst_11 : f32 to vector<8x1xf32>
    %18 = arith.divf %16, %17 : vector<8x1xf32>
    %19 = vector.broadcast %11 : vector<8x1xf32> to vector<8x32xf32>
    %20 = arith.subf %2, %19 : vector<8x32xf32>
    %cst_12 = arith.constant 9.99999974E-6 : f32
    %21 = vector.broadcast %cst_12 : f32 to vector<8x1xf32>
    %22 = arith.addf %18, %21 : vector<8x1xf32>
    %23 = math.rsqrt %22 : vector<8x1xf32>
    %24 = vector.broadcast %23 : vector<8x1xf32> to vector<8x32xf32>
    %25 = arith.mulf %20, %24 : vector<8x32xf32>
    %26 = vector.broadcast %6 : vector<1x32xf32> to vector<8x32xf32>
    %27 = arith.mulf %25, %26 : vector<8x32xf32>
    %28 = vector.broadcast %7 : vector<1x32xf32> to vector<8x32xf32>
    %29 = arith.addf %27, %28 : vector<8x32xf32>
    %c0_13 = arith.constant 0 : index
    %c0_14 = arith.constant 0 : index
    %30 = vector.load %arg5[%c0_13, %c0_14] : memref<32x32xbf16, #tpu.memory_space<vmem>>, vector<32x32xbf16>
    %31 = arith.truncf %29 : vector<8x32xf32> to vector<8x32xbf16>
    %cst_15 = arith.constant dense<0.000000e+00> : vector<8x32xf32>
    %32 = tpu.matmul %31, %30, %cst_15 {dimension_numbers = #tpu.dot_dimension_numbers<[1], [0], [0], [1], [0, 0, 1, 1], [], []>} : vector<8x32xbf16>, vector<32x32xbf16>, vector<8x32xf32> -> vector<8x32xf32>
    %c0_16 = arith.constant 0 : index
    %c0_17 = arith.constant 0 : index
    %33 = vector.load %arg6[%c0_16, %c0_17] : memref<1x32xf32, #tpu.memory_space<vmem>>, vector<1x32xf32>
    %34 = vector.broadcast %33 : vector<1x32xf32> to vector<8x32xf32>
    %35 = arith.addf %32, %34 : vector<8x32xf32>
    %c0_18 = arith.constant 0 : index
    %c0_19 = arith.constant 0 : index
    %36 = vector.load %arg7[%c0_18, %c0_19] : memref<32x32xbf16, #tpu.memory_space<vmem>>, vector<32x32xbf16>
    %37 = arith.truncf %29 : vector<8x32xf32> to vector<8x32xbf16>
    %cst_20 = arith.constant dense<0.000000e+00> : vector<8x32xf32>
    %38 = tpu.matmul %37, %36, %cst_20 {dimension_numbers = #tpu.dot_dimension_numbers<[1], [0], [0], [1], [0, 0, 1, 1], [], []>} : vector<8x32xbf16>, vector<32x32xbf16>, vector<8x32xf32> -> vector<8x32xf32>
    %c0_21 = arith.constant 0 : index
    %c0_22 = arith.constant 0 : index
    %39 = vector.load %arg8[%c0_21, %c0_22] : memref<1x32xf32, #tpu.memory_space<vmem>>, vector<1x32xf32>
    %40 = vector.broadcast %39 : vector<1x32xf32> to vector<8x32xf32>
    %41 = arith.addf %38, %40 : vector<8x32xf32>
    %c0_23 = arith.constant 0 : index
    %c0_24 = arith.constant 0 : index
    %42 = vector.load %arg9[%c0_23, %c0_24] : memref<32x32xbf16, #tpu.memory_space<vmem>>, vector<32x32xbf16>
    %43 = arith.truncf %29 : vector<8x32xf32> to vector<8x32xbf16>
    %cst_25 = arith.constant dense<0.000000e+00> : vector<8x32xf32>
    %44 = tpu.matmul %43, %42, %cst_25 {dimension_numbers = #tpu.dot_dimension_numbers<[1], [0], [0], [1], [0, 0, 1, 1], [], []>} : vector<8x32xbf16>, vector<32x32xbf16>, vector<8x32xf32> -> vector<8x32xf32>
    %c0_26 = arith.constant 0 : index
    %c0_27 = arith.constant 0 : index
    %45 = vector.load %arg10[%c0_26, %c0_27] : memref<1x32xf32, #tpu.memory_space<vmem>>, vector<1x32xf32>
    %46 = vector.broadcast %45 : vector<1x32xf32> to vector<8x32xf32>
    %47 = arith.addf %44, %46 : vector<8x32xf32>
    %c0_28 = arith.constant 0 : index
    %c0_29 = arith.constant 0 : index
    %48 = vector.load %arg11[%c0_28, %c0_29] : memref<32x32xbf16, #tpu.memory_space<vmem>>, vector<32x32xbf16>
    %c0_30 = arith.constant 0 : index
    %c0_31 = arith.constant 0 : index
    %49 = vector.load %arg12[%c0_30, %c0_31] : memref<1x32xf32, #tpu.memory_space<vmem>>, vector<1x32xf32>
    %cst_32 = arith.constant 0.353553385 : f32
    %50 = vector.broadcast %cst_32 : f32 to vector<8x32xf32>
    %51 = arith.mulf %35, %50 : vector<8x32xf32>
    %52 = vector.shape_cast %51 : vector<8x32xf32> to vector<8x4x8xf32>
    %53 = tpu.transpose %52, [1, 0, 2] : vector<8x4x8xf32> -> vector<4x8x8xf32>
    %54 = arith.truncf %53 : vector<4x8x8xf32> to vector<4x8x8xbf16>
    %55 = vector.shape_cast %41 : vector<8x32xf32> to vector<8x4x8xf32>
    %56 = tpu.transpose %55, [1, 0, 2] : vector<8x4x8xf32> -> vector<4x8x8xf32>
    %57 = arith.truncf %56 : vector<4x8x8xf32> to vector<4x8x8xbf16>
    %58 = vector.shape_cast %47 : vector<8x32xf32> to vector<8x4x8xf32>
    %59 = tpu.transpose %58, [1, 0, 2] : vector<8x4x8xf32> -> vector<4x8x8xf32>
    %60 = arith.truncf %59 : vector<4x8x8xf32> to vector<4x8x8xbf16>
    "tpu.trace_start"() <{level = 10 : i32, message = "htd,hsd->hts"}> : () -> ()
    %cst_33 = arith.constant dense<0.000000e+00> : vector<4x8x8xf32>
    %61 = tpu.matmul %54, %57, %cst_33 {dimension_numbers = #tpu.dot_dimension_numbers<[2], [2], [1], [1], [0, 0, 0, 1, 1, 1], [0], [0]>} : vector<4x8x8xbf16>, vector<4x8x8xbf16>, vector<4x8x8xf32> -> vector<4x8x8xf32>
    "tpu.trace_stop"() : () -> ()
    %62 = tpu.iota {dimensions = array<i32: 0>} : vector<8x8xi32>
    %63 = tpu.iota {dimensions = array<i32: 1>} : vector<8x8xi32>
    %64 = arith.cmpi sle, %63, %62 : vector<8x8xi32>
    %cst_34 = arith.constant 0.000000e+00 : f32
    %cst_35 = arith.constant -1.000000e+30 : f32
    %65 = vector.broadcast %cst_34 : f32 to vector<8x8xf32>
    %66 = vector.broadcast %cst_35 : f32 to vector<8x8xf32>
    %67 = arith.select %64, %65, %66 : vector<8x8xi1>, vector<8x8xf32>
    %68 = vector.shape_cast %67 : vector<8x8xf32> to vector<1x8x8xf32>
    %69 = vector.broadcast %68 : vector<1x8x8xf32> to vector<4x8x8xf32>
    %70 = arith.addf %61, %69 : vector<4x8x8xf32>
    %cst_36 = arith.constant dense<0xFF800000> : vector<4x8xf32>
    %71 = vector.multi_reduction <maximumf>, %70, %cst_36 [2] : vector<4x8x8xf32> to vector<4x8xf32>
    %72 = vector.shape_cast %71 : vector<4x8xf32> to vector<4x8x1xf32>
    %73 = vector.broadcast %72 : vector<4x8x1xf32> to vector<4x8x8xf32>
    %74 = arith.subf %70, %73 : vector<4x8x8xf32>
    %75 = math.exp %74 : vector<4x8x8xf32>
    %cst_37 = arith.constant dense<0.000000e+00> : vector<4x8xf32>
    %76 = vector.multi_reduction <add>, %75, %cst_37 [2] : vector<4x8x8xf32> to vector<4x8xf32>
    %77 = vector.shape_cast %76 : vector<4x8xf32> to vector<4x8x1xf32>
    %78 = tpu.reciprocal %77 {approx = true} : vector<4x8x1xf32> -> vector<4x8x1xf32>
    %79 = vector.broadcast %78 : vector<4x8x1xf32> to vector<4x8x8xf32>
    %80 = arith.mulf %75, %79 : vector<4x8x8xf32>
    %81 = arith.truncf %80 : vector<4x8x8xf32> to vector<4x8x8xbf16>
    "tpu.trace_start"() <{level = 10 : i32, message = "hts,hsd->htd"}> : () -> ()
    %cst_38 = arith.constant dense<0.000000e+00> : vector<4x8x8xf32>
    %82 = tpu.matmul %81, %60, %cst_38 {dimension_numbers = #tpu.dot_dimension_numbers<[2], [1], [1], [2], [0, 0, 0, 1, 1, 2], [0], [0]>} : vector<4x8x8xbf16>, vector<4x8x8xbf16>, vector<4x8x8xf32> -> vector<4x8x8xf32>
    "tpu.trace_stop"() : () -> ()
    %83 = tpu.transpose %82, [1, 0, 2] : vector<4x8x8xf32> -> vector<8x4x8xf32>
    %84 = vector.shape_cast %83 : vector<8x4x8xf32> to vector<8x32xf32>
    %85 = arith.truncf %84 : vector<8x32xf32> to vector<8x32xbf16>
    %cst_39 = arith.constant dense<0.000000e+00> : vector<8x32xf32>
    %86 = tpu.matmul %85, %48, %cst_39 {dimension_numbers = #tpu.dot_dimension_numbers<[1], [0], [0], [1], [0, 0, 1, 1], [], []>} : vector<8x32xbf16>, vector<32x32xbf16>, vector<8x32xf32> -> vector<8x32xf32>
    %87 = vector.broadcast %49 : vector<1x32xf32> to vector<8x32xf32>
    %88 = arith.addf %86, %87 : vector<8x32xf32>
    %89 = arith.addf %2, %88 : vector<8x32xf32>
    %c0_40 = arith.constant 0 : index
    %c0_41 = arith.constant 0 : index
    %90 = vector.load %arg13[%c0_40, %c0_41] : memref<1x32xf32, #tpu.memory_space<vmem>>, vector<1x32xf32>
    %c0_42 = arith.constant 0 : index
    %c0_43 = arith.constant 0 : index
    %91 = vector.load %arg14[%c0_42, %c0_43] : memref<1x32xf32, #tpu.memory_space<vmem>>, vector<1x32xf32>
    %cst_44 = arith.constant dense<0.000000e+00> : vector<8xf32>
    %92 = vector.multi_reduction <add>, %89, %cst_44 [1] : vector<8x32xf32> to vector<8xf32>
    %93 = vector.shape_cast %92 : vector<8xf32> to vector<8x1xf32>
    %cst_45 = arith.constant 3.200000e+01 : f32
    %94 = vector.broadcast %cst_45 : f32 to vector<8x1xf32>
    %95 = arith.divf %93, %94 : vector<8x1xf32>
    %96 = vector.broadcast %95 : vector<8x1xf32> to vector<8x32xf32>
    %97 = arith.subf %89, %96 : vector<8x32xf32>
    %98 = arith.mulf %97, %97 : vector<8x32xf32>
    %cst_46 = arith.constant dense<0.000000e+00> : vector<8xf32>
    %99 = vector.multi_reduction <add>, %98, %cst_46 [1] : vector<8x32xf32> to vector<8xf32>
    %100 = vector.shape_cast %99 : vector<8xf32> to vector<8x1xf32>
    %cst_47 = arith.constant 3.200000e+01 : f32
    %101 = vector.broadcast %cst_47 : f32 to vector<8x1xf32>
    %102 = arith.divf %100, %101 : vector<8x1xf32>
    %103 = vector.broadcast %95 : vector<8x1xf32> to vector<8x32xf32>
    %104 = arith.subf %89, %103 : vector<8x32xf32>
    %cst_48 = arith.constant 9.99999974E-6 : f32
    %105 = vector.broadcast %cst_48 : f32 to vector<8x1xf32>
    %106 = arith.addf %102, %105 : vector<8x1xf32>
    %107 = math.rsqrt %106 : vector<8x1xf32>
    %108 = vector.broadcast %107 : vector<8x1xf32> to vector<8x32xf32>
    %109 = arith.mulf %104, %108 : vector<8x32xf32>
    %110 = vector.broadcast %90 : vector<1x32xf32> to vector<8x32xf32>
    %111 = arith.mulf %109, %110 : vector<8x32xf32>
    %112 = vector.broadcast %91 : vector<1x32xf32> to vector<8x32xf32>
    %113 = arith.addf %111, %112 : vector<8x32xf32>
    %c0_49 = arith.constant 0 : index
    %c0_50 = arith.constant 0 : index
    %114 = vector.load %arg15[%c0_49, %c0_50] : memref<32x32xbf16, #tpu.memory_space<vmem>>, vector<32x32xbf16>
    %115 = arith.truncf %113 : vector<8x32xf32> to vector<8x32xbf16>
    %cst_51 = arith.constant dense<0.000000e+00> : vector<8x32xf32>
    %116 = tpu.matmul %115, %114, %cst_51 {dimension_numbers = #tpu.dot_dimension_numbers<[1], [0], [0], [1], [0, 0, 1, 1], [], []>} : vector<8x32xbf16>, vector<32x32xbf16>, vector<8x32xf32> -> vector<8x32xf32>
    %c0_52 = arith.constant 0 : index
    %c0_53 = arith.constant 0 : index
    %117 = vector.load %arg16[%c0_52, %c0_53] : memref<1x32xf32, #tpu.memory_space<vmem>>, vector<1x32xf32>
    %118 = vector.broadcast %117 : vector<1x32xf32> to vector<8x32xf32>
    %119 = arith.addf %116, %118 : vector<8x32xf32>
    %c0_54 = arith.constant 0 : index
    %c0_55 = arith.constant 0 : index
    %120 = vector.load %arg17[%c0_54, %c0_55] : memref<32x32xbf16, #tpu.memory_space<vmem>>, vector<32x32xbf16>
    %121 = arith.truncf %5 : vector<16x32xf32> to vector<16x32xbf16>
    %cst_56 = arith.constant dense<0.000000e+00> : vector<16x32xf32>
    %122 = tpu.matmul %121, %120, %cst_56 {dimension_numbers = #tpu.dot_dimension_numbers<[1], [0], [0], [1], [0, 0, 1, 1], [], []>} : vector<16x32xbf16>, vector<32x32xbf16>, vector<16x32xf32> -> vector<16x32xf32>
    %c0_57 = arith.constant 0 : index
    %c0_58 = arith.constant 0 : index
    %123 = vector.load %arg18[%c0_57, %c0_58] : memref<1x32xf32, #tpu.memory_space<vmem>>, vector<1x32xf32>
    %124 = vector.broadcast %123 : vector<1x32xf32> to vector<16x32xf32>
    %125 = arith.addf %122, %124 : vector<16x32xf32>
    %c0_59 = arith.constant 0 : index
    %c0_60 = arith.constant 0 : index
    %126 = vector.load %arg19[%c0_59, %c0_60] : memref<32x32xbf16, #tpu.memory_space<vmem>>, vector<32x32xbf16>
    %127 = arith.truncf %5 : vector<16x32xf32> to vector<16x32xbf16>
    %cst_61 = arith.constant dense<0.000000e+00> : vector<16x32xf32>
    %128 = tpu.matmul %127, %126, %cst_61 {dimension_numbers = #tpu.dot_dimension_numbers<[1], [0], [0], [1], [0, 0, 1, 1], [], []>} : vector<16x32xbf16>, vector<32x32xbf16>, vector<16x32xf32> -> vector<16x32xf32>
    %c0_62 = arith.constant 0 : index
    %c0_63 = arith.constant 0 : index
    %129 = vector.load %arg20[%c0_62, %c0_63] : memref<1x32xf32, #tpu.memory_space<vmem>>, vector<1x32xf32>
    %130 = vector.broadcast %129 : vector<1x32xf32> to vector<16x32xf32>
    %131 = arith.addf %128, %130 : vector<16x32xf32>
    %c0_64 = arith.constant 0 : index
    %c0_65 = arith.constant 0 : index
    %132 = vector.load %arg21[%c0_64, %c0_65] : memref<32x32xbf16, #tpu.memory_space<vmem>>, vector<32x32xbf16>
    %c0_66 = arith.constant 0 : index
    %c0_67 = arith.constant 0 : index
    %133 = vector.load %arg22[%c0_66, %c0_67] : memref<1x32xf32, #tpu.memory_space<vmem>>, vector<1x32xf32>
    %cst_68 = arith.constant 0.353553385 : f32
    %134 = vector.broadcast %cst_68 : f32 to vector<8x32xf32>
    %135 = arith.mulf %119, %134 : vector<8x32xf32>
    %136 = vector.shape_cast %135 : vector<8x32xf32> to vector<8x4x8xf32>
    %137 = tpu.transpose %136, [1, 0, 2] : vector<8x4x8xf32> -> vector<4x8x8xf32>
    %138 = arith.truncf %137 : vector<4x8x8xf32> to vector<4x8x8xbf16>
    %139 = vector.shape_cast %125 : vector<16x32xf32> to vector<16x4x8xf32>
    %140 = tpu.transpose %139, [1, 0, 2] : vector<16x4x8xf32> -> vector<4x16x8xf32>
    %141 = arith.truncf %140 : vector<4x16x8xf32> to vector<4x16x8xbf16>
    %142 = vector.shape_cast %131 : vector<16x32xf32> to vector<16x4x8xf32>
    %143 = tpu.transpose %142, [1, 0, 2] : vector<16x4x8xf32> -> vector<4x16x8xf32>
    %144 = arith.truncf %143 : vector<4x16x8xf32> to vector<4x16x8xbf16>
    "tpu.trace_start"() <{level = 10 : i32, message = "htd,hsd->hts"}> : () -> ()
    %cst_69 = arith.constant dense<0.000000e+00> : vector<4x8x16xf32>
    %145 = tpu.matmul %138, %141, %cst_69 {dimension_numbers = #tpu.dot_dimension_numbers<[2], [2], [1], [1], [0, 0, 0, 1, 1, 1], [0], [0]>} : vector<4x8x8xbf16>, vector<4x16x8xbf16>, vector<4x8x16xf32> -> vector<4x8x16xf32>
    "tpu.trace_stop"() : () -> ()
    %cst_70 = arith.constant dense<0xFF800000> : vector<4x8xf32>
    %146 = vector.multi_reduction <maximumf>, %145, %cst_70 [2] : vector<4x8x16xf32> to vector<4x8xf32>
    %147 = vector.shape_cast %146 : vector<4x8xf32> to vector<4x8x1xf32>
    %148 = vector.broadcast %147 : vector<4x8x1xf32> to vector<4x8x16xf32>
    %149 = arith.subf %145, %148 : vector<4x8x16xf32>
    %150 = math.exp %149 : vector<4x8x16xf32>
    %cst_71 = arith.constant dense<0.000000e+00> : vector<4x8xf32>
    %151 = vector.multi_reduction <add>, %150, %cst_71 [2] : vector<4x8x16xf32> to vector<4x8xf32>
    %152 = vector.shape_cast %151 : vector<4x8xf32> to vector<4x8x1xf32>
    %153 = tpu.reciprocal %152 {approx = true} : vector<4x8x1xf32> -> vector<4x8x1xf32>
    %154 = vector.broadcast %153 : vector<4x8x1xf32> to vector<4x8x16xf32>
    %155 = arith.mulf %150, %154 : vector<4x8x16xf32>
    %156 = arith.truncf %155 : vector<4x8x16xf32> to vector<4x8x16xbf16>
    "tpu.trace_start"() <{level = 10 : i32, message = "hts,hsd->htd"}> : () -> ()
    %cst_72 = arith.constant dense<0.000000e+00> : vector<4x8x8xf32>
    %157 = tpu.matmul %156, %144, %cst_72 {dimension_numbers = #tpu.dot_dimension_numbers<[2], [1], [1], [2], [0, 0, 0, 1, 1, 2], [0], [0]>} : vector<4x8x16xbf16>, vector<4x16x8xbf16>, vector<4x8x8xf32> -> vector<4x8x8xf32>
    "tpu.trace_stop"() : () -> ()
    %158 = tpu.transpose %157, [1, 0, 2] : vector<4x8x8xf32> -> vector<8x4x8xf32>
    %159 = vector.shape_cast %158 : vector<8x4x8xf32> to vector<8x32xf32>
    %160 = arith.truncf %159 : vector<8x32xf32> to vector<8x32xbf16>
    %cst_73 = arith.constant dense<0.000000e+00> : vector<8x32xf32>
    %161 = tpu.matmul %160, %132, %cst_73 {dimension_numbers = #tpu.dot_dimension_numbers<[1], [0], [0], [1], [0, 0, 1, 1], [], []>} : vector<8x32xbf16>, vector<32x32xbf16>, vector<8x32xf32> -> vector<8x32xf32>
    %162 = vector.broadcast %133 : vector<1x32xf32> to vector<8x32xf32>
    %163 = arith.addf %161, %162 : vector<8x32xf32>
    %164 = arith.addf %89, %163 : vector<8x32xf32>
    %c0_74 = arith.constant 0 : index
    %c0_75 = arith.constant 0 : index
    %165 = vector.load %arg23[%c0_74, %c0_75] : memref<1x32xf32, #tpu.memory_space<vmem>>, vector<1x32xf32>
    %c0_76 = arith.constant 0 : index
    %c0_77 = arith.constant 0 : index
    %166 = vector.load %arg24[%c0_76, %c0_77] : memref<1x32xf32, #tpu.memory_space<vmem>>, vector<1x32xf32>
    %cst_78 = arith.constant dense<0.000000e+00> : vector<8xf32>
    %167 = vector.multi_reduction <add>, %164, %cst_78 [1] : vector<8x32xf32> to vector<8xf32>
    %168 = vector.shape_cast %167 : vector<8xf32> to vector<8x1xf32>
    %cst_79 = arith.constant 3.200000e+01 : f32
    %169 = vector.broadcast %cst_79 : f32 to vector<8x1xf32>
    %170 = arith.divf %168, %169 : vector<8x1xf32>
    %171 = vector.broadcast %170 : vector<8x1xf32> to vector<8x32xf32>
    %172 = arith.subf %164, %171 : vector<8x32xf32>
    %173 = arith.mulf %172, %172 : vector<8x32xf32>
    %cst_80 = arith.constant dense<0.000000e+00> : vector<8xf32>
    %174 = vector.multi_reduction <add>, %173, %cst_80 [1] : vector<8x32xf32> to vector<8xf32>
    %175 = vector.shape_cast %174 : vector<8xf32> to vector<8x1xf32>
    %cst_81 = arith.constant 3.200000e+01 : f32
    %176 = vector.broadcast %cst_81 : f32 to vector<8x1xf32>
    %177 = arith.divf %175, %176 : vector<8x1xf32>
    %178 = vector.broadcast %170 : vector<8x1xf32> to vector<8x32xf32>
    %179 = arith.subf %164, %178 : vector<8x32xf32>
    %cst_82 = arith.constant 9.99999974E-6 : f32
    %180 = vector.broadcast %cst_82 : f32 to vector<8x1xf32>
    %181 = arith.addf %177, %180 : vector<8x1xf32>
    %182 = math.rsqrt %181 : vector<8x1xf32>
    %183 = vector.broadcast %182 : vector<8x1xf32> to vector<8x32xf32>
    %184 = arith.mulf %179, %183 : vector<8x32xf32>
    %185 = vector.broadcast %165 : vector<1x32xf32> to vector<8x32xf32>
    %186 = arith.mulf %184, %185 : vector<8x32xf32>
    %187 = vector.broadcast %166 : vector<1x32xf32> to vector<8x32xf32>
    %188 = arith.addf %186, %187 : vector<8x32xf32>
    %c0_83 = arith.constant 0 : index
    %c0_84 = arith.constant 0 : index
    %189 = vector.load %arg25[%c0_83, %c0_84] : memref<32x128xbf16, #tpu.memory_space<vmem>>, vector<32x128xbf16>
    %190 = arith.truncf %188 : vector<8x32xf32> to vector<8x32xbf16>
    %cst_85 = arith.constant dense<0.000000e+00> : vector<8x128xf32>
    %191 = tpu.matmul %190, %189, %cst_85 {dimension_numbers = #tpu.dot_dimension_numbers<[1], [0], [0], [1], [0, 0, 1, 1], [], []>} : vector<8x32xbf16>, vector<32x128xbf16>, vector<8x128xf32> -> vector<8x128xf32>
    %c0_86 = arith.constant 0 : index
    %c0_87 = arith.constant 0 : index
    %192 = vector.load %arg26[%c0_86, %c0_87] : memref<1x128xf32, #tpu.memory_space<vmem>>, vector<1x128xf32>
    %193 = vector.broadcast %192 : vector<1x128xf32> to vector<8x128xf32>
    %194 = arith.addf %191, %193 : vector<8x128xf32>
    %195 = arith.mulf %194, %194 : vector<8x128xf32>
    %196 = arith.mulf %194, %195 : vector<8x128xf32>
    %cst_88 = arith.constant 4.471500e-02 : f32
    %197 = vector.broadcast %cst_88 : f32 to vector<8x128xf32>
    %198 = arith.mulf %197, %196 : vector<8x128xf32>
    %199 = arith.addf %194, %198 : vector<8x128xf32>
    %cst_89 = arith.constant 0.797884583 : f32
    %200 = vector.broadcast %cst_89 : f32 to vector<8x128xf32>
    %201 = arith.mulf %200, %199 : vector<8x128xf32>
    %202 = math.tanh %201 : vector<8x128xf32>
    %cst_90 = arith.constant 1.000000e+00 : f32
    %203 = vector.broadcast %cst_90 : f32 to vector<8x128xf32>
    %204 = arith.addf %203, %202 : vector<8x128xf32>
    %cst_91 = arith.constant 5.000000e-01 : f32
    %205 = vector.broadcast %cst_91 : f32 to vector<8x128xf32>
    %206 = arith.mulf %205, %204 : vector<8x128xf32>
    %207 = arith.mulf %194, %206 : vector<8x128xf32>
    %c0_92 = arith.constant 0 : index
    %c0_93 = arith.constant 0 : index
    %208 = vector.load %arg27[%c0_92, %c0_93] : memref<128x32xbf16, #tpu.memory_space<vmem>>, vector<128x32xbf16>
    %209 = arith.truncf %207 : vector<8x128xf32> to vector<8x128xbf16>
    %cst_94 = arith.constant dense<0.000000e+00> : vector<8x32xf32>
    %210 = tpu.matmul %209, %208, %cst_94 {dimension_numbers = #tpu.dot_dimension_numbers<[1], [0], [0], [1], [0, 0, 1, 1], [], []>} : vector<8x128xbf16>, vector<128x32xbf16>, vector<8x32xf32> -> vector<8x32xf32>
    %211 = arith.addf %164, %210 : vector<8x32xf32>
    %c0_95 = arith.constant 0 : index
    %c0_96 = arith.constant 0 : index
    %212 = vector.load %arg28[%c0_95, %c0_96] : memref<1x32xf32, #tpu.memory_space<vmem>>, vector<1x32xf32>
    %213 = vector.broadcast %212 : vector<1x32xf32> to vector<8x32xf32>
    %214 = arith.addf %211, %213 : vector<8x32xf32>
    %215 = arith.truncf %214 : vector<8x32xf32> to vector<8x32xbf16>
    %c0_97 = arith.constant 0 : index
    %c0_98 = arith.constant 0 : index
    %c0_99 = arith.constant 0 : index
    %216 = vector.load %arg31[%c0_97, %c0_98, %c0_99] : memref<1x8x32xbf16, #tpu.memory_space<vmem>>, vector<1x8x32xbf16>
    %217 = vector.shape_cast %216 : vector<1x8x32xbf16> to vector<8x32xbf16>
    %218 = vector.shape_cast %215 : vector<8x32xbf16> to vector<1x8x32xbf16>
    tpu.vector_store %arg31[%c0_97, %c0_98, %c0_99], %218 {strides = array<i32>} : memref<1x8x32xbf16, #tpu.memory_space<vmem>>, vector<1x8x32xbf16>,
    return
  }
  func.func @transform_0(%arg0: i32) -> (i32, i32, i32) {
    %c0_i32 = arith.constant 0 : i32
    %c0_i32_0 = arith.constant 0 : i32
    %c0_i32_1 = arith.constant 0 : i32
    return %arg0, %c0_i32, %c0_i32_0 : i32, i32, i32
  }
  func.func @transform_1(%arg0: i32) -> (i32, i32, i32) {
    %c0_i32 = arith.constant 0 : i32
    %c0_i32_0 = arith.constant 0 : i32
    %c0_i32_1 = arith.constant 0 : i32
    return %arg0, %c0_i32, %c0_i32_0 : i32, i32, i32
  }
  func.func @transform_2(%arg0: i32) -> (i32, i32) {
    %c0_i32 = arith.constant 0 : i32
    %c0_i32_0 = arith.constant 0 : i32
    %c0_i32_1 = arith.constant 0 : i32
    return %c0_i32, %c0_i32_0 : i32, i32
  }
  func.func @transform_3(%arg0: i32) -> (i32, i32) {
    %c0_i32 = arith.constant 0 : i32
    %c0_i32_0 = arith.constant 0 : i32
    %c0_i32_1 = arith.constant 0 : i32
    return %c0_i32, %c0_i32_0 : i32, i32
  }
  func.func @transform_4(%arg0: i32) -> (i32, i32) {
    %c0_i32 = arith.constant 0 : i32
    %c0_i32_0 = arith.constant 0 : i32
    %c0_i32_1 = arith.constant 0 : i32
    return %c0_i32, %c0_i32_0 : i32, i32
  }
  func.func @transform_5(%arg0: i32) -> (i32, i32) {
    %c0_i32 = arith.constant 0 : i32
    %c0_i32_0 = arith.constant 0 : i32
    %c0_i32_1 = arith.constant 0 : i32
    return %c0_i32, %c0_i32_0 : i32, i32
  }
  func.func @transform_6(%arg0: i32) -> (i32, i32) {
    %c0_i32 = arith.constant 0 : i32
    %c0_i32_0 = arith.constant 0 : i32
    %c0_i32_1 = arith.constant 0 : i32
    return %c0_i32, %c0_i32_0 : i32, i32
  }
  func.func @transform_7(%arg0: i32) -> (i32, i32) {
    %c0_i32 = arith.constant 0 : i32
    %c0_i32_0 = arith.constant 0 : i32
    %c0_i32_1 = arith.constant 0 : i32
    return %c0_i32, %c0_i32_0 : i32, i32
  }
  func.func @transform_8(%arg0: i32) -> (i32, i32) {
    %c0_i32 = arith.constant 0 : i32
    %c0_i32_0 = arith.constant 0 : i32
    %c0_i32_1 = arith.constant 0 : i32
    return %c0_i32, %c0_i32_0 : i32, i32
  }
  func.func @transform_9(%arg0: i32) -> (i32, i32) {
    %c0_i32 = arith.constant 0 : i32
    %c0_i32_0 = arith.constant 0 : i32
    %c0_i32_1 = arith.constant 0 : i32
    return %c0_i32, %c0_i32_0 : i32, i32
  }
  func.func @transform_10(%arg0: i32) -> (i32, i32) {
    %c0_i32 = arith.constant 0 : i32
    %c0_i32_0 = arith.constant 0 : i32
    %c0_i32_1 = arith.constant 0 : i32
    return %c0_i32, %c0_i32_0 : i32, i32
  }
  func.func @transform_11(%arg0: i32) -> (i32, i32) {
    %c0_i32 = arith.constant 0 : i32
    %c0_i32_0 = arith.constant 0 : i32
    %c0_i32_1 = arith.constant 0 : i32
    return %c0_i32, %c0_i32_0 : i32, i32
  }
  func.func @transform_12(%arg0: i32) -> (i32, i32) {
    %c0_i32 = arith.constant 0 : i32
    %c0_i32_0 = arith.constant 0 : i32
    %c0_i32_1 = arith.constant 0 : i32
    return %c0_i32, %c0_i32_0 : i32, i32
  }
  func.func @transform_13(%arg0: i32) -> (i32, i32) {
    %c0_i32 = arith.constant 0 : i32
    %c0_i32_0 = arith.constant 0 : i32
    %c0_i32_1 = arith.constant 0 : i32
    return %c0_i32, %c0_i32_0 : i32, i32
  }
  func.func @transform_14(%arg0: i32) -> (i32, i32) {
    %c0_i32 = arith.constant 0 : i32
    %c0_i32_0 = arith.constant 0 : i32
    %c0_i32_1 = arith.constant 0 : i32
    return %c0_i32, %c0_i32_0 : i32, i32
  }
  func.func @transform_15(%arg0: i32) -> (i32, i32) {
    %c0_i32 = arith.constant 0 : i32
    %c0_i32_0 = arith.constant 0 : i32
    %c0_i32_1 = arith.constant 0 : i32
    return %c0_i32, %c0_i32_0 : i32, i32
  }
  func.func @transform_16(%arg0: i32) -> (i32, i32) {
    %c0_i32 = arith.constant 0 : i32
    %c0_i32_0 = arith.constant 0 : i32
    %c0_i32_1 = arith.constant 0 : i32
    return %c0_i32, %c0_i32_0 : i32, i32
  }
  func.func @transform_17(%arg0: i32) -> (i32, i32) {
    %c0_i32 = arith.constant 0 : i32
    %c0_i32_0 = arith.constant 0 : i32
    %c0_i32_1 = arith.constant 0 : i32
    return %c0_i32, %c0_i32_0 : i32, i32
  }
  func.func @transform_18(%arg0: i32) -> (i32, i32) {
    %c0_i32 = arith.constant 0 : i32
    %c0_i32_0 = arith.constant 0 : i32
    %c0_i32_1 = arith.constant 0 : i32
    return %c0_i32, %c0_i32_0 : i32, i32
  }
  func.func @transform_19(%arg0: i32) -> (i32, i32) {
    %c0_i32 = arith.constant 0 : i32
    %c0_i32_0 = arith.constant 0 : i32
    %c0_i32_1 = arith.constant 0 : i32
    return %c0_i32, %c0_i32_0 : i32, i32
  }
  func.func @transform_20(%arg0: i32) -> (i32, i32) {
    %c0_i32 = arith.constant 0 : i32
    %c0_i32_0 = arith.constant 0 : i32
    %c0_i32_1 = arith.constant 0 : i32
    return %c0_i32, %c0_i32_0 : i32, i32
  }
  func.func @transform_21(%arg0: i32) -> (i32, i32) {
    %c0_i32 = arith.constant 0 : i32
    %c0_i32_0 = arith.constant 0 : i32
    %c0_i32_1 = arith.constant 0 : i32
    return %c0_i32, %c0_i32_0 : i32, i32
  }
  func.func @transform_22(%arg0: i32) -> (i32, i32) {
    %c0_i32 = arith.constant 0 : i32
    %c0_i32_0 = arith.constant 0 : i32
    %c0_i32_1 = arith.constant 0 : i32
    return %c0_i32, %c0_i32_0 : i32, i32
  }
  func.func @transform_23(%arg0: i32) -> (i32, i32) {
    %c0_i32 = arith.constant 0 : i32
    %c0_i32_0 = arith.constant 0 : i32
    %c0_i32_1 = arith.constant 0 : i32
    return %c0_i32, %c0_i32_0 : i32, i32
  }
  func.func @transform_24(%arg0: i32) -> (i32, i32) {
    %c0_i32 = arith.constant 0 : i32
    %c0_i32_0 = arith.constant 0 : i32
    %c0_i32_1 = arith.constant 0 : i32
    return %c0_i32, %c0_i32_0 : i32, i32
  }
  func.func @transform_25(%arg0: i32) -> (i32, i32) {
    %c0_i32 = arith.constant 0 : i32
    %c0_i32_0 = arith.constant 0 : i32
    %c0_i32_1 = arith.constant 0 : i32
    return %c0_i32, %c0_i32_0 : i32, i32
  }
  func.func @transform_26(%arg0: i32) -> (i32, i32) {
    %c0_i32 = arith.constant 0 : i32
    %c0_i32_0 = arith.constant 0 : i32
    %c0_i32_1 = arith.constant 0 : i32
    return %c0_i32, %c0_i32_0 : i32, i32
  }
  func.func @transform_27(%arg0: i32) -> (i32, i32) {
    %c0_i32 = arith.constant 0 : i32
    %c0_i32_0 = arith.constant 0 : i32
    %c0_i32_1 = arith.constant 0 : i32
    return %c0_i32, %c0_i32_0 : i32, i32
  }
  func.func @transform_28(%arg0: i32) -> (i32, i32) {
    %c0_i32 = arith.constant 0 : i32
    %c0_i32_0 = arith.constant 0 : i32
    %c0_i32_1 = arith.constant 0 : i32
    return %c0_i32, %c0_i32_0 : i32, i32
  }
  func.func @transform_29(%arg0: i32) -> (i32, i32) {
    %c0_i32 = arith.constant 0 : i32
    %c0_i32_0 = arith.constant 0 : i32
    %c0_i32_1 = arith.constant 0 : i32
    return %c0_i32, %c0_i32_0 : i32, i32
  }
  func.func @transform_30(%arg0: i32) -> (i32, i32, i32) {
    %c0_i32 = arith.constant 0 : i32
    %c0_i32_0 = arith.constant 0 : i32
    %c0_i32_1 = arith.constant 0 : i32
    return %arg0, %c0_i32, %c0_i32_0 : i32, i32, i32
  }
}

module attributes {stable_mosaic.version = 11 : i64} {
  func.func @_lm_head_kernel(%arg0: i32, %arg1: i32, %arg2: memref<16x32xbf16, #tpu.memory_space<vmem>>, %arg3: memref<32x128xbf16, #tpu.memory_space<vmem>>, %arg4: memref<1x128xf32, #tpu.memory_space<vmem>>, %arg5: memref<16x128xf32, #tpu.memory_space<vmem>>) attributes {dimension_semantics = [#tpu.dimension_semantics<parallel>, #tpu.dimension_semantics<parallel>], iteration_bounds = array<i64: 1, 1>, scalar_prefetch = 0 : i64, scratch_operands = 0 : i64, tpu.core_type = #tpu.core_type<tc>, window_params = [{transform_indices = @transform_0, window_bounds = array<i64: 16, 32>}, {transform_indices = @transform_1, window_bounds = array<i64: 32, 128>}, {transform_indices = @transform_2, window_bounds = array<i64: 1, 128>}, {transform_indices = @transform_3, window_bounds = array<i64: 16, 128>}]} {
    %c0 = arith.constant 0 : index
    %c0_0 = arith.constant 0 : index
    %0 = vector.load %arg2[%c0, %c0_0] : memref<16x32xbf16, #tpu.memory_space<vmem>>, vector<16x32xbf16>
    %c0_1 = arith.constant 0 : index
    %c0_2 = arith.constant 0 : index
    %1 = vector.load %arg3[%c0_1, %c0_2] : memref<32x128xbf16, #tpu.memory_space<vmem>>, vector<32x128xbf16>
    %cst = arith.constant dense<0.000000e+00> : vector<16x128xf32>
    %2 = tpu.matmul %0, %1, %cst {dimension_numbers = #tpu.dot_dimension_numbers<[1], [0], [0], [1], [0, 0, 1, 1], [], []>} : vector<16x32xbf16>, vector<32x128xbf16>, vector<16x128xf32> -> vector<16x128xf32>
    %c0_3 = arith.constant 0 : index
    %c0_4 = arith.constant 0 : index
    %3 = vector.load %arg4[%c0_3, %c0_4] : memref<1x128xf32, #tpu.memory_space<vmem>>, vector<1x128xf32>
    %4 = vector.broadcast %3 : vector<1x128xf32> to vector<16x128xf32>
    %5 = arith.addf %2, %4 : vector<16x128xf32>
    %c0_5 = arith.constant 0 : index
    %c0_6 = arith.constant 0 : index
    %6 = vector.load %arg5[%c0_5, %c0_6] : memref<16x128xf32, #tpu.memory_space<vmem>>, vector<16x128xf32>
    tpu.vector_store %arg5[%c0_5, %c0_6], %5 {strides = array<i32>} : memref<16x128xf32, #tpu.memory_space<vmem>>, vector<16x128xf32>,
    return
  }
  func.func @transform_0(%arg0: i32, %arg1: i32) -> (i32, i32) {
    %c0_i32 = arith.constant 0 : i32
    %c0_i32_0 = arith.constant 0 : i32
    return %arg0, %c0_i32 : i32, i32
  }
  func.func @transform_1(%arg0: i32, %arg1: i32) -> (i32, i32) {
    %c0_i32 = arith.constant 0 : i32
    %c0_i32_0 = arith.constant 0 : i32
    return %c0_i32, %arg1 : i32, i32
  }
  func.func @transform_2(%arg0: i32, %arg1: i32) -> (i32, i32) {
    %c0_i32 = arith.constant 0 : i32
    %c0_i32_0 = arith.constant 0 : i32
    return %c0_i32, %arg1 : i32, i32
  }
  func.func @transform_3(%arg0: i32, %arg1: i32) -> (i32, i32) {
    %c0_i32 = arith.constant 0 : i32
    return %arg0, %arg1 : i32, i32
  }
}

</mosaic_0001>

<bundles_post_ra>
// kernel: image_to_text_forward.6
= control target key start
LH: loop header
LB: loop body
LE: loop exit
PB: predicated region body
PF: predicated region fallthrough
CT: control target
= control target key end

     0   :  { %s432_s15 = smov 0   ;;  %s467_s0 = inlined_call_operand.vmem [shape: f32[2,16,48], index: 0, kind: input, shape index: {}]   ;;  %s468_s1 = inlined_call_operand.vmem [shape: bf16[48,32], index: 1, kind: input, shape index: {}]   ;;  %s469_s2 = inlined_call_operand.vmem [shape: f32[1,32], index: 2, kind: input, shape index: {}]   ;;  %s470_s3 = inlined_call_operand.vmem [shape: f32[16,32], index: 3, kind: input, shape index: {}]   ;;  %s471_s4 = inlined_call_operand.vmem [shape: bf16[2,16,32], index: 4, kind: output, shape index: {}]  }
   0x1 LB: > { %s348_s16 = sadd.s32 4294967295, %s403_s15   ;;  %p352_p0 = scmp.ge.s32.totalorder %s403_s15, 1  ;;  %s403_s15 = sphi %s432_s15, %s14_s15  }
   0x2   : > { %p162_p1 = scmp.lt.s32.totalorder %s403_s15, 3 }
   0x4   : > { %p163_p2 = pnand %p352_p0, %p162_p1 }
   0x5   : > { %v394_v0 = vld [vmem:[%s468_s1] sm:$0xff] (!%p163_p2)   ;;  %v405_v1 = vmov (!%p163_p2), 0.0   ;;  %v395_v2 = vld [vmem:[%s468_s1 + $0x8] sm:$0xff] (!%p163_p2)   ;;  %vm406_vm0 = vmmov (!%p163_p2), 0   ;;  %p188_p3 = scmp.lt.s32.totalorder (!%p163_p2), %s348_s16, 1  ;;  %v396_v3 = vld [vmem:[%s468_s1 + $0x10] sm:$0xff] (!%p163_p2)  }
   0x6   : > { %166 = sbr.rel (%p163_p2) target bundleno = 240 (0xf0), region = 36  ;;  %374 = vmatprep.subr.bf16.mxu0 (!%p163_p2), %v405_v1  ;;  %380 = vmatprep.mubr.msk.bf16.mxu0 (!%p163_p2), %vm406_vm0, %v405_v1  ;;  %vm233_vm1 = vcmask (!%p163_p2), 392192   ;;  %v357_v7 = vld [vmem:[%s469_s2] ss:$0 sm:$0xff] (!%p163_p2)  ;;  %v279_v13 = vld [vmem:[%s470_s3 + $0x8] sm:$0xff] (!%p163_p2)  ;;  %vm290_vm2 = vcmask (!%p163_p2), 257024  }
   0x7   : > { %375 = vmatpush3.bf16.msra.mxu0 (!%p163_p2), %v394_v0  ;;  %v278_v9 = vld [vmem:[%s470_s3] sm:$0xff] (!%p163_p2) }
   0x8   : > { %376 = vmatprep.subr.bf16.mxu0 (!%p163_p2), %v405_v1 }
   0xb   : > { %377 = vmatpush3.bf16.msra.mxu0 (!%p163_p2), %v395_v2 }
   0xc   : > { %378 = vmatprep.subr.bf16.mxu0 (!%p163_p2), %v405_v1 }
   0xd   : > { %s473_s16 = smov (!%p188_p3, %s348_s16), 1 }
   0xe   : > { %s366_s23 = sshll.u32 %s473_s16, 4  ;;  %s367_s5 = sshll.u32 %s473_s16, 3 }
   0xf   : > { %s192_s26 = scalar_lea.vmem %s467_s0, %s366_s23  ;;  %379 = vmatpush3.bf16.msra.mxu0 %v396_v3  ;;  %s197_s10 = scalar_lea.vmem %s471_s4, %s367_s5 }
  0x10   : > { %v199_v4 = vld [vmem:[%s192_s26] sm:$0xff]  ;;  %v200_v5 = vld [vmem:[%s192_s26 + $0x8] sm:$0xff] }
  0x11   : > { %v207_v6 = vpack.c.bf16 %v200_v5, %v199_v4 }
  0x13   : > { %381 = vmatmul.mubr.msk.bf16.vlgmr.msra.gmra.mrb[0].mxu0 %vm233_vm1, %v207_v6 }
  0xe6   : > { %v271_v8 = vpop.f32.mrb[0].mxu0 }
  0xe7   : > { %v272_v10 = vadd.f32 %v357_v7, %v271_v8  ;;  %v382_v11 = vpop.f32.mrb[1].mxu0 }
  0xe8   : > { %v274_v12 = vpop.f32.mrb[2].mxu0 }
  0xe9   : > { %v280_v14 = vadd.f32 %v278_v9, %v272_v10  ;;  %v275_v15 = vadd.f32 %v357_v7, %v274_v12  ;;  %v383_v16 = vpop.f32.mrb[3].mxu0 }
  0xeb   : > { %v368_v17 = vpack.c.bf16 %v280_v14, %v280_v14  ;;  %v281_v18 = vadd.f32 %v279_v13, %v275_v15 }
  0xed   : > { %291 = vst.msk [vmem:[%s197_s10] sm:$0xf] %vm290_vm2, %v368_v17  ;;  %v369_v19 = vpack.c.bf16 %v281_v18, %v281_v18 }
  0xef   : > { %292 = vst.msk [vmem:[%s197_s10 + $0x4] sm:$0xf] %vm290_vm2, %v369_v19 }
  0xf0 PF: > { %s14_s15 = sadd.s32 1, %s403_s15  }
  0xf1   : > { %p11_p4 = scmp.ge.s32.totalorder %s14_s15, 4  }
  0xf3   :  { %13 = sbr.rel (!%p11_p4) target bundleno = 1 (0x1), region = 66 }

// kernel: image_to_text_forward.8
= control target key start
LH: loop header
LB: loop body
LE: loop exit
PB: predicated region body
PF: predicated region fallthrough
CT: control target
= control target key end

     0   :  { %s3877_s0 = inlined_call_operand.vmem [shape: bf16[2,16,32], index: 0, kind: input, shape index: {}]   ;;  %s3878_s1 = inlined_call_operand.vmem [shape: f32[1,32], index: 1, kind: input, shape index: {}]   ;;  %s3879_s2 = inlined_call_operand.vmem [shape: f32[1,32], index: 2, kind: input, shape index: {}]   ;;  %s3880_s3 = inlined_call_operand.vmem [shape: bf16[32,32], index: 3, kind: input, shape index: {}]   ;;  %s3881_s4 = inlined_call_operand.vmem [shape: f32[1,32], index: 4, kind: input, shape index: {}]   ;;  %s3882_s5 = inlined_call_operand.vmem [shape: bf16[32,32], index: 5, kind: input, shape index: {}]   ;;  %s3883_s6 = inlined_call_operand.vmem [shape: f32[1,32], index: 6, kind: input, shape index: {}]   ;;  %s3884_s7 = inlined_call_operand.vmem [shape: bf16[32,32], index: 7, kind: input, shape index: {}]   ;;  %s3885_s8 = inlined_call_operand.vmem [shape: f32[1,32], index: 8, kind: input, shape index: {}]   ;;  %s3886_s9 = inlined_call_operand.vmem [shape: bf16[32,32], index: 9, kind: input, shape index: {}]   ;;  %s3887_s10 = inlined_call_operand.vmem [shape: f32[1,32], index: 10, kind: input, shape index: {}]   ;;  %s3888_s11 = inlined_call_operand.vmem [shape: f32[1,32], index: 11, kind: input, shape index: {}]   ;;  %s3889_s12 = inlined_call_operand.vmem [shape: f32[1,32], index: 12, kind: input, shape index: {}]   ;;  %s3890_s13 = inlined_call_operand.vmem [shape: bf16[32,128], index: 13, kind: input, shape index: {}]   ;;  %s3891_s14 = inlined_call_operand.vmem [shape: f32[1,128], index: 14, kind: input, shape index: {}]   ;;  %s3892_s15 = inlined_call_operand.vmem [shape: bf16[128,32], index: 15, kind: input, shape index: {}]   ;;  %s3893_s16 = inlined_call_operand.vmem [shape: f32[1,32], index: 16, kind: input, shape index: {}]   ;;  %s3894_s17 = inlined_call_operand.vmem [shape: f32[1,32], index: 17, kind: input, shape index: {}]   ;;  %s3895_s18 = inlined_call_operand.vmem [shape: f32[1,32], index: 18, kind: input, shape index: {}]   ;;  %s3896_s19 = inlined_call_operand.vmem [shape: bf16[2,16,32], index: 19, kind: output, shape index: {}]  }
   0x1   :  { %3898 = sst [smem:[#allocation2_spill]] %s3877_s0  ;;  %s3373_s0 = smov 0  }
   0x2   :  { %3899 = sst [smem:[#allocation3_spill]] %s3878_s1 }
   0x3   :  { %3900 = sst [smem:[#allocation4_spill]] %s3879_s2 }
   0x4   :  { %3901 = sst [smem:[#allocation5_spill]] %s3880_s3 }
   0x5 LB: > { %s2928_s30 = sadd.s32 4294967295, %s3261_s0   ;;  %p2932_p0 = scmp.ge.s32.totalorder %s3261_s0, 1  ;;  %s3261_s0 = sphi %s3373_s0, %s29_s0  }
   0x6   : > { %p537_p1 = scmp.lt.s32.totalorder %s3261_s0, 3 }
   0x8   : > { %p538_p2 = pnand %p2932_p0, %p537_p1 }
   0x9   : > { %p593_p3 = scmp.lt.s32.totalorder (!%p538_p2), %s2928_s30, 1  ;;  %s3902_s22 = sld [smem:[#allocation2_spill]] (!%p538_p2)  ;;  %vm610_vm0 = vcmask (!%p538_p2), 261120   ;;  %v3263_v16 = vmov (!%p538_p2), 0.0   ;;  %vm3264_vm1 = vmmov (!%p538_p2), 0   ;;  %v3191_v34 = vld [vmem:[%s3882_s5] sm:$0xff] (!%p538_p2)   ;;  %v882_v61 = vlaneseq (!%p538_p2) }
   0xa   : > { %541 = sbr.rel (%p538_p2) target bundleno = 2987 (0xbab), region = 96  ;;  %s3903_s25 = sld [smem:[#allocation5_spill]] (!%p538_p2)  ;;  %3048 = vmatprep.subr.bf16.mxu0 (!%p538_p2), %v3263_v16  ;;  %3072 = vmatprep.subr.bf16.mxu1 (!%p538_p2), %v3263_v16  ;;  %v3192_v36 = vld [vmem:[%s3882_s5 + $0x8] sm:$0xff] (!%p538_p2)   ;;  %v3193_v37 = vld [vmem:[%s3884_s7] sm:$0xff] (!%p538_p2)   ;;  %v3268_v59 = vmov (!%p538_p2), 1983009808  }
   0xb   : > { %3052 = vmatprep.mubr.msk.bf16.mxu0 (!%p538_p2), %vm3264_vm1, %v3263_v16  ;;  %3074 = vmatprep.mubr.msk.bf16.mxu1 (!%p538_p2), %vm3264_vm1, %v3263_v16  ;;  %s3904_s29 = sld [smem:[#allocation3_spill]] (!%p538_p2)  ;;  %v3194_v38 = vld [vmem:[%s3884_s7 + $0x8] sm:$0xff] (!%p538_p2)   ;;  %v2939_v39 = vld [vmem:[%s3881_s4] ss:$0 sm:$0xff] (!%p538_p2)  ;;  %s3266_s24 = smov (!%p538_p2), 112   ;;  %v880_v60 = vunpack.c.l.s4 (!%p538_p2), %v3268_v59  ;;  %vm1745_vm2 = vcmask (!%p538_p2), 64512  }
   0xc   : > { %v2943_v48 = vld [vmem:[%s3883_s6] ss:$0 sm:$0xff] (!%p538_p2)  ;;  %s3267_s3 = smov (!%p538_p2), 104   ;;  %vm1934_vm3 = vcmask (!%p538_p2), 130048   ;;  %s3272_s23 = smov (!%p538_p2), 24   ;;  %vm2503_vm4 = vcmask (!%p538_p2), 195584  }
   0xd   : > { %vm2870_vm5 = vcmask (!%p538_p2), 257024  }
  0x10   : > { %v3189_v15 = vld [vmem:[%s3903_s25] sm:$0xff] (!%p538_p2)   ;;  %v3190_v17 = vld [vmem:[%s3903_s25 + $0x8] sm:$0xff] (!%p538_p2)  }
  0x11   : > { %s3907_s30 = smov (!%p593_p3, %s2928_s30), 1  ;;  %3049 = vmatpush3.bf16.msra.mxu0 %v3189_v15  ;;  %v2937_v26 = vld [vmem:[%s3904_s29] ss:$0 sm:$0xff] }
  0x12   : > { %s3000_s20 = sshll.u32 %s3907_s30, 3  ;;  %3050 = vmatprep.subr.bf16.mxu0 %v3263_v16 }
  0x13   : > { %s597_s2 = scalar_lea.vmem %s3902_s22, %s3000_s20  ;;  %s3905_s22 = sld [smem:[#allocation4_spill]] }
  0x14   : > { %v3005_v0 = vld [vmem:[%s597_s2] sm:$0xff]   ;;  %s3271_s2 = smov 8   ;;  %s602_s27 = scalar_lea.vmem %s3896_s19, %s3000_s20 }
  0x15   : > { %v3389_v1 = vunpack.c.l.bf16 %v3005_v0  ;;  %v3391_v2 = vunpack.c.h.bf16 %v3005_v0  ;;  %3051 = vmatpush3.bf16.msra.mxu0 %v3190_v17  ;;  %v3269_v0 = vmov 1934713408  }
  0x16   : > { %3056 = vmatprep.subr.bf16.mxu0 %v3263_v16 }
  0x17   : > { %v611_v3 = vsel %vm610_vm0, %v3389_v1, 0.0  ;;  %v614_v4 = vsel %vm610_vm0, %v3391_v2, 0.0 }
  0x18   : > { %612 = vadd.xlane.f32.xlu0 %v611_v3  ;;  %v912_v3 = vunpack.c.l.s4 %v3269_v0 }
  0x19   : > { %v2938_v30 = vld [vmem:[%s3905_s22] ss:$0 sm:$0xff]  ;;  %s3265_s22 = smov 120  }
  0x1c   : > { %615 = vadd.xlane.f32.xlu0 %v614_v4  ;;  %v881_v4 = vunpack.c.0.s8 %v880_v60 }
  0xa5   : > { %v613_v5 = vpop.xlane.xlu0 %612 }
  0xa6   : > { %v618_v6 = vmul.f32 0.03125, %v613_v5  ;;  %v883_v5 = vshrl.u32 %v882_v61, 7 }
  0xa8   : > { %v620_v7 = vsub.f32 %v3389_v1, %v618_v6 }
  0xa9   : > { %v616_v8 = vpop.xlane.xlu0 %615 }
  0xaa   : > { %v619_v9 = vmul.f32 0.03125, %v616_v8  ;;  %v622_v10 = vmul.f32 %v620_v7, %v620_v7  ;;  %v913_v8 = vunpack.c.0.s8 %v912_v3 }
  0xac   : > { %v621_v11 = vsub.f32 %v3391_v2, %v619_v9  ;;  %v624_v12 = vsel %vm610_vm0, %v622_v10, 0.0  ;;  %v3485_v9 = vsub.s32 %v881_v4, %v883_v5  ;;  %v3487_v17 = vsub.s32 %v913_v8, %v883_v5 }
  0xad   : > { %625 = vadd.xlane.f32.xlu1 %v624_v12 }
  0xae   : > { %v623_v13 = vmul.f32 %v621_v11, %v621_v11 }
  0xb0   : > { %v627_v14 = vsel %vm610_vm0, %v623_v13, 0.0 }
  0xb1   : > { %628 = vadd.xlane.f32.xlu1 %v627_v14 }
 0x13a   : > { %v626_v18 = vpop.xlane.xlu1 %625 }
 0x13b   : > { %v630_v19 = vmul.f32 0.03125, %v626_v18 }
 0x13d   : > { %v632_v20 = vadd.f32 1e-05, %v630_v19 }
 0x13e   : > { %v629_v21 = vpop.xlane.xlu1 %628 }
 0x13f   : > { %3207 = vrsqrt.f32 %v632_v20  ;;  %v631_v22 = vmul.f32 0.03125, %v629_v21 }
 0x141   : > { %v633_v23 = vadd.f32 1e-05, %v631_v22 }
 0x143   : > { %3209 = vrsqrt.f32 %v633_v23 }
 0x149   : > { %v3208_v24 = vpop.eup %3207 }
 0x14a   : > { %v636_v25 = vmul.f32 %v3208_v24, %v620_v7 }
 0x14c   : > { %v644_v29 = vmul.f32 %v2937_v26, %v636_v25 }
 0x14d   : > { %v3210_v27 = vpop.eup %3209 }
 0x14e   : > { %v637_v28 = vmul.f32 %v3210_v27, %v621_v11  ;;  %v652_v32 = vadd.f32 %v2938_v30, %v644_v29 }
 0x150   : > { %v645_v31 = vmul.f32 %v2937_v26, %v637_v28 }
 0x152   : > { %v653_v33 = vadd.f32 %v2938_v30, %v645_v31 }
 0x154   : > { %v658_v35 = vpack.c.bf16 %v653_v33, %v652_v32 }
 0x156   : > { %3053 = vmatmul.mubr.msk.bf16.vlgmr.msra.gmra.mrb[0].mxu0 %vm610_vm0, %v658_v35 }
 0x157   : > { %3057 = vmatpush3.bf16.msra.mxu0 %v3191_v34  ;;  %3060 = vmatprep.mubr.msk.bf16.mxu0 %vm3264_vm1, %v3263_v16 }
 0x158   : > { %3058 = vmatprep.subr.bf16.mxu0 %v3263_v16 }
 0x15b   : > { %3059 = vmatpush3.bf16.msra.mxu0 %v3192_v36 }
 0x15c   : > { %3064 = vmatprep.subr.bf16.mxu0 %v3263_v16 }
 0x15e   : > { %3061 = vmatmul.mubr.msk.bf16.vlgmr.msra.gmra.mrb[4].mxu0 %vm610_vm0, %v658_v35 }
 0x15f   : > { %3065 = vmatpush3.bf16.msra.mxu0 %v3193_v37  ;;  %3068 = vmatprep.mubr.msk.bf16.mxu0 %vm3264_vm1, %v3263_v16 }
 0x160   : > { %3066 = vmatprep.subr.bf16.mxu0 %v3263_v16 }
 0x163   : > { %3067 = vmatpush3.bf16.msra.mxu0 %v3194_v38 }
 0x164   : > { %3078 = vmatprep.subr.bf16.mxu0 %v3263_v16 }
 0x166   : > { %3069 = vmatmul.mubr.msk.bf16.vlgmr.msra.gmra.mrb[8].mxu0 %vm610_vm0, %v658_v35 }
 0x167   : > { %3080 = vmatprep.mubr.msk.bf16.mxu0 %vm3264_vm1, %v3263_v16 }
 0x229   : > { %v715_v40 = vpop.f32.mrb[0].mxu0 }
 0x22a   : > { %v716_v41 = vadd.f32 %v2939_v39, %v715_v40  ;;  %v3054_v42 = vpop.f32.mrb[1].mxu0 }
 0x22b   : > { %v718_v43 = vpop.f32.mrb[2].mxu0 }
 0x22c   : > { %v3449_v44 = vmul.f32 0.35355338, %v716_v41  ;;  %v719_v45 = vadd.f32 %v2939_v39, %v718_v43  ;;  %v3055_v46 = vpop.f32.mrb[3].mxu0 }
 0x22e   : > { %v3451_v47 = vmul.f32 0.35355338, %v719_v45  ;;  %859 = vrot.lane.b32.xlu0 %v3449_v44, %s3265_s22 }
 0x230   : > { %861 = vrot.lane.b32.xlu1 %v3451_v47, %s3265_s22 }
 0x231   : > { %v779_v49 = vpop.f32.mrb[4].mxu0 }
 0x232   : > { %v780_v50 = vadd.f32 %v2943_v48, %v779_v49  ;;  %v3062_v51 = vpop.f32.mrb[5].mxu0 }
 0x233   : > { %v782_v52 = vpop.f32.mrb[6].mxu0 }
 0x234   : > { %1161 = vrot.lane.b32.xlu1 %v780_v50, %s3266_s24  ;;  %1155 = vrot.lane.b32.xlu0 %v780_v50, %s3265_s22  ;;  %v3063_v53 = vpop.f32.mrb[7].mxu0  ;;  %v3462_v54 = vadd.f32 %v2943_v48, %v782_v52 }
 0x238   : > { %1167 = vrot.lane.b32.xlu0 %v780_v50, %s3267_s3  ;;  %1157 = vrot.lane.b32.xlu1 %v3462_v54, %s3265_s22 }
 0x239   : > { %v3467_v55 = vpop.f32.mrb[8].mxu0 }
 0x23a   : > { %v3070_v56 = vpop.f32.mrb[9].mxu0 }
 0x23b   : > { %v3469_v57 = vpop.f32.mrb[10].mxu0 }
 0x23c   : > { %865 = vrot.lane.b32.xlu0 %v3449_v44, %s3266_s24  ;;  %1163 = vrot.lane.b32.xlu1 %v3462_v54, %s3266_s24  ;;  %v3071_v58 = vpop.f32.mrb[11].mxu0 }
 0x240   : > { %871 = vrot.lane.b32.xlu0 %v3449_v44, %s3267_s3  ;;  %1169 = vrot.lane.b32.xlu1 %v3462_v54, %s3267_s3 }
 0x244   : > { %867 = vrot.lane.b32.xlu1 %v3451_v47, %s3266_s24 }
 0x248   : > { %873 = vrot.lane.b32.xlu1 %v3451_v47, %s3267_s3 }
 0x2a0   : > { %v860_v62 = vpop.permute.xlu0 %859 }
 0x2a2   : > { %v3483_v63 = vpop.permute.xlu1 %861 }
 0x2a6   : > { %v1162_v6 = vpop.permute.xlu1 %1161  ;;  %v1156_v7 = vpop.permute.xlu0 %1155 }
 0x2a7   : > { %v1173_v10 = vcombine.low %v780_v50, %v1162_v6  ;;  %v1174_v11 = vcombine.high %v780_v50, %v1162_v6 }
 0x2a9   : > { %v1181_v18 = vrot.slane %v1173_v10, %v3485_v9  ;;  %v1188_v19 = vrot.slane %v1174_v11, %v3485_v9 }
 0x2aa   : > { %v1168_v12 = vpop.permute.xlu0 %1167  ;;  %v1158_v13 = vpop.permute.xlu1 %1157 }
 0x2ab   : > { %v1189_v14 = vcombine.low %v1156_v7, %v1168_v12  ;;  %v1190_v15 = vcombine.high %v1156_v7, %v1168_v12 }
 0x2ad   : > { %v1197_v20 = vrot.slane %v1189_v14, %v3485_v9  ;;  %v1204_v21 = vrot.slane %v1190_v15, %v3485_v9 }
 0x2ae   : > { %v866_v22 = vpop.permute.xlu0 %865  ;;  %v1164_v23 = vpop.permute.xlu1 %1163 }
 0x2af   : > { %v1205_v24 = vcombine.low %v1181_v18, %v1197_v20  ;;  %v1206_v25 = vcombine.high %v1181_v18, %v1197_v20  ;;  %v1221_v26 = vcombine.low %v1188_v19, %v1204_v21  ;;  %v1222_v27 = vcombine.high %v1188_v19, %v1204_v21 }
 0x2b0   : > { %v877_v28 = vcombine.low %v3449_v44, %v866_v22  ;;  %v878_v29 = vcombine.high %v3449_v44, %v866_v22  ;;  %v1241_v30 = vcombine.low %v3462_v54, %v1164_v23  ;;  %v1242_v31 = vcombine.high %v3462_v54, %v1164_v23 }
 0x2b1   : > { %v1213_v32 = vrot.slane %v1205_v24, %v3487_v17  ;;  %v1220_v33 = vrot.slane %v1206_v25, %v3487_v17  ;;  %v1229_v34 = vrot.slane %v1221_v26, %v3487_v17  ;;  %v1236_v35 = vrot.slane %v1222_v27, %v3487_v17 }
 0x2b2   : > { %v872_v36 = vpop.permute.xlu0 %871  ;;  %v1170_v37 = vpop.permute.xlu1 %1169  ;;  %v885_v46 = vrot.slane %v877_v28, %v3485_v9  ;;  %v892_v48 = vrot.slane %v878_v29, %v3485_v9  ;;  %v1249_v49 = vrot.slane %v1241_v30, %v3485_v9  ;;  %v1256_v50 = vrot.slane %v1242_v31, %v3485_v9 }
 0x2b3   : > { %v1309_v38 = vcombine.low %v1213_v32, %v1220_v33  ;;  %v2955_v39 = vcombine.high %v1213_v32, %v1220_v33  ;;  %v1325_v40 = vcombine.low %v1229_v34, %v1236_v35  ;;  %v2956_v41 = vcombine.high %v1229_v34, %v1236_v35 }
 0x2b4   : > { %v893_v42 = vcombine.low %v860_v62, %v872_v36  ;;  %v894_v43 = vcombine.high %v860_v62, %v872_v36  ;;  %v1257_v44 = vcombine.low %v1158_v13, %v1170_v37  ;;  %v1258_v45 = vcombine.high %v1158_v13, %v1170_v37 }
 0x2b5   : > { %v3510_v58 = vrot.slane %v1309_v38, %v3485_v9  ;;  %v3513_v59 = vrot.slane %v2955_v39, %v3485_v9  ;;  %v3516_v60 = vrot.slane %v1325_v40, %v3485_v9  ;;  %v3519_v61 = vrot.slane %v2956_v41, %v3485_v9 }
 0x2b6   : > { %v901_v51 = vrot.slane %v893_v42, %v3485_v9  ;;  %v908_v52 = vrot.slane %v894_v43, %v3485_v9  ;;  %v1265_v53 = vrot.slane %v1257_v44, %v3485_v9  ;;  %v1272_v54 = vrot.slane %v1258_v45, %v3485_v9  ;;  %v868_v56 = vpop.permute.xlu1 %867 }
 0x2b7   : > { %v945_v21 = vcombine.low %v3451_v47, %v868_v56  ;;  %v946_v22 = vcombine.high %v3451_v47, %v868_v56  ;;  %v1341_v28 = vcombine.low %v3510_v58, %v3513_v59  ;;  %v1357_v29 = vcombine.low %v3516_v60, %v3519_v61 }
 0x2b8   : > { %v909_v62 = vcombine.low %v885_v46, %v901_v51  ;;  %v910_v0 = vcombine.high %v885_v46, %v901_v51  ;;  %v925_v3 = vcombine.low %v892_v48, %v908_v52  ;;  %v926_v4 = vcombine.high %v892_v48, %v908_v52 }
 0x2b9   : > { %v1273_v5 = vcombine.low %v1249_v49, %v1265_v53  ;;  %v1274_v6 = vcombine.high %v1249_v49, %v1265_v53  ;;  %v1289_v7 = vcombine.low %v1256_v50, %v1272_v54  ;;  %v1290_v8 = vcombine.high %v1256_v50, %v1272_v54 }
 0x2ba   : > { %v917_v10 = vrot.slane %v909_v62, %v3487_v17  ;;  %v924_v11 = vrot.slane %v910_v0, %v3487_v17  ;;  %v933_v12 = vrot.slane %v925_v3, %v3487_v17  ;;  %v940_v13 = vrot.slane %v926_v4, %v3487_v17  ;;  %v874_v23 = vpop.permute.xlu1 %873 }
 0x2bb   : > { %v1281_v14 = vrot.slane %v1273_v5, %v3487_v17  ;;  %v1288_v15 = vrot.slane %v1274_v6, %v3487_v17  ;;  %v1297_v18 = vrot.slane %v1289_v7, %v3487_v17  ;;  %v1304_v19 = vrot.slane %v1290_v8, %v3487_v17 }
 0x2bc   : > { %v1013_v20 = vcombine.low %v917_v10, %v924_v11  ;;  %v2951_v26 = vcombine.high %v917_v10, %v924_v11  ;;  %v1029_v30 = vcombine.low %v933_v12, %v940_v13  ;;  %v2952_v31 = vcombine.high %v933_v12, %v940_v13 }
 0x2bd   : > { %v1377_v24 = vcombine.low %v1281_v14, %v1288_v15  ;;  %v2957_v25 = vcombine.high %v1281_v14, %v1288_v15  ;;  %v1393_v27 = vcombine.low %v1297_v18, %v1304_v19  ;;  %v961_v32 = vcombine.low %v3483_v63, %v874_v23 }
 0x2be   : > { %v962_v33 = vcombine.high %v3483_v63, %v874_v23  ;;  %v3538_v34 = vrot.slane %v1013_v20, %v3485_v9  ;;  %v2958_v47 = vcombine.high %v1297_v18, %v1304_v19  ;;  %v953_v35 = vrot.slane %v945_v21, %v3485_v9 }
 0x2bf   : > { %v960_v36 = vrot.slane %v946_v22, %v3485_v9  ;;  %v969_v37 = vrot.slane %v961_v32, %v3485_v9  ;;  %v1384_v39 = vrot.slane %v1377_v24, %v3485_v9  ;;  %v1392_v40 = vrot.slane %v2957_v25, %v3485_v9 }
 0x2c0   : > { %v976_v38 = vrot.slane %v962_v33, %v3485_v9  ;;  %v3547_v41 = vrot.slane %v2951_v26, %v3485_v9  ;;  %v1349_v63 = vrot.slane %v1341_v28, %v3487_v17  ;;  %v1365_v42 = vrot.slane %v1357_v29, %v3487_v17 }
 0x2c1   : > { %v1400_v43 = vrot.slane %v1393_v27, %v3485_v9  ;;  %v977_v44 = vcombine.low %v953_v35, %v969_v37  ;;  %v978_v45 = vcombine.high %v953_v35, %v969_v37  ;;  %v3553_v49 = vrot.slane %v1029_v30, %v3485_v9 }
 0x2c2   : > { %v993_v46 = vcombine.low %v960_v36, %v976_v38  ;;  %v994_v48 = vcombine.high %v960_v36, %v976_v38  ;;  %v3556_v50 = vrot.slane %v2952_v31, %v3485_v9  ;;  %v1408_v51 = vrot.slane %v2958_v47, %v3485_v9 }
 0x2c3   : > { %v1409_v52 = vcombine.low %v1384_v39, %v1392_v40  ;;  %v985_v53 = vrot.slane %v977_v44, %v3487_v17  ;;  %v992_v54 = vrot.slane %v978_v45, %v3487_v17  ;;  %v1373_v0 = vcombine.low %v1349_v63, %v1365_v42 }
 0x2c4   : > { %v1001_v56 = vrot.slane %v993_v46, %v3487_v17  ;;  %v1008_v62 = vrot.slane %v994_v48, %v3487_v17  ;;  %v1425_v4 = vcombine.low %v1400_v43, %v1408_v51  ;;  %v1045_v11 = vcombine.low %v3538_v34, %v3547_v41 }
 0x2c5   : > { %v1417_v3 = vrot.slane %v1409_v52, %v3487_v17  ;;  %v1081_v5 = vcombine.low %v985_v53, %v992_v54  ;;  %v2953_v6 = vcombine.high %v985_v53, %v992_v54  ;;  %v1061_v12 = vcombine.low %v3553_v49, %v3556_v50 }
 0x2c6   : > { %v1097_v7 = vcombine.low %v1001_v56, %v1008_v62  ;;  %v2954_v8 = vcombine.high %v1001_v56, %v1008_v62  ;;  %v1433_v10 = vrot.slane %v1425_v4, %v3487_v17  ;;  %v1342_v13 = vcombine.high %v3510_v58, %v3513_v59 }
 0x2c7   : > { %v1088_v14 = vrot.slane %v1081_v5, %v3485_v9  ;;  %v1096_v15 = vrot.slane %v2953_v6, %v3485_v9  ;;  %v1374_v21 = vcombine.high %v1349_v63, %v1365_v42  ;;  %v1358_v23 = vcombine.high %v3516_v60, %v3519_v61 }
 0x2c8   : > { %v1104_v18 = vrot.slane %v1097_v7, %v3485_v9  ;;  %v1112_v19 = vrot.slane %v2954_v8, %v3485_v9  ;;  %v1441_v20 = vcombine.low %v1417_v3, %v1433_v10  ;;  %v1442_v22 = vcombine.high %v1417_v3, %v1433_v10 }
 0x2c9   : > { %v1113_v24 = vcombine.low %v1088_v14, %v1096_v15  ;;  %v1053_v58 = vrot.slane %v1045_v11, %v3487_v17  ;;  %v1069_v59 = vrot.slane %v1061_v12, %v3487_v17  ;;  %v1356_v30 = vrot.slane %v1342_v13, %v3487_v17 }
 0x2ca   : > { %v1129_v25 = vcombine.low %v1104_v18, %v1112_v19  ;;  %v1445_v26 = vpack.c.bf16 %v1441_v20, %v1373_v0  ;;  %v1446_v27 = vpack.c.bf16 %v1442_v22, %v1374_v21  ;;  %v1372_v60 = vrot.slane %v1358_v23, %v3487_v17 }
 0x2cb   : > { %v1121_v28 = vrot.slane %v1113_v24, %v3487_v17  ;;  %v1410_v61 = vcombine.high %v1384_v39, %v1392_v40  ;;  %v1426_v35 = vcombine.high %v1400_v43, %v1408_v51  ;;  %v1077_v36 = vcombine.low %v1053_v58, %v1069_v59 }
 0x2cc   : > { %v1137_v29 = vrot.slane %v1129_v25, %v3487_v17  ;;  %v1750_v31 = vsel %vm1745_vm2, %v1445_v26, 0  ;;  %v1797_v32 = vsel %vm1745_vm2, %v1446_v27, 0  ;;  %v1078_v37 = vcombine.high %v1053_v58, %v1069_v59 }
 0x2cd   : > { %3073 = vmatpush3.bf16.xpose.msra.mxu1 %v1750_v31  ;;  %3079 = vmatpush3.bf16.xpose.msra.mxu0 %v1797_v32  ;;  %v1424_v38 = vrot.slane %v1410_v61, %v3487_v17  ;;  %v1114_v63 = vcombine.high %v1088_v14, %v1096_v15  ;;  %v1130_v42 = vcombine.high %v1104_v18, %v1112_v19  ;;  %v2947_v31 = vld [vmem:[%s3885_s8] ss:$0 sm:$0xff] }
 0x2ce   : > { %v1145_v33 = vcombine.low %v1121_v28, %v1137_v29  ;;  %v1146_v47 = vcombine.high %v1121_v28, %v1137_v29  ;;  %3084 = vmatprep.subr.bf16.mxu1 %v3263_v16  ;;  %3090 = vmatprep.subr.bf16.mxu0 %v3263_v16  ;;  %v1440_v44 = vrot.slane %v1426_v35, %v3487_v17 }
 0x2cf   : > { %v1046_v39 = vcombine.high %v3538_v34, %v3547_v41  ;;  %v1062_v40 = vcombine.high %v3553_v49, %v3556_v50  ;;  %v1375_v46 = vcombine.low %v1356_v30, %v1372_v60  ;;  %v1376_v51 = vcombine.high %v1356_v30, %v1372_v60 }
 0x2d0   : > { %v1149_v45 = vpack.c.bf16 %v1145_v33, %v1077_v36  ;;  %v1150_v43 = vpack.c.bf16 %v1146_v47, %v1078_v37  ;;  %v1443_v48 = vcombine.low %v1424_v38, %v1440_v44  ;;  %v1444_v52 = vcombine.high %v1424_v38, %v1440_v44 }
 0x2d1   : > { %v1128_v53 = vrot.slane %v1114_v63, %v3487_v17  ;;  %v1144_v54 = vrot.slane %v1130_v42, %v3487_v17  ;;  %v1060_v34 = vrot.slane %v1046_v39, %v3487_v17  ;;  %v1076_v41 = vrot.slane %v1062_v40, %v3487_v17 }
 0x2d2   : > { %v1447_v56 = vpack.c.bf16 %v1443_v48, %v1375_v46  ;;  %v1448_v62 = vpack.c.bf16 %v1444_v52, %v1376_v51  ;;  %v3627_v32 = vadd.f32 %v2947_v31, %v3469_v57  ;;  %v3632_v60 = vadd.f32 %v2947_v31, %v3467_v55 }
 0x2d3   : > { %v1147_v0 = vcombine.low %v1128_v53, %v1144_v54  ;;  %v1148_v3 = vcombine.high %v1128_v53, %v1144_v54  ;;  %v1079_v4 = vcombine.low %v1060_v34, %v1076_v41  ;;  %v1080_v5 = vcombine.high %v1060_v34, %v1076_v41 }
 0x2d4   : > { %3075 = vmatmul.mubr.msk.bf16.vlgmr.msra.gmra.mrb[0].mxu1 %vm1745_vm2, %v1149_v45  ;;  %3081 = vmatmul.mubr.msk.bf16.vlgmr.msra.gmra.mrb[12].mxu0 %vm1745_vm2, %v1150_v43  ;;  %v1844_v49 = vsel %vm1745_vm2, %v1447_v56, 0  ;;  %v1891_v50 = vsel %vm1745_vm2, %v1448_v62, 0 }
 0x2d5   : > { %3086 = vmatprep.mubr.msk.bf16.mxu1 %vm3264_vm1, %v3263_v16  ;;  %3092 = vmatprep.mubr.msk.bf16.mxu0 %vm3264_vm1, %v3263_v16  ;;  %v1151_v6 = vpack.c.bf16 %v1147_v0, %v1079_v4  ;;  %v1152_v7 = vpack.c.bf16 %v1148_v3, %v1080_v5 }
 0x2d6   : > { %3085 = vmatpush3.bf16.xpose.msra.mxu1 %v1844_v49  ;;  %3091 = vmatpush3.bf16.xpose.msra.mxu0 %v1891_v50 }
 0x2d7   : > { %3096 = vmatprep.subr.bf16.mxu1 %v3263_v16  ;;  %3102 = vmatprep.subr.bf16.mxu0 %v3263_v16 }
 0x2dd   : > { %3087 = vmatmul.mubr.msk.bf16.vlgmr.msra.gmra.mrb[4].mxu1 %vm1745_vm2, %v1151_v6  ;;  %3093 = vmatmul.mubr.msk.bf16.vlgmr.msra.gmra.mrb[16].mxu0 %vm1745_vm2, %v1152_v7 }
 0x2de   : > { %3098 = vmatprep.mubr.msk.bf16.mxu1 %vm3264_vm1, %v3263_v16  ;;  %3104 = vmatprep.mubr.msk.bf16.mxu0 %vm3264_vm1, %v3263_v16 }
 0x3a7   : > { %v1786_v8 = vpop.f32.mrb[0].mxu1  ;;  %v1833_v10 = vpop.f32.mrb[12].mxu0 }
 0x3a8   : > { %v3076_v11 = vpop.f32.mrb[1].mxu1  ;;  %v3082_v12 = vpop.f32.mrb[13].mxu0  ;;  %v1935_v13 = vsel %vm1934_vm3, %v1786_v8, -inf  ;;  %v1941_v21 = vsel %vm1934_vm3, %v1833_v10, -inf }
 0x3a9   : > { %1936 = vmax.xlane.f32.xlu0 %v1935_v13  ;;  %v1789_v14 = vpop.f32.mrb[2].mxu1  ;;  %v1836_v15 = vpop.f32.mrb[14].mxu0 }
 0x3aa   : > { %v3077_v18 = vpop.f32.mrb[3].mxu1  ;;  %v3083_v19 = vpop.f32.mrb[15].mxu0  ;;  %v1938_v20 = vsel %vm1934_vm3, %v1789_v14, -inf  ;;  %v1944_v24 = vsel %vm1934_vm3, %v1836_v15, -inf }
 0x3ab   : > { %1939 = vmax.xlane.f32.xlu1 %v1938_v20 }
 0x3ad   : > { %1942 = vmax.xlane.f32.xlu0 %v1941_v21 }
 0x3b0   : > { %v1880_v22 = vpop.f32.mrb[4].mxu1  ;;  %v1927_v23 = vpop.f32.mrb[16].mxu0 }
 0x3b1   : > { %v3088_v25 = vpop.f32.mrb[5].mxu1  ;;  %v3094_v26 = vpop.f32.mrb[17].mxu0  ;;  %1945 = vmax.xlane.f32.xlu0 %v1944_v24  ;;  %v1947_v29 = vsel %vm1934_vm3, %v1880_v22, -inf  ;;  %v1953_v30 = vsel %vm1934_vm3, %v1927_v23, -inf }
 0x3b2   : > { %v3617_v27 = vpop.f32.mrb[6].mxu1  ;;  %v3619_v58 = vpop.f32.mrb[18].mxu0 }
 0x3b3   : > { %v3089_v59 = vpop.f32.mrb[7].mxu1  ;;  %v3095_v28 = vpop.f32.mrb[19].mxu0  ;;  %v1950_v61 = vsel %vm1934_vm3, %v3617_v27, -inf  ;;  %v1956_v57 = vsel %vm1934_vm3, %v3619_v58, -inf }
 0x3b5   : > { %1948 = vmax.xlane.f32.xlu0 %v1947_v29 }
 0x3b9   : > { %1954 = vmax.xlane.f32.xlu0 %v1953_v30 }
 0x3bc   : > { %1453 = vrot.lane.b32.xlu1 %v3627_v32, %s3265_s22 }
 0x3c0   : > { %1457 = vrot.lane.b32.xlu1 %v3632_v60, %s3266_s24 }
 0x3cf   : > { %1451 = vrot.lane.b32.xlu0 %v3632_v60, %s3265_s22  ;;  %s3270_s22 = smov 16  }
 0x3d3   : > { %1463 = vrot.lane.b32.xlu0 %v3632_v60, %s3267_s3 }
 0x3e4   : > { %1951 = vmax.xlane.f32.xlu1 %v1950_v61 }
 0x3e8   : > { %1957 = vmax.xlane.f32.xlu1 %v1956_v57 }
 0x3f9   : > { %1459 = vrot.lane.b32.xlu1 %v3627_v32, %s3266_s24 }
 0x436   : > { %v1937_v55 = vpop.xlane.xlu0 %1936 }
 0x437   : > { %v1959_v33 = vsub.f32 %v1786_v8, %v1937_v55 }
 0x438   : > { %v1940_v47 = vpop.xlane.xlu1 %1939 }
 0x439   : > { %v1967_v35 = vmul.f32 1.442695, %v1959_v33  ;;  %v1960_v36 = vsub.f32 %v1789_v14, %v1940_v47 }
 0x43a   : > { %v1943_v37 = vpop.xlane.xlu0 %1942 }
 0x43b   : > { %3211 = vpow2.f32 %v1967_v35  ;;  %v1969_v38 = vmul.f32 1.442695, %v1960_v36  ;;  %v1961_v63 = vsub.f32 %v1833_v10, %v1943_v37 }
 0x43c   : > { %v1454_v6 = vpop.permute.xlu1 %1453 }
 0x43d   : > { %3213 = vpow2.f32 %v1969_v38  ;;  %v1971_v42 = vmul.f32 1.442695, %v1961_v63 }
 0x43e   : > { %v1946_v44 = vpop.xlane.xlu0 %1945 }
 0x43f   : > { %3215 = vpow2.f32 %v1971_v42  ;;  %v1962_v39 = vsub.f32 %v1836_v15, %v1946_v44 }
 0x440   : > { %v1458_v7 = vpop.permute.xlu1 %1457 }
 0x441   : > { %v1973_v40 = vmul.f32 1.442695, %v1962_v39  ;;  %v1469_v24 = vcombine.low %v3632_v60, %v1458_v7  ;;  %v1470_v26 = vcombine.high %v3632_v60, %v1458_v7 }
 0x442   : > { %v1949_v45 = vpop.xlane.xlu0 %1948 }
 0x443   : > { %3217 = vpow2.f32 %v1973_v40  ;;  %v1963_v43 = vsub.f32 %v1880_v22, %v1949_v45  ;;  %v1484_v29 = vrot.slane %v1470_v26, %v3485_v9 }
 0x445   : > { %v3646_v46 = vpop.eup %3211  ;;  %v1975_v48 = vmul.f32 1.442695, %v1963_v43 }
 0x446   : > { %v1955_v51 = vpop.xlane.xlu0 %1954  ;;  %v1983_v52 = vsel %vm1934_vm3, %v3646_v46, 0.0 }
 0x447   : > { %v3650_v53 = vpop.eup %3213  ;;  %3219 = vpow2.f32 %v1975_v48  ;;  %v1965_v54 = vsub.f32 %v1927_v23, %v1955_v51  ;;  %1984 = vadd.xlane.f32.xlu0 %v1983_v52 }
 0x448   : > { %v1986_v56 = vsel %vm1934_vm3, %v3650_v53, 0.0 }
 0x449   : > { %v3654_v62 = vpop.eup %3215  ;;  %v1979_v34 = vmul.f32 1.442695, %v1965_v54  ;;  %1987 = vadd.xlane.f32.xlu1 %v1986_v56 }
 0x44a   : > { %v1989_v41 = vsel %vm1934_vm3, %v3654_v62, 0.0  ;;  %v1452_v21 = vpop.permute.xlu0 %1451 }
 0x44b   : > { %3221 = vpow2.f32 %v1979_v34  ;;  %1990 = vadd.xlane.f32.xlu0 %v1989_v41 }
 0x44d   : > { %v3658_v49 = vpop.eup %3217 }
 0x44e   : > { %v1992_v50 = vsel %vm1934_vm3, %v3658_v49, 0.0  ;;  %v1464_v22 = vpop.permute.xlu0 %1463 }
 0x44f   : > { %1993 = vadd.xlane.f32.xlu1 %v1992_v50  ;;  %v1485_v23 = vcombine.low %v1452_v21, %v1464_v22  ;;  %v1486_v25 = vcombine.high %v1452_v21, %v1464_v22 }
 0x451   : > { %v3662_v0 = vpop.eup %3219  ;;  %v1500_v59 = vrot.slane %v1486_v25, %v3485_v9 }
 0x452   : > { %v1995_v3 = vsel %vm1934_vm3, %v3662_v0, 0.0 }
 0x453   : > { %1996 = vadd.xlane.f32.xlu0 %v1995_v3  ;;  %v1517_v61 = vcombine.low %v1484_v29, %v1500_v59  ;;  %v1518_v57 = vcombine.high %v1484_v29, %v1500_v59 }
 0x455   : > { %v3666_v4 = vpop.eup %3221  ;;  %v1525_v60 = vrot.slane %v1517_v61, %v3487_v17  ;;  %v1532_v35 = vrot.slane %v1518_v57, %v3487_v17 }
 0x456   : > { %v2001_v5 = vsel %vm1934_vm3, %v3666_v4, 0.0 }
 0x457   : > { %2002 = vadd.xlane.f32.xlu0 %v2001_v5  ;;  %v1621_v39 = vcombine.low %v1525_v60, %v1532_v35  ;;  %v2960_v40 = vcombine.high %v1525_v60, %v1532_v35 }
 0x459   : > { %v1628_v50 = vrot.slane %v1621_v39, %v3485_v9  ;;  %v1636_v3 = vrot.slane %v2960_v40, %v3485_v9 }
 0x460   : > { %1465 = vrot.lane.b32.xlu1 %v3627_v32, %s3267_s3 }
 0x471   : > { %v1952_v8 = vpop.xlane.xlu1 %1951 }
 0x472   : > { %v1964_v10 = vsub.f32 %v3617_v27, %v1952_v8  ;;  %v1493_v27 = vrot.slane %v1485_v23, %v3485_v9 }
 0x474   : > { %v1977_v11 = vmul.f32 1.442695, %v1964_v10 }
 0x475   : > { %v1958_v12 = vpop.xlane.xlu1 %1957 }
 0x476   : > { %3223 = vpow2.f32 %v1977_v11  ;;  %v1966_v13 = vsub.f32 %v3619_v58, %v1958_v12  ;;  %v1477_v58 = vrot.slane %v1469_v24, %v3485_v9 }
 0x478   : > { %v1981_v14 = vmul.f32 1.442695, %v1966_v13  ;;  %v1501_v30 = vcombine.low %v1477_v58, %v1493_v27  ;;  %v1502_v31 = vcombine.high %v1477_v58, %v1493_v27 }
 0x479   : > { %v1460_v28 = vpop.permute.xlu1 %1459 }
 0x47a   : > { %3225 = vpow2.f32 %v1981_v14  ;;  %v1509_v33 = vrot.slane %v1501_v30, %v3487_v17  ;;  %v1516_v47 = vrot.slane %v1502_v31, %v3487_v17  ;;  %v1537_v63 = vcombine.low %v3627_v32, %v1460_v28 }
 0x47b   : > { %v1538_v42 = vcombine.high %v3627_v32, %v1460_v28  ;;  %v1654_v30 = vcombine.high %v1628_v50, %v1636_v3 }
 0x47c   : > { %v1605_v38 = vcombine.low %v1509_v33, %v1516_v47  ;;  %v2959_v44 = vcombine.high %v1509_v33, %v1516_v47  ;;  %v1545_v52 = vrot.slane %v1537_v63, %v3485_v9 }
 0x47d   : > { %v1552_v54 = vrot.slane %v1538_v42, %v3485_v9  ;;  %v1668_v42 = vrot.slane %v1654_v30, %v3487_v17 }
 0x47e   : > { %v1612_v51 = vrot.slane %v1605_v38, %v3485_v9  ;;  %v1620_v32 = vrot.slane %v2959_v44, %v3485_v9 }
 0x480   : > { %v3674_v15 = vpop.eup %3223  ;;  %v1637_v14 = vcombine.low %v1612_v51, %v1620_v32  ;;  %v1638_v29 = vcombine.high %v1612_v51, %v1620_v32 }
 0x481   : > { %v1998_v18 = vsel %vm1934_vm3, %v3674_v15, 0.0 }
 0x482   : > { %v1645_v59 = vrot.slane %v1637_v14, %v3487_v17  ;;  %v1652_v63 = vrot.slane %v1638_v29, %v3487_v17 }
 0x484   : > { %v3678_v19 = vpop.eup %3225  ;;  %1999 = vadd.xlane.f32.xlu1 %v1998_v18  ;;  %v1653_v18 = vcombine.low %v1628_v50, %v1636_v3  ;;  %v1671_v32 = vcombine.low %v1652_v63, %v1668_v42  ;;  %v1672_v50 = vcombine.high %v1652_v63, %v1668_v42 }
 0x485   : > { %v2004_v20 = vsel %vm1934_vm3, %v3678_v19, 0.0 }
 0x486   : > { %2005 = vadd.xlane.f32.xlu0 %v2004_v20  ;;  %v1661_v28 = vrot.slane %v1653_v18, %v3487_v17 }
 0x488   : > { %v1669_v44 = vcombine.low %v1645_v59, %v1661_v28  ;;  %v1670_v40 = vcombine.high %v1645_v59, %v1661_v28 }
 0x4d4   : > { %v1985_v37 = vpop.xlane.xlu0 %1984 }
 0x4d5   : > { %3227 = vrcp.f32 %v1985_v37 }
 0x4d6   : > { %v1988_v55 = vpop.xlane.xlu1 %1987 }
 0x4d7   : > { %3229 = vrcp.f32 %v1988_v55 }
 0x4d8   : > { %v1991_v56 = vpop.xlane.xlu0 %1990 }
 0x4dc   : > { %v1994_v36 = vpop.xlane.xlu1 %1993 }
 0x4dd   : > { %3231 = vrcp.f32 %v1994_v36 }
 0x4de   : > { %3233 = vrcp.f32 %v1991_v56 }
 0x4df   : > { %v3228_v58 = vpop.eup %3227 }
 0x4e0   : > { %v1466_v45 = vpop.permute.xlu1 %1465 }
 0x4e1   : > { %v1553_v43 = vcombine.low %v1454_v6, %v1466_v45  ;;  %v1554_v48 = vcombine.high %v1454_v6, %v1466_v45  ;;  %v3230_v31 = vpop.eup %3229 }
 0x4e3   : > { %v1561_v34 = vrot.slane %v1553_v43, %v3485_v9  ;;  %v1568_v41 = vrot.slane %v1554_v48, %v3485_v9  ;;  %v2016_v43 = vmul.f32 %v3230_v31, %v3650_v53 }
 0x4e5   : > { %v1569_v5 = vcombine.low %v1545_v52, %v1561_v34  ;;  %v1570_v6 = vcombine.high %v1545_v52, %v1561_v34  ;;  %v1585_v7 = vcombine.low %v1552_v54, %v1568_v41  ;;  %v1586_v8 = vcombine.high %v1552_v54, %v1568_v41 }
 0x4e6   : > { %v2015_v34 = vmul.f32 %v3228_v58, %v3646_v46  ;;  %v1997_v46 = vpop.xlane.xlu0 %1996 }
 0x4e7   : > { %v1577_v10 = vrot.slane %v1569_v5, %v3487_v17  ;;  %v1584_v11 = vrot.slane %v1570_v6, %v3487_v17  ;;  %v1593_v12 = vrot.slane %v1585_v7, %v3487_v17  ;;  %v1600_v13 = vrot.slane %v1586_v8, %v3487_v17  ;;  %v3232_v47 = vpop.eup %3231 }
 0x4e8   : > { %v3234_v38 = vpop.eup %3233  ;;  %v2018_v48 = vmul.f32 %v3232_v47, %v3658_v49  ;;  %v2023_v3 = vpack.c.bf16 %v2016_v43, %v2015_v34  ;;  %3235 = vrcp.f32 %v1997_v46 }
 0x4e9   : > { %v1673_v20 = vcombine.low %v1577_v10, %v1584_v11  ;;  %v2961_v21 = vcombine.high %v1577_v10, %v1584_v11  ;;  %v1689_v22 = vcombine.low %v1593_v12, %v1600_v13  ;;  %v2962_v23 = vcombine.high %v1593_v12, %v1600_v13 }
 0x4ea   : > { %v2017_v41 = vmul.f32 %v3234_v38, %v3654_v62  ;;  %v2003_v62 = vpop.xlane.xlu0 %2002 }
 0x4eb   : > { %v1680_v24 = vrot.slane %v1673_v20, %v3485_v9  ;;  %v1688_v25 = vrot.slane %v2961_v21, %v3485_v9  ;;  %v1696_v26 = vrot.slane %v1689_v22, %v3485_v9  ;;  %v1704_v27 = vrot.slane %v2962_v23, %v3485_v9 }
 0x4ec   : > { %v2024_v5 = vpack.c.bf16 %v2018_v48, %v2017_v41  ;;  %3237 = vrcp.f32 %v2003_v62 }
 0x4ed   : > { %v1705_v61 = vcombine.low %v1680_v24, %v1688_v25  ;;  %v1721_v57 = vcombine.low %v1696_v26, %v1704_v27  ;;  %v1706_v55 = vcombine.high %v1680_v24, %v1688_v25  ;;  %v1722_v33 = vcombine.high %v1696_v26, %v1704_v27 }
 0x4ef   : > { %v1713_v60 = vrot.slane %v1705_v61, %v3487_v17  ;;  %v1729_v35 = vrot.slane %v1721_v57, %v3487_v17  ;;  %v1720_v36 = vrot.slane %v1706_v55, %v3487_v17  ;;  %v1736_v37 = vrot.slane %v1722_v33, %v3487_v17 }
 0x4f1   : > { %v1737_v39 = vcombine.low %v1713_v60, %v1729_v35  ;;  %v1738_v45 = vcombine.high %v1713_v60, %v1729_v35  ;;  %v1739_v54 = vcombine.low %v1720_v36, %v1736_v37  ;;  %v1740_v56 = vcombine.high %v1720_v36, %v1736_v37 }
 0x4f2   : > { %v3236_v8 = vpop.eup %3235 }
 0x4f3   : > { %v1741_v51 = vpack.c.bf16 %v1737_v39, %v1669_v44  ;;  %v1742_v52 = vpack.c.bf16 %v1738_v45, %v1670_v40  ;;  %v1743_v53 = vpack.c.bf16 %v1739_v54, %v1671_v32  ;;  %v1744_v49 = vpack.c.bf16 %v1740_v56, %v1672_v50 }
 0x4f4   : > { %v2019_v12 = vmul.f32 %v3236_v8, %v3662_v0 }
 0x4f5   : > { %3097 = vmatpush3.bf16.msra.mxu1 %v1741_v51  ;;  %3103 = vmatpush3.bf16.msra.mxu0 %v1742_v52 }
 0x4f6   : > { %3108 = vmatprep.subr.bf16.mxu1 %v3263_v16  ;;  %3114 = vmatprep.subr.bf16.mxu0 %v3263_v16  ;;  %v3238_v10 = vpop.eup %3237 }
 0x4f7   : > { %v2021_v18 = vmul.f32 %v3238_v10, %v3666_v4 }
 0x4f8   : > { %3099 = vmatmul.mubr.msk.bf16.vlgmr.msra.gmra.mrb[8].mxu1 %vm1934_vm3, %v2023_v3  ;;  %3105 = vmatmul.mubr.msk.bf16.vlgmr.msra.gmra.mrb[20].mxu0 %vm1934_vm3, %v2024_v5 }
 0x4f9   : > { %3109 = vmatpush3.bf16.msra.mxu1 %v1743_v53  ;;  %3115 = vmatpush3.bf16.msra.mxu0 %v1744_v49 }
 0x4fa   : > { %3110 = vmatprep.mubr.msk.bf16.mxu1 %vm3264_vm1, %v3263_v16  ;;  %3116 = vmatprep.mubr.msk.bf16.mxu0 %vm3264_vm1, %v3263_v16 }
 0x4fb   : > { %3120 = vmatprep.subr.bf16.mxu1 %v3263_v16  ;;  %3128 = vmatprep.subr.bf16.mxu0 %v3263_v16 }
 0x511   : > { %v2000_v6 = vpop.xlane.xlu1 %1999 }
 0x512   : > { %3239 = vrcp.f32 %v2000_v6 }
 0x513   : > { %v2006_v7 = vpop.xlane.xlu0 %2005 }
 0x514   : > { %3241 = vrcp.f32 %v2006_v7 }
 0x51c   : > { %v3240_v11 = vpop.eup %3239 }
 0x51d   : > { %v2020_v13 = vmul.f32 %v3240_v11, %v3674_v15 }
 0x51e   : > { %v3242_v14 = vpop.eup %3241 }
 0x51f   : > { %v2022_v20 = vmul.f32 %v3242_v14, %v3678_v19  ;;  %v2025_v21 = vpack.c.bf16 %v2020_v13, %v2019_v12 }
 0x521   : > { %3111 = vmatmul.mubr.msk.bf16.vlgmr.msra.gmra.mrb[12].mxu1 %vm1934_vm3, %v2025_v21  ;;  %v2026_v22 = vpack.c.bf16 %v2022_v20, %v2021_v18 }
 0x522   : > { %3124 = vmatprep.mubr.msk.bf16.mxu1 %vm3264_vm1, %v3263_v16 }
 0x523   : > { %3117 = vmatmul.mubr.msk.bf16.vlgmr.msra.gmra.mrb[24].mxu0 %vm1934_vm3, %v2026_v22 }
 0x524   : > { %3132 = vmatprep.mubr.msk.bf16.mxu0 %vm3264_vm1, %v3263_v16 }
 0x5cb   : > { %v2064_v0 = vpop.f32.mrb[8].mxu1  ;;  %v2108_v23 = vpop.f32.mrb[20].mxu0 }
 0x5cc   : > { %v3100_v15 = vpop.f32.mrb[9].mxu1  ;;  %v3106_v24 = vpop.f32.mrb[21].mxu0 }
 0x5cd   : > { %v2067_v25 = vpop.f32.mrb[10].mxu1  ;;  %v2111_v4 = vpop.f32.mrb[22].mxu0 }
 0x5ce   : > { %v3101_v26 = vpop.f32.mrb[11].mxu1  ;;  %v3107_v19 = vpop.f32.mrb[23].mxu0 }
 0x5f4   : > { %v2152_v27 = vpop.f32.mrb[12].mxu1 }
 0x5f5   : > { %v2203_v58 = vcombine.low %v2064_v0, %v2152_v27  ;;  %v2204_v59 = vcombine.high %v2064_v0, %v2152_v27  ;;  %v3112_v28 = vpop.f32.mrb[13].mxu1 }
 0x5f6   : > { %v2155_v29 = vpop.f32.mrb[14].mxu1  ;;  %v2196_v30 = vpop.f32.mrb[24].mxu0 }
 0x5f7   : > { %v2271_v31 = vcombine.low %v2067_v25, %v2155_v29  ;;  %v2272_v61 = vcombine.high %v2067_v25, %v2155_v29  ;;  %v3113_v57 = vpop.f32.mrb[15].mxu1  ;;  %v3118_v55 = vpop.f32.mrb[25].mxu0  ;;  %v2219_v33 = vcombine.low %v2108_v23, %v2196_v30  ;;  %v2220_v47 = vcombine.high %v2108_v23, %v2196_v30  ;;  %v3195_v23 = vld [vmem:[%s3886_s9] sm:$0xff]  }
 0x5f8   : > { %v2199_v60 = vpop.f32.mrb[26].mxu0  ;;  %v2211_v38 = vrot.slane %v2203_v58, %v3485_v9  ;;  %v2218_v63 = vrot.slane %v2204_v59, %v3485_v9  ;;  %3121 = vmatpush3.bf16.msra.mxu1 %v3195_v23 }
 0x5f9   : > { %v2287_v35 = vcombine.low %v2111_v4, %v2199_v60  ;;  %v2288_v36 = vcombine.high %v2111_v4, %v2199_v60  ;;  %v3119_v37 = vpop.f32.mrb[27].mxu0  ;;  %v2227_v42 = vrot.slane %v2219_v33, %v3485_v9  ;;  %v2234_v44 = vrot.slane %v2220_v47, %v3485_v9  ;;  %3122 = vmatprep.subr.bf16.mxu1 %v3263_v16 }
 0x5fa   : > { %v2279_v39 = vrot.slane %v2271_v31, %v3485_v9  ;;  %v2286_v40 = vrot.slane %v2272_v61, %v3485_v9 }
 0x5fb   : > { %v2295_v45 = vrot.slane %v2287_v35, %v3485_v9  ;;  %v2302_v43 = vrot.slane %v2288_v36, %v3485_v9  ;;  %v2235_v48 = vcombine.low %v2211_v38, %v2227_v42  ;;  %v2236_v51 = vcombine.high %v2211_v38, %v2227_v42  ;;  %v3196_v35 = vld [vmem:[%s3886_s9 + $0x8] sm:$0xff]  }
 0x5fc   : > { %v2251_v52 = vcombine.low %v2218_v63, %v2234_v44  ;;  %v2252_v54 = vcombine.high %v2218_v63, %v2234_v44  ;;  %3123 = vmatpush3.bf16.msra.mxu1 %v3196_v35  ;;  %v2980_v35 = vld [vmem:[%s3889_s12] ss:$0 sm:$0xff] }
 0x5fd   : > { %v2303_v56 = vcombine.low %v2279_v39, %v2295_v45  ;;  %v2304_v34 = vcombine.high %v2279_v39, %v2295_v45  ;;  %v2319_v41 = vcombine.low %v2286_v40, %v2302_v43  ;;  %v2320_v32 = vcombine.high %v2286_v40, %v2302_v43  ;;  %3136 = vmatprep.subr.bf16.mxu1 %v3263_v16 }
 0x5fe   : > { %v2243_v50 = vrot.slane %v2235_v48, %v3487_v17  ;;  %v2250_v3 = vrot.slane %v2236_v51, %v3487_v17  ;;  %v2259_v5 = vrot.slane %v2251_v52, %v3487_v17  ;;  %v2266_v53 = vrot.slane %v2252_v54, %v3487_v17 }
 0x5ff   : > { %v2311_v49 = vrot.slane %v2303_v56, %v3487_v17  ;;  %v2318_v46 = vrot.slane %v2304_v34, %v3487_v17  ;;  %v2327_v62 = vrot.slane %v2319_v41, %v3487_v17  ;;  %v2334_v6 = vrot.slane %v2320_v32, %v3487_v17 }
 0x600   : > { %v2339_v7 = vcombine.low %v2243_v50, %v2250_v3  ;;  %v2971_v8 = vcombine.high %v2243_v50, %v2250_v3  ;;  %v2355_v10 = vcombine.low %v2259_v5, %v2266_v53  ;;  %v2972_v11 = vcombine.high %v2259_v5, %v2266_v53 }
 0x601   : > { %v2407_v12 = vcombine.low %v2311_v49, %v2318_v46  ;;  %v2973_v13 = vcombine.high %v2311_v49, %v2318_v46  ;;  %v2423_v14 = vcombine.low %v2327_v62, %v2334_v6  ;;  %v2974_v18 = vcombine.high %v2327_v62, %v2334_v6 }
 0x602   : > { %v2346_v20 = vrot.slane %v2339_v7, %v3485_v9  ;;  %v2354_v21 = vrot.slane %v2971_v8, %v3485_v9  ;;  %v2362_v22 = vrot.slane %v2355_v10, %v3485_v9  ;;  %v2370_v0 = vrot.slane %v2972_v11, %v3485_v9  ;;  %v2975_v7 = vld [vmem:[%s3887_s10] ss:$0 sm:$0xff] }
 0x603   : > { %v2414_v15 = vrot.slane %v2407_v12, %v3485_v9  ;;  %v2422_v24 = vrot.slane %v2973_v13, %v3485_v9  ;;  %v2430_v25 = vrot.slane %v2423_v14, %v3485_v9  ;;  %v2438_v4 = vrot.slane %v2974_v18, %v3485_v9 }
 0x604   : > { %v2372_v26 = vcombine.high %v2346_v20, %v2354_v21  ;;  %v2388_v19 = vcombine.high %v2362_v22, %v2370_v0  ;;  %v2371_v27 = vcombine.low %v2346_v20, %v2354_v21  ;;  %v2387_v58 = vcombine.low %v2362_v22, %v2370_v0 }
 0x605   : > { %v2440_v59 = vcombine.high %v2414_v15, %v2422_v24  ;;  %v2456_v28 = vcombine.high %v2430_v25, %v2438_v4  ;;  %v2439_v29 = vcombine.low %v2414_v15, %v2422_v24  ;;  %v2455_v30 = vcombine.low %v2430_v25, %v2438_v4 }
 0x606   : > { %v2386_v31 = vrot.slane %v2372_v26, %v3487_v17  ;;  %v2402_v61 = vrot.slane %v2388_v19, %v3487_v17  ;;  %v2379_v57 = vrot.slane %v2371_v27, %v3487_v17  ;;  %v2395_v55 = vrot.slane %v2387_v58, %v3487_v17  ;;  %v3197_v27 = vld [vmem:[%s3890_s13] sm:$0xff]   ;;  %v3198_v58 = vld [vmem:[%s3890_s13 + $0x8] sm:$0xff]  }
 0x607   : > { %v2454_v9 = vrot.slane %v2440_v59, %v3487_v17  ;;  %v2470_v33 = vrot.slane %v2456_v28, %v3487_v17  ;;  %v2447_v47 = vrot.slane %v2439_v29, %v3487_v17  ;;  %v2463_v60 = vrot.slane %v2455_v30, %v3487_v17  ;;  %3129 = vmatpush3.bf16.msra.mxu0 %v3197_v27 }
 0x608   : > { %v2405_v36 = vcombine.low %v2386_v31, %v2402_v61  ;;  %v2403_v37 = vcombine.low %v2379_v57, %v2395_v55  ;;  %v2404_v38 = vcombine.high %v2379_v57, %v2395_v55  ;;  %v2406_v63 = vcombine.high %v2386_v31, %v2402_v61  ;;  %3130 = vmatprep.subr.bf16.mxu0 %v3263_v16 }
 0x609   : > { %v2473_v42 = vcombine.low %v2454_v9, %v2470_v33  ;;  %v2472_v44 = vcombine.high %v2447_v47, %v2463_v60  ;;  %v2471_v39 = vcombine.low %v2447_v47, %v2463_v60  ;;  %v2474_v40 = vcombine.high %v2454_v9, %v2470_v33  ;;  %v2979_v9 = vld [vmem:[%s3888_s11] ss:$0 sm:$0xff] }
 0x60b   : > { %v3179_v45 = vpack.i.bf16 %v2473_v42, %v2405_v36  ;;  %v3174_v43 = vpack.i.bf16 %v2472_v44, %v2404_v38  ;;  %v3184_v48 = vpack.i.bf16 %v2474_v40, %v2406_v63  ;;  %3131 = vmatpush3.bf16.msra.mxu0 %v3198_v58  ;;  %v3199_v42 = vld [vmem:[%s3892_s15] sm:$0xff]   ;;  %v3200_v44 = vld [vmem:[%s3892_s15 + $0x8] sm:$0xff]   ;;  %v3202_v40 = vld [vmem:[%s3892_s15 + $0x18] sm:$0xff]  }
 0x60d   : > { %3180 = vrot.lane.b32.xlu1 %v3179_v45, %s3270_s22  ;;  %3175 = vrot.lane.b32.xlu0 %v3174_v43, %s3271_s2  ;;  %v3203_v45 = vld [vmem:[%s3892_s15 + $0x20] sm:$0xff]   ;;  %v3204_v43 = vld [vmem:[%s3892_s15 + $0x28] sm:$0xff]  }
 0x611   : > { %3185 = vrot.lane.b32.xlu1 %v3184_v48, %s3272_s23  ;;  %v3205_v48 = vld [vmem:[%s3892_s15 + $0x30] sm:$0xff]  }
 0x67f   : > { %v3181_v17 = vpop.permute.xlu1 %3180  ;;  %v3176_v51 = vpop.permute.xlu0 %3175 }
 0x680   : > { %v3178_v52 = vunpack.i.h.bf16 %v3176_v51  ;;  %v3177_v54 = vunpack.i.l.bf16 %v3176_v51  ;;  %v3183_v56 = vunpack.i.h.bf16 %v3181_v17  ;;  %v3182_v34 = vunpack.i.l.bf16 %v3181_v17  ;;  %v3206_v17 = vld [vmem:[%s3892_s15 + $0x38] sm:$0xff]   ;;  %v2981_v51 = vld [vmem:[%s3891_s14] ss:$0 sm:$0xff] }
 0x682   : > { %v2499_v41 = vsel %vm1745_vm2, %v2403_v37, %v3177_v54  ;;  %v2500_v32 = vsel %vm1745_vm2, %v2471_v39, %v3178_v52  ;;  %v3201_v39 = vld [vmem:[%s3892_s15 + $0x10] sm:$0xff]  }
 0x683   : > { %v3186_v50 = vpop.permute.xlu1 %3185  ;;  %v2501_v53 = vsel %vm1934_vm3, %v2499_v41, %v3182_v34  ;;  %v2502_v49 = vsel %vm1934_vm3, %v2500_v32, %v3183_v56 }
 0x684   : > { %v3188_v3 = vunpack.i.h.bf16 %v3186_v50  ;;  %v3187_v5 = vunpack.i.l.bf16 %v3186_v50 }
 0x686   : > { %v2504_v46 = vsel %vm2503_vm4, %v2501_v53, %v3187_v5  ;;  %v2505_v62 = vsel %vm2503_vm4, %v2502_v49, %v3188_v3 }
 0x687   : > { %v2506_v6 = vpack.c.bf16 %v2505_v62, %v2504_v46 }
 0x689   : > { %3125 = vmatmul.mubr.msk.bf16.vlgmr.msra.gmra.mrb[16].mxu1 %vm610_vm0, %v2506_v6 }
 0x68a   : > { %3152 = vmatprep.mubr.msk.bf16.mxu1 %vm3264_vm1, %v3263_v16  ;;  %3137 = vmatpush3.bf16.msra.mxu1 %v3199_v42 }
 0x68b   : > { %3138 = vmatprep.subr.bf16.mxu1 %v3263_v16 }
 0x68e   : > { %3139 = vmatpush3.bf16.msra.mxu1 %v3200_v44  ;;  %v2995_v44 = vld [vmem:[%s3895_s18] ss:$0 sm:$0xff] }
 0x68f   : > { %3140 = vmatprep.subr.bf16.mxu1 %v3263_v16 }
 0x692   : > { %3141 = vmatpush3.bf16.msra.mxu1 %v3201_v39 }
 0x693   : > { %3142 = vmatprep.subr.bf16.mxu1 %v3263_v16 }
 0x696   : > { %3143 = vmatpush3.bf16.msra.mxu1 %v3202_v40 }
 0x697   : > { %3144 = vmatprep.subr.bf16.mxu1 %v3263_v16 }
 0x69a   : > { %3145 = vmatpush3.bf16.msra.mxu1 %v3203_v45 }
 0x69b   : > { %3146 = vmatprep.subr.bf16.mxu1 %v3263_v16 }
 0x69e   : > { %3147 = vmatpush3.bf16.msra.mxu1 %v3204_v43 }
 0x69f   : > { %3148 = vmatprep.subr.bf16.mxu1 %v3263_v16 }
 0x6a2   : > { %3149 = vmatpush3.bf16.msra.mxu1 %v3205_v48 }
 0x6a3   : > { %3150 = vmatprep.subr.bf16.mxu1 %v3263_v16 }
 0x6a6   : > { %3151 = vmatpush3.bf16.msra.mxu1 %v3206_v17 }
 0x75c   : > { %v2562_v8 = vpop.f32.mrb[16].mxu1 }
 0x75d   : > { %v2563_v10 = vadd.f32 %v2975_v7, %v2562_v8  ;;  %v3126_v11 = vpop.f32.mrb[17].mxu1 }
 0x75e   : > { %v2565_v12 = vpop.f32.mrb[18].mxu1 }
 0x75f   : > { %v3793_v13 = vadd.f32 %v3389_v1, %v2563_v10  ;;  %v2566_v14 = vadd.f32 %v2975_v7, %v2565_v12  ;;  %v3127_v18 = vpop.f32.mrb[19].mxu1 }
 0x761   : > { %v3796_v20 = vadd.f32 %v3391_v2, %v2566_v14  ;;  %v2573_v21 = vsel %vm610_vm0, %v3793_v13, 0.0 }
 0x762   : > { %2574 = vadd.xlane.f32.xlu1 %v2573_v21 }
 0x763   : > { %v2576_v22 = vsel %vm610_vm0, %v3796_v20, 0.0 }
 0x764   : > { %2577 = vadd.xlane.f32.xlu0 %v2576_v22 }
 0x7ef   : > { %v2575_v0 = vpop.xlane.xlu1 %2574 }
 0x7f0   : > { %v2579_v23 = vmul.f32 0.03125, %v2575_v0 }
 0x7f1   : > { %v2578_v15 = vpop.xlane.xlu0 %2577 }
 0x7f2   : > { %v2581_v24 = vsub.f32 %v3793_v13, %v2579_v23  ;;  %v2580_v1 = vmul.f32 0.03125, %v2578_v15  ;;  %v2993_v15 = vld [vmem:[%s3893_s16] ss:$0 sm:$0xff] }
 0x7f4   : > { %v2582_v25 = vsub.f32 %v3796_v20, %v2580_v1  ;;  %v2583_v4 = vmul.f32 %v2581_v24, %v2581_v24 }
 0x7f6   : > { %v2585_v2 = vsel %vm610_vm0, %v2583_v4, 0.0  ;;  %v2584_v26 = vmul.f32 %v2582_v25, %v2582_v25 }
 0x7f7   : > { %2586 = vadd.xlane.f32.xlu0 %v2585_v2 }
 0x7f8   : > { %v2588_v19 = vsel %vm610_vm0, %v2584_v26, 0.0 }
 0x7fb   : > { %2589 = vadd.xlane.f32.xlu0 %v2588_v19 }
 0x884   : > { %v2587_v59 = vpop.xlane.xlu0 %2586 }
 0x885   : > { %v2591_v28 = vmul.f32 0.03125, %v2587_v59 }
 0x887   : > { %v2593_v29 = vadd.f32 1e-05, %v2591_v28 }
 0x888   : > { %v2590_v30 = vpop.xlane.xlu0 %2589 }
 0x889   : > { %3243 = vrsqrt.f32 %v2593_v29  ;;  %v2592_v31 = vmul.f32 0.03125, %v2590_v30 }
 0x88b   : > { %v2594_v61 = vadd.f32 1e-05, %v2592_v31 }
 0x88d   : > { %3245 = vrsqrt.f32 %v2594_v61 }
 0x893   : > { %v3244_v57 = vpop.eup %3243 }
 0x894   : > { %v2597_v55 = vmul.f32 %v3244_v57, %v2581_v24 }
 0x896   : > { %v2605_v47 = vmul.f32 %v2979_v9, %v2597_v55 }
 0x897   : > { %v3246_v33 = vpop.eup %3245 }
 0x898   : > { %v2598_v60 = vmul.f32 %v3246_v33, %v2582_v25  ;;  %v2613_v37 = vadd.f32 %v2980_v35, %v2605_v47 }
 0x89a   : > { %v2606_v36 = vmul.f32 %v2979_v9, %v2598_v60 }
 0x89c   : > { %v2614_v38 = vadd.f32 %v2980_v35, %v2606_v36 }
 0x89e   : > { %v2619_v63 = vpack.c.bf16 %v2614_v38, %v2613_v37  ;;  %v2994_v38 = vld [vmem:[%s3894_s17] ss:$0 sm:$0xff] }
 0x8a0   : > { %3133 = vmatmul.mubr.msk.bf16.vlgmr.msra.gmra.mrb[28].mxu0 %vm610_vm0, %v2619_v63 }
 0x973   : > { %v2676_v52 = vpop.f32.mrb[28].mxu0 }
 0x974   : > { %v2677_v54 = vadd.f32 %v2981_v51, %v2676_v52  ;;  %v3134_v56 = vpop.f32.mrb[29].mxu0 }
 0x975   : > { %v2679_v34 = vpop.f32.mrb[30].mxu0 }
 0x976   : > { %v2683_v41 = vmul.f32 %v2677_v54, %v2677_v54  ;;  %v2680_v32 = vadd.f32 %v2981_v51, %v2679_v34  ;;  %v3135_v50 = vpop.f32.mrb[31].mxu0 }
 0x978   : > { %v2685_v3 = vmul.f32 %v2683_v41, %v2677_v54  ;;  %v2684_v5 = vmul.f32 %v2680_v32, %v2680_v32 }
 0x97a   : > { %v2687_v53 = vmul.f32 0.044715, %v2685_v3  ;;  %v2686_v49 = vmul.f32 %v2684_v5, %v2680_v32 }
 0x97c   : > { %v2689_v46 = vadd.f32 %v2687_v53, %v2677_v54  ;;  %v2688_v62 = vmul.f32 0.044715, %v2686_v49 }
 0x97e   : > { %v2691_v6 = vmul.f32 0.7978846, %v2689_v46  ;;  %v2690_v16 = vadd.f32 %v2688_v62, %v2680_v32 }
 0x980   : > { %3247 = vtanh.f32 %v2691_v6  ;;  %v2692_v7 = vmul.f32 0.7978846, %v2690_v16 }
 0x982   : > { %3249 = vtanh.f32 %v2692_v7 }
 0x98a   : > { %v3248_v8 = vpop.eup %3247 }
 0x98b   : > { %v2695_v10 = vadd.f32 1.0, %v3248_v8 }
 0x98c   : > { %v3250_v11 = vpop.eup %3249 }
 0x98d   : > { %v2697_v12 = vmul.f32 0.5, %v2695_v10  ;;  %v2696_v14 = vadd.f32 1.0, %v3250_v11 }
 0x98f   : > { %v2698_v18 = vmul.f32 0.5, %v2696_v14  ;;  %v2699_v21 = vmul.f32 %v2697_v12, %v2677_v54 }
 0x991   : > { %v2700_v22 = vmul.f32 %v2698_v18, %v2680_v32 }
 0x993   : > { %v2717_v0 = vpack.c.bf16 %v2700_v22, %v2699_v21 }
 0x995   : > { %3153 = vmatmul.mubr.bf16.vlgmr.msra.gmra.mrb[20].mxu1 %v2717_v0 }
 0xa68   : > { %v2800_v23 = vpop.f32.mrb[20].mxu1 }
 0xa69   : > { %v2807_v24 = vadd.f32 %v2800_v23, %v3793_v13  ;;  %v3154_v1 = vpop.f32.mrb[21].mxu1 }
 0xa6a   : > { %v2803_v25 = vpop.f32.mrb[22].mxu1 }
 0xa6b   : > { %v2808_v4 = vadd.f32 %v2803_v25, %v3796_v20  ;;  %v3155_v2 = vpop.f32.mrb[23].mxu1  ;;  %v2816_v26 = vadd.f32 %v2993_v15, %v2807_v24 }
 0xa6d   : > { %v2820_v19 = vsel %vm610_vm0, %v2816_v26, 0.0  ;;  %v2817_v27 = vadd.f32 %v2993_v15, %v2808_v4 }
 0xa6e   : > { %2821 = vadd.xlane.f32.xlu1 %v2820_v19 }
 0xa6f   : > { %v2823_v58 = vsel %vm610_vm0, %v2817_v27, 0.0 }
 0xa70   : > { %2824 = vadd.xlane.f32.xlu0 %v2823_v58 }
 0xafb   : > { %v2822_v59 = vpop.xlane.xlu1 %2821 }
 0xafc   : > { %v2826_v28 = vmul.f32 0.03125, %v2822_v59 }
 0xafd   : > { %v2825_v29 = vpop.xlane.xlu0 %2824 }
 0xafe   : > { %v2828_v30 = vsub.f32 %v2816_v26, %v2826_v28  ;;  %v2827_v31 = vmul.f32 0.03125, %v2825_v29 }
 0xb00   : > { %v2829_v61 = vsub.f32 %v2817_v27, %v2827_v31  ;;  %v2830_v13 = vmul.f32 %v2828_v30, %v2828_v30 }
 0xb02   : > { %v2832_v57 = vsel %vm610_vm0, %v2830_v13, 0.0  ;;  %v2831_v55 = vmul.f32 %v2829_v61, %v2829_v61 }
 0xb03   : > { %2833 = vadd.xlane.f32.xlu1 %v2832_v57 }
 0xb04   : > { %v2835_v20 = vsel %vm610_vm0, %v2831_v55, 0.0 }
 0xb05   : > { %2836 = vadd.xlane.f32.xlu0 %v2835_v20 }
 0xb90   : > { %v2834_v9 = vpop.xlane.xlu1 %2833 }
 0xb91   : > { %v2838_v33 = vmul.f32 0.03125, %v2834_v9 }
 0xb92   : > { %v2837_v47 = vpop.xlane.xlu0 %2836 }
 0xb93   : > { %v2840_v60 = vadd.f32 1e-05, %v2838_v33  ;;  %v2839_v35 = vmul.f32 0.03125, %v2837_v47 }
 0xb95   : > { %3251 = vrsqrt.f32 %v2840_v60  ;;  %v2841_v36 = vadd.f32 1e-05, %v2839_v35 }
 0xb97   : > { %3253 = vrsqrt.f32 %v2841_v36 }
 0xb9f   : > { %v3252_v37 = vpop.eup %3251 }
 0xba0   : > { %v2844_v63 = vmul.f32 %v3252_v37, %v2828_v30 }
 0xba1   : > { %v3254_v42 = vpop.eup %3253 }
 0xba2   : > { %v2852_v39 = vmul.f32 %v2994_v38, %v2844_v63  ;;  %v2845_v40 = vmul.f32 %v3254_v42, %v2829_v61 }
 0xba4   : > { %v2860_v45 = vadd.f32 %v2995_v44, %v2852_v39  ;;  %v2853_v43 = vmul.f32 %v2994_v38, %v2845_v40 }
 0xba6   : > { %v3002_v48 = vpack.c.bf16 %v2860_v45, %v2860_v45  ;;  %v2861_v17 = vadd.f32 %v2995_v44, %v2853_v43 }
 0xba8   : > { %2871 = vst.msk [vmem:[%s602_s27] sm:$0xf] %vm2870_vm5, %v3002_v48  ;;  %v3003_v51 = vpack.c.bf16 %v2861_v17, %v2861_v17 }
 0xbaa   : > { %2872 = vst.msk [vmem:[%s602_s27 + $0x4] sm:$0xf] %vm2870_vm5, %v3003_v51 }
 0xbab PF: > { %s29_s0 = sadd.s32 1, %s3261_s0  }
 0xbac   : > { %p26_p4 = scmp.ge.s32.totalorder %s29_s0, 4  }
 0xbae   :  { %28 = sbr.rel (!%p26_p4) target bundleno = 5 (0x5), region = 126 }

// kernel: image_to_text_forward.7
= control target key start
LH: loop header
LB: loop body
LE: loop exit
PB: predicated region body
PF: predicated region fallthrough
CT: control target
= control target key end

     0   :  { %s3817_s0 = inlined_call_operand.vmem [shape: bf16[2,16,32], index: 0, kind: input, shape index: {}]   ;;  %s3818_s1 = inlined_call_operand.vmem [shape: f32[1,32], index: 1, kind: input, shape index: {}, may-alias: {1,17}]   ;;  %s3819_s2 = inlined_call_operand.vmem [shape: f32[1,32], index: 2, kind: input, shape index: {}, may-alias: {2,18}]   ;;  %s3820_s3 = inlined_call_operand.vmem [shape: bf16[32,32], index: 3, kind: input, shape index: {}]   ;;  %s3821_s4 = inlined_call_operand.vmem [shape: f32[1,32], index: 4, kind: input, shape index: {}]   ;;  %s3822_s5 = inlined_call_operand.vmem [shape: bf16[32,32], index: 5, kind: input, shape index: {}]   ;;  %s3823_s6 = inlined_call_operand.vmem [shape: f32[1,32], index: 6, kind: input, shape index: {}]   ;;  %s3824_s7 = inlined_call_operand.vmem [shape: bf16[32,32], index: 7, kind: input, shape index: {}]   ;;  %s3825_s8 = inlined_call_operand.vmem [shape: f32[1,32], index: 8, kind: input, shape index: {}]   ;;  %s3826_s9 = inlined_call_operand.vmem [shape: bf16[32,32], index: 9, kind: input, shape index: {}]   ;;  %s3827_s10 = inlined_call_operand.vmem [shape: f32[1,32], index: 10, kind: input, shape index: {}]   ;;  %s3828_s11 = inlined_call_operand.vmem [shape: f32[1,32], index: 11, kind: input, shape index: {}]   ;;  %s3829_s12 = inlined_call_operand.vmem [shape: f32[1,32], index: 12, kind: input, shape index: {}]   ;;  %s3830_s13 = inlined_call_operand.vmem [shape: bf16[32,128], index: 13, kind: input, shape index: {}]   ;;  %s3831_s14 = inlined_call_operand.vmem [shape: f32[1,128], index: 14, kind: input, shape index: {}]   ;;  %s3832_s15 = inlined_call_operand.vmem [shape: bf16[128,32], index: 15, kind: input, shape index: {}]   ;;  %s3833_s16 = inlined_call_operand.vmem [shape: f32[1,32], index: 16, kind: input, shape index: {}]   ;;  %s3834_s17 = inlined_call_operand.vmem [shape: f32[1,32], index: 17, kind: input, shape index: {}, may-alias: {1,17}]   ;;  %s3835_s18 = inlined_call_operand.vmem [shape: f32[1,32], index: 18, kind: input, shape index: {}, may-alias: {2,18}]   ;;  %s3836_s19 = inlined_call_operand.vmem [shape: bf16[2,16,32], index: 19, kind: output, shape index: {}]  }
   0x1   :  { %3838 = sst [smem:[#allocation2_spill]] %s3817_s0  ;;  %s3323_s0 = smov 0  }
   0x2   :  { %3839 = sst [smem:[#allocation3_spill]] %s3818_s1 }
   0x3   :  { %3840 = sst [smem:[#allocation4_spill]] %s3819_s2 }
   0x4   :  { %3841 = sst [smem:[#allocation5_spill]] %s3820_s3 }
   0x5 LB: > { %s2884_s30 = sadd.s32 4294967295, %s3211_s0   ;;  %p2888_p0 = scmp.ge.s32.totalorder %s3211_s0, 1  ;;  %s3211_s0 = sphi %s3323_s0, %s29_s0  }
   0x6   : > { %p537_p1 = scmp.lt.s32.totalorder %s3211_s0, 3 }
   0x8   : > { %p538_p2 = pnand %p2888_p0, %p537_p1 }
   0x9   : > { %p593_p3 = scmp.lt.s32.totalorder (!%p538_p2), %s2884_s30, 1  ;;  %s3842_s21 = sld [smem:[#allocation2_spill]] (!%p538_p2)  ;;  %vm610_vm0 = vcmask (!%p538_p2), 261120   ;;  %v3213_v16 = vmov (!%p538_p2), 0.0   ;;  %vm3214_vm1 = vmmov (!%p538_p2), 0   ;;  %v3145_v34 = vld [vmem:[%s3822_s5] sm:$0xff] (!%p538_p2)   ;;  %v882_v61 = vlaneseq (!%p538_p2) }
   0xa   : > { %541 = sbr.rel (%p538_p2) target bundleno = 2674 (0xa72), region = 96  ;;  %s3843_s23 = sld [smem:[#allocation5_spill]] (!%p538_p2)  ;;  %3002 = vmatprep.subr.bf16.mxu0 (!%p538_p2), %v3213_v16  ;;  %3026 = vmatprep.subr.bf16.mxu1 (!%p538_p2), %v3213_v16  ;;  %v3146_v36 = vld [vmem:[%s3822_s5 + $0x8] sm:$0xff] (!%p538_p2)   ;;  %v3147_v37 = vld [vmem:[%s3824_s7] sm:$0xff] (!%p538_p2)   ;;  %v3218_v59 = vmov (!%p538_p2), 1983009808  }
   0xb   : > { %3006 = vmatprep.mubr.msk.bf16.mxu0 (!%p538_p2), %vm3214_vm1, %v3213_v16  ;;  %3028 = vmatprep.mubr.msk.bf16.mxu1 (!%p538_p2), %vm3214_vm1, %v3213_v16  ;;  %s3844_s27 = sld [smem:[#allocation3_spill]] (!%p538_p2)  ;;  %s3845_s18 = sld [smem:[#allocation4_spill]] (!%p538_p2)  ;;  %v3148_v38 = vld [vmem:[%s3824_s7 + $0x8] sm:$0xff] (!%p538_p2)   ;;  %v2895_v39 = vld [vmem:[%s3821_s4] ss:$0 sm:$0xff] (!%p538_p2)  ;;  %v880_v60 = vunpack.c.l.s4 (!%p538_p2), %v3218_v59  ;;  %vm1745_vm2 = vcmask (!%p538_p2), 64512  }
   0xc   : > { %s3215_s28 = smov (!%p538_p2), 120   ;;  %v2899_v48 = vld [vmem:[%s3823_s6] ss:$0 sm:$0xff] (!%p538_p2)  ;;  %s3216_s20 = smov (!%p538_p2), 112   ;;  %vm1934_vm3 = vcmask (!%p538_p2), 130048   ;;  %vm2503_vm4 = vcmask (!%p538_p2), 195584  }
   0xd   : > { %s3220_s26 = smov (!%p538_p2), 16   ;;  %vm2826_vm5 = vcmask (!%p538_p2), 257024  }
  0x10   : > { %v3143_v15 = vld [vmem:[%s3843_s23] sm:$0xff] (!%p538_p2)   ;;  %v3144_v17 = vld [vmem:[%s3843_s23 + $0x8] sm:$0xff] (!%p538_p2)  }
  0x11   : > { %s3847_s30 = smov (!%p593_p3, %s2884_s30), 1  ;;  %3003 = vmatpush3.bf16.msra.mxu0 %v3143_v15  ;;  %v2893_v26 = vld [vmem:[%s3844_s27] ss:$0 sm:$0xff]  ;;  %s3221_s27 = smov 8  }
  0x12   : > { %s2954_s17 = sshll.u32 %s3847_s30, 3  ;;  %3004 = vmatprep.subr.bf16.mxu0 %v3213_v16  ;;  %v2894_v30 = vld [vmem:[%s3845_s18] ss:$0 sm:$0xff] }
  0x13   : > { %s597_s1 = scalar_lea.vmem %s3842_s21, %s2954_s17  ;;  %s3217_s21 = smov 104  }
  0x14   : > { %v2959_v0 = vld [vmem:[%s597_s1] sm:$0xff]   ;;  %s602_s2 = scalar_lea.vmem %s3836_s19, %s2954_s17 }
  0x15   : > { %v3339_v1 = vunpack.c.l.bf16 %v2959_v0  ;;  %v3341_v2 = vunpack.c.h.bf16 %v2959_v0  ;;  %3005 = vmatpush3.bf16.msra.mxu0 %v3144_v17  ;;  %v3219_v0 = vmov 1934713408  }
  0x16   : > { %3010 = vmatprep.subr.bf16.mxu0 %v3213_v16 }
  0x17   : > { %v611_v3 = vsel %vm610_vm0, %v3339_v1, 0.0  ;;  %v614_v4 = vsel %vm610_vm0, %v3341_v2, 0.0 }
  0x18   : > { %612 = vadd.xlane.f32.xlu0 %v611_v3  ;;  %v912_v3 = vunpack.c.l.s4 %v3219_v0 }
  0x1c   : > { %615 = vadd.xlane.f32.xlu0 %v614_v4  ;;  %v881_v4 = vunpack.c.0.s8 %v880_v60 }
  0xa5   : > { %v613_v5 = vpop.xlane.xlu0 %612 }
  0xa6   : > { %v618_v6 = vmul.f32 0.03125, %v613_v5  ;;  %v883_v5 = vshrl.u32 %v882_v61, 7 }
  0xa8   : > { %v620_v7 = vsub.f32 %v3339_v1, %v618_v6 }
  0xa9   : > { %v616_v8 = vpop.xlane.xlu0 %615 }
  0xaa   : > { %v619_v9 = vmul.f32 0.03125, %v616_v8  ;;  %v622_v10 = vmul.f32 %v620_v7, %v620_v7  ;;  %v913_v8 = vunpack.c.0.s8 %v912_v3 }
  0xac   : > { %v621_v11 = vsub.f32 %v3341_v2, %v619_v9  ;;  %v624_v12 = vsel %vm610_vm0, %v622_v10, 0.0  ;;  %v3435_v9 = vsub.s32 %v881_v4, %v883_v5  ;;  %v3437_v17 = vsub.s32 %v913_v8, %v883_v5 }
  0xad   : > { %625 = vadd.xlane.f32.xlu1 %v624_v12 }
  0xae   : > { %v623_v13 = vmul.f32 %v621_v11, %v621_v11 }
  0xb0   : > { %v627_v14 = vsel %vm610_vm0, %v623_v13, 0.0 }
  0xb1   : > { %628 = vadd.xlane.f32.xlu1 %v627_v14 }
 0x13a   : > { %v626_v18 = vpop.xlane.xlu1 %625 }
 0x13b   : > { %v630_v19 = vmul.f32 0.03125, %v626_v18 }
 0x13d   : > { %v632_v20 = vadd.f32 1e-05, %v630_v19 }
 0x13e   : > { %v629_v21 = vpop.xlane.xlu1 %628 }
 0x13f   : > { %3161 = vrsqrt.f32 %v632_v20  ;;  %v631_v22 = vmul.f32 0.03125, %v629_v21 }
 0x141   : > { %v633_v23 = vadd.f32 1e-05, %v631_v22 }
 0x143   : > { %3163 = vrsqrt.f32 %v633_v23 }
 0x149   : > { %v3162_v24 = vpop.eup %3161 }
 0x14a   : > { %v636_v25 = vmul.f32 %v3162_v24, %v620_v7 }
 0x14c   : > { %v644_v29 = vmul.f32 %v2893_v26, %v636_v25 }
 0x14d   : > { %v3164_v27 = vpop.eup %3163 }
 0x14e   : > { %v637_v28 = vmul.f32 %v3164_v27, %v621_v11  ;;  %v652_v32 = vadd.f32 %v2894_v30, %v644_v29 }
 0x150   : > { %v645_v31 = vmul.f32 %v2893_v26, %v637_v28 }
 0x152   : > { %v653_v33 = vadd.f32 %v2894_v30, %v645_v31 }
 0x154   : > { %v658_v35 = vpack.c.bf16 %v653_v33, %v652_v32 }
 0x156   : > { %3007 = vmatmul.mubr.msk.bf16.vlgmr.msra.gmra.mrb[0].mxu0 %vm610_vm0, %v658_v35 }
 0x157   : > { %3011 = vmatpush3.bf16.msra.mxu0 %v3145_v34  ;;  %3014 = vmatprep.mubr.msk.bf16.mxu0 %vm3214_vm1, %v3213_v16 }
 0x158   : > { %3012 = vmatprep.subr.bf16.mxu0 %v3213_v16 }
 0x15b   : > { %3013 = vmatpush3.bf16.msra.mxu0 %v3146_v36 }
 0x15c   : > { %3018 = vmatprep.subr.bf16.mxu0 %v3213_v16 }
 0x15e   : > { %3015 = vmatmul.mubr.msk.bf16.vlgmr.msra.gmra.mrb[4].mxu0 %vm610_vm0, %v658_v35 }
 0x15f   : > { %3019 = vmatpush3.bf16.msra.mxu0 %v3147_v37  ;;  %3022 = vmatprep.mubr.msk.bf16.mxu0 %vm3214_vm1, %v3213_v16 }
 0x160   : > { %3020 = vmatprep.subr.bf16.mxu0 %v3213_v16 }
 0x163   : > { %3021 = vmatpush3.bf16.msra.mxu0 %v3148_v38 }
 0x164   : > { %3032 = vmatprep.subr.bf16.mxu0 %v3213_v16 }
 0x166   : > { %3023 = vmatmul.mubr.msk.bf16.vlgmr.msra.gmra.mrb[8].mxu0 %vm610_vm0, %v658_v35 }
 0x167   : > { %3034 = vmatprep.mubr.msk.bf16.mxu0 %vm3214_vm1, %v3213_v16 }
 0x229   : > { %v715_v40 = vpop.f32.mrb[0].mxu0 }
 0x22a   : > { %v716_v41 = vadd.f32 %v2895_v39, %v715_v40  ;;  %v3008_v42 = vpop.f32.mrb[1].mxu0 }
 0x22b   : > { %v718_v43 = vpop.f32.mrb[2].mxu0 }
 0x22c   : > { %v3399_v44 = vmul.f32 0.35355338, %v716_v41  ;;  %v719_v45 = vadd.f32 %v2895_v39, %v718_v43  ;;  %v3009_v46 = vpop.f32.mrb[3].mxu0 }
 0x22e   : > { %v3401_v47 = vmul.f32 0.35355338, %v719_v45  ;;  %859 = vrot.lane.b32.xlu0 %v3399_v44, %s3215_s28 }
 0x230   : > { %861 = vrot.lane.b32.xlu1 %v3401_v47, %s3215_s28 }
 0x231   : > { %v779_v49 = vpop.f32.mrb[4].mxu0 }
 0x232   : > { %v780_v50 = vadd.f32 %v2899_v48, %v779_v49  ;;  %v3016_v51 = vpop.f32.mrb[5].mxu0 }
 0x233   : > { %v782_v52 = vpop.f32.mrb[6].mxu0 }
 0x234   : > { %1161 = vrot.lane.b32.xlu1 %v780_v50, %s3216_s20  ;;  %1155 = vrot.lane.b32.xlu0 %v780_v50, %s3215_s28  ;;  %v3017_v53 = vpop.f32.mrb[7].mxu0  ;;  %v3412_v54 = vadd.f32 %v2899_v48, %v782_v52 }
 0x238   : > { %1167 = vrot.lane.b32.xlu0 %v780_v50, %s3217_s21  ;;  %1157 = vrot.lane.b32.xlu1 %v3412_v54, %s3215_s28 }
 0x239   : > { %v3417_v55 = vpop.f32.mrb[8].mxu0 }
 0x23a   : > { %v3024_v56 = vpop.f32.mrb[9].mxu0 }
 0x23b   : > { %v3419_v57 = vpop.f32.mrb[10].mxu0 }
 0x23c   : > { %865 = vrot.lane.b32.xlu0 %v3399_v44, %s3216_s20  ;;  %1163 = vrot.lane.b32.xlu1 %v3412_v54, %s3216_s20  ;;  %v3025_v58 = vpop.f32.mrb[11].mxu0 }
 0x240   : > { %871 = vrot.lane.b32.xlu0 %v3399_v44, %s3217_s21  ;;  %1169 = vrot.lane.b32.xlu1 %v3412_v54, %s3217_s21 }
 0x244   : > { %867 = vrot.lane.b32.xlu1 %v3401_v47, %s3216_s20 }
 0x248   : > { %873 = vrot.lane.b32.xlu1 %v3401_v47, %s3217_s21 }
 0x2a0   : > { %v860_v62 = vpop.permute.xlu0 %859 }
 0x2a2   : > { %v3433_v63 = vpop.permute.xlu1 %861 }
 0x2a6   : > { %v1162_v6 = vpop.permute.xlu1 %1161  ;;  %v1156_v7 = vpop.permute.xlu0 %1155 }
 0x2a7   : > { %v1173_v10 = vcombine.low %v780_v50, %v1162_v6  ;;  %v1174_v11 = vcombine.high %v780_v50, %v1162_v6 }
 0x2a9   : > { %v1181_v18 = vrot.slane %v1173_v10, %v3435_v9  ;;  %v1188_v19 = vrot.slane %v1174_v11, %v3435_v9 }
 0x2aa   : > { %v1168_v12 = vpop.permute.xlu0 %1167  ;;  %v1158_v13 = vpop.permute.xlu1 %1157 }
 0x2ab   : > { %v1189_v14 = vcombine.low %v1156_v7, %v1168_v12  ;;  %v1190_v15 = vcombine.high %v1156_v7, %v1168_v12 }
 0x2ad   : > { %v1197_v20 = vrot.slane %v1189_v14, %v3435_v9  ;;  %v1204_v21 = vrot.slane %v1190_v15, %v3435_v9 }
 0x2ae   : > { %v866_v22 = vpop.permute.xlu0 %865  ;;  %v1164_v23 = vpop.permute.xlu1 %1163 }
 0x2af   : > { %v1205_v24 = vcombine.low %v1181_v18, %v1197_v20  ;;  %v1206_v25 = vcombine.high %v1181_v18, %v1197_v20  ;;  %v1221_v26 = vcombine.low %v1188_v19, %v1204_v21  ;;  %v1222_v27 = vcombine.high %v1188_v19, %v1204_v21 }
 0x2b0   : > { %v877_v28 = vcombine.low %v3399_v44, %v866_v22  ;;  %v878_v29 = vcombine.high %v3399_v44, %v866_v22  ;;  %v1241_v30 = vcombine.low %v3412_v54, %v1164_v23  ;;  %v1242_v31 = vcombine.high %v3412_v54, %v1164_v23 }
 0x2b1   : > { %v1213_v32 = vrot.slane %v1205_v24, %v3437_v17  ;;  %v1220_v33 = vrot.slane %v1206_v25, %v3437_v17  ;;  %v1229_v34 = vrot.slane %v1221_v26, %v3437_v17  ;;  %v1236_v35 = vrot.slane %v1222_v27, %v3437_v17 }
 0x2b2   : > { %v872_v36 = vpop.permute.xlu0 %871  ;;  %v1170_v37 = vpop.permute.xlu1 %1169  ;;  %v885_v46 = vrot.slane %v877_v28, %v3435_v9  ;;  %v892_v48 = vrot.slane %v878_v29, %v3435_v9  ;;  %v1249_v49 = vrot.slane %v1241_v30, %v3435_v9  ;;  %v1256_v50 = vrot.slane %v1242_v31, %v3435_v9 }
 0x2b3   : > { %v1309_v38 = vcombine.low %v1213_v32, %v1220_v33  ;;  %v2911_v39 = vcombine.high %v1213_v32, %v1220_v33  ;;  %v1325_v40 = vcombine.low %v1229_v34, %v1236_v35  ;;  %v2912_v41 = vcombine.high %v1229_v34, %v1236_v35 }
 0x2b4   : > { %v893_v42 = vcombine.low %v860_v62, %v872_v36  ;;  %v894_v43 = vcombine.high %v860_v62, %v872_v36  ;;  %v1257_v44 = vcombine.low %v1158_v13, %v1170_v37  ;;  %v1258_v45 = vcombine.high %v1158_v13, %v1170_v37 }
 0x2b5   : > { %v3460_v58 = vrot.slane %v1309_v38, %v3435_v9  ;;  %v3463_v59 = vrot.slane %v2911_v39, %v3435_v9  ;;  %v3466_v60 = vrot.slane %v1325_v40, %v3435_v9  ;;  %v3469_v61 = vrot.slane %v2912_v41, %v3435_v9 }
 0x2b6   : > { %v901_v51 = vrot.slane %v893_v42, %v3435_v9  ;;  %v908_v52 = vrot.slane %v894_v43, %v3435_v9  ;;  %v1265_v53 = vrot.slane %v1257_v44, %v3435_v9  ;;  %v1272_v54 = vrot.slane %v1258_v45, %v3435_v9  ;;  %v868_v56 = vpop.permute.xlu1 %867 }
 0x2b7   : > { %v945_v21 = vcombine.low %v3401_v47, %v868_v56  ;;  %v946_v22 = vcombine.high %v3401_v47, %v868_v56  ;;  %v1341_v28 = vcombine.low %v3460_v58, %v3463_v59  ;;  %v1357_v29 = vcombine.low %v3466_v60, %v3469_v61 }
 0x2b8   : > { %v909_v62 = vcombine.low %v885_v46, %v901_v51  ;;  %v910_v0 = vcombine.high %v885_v46, %v901_v51  ;;  %v925_v3 = vcombine.low %v892_v48, %v908_v52  ;;  %v926_v4 = vcombine.high %v892_v48, %v908_v52 }
 0x2b9   : > { %v1273_v5 = vcombine.low %v1249_v49, %v1265_v53  ;;  %v1274_v6 = vcombine.high %v1249_v49, %v1265_v53  ;;  %v1289_v7 = vcombine.low %v1256_v50, %v1272_v54  ;;  %v1290_v8 = vcombine.high %v1256_v50, %v1272_v54 }
 0x2ba   : > { %v917_v10 = vrot.slane %v909_v62, %v3437_v17  ;;  %v924_v11 = vrot.slane %v910_v0, %v3437_v17  ;;  %v933_v12 = vrot.slane %v925_v3, %v3437_v17  ;;  %v940_v13 = vrot.slane %v926_v4, %v3437_v17  ;;  %v874_v23 = vpop.permute.xlu1 %873 }
 0x2bb   : > { %v1281_v14 = vrot.slane %v1273_v5, %v3437_v17  ;;  %v1288_v15 = vrot.slane %v1274_v6, %v3437_v17  ;;  %v1297_v18 = vrot.slane %v1289_v7, %v3437_v17  ;;  %v1304_v19 = vrot.slane %v1290_v8, %v3437_v17 }
 0x2bc   : > { %v1013_v20 = vcombine.low %v917_v10, %v924_v11  ;;  %v2907_v26 = vcombine.high %v917_v10, %v924_v11  ;;  %v1029_v30 = vcombine.low %v933_v12, %v940_v13  ;;  %v2908_v31 = vcombine.high %v933_v12, %v940_v13 }
 0x2bd   : > { %v1377_v24 = vcombine.low %v1281_v14, %v1288_v15  ;;  %v2913_v25 = vcombine.high %v1281_v14, %v1288_v15  ;;  %v1393_v27 = vcombine.low %v1297_v18, %v1304_v19  ;;  %v961_v32 = vcombine.low %v3433_v63, %v874_v23 }
 0x2be   : > { %v962_v33 = vcombine.high %v3433_v63, %v874_v23  ;;  %v3488_v34 = vrot.slane %v1013_v20, %v3435_v9  ;;  %v2914_v47 = vcombine.high %v1297_v18, %v1304_v19  ;;  %v953_v35 = vrot.slane %v945_v21, %v3435_v9 }
 0x2bf   : > { %v960_v36 = vrot.slane %v946_v22, %v3435_v9  ;;  %v969_v37 = vrot.slane %v961_v32, %v3435_v9  ;;  %v1384_v39 = vrot.slane %v1377_v24, %v3435_v9  ;;  %v1392_v40 = vrot.slane %v2913_v25, %v3435_v9 }
 0x2c0   : > { %v976_v38 = vrot.slane %v962_v33, %v3435_v9  ;;  %v3497_v41 = vrot.slane %v2907_v26, %v3435_v9  ;;  %v1349_v63 = vrot.slane %v1341_v28, %v3437_v17  ;;  %v1365_v42 = vrot.slane %v1357_v29, %v3437_v17 }
 0x2c1   : > { %v1400_v43 = vrot.slane %v1393_v27, %v3435_v9  ;;  %v977_v44 = vcombine.low %v953_v35, %v969_v37  ;;  %v978_v45 = vcombine.high %v953_v35, %v969_v37  ;;  %v3503_v49 = vrot.slane %v1029_v30, %v3435_v9 }
 0x2c2   : > { %v993_v46 = vcombine.low %v960_v36, %v976_v38  ;;  %v994_v48 = vcombine.high %v960_v36, %v976_v38  ;;  %v3506_v50 = vrot.slane %v2908_v31, %v3435_v9  ;;  %v1408_v51 = vrot.slane %v2914_v47, %v3435_v9 }
 0x2c3   : > { %v1409_v52 = vcombine.low %v1384_v39, %v1392_v40  ;;  %v985_v53 = vrot.slane %v977_v44, %v3437_v17  ;;  %v992_v54 = vrot.slane %v978_v45, %v3437_v17  ;;  %v1373_v0 = vcombine.low %v1349_v63, %v1365_v42 }
 0x2c4   : > { %v1001_v56 = vrot.slane %v993_v46, %v3437_v17  ;;  %v1008_v62 = vrot.slane %v994_v48, %v3437_v17  ;;  %v1425_v4 = vcombine.low %v1400_v43, %v1408_v51  ;;  %v1045_v11 = vcombine.low %v3488_v34, %v3497_v41 }
 0x2c5   : > { %v1417_v3 = vrot.slane %v1409_v52, %v3437_v17  ;;  %v1081_v5 = vcombine.low %v985_v53, %v992_v54  ;;  %v2909_v6 = vcombine.high %v985_v53, %v992_v54  ;;  %v1061_v12 = vcombine.low %v3503_v49, %v3506_v50 }
 0x2c6   : > { %v1097_v7 = vcombine.low %v1001_v56, %v1008_v62  ;;  %v2910_v8 = vcombine.high %v1001_v56, %v1008_v62  ;;  %v1433_v10 = vrot.slane %v1425_v4, %v3437_v17  ;;  %v1342_v13 = vcombine.high %v3460_v58, %v3463_v59 }
 0x2c7   : > { %v1088_v14 = vrot.slane %v1081_v5, %v3435_v9  ;;  %v1096_v15 = vrot.slane %v2909_v6, %v3435_v9  ;;  %v1374_v21 = vcombine.high %v1349_v63, %v1365_v42  ;;  %v1358_v23 = vcombine.high %v3466_v60, %v3469_v61 }
 0x2c8   : > { %v1104_v18 = vrot.slane %v1097_v7, %v3435_v9  ;;  %v1112_v19 = vrot.slane %v2910_v8, %v3435_v9  ;;  %v1441_v20 = vcombine.low %v1417_v3, %v1433_v10  ;;  %v1442_v22 = vcombine.high %v1417_v3, %v1433_v10 }
 0x2c9   : > { %v1113_v24 = vcombine.low %v1088_v14, %v1096_v15  ;;  %v1053_v58 = vrot.slane %v1045_v11, %v3437_v17  ;;  %v1069_v59 = vrot.slane %v1061_v12, %v3437_v17  ;;  %v1356_v30 = vrot.slane %v1342_v13, %v3437_v17 }
 0x2ca   : > { %v1129_v25 = vcombine.low %v1104_v18, %v1112_v19  ;;  %v1445_v26 = vpack.c.bf16 %v1441_v20, %v1373_v0  ;;  %v1446_v27 = vpack.c.bf16 %v1442_v22, %v1374_v21  ;;  %v1372_v60 = vrot.slane %v1358_v23, %v3437_v17 }
 0x2cb   : > { %v1121_v28 = vrot.slane %v1113_v24, %v3437_v17  ;;  %v1410_v61 = vcombine.high %v1384_v39, %v1392_v40  ;;  %v1426_v35 = vcombine.high %v1400_v43, %v1408_v51  ;;  %v1077_v36 = vcombine.low %v1053_v58, %v1069_v59 }
 0x2cc   : > { %v1137_v29 = vrot.slane %v1129_v25, %v3437_v17  ;;  %v1750_v31 = vsel %vm1745_vm2, %v1445_v26, 0  ;;  %v1797_v32 = vsel %vm1745_vm2, %v1446_v27, 0  ;;  %v1078_v37 = vcombine.high %v1053_v58, %v1069_v59 }
 0x2cd   : > { %3027 = vmatpush3.bf16.xpose.msra.mxu1 %v1750_v31  ;;  %3033 = vmatpush3.bf16.xpose.msra.mxu0 %v1797_v32  ;;  %v1424_v38 = vrot.slane %v1410_v61, %v3437_v17  ;;  %v1114_v63 = vcombine.high %v1088_v14, %v1096_v15  ;;  %v1130_v42 = vcombine.high %v1104_v18, %v1112_v19  ;;  %v2903_v31 = vld [vmem:[%s3825_s8] ss:$0 sm:$0xff] }
 0x2ce   : > { %v1145_v33 = vcombine.low %v1121_v28, %v1137_v29  ;;  %v1146_v47 = vcombine.high %v1121_v28, %v1137_v29  ;;  %3038 = vmatprep.subr.bf16.mxu1 %v3213_v16  ;;  %3044 = vmatprep.subr.bf16.mxu0 %v3213_v16  ;;  %v1440_v44 = vrot.slane %v1426_v35, %v3437_v17 }
 0x2cf   : > { %v1046_v39 = vcombine.high %v3488_v34, %v3497_v41  ;;  %v1062_v40 = vcombine.high %v3503_v49, %v3506_v50  ;;  %v1375_v46 = vcombine.low %v1356_v30, %v1372_v60  ;;  %v1376_v51 = vcombine.high %v1356_v30, %v1372_v60 }
 0x2d0   : > { %v1149_v45 = vpack.c.bf16 %v1145_v33, %v1077_v36  ;;  %v1150_v43 = vpack.c.bf16 %v1146_v47, %v1078_v37  ;;  %v1443_v48 = vcombine.low %v1424_v38, %v1440_v44  ;;  %v1444_v52 = vcombine.high %v1424_v38, %v1440_v44 }
 0x2d1   : > { %v1128_v53 = vrot.slane %v1114_v63, %v3437_v17  ;;  %v1144_v54 = vrot.slane %v1130_v42, %v3437_v17  ;;  %v1060_v34 = vrot.slane %v1046_v39, %v3437_v17  ;;  %v1076_v41 = vrot.slane %v1062_v40, %v3437_v17 }
 0x2d2   : > { %v1447_v56 = vpack.c.bf16 %v1443_v48, %v1375_v46  ;;  %v1448_v62 = vpack.c.bf16 %v1444_v52, %v1376_v51  ;;  %v3577_v32 = vadd.f32 %v2903_v31, %v3419_v57  ;;  %v3582_v60 = vadd.f32 %v2903_v31, %v3417_v55 }
 0x2d3   : > { %v1147_v0 = vcombine.low %v1128_v53, %v1144_v54  ;;  %v1148_v3 = vcombine.high %v1128_v53, %v1144_v54  ;;  %v1079_v4 = vcombine.low %v1060_v34, %v1076_v41  ;;  %v1080_v5 = vcombine.high %v1060_v34, %v1076_v41 }
 0x2d4   : > { %3029 = vmatmul.mubr.msk.bf16.vlgmr.msra.gmra.mrb[0].mxu1 %vm1745_vm2, %v1149_v45  ;;  %3035 = vmatmul.mubr.msk.bf16.vlgmr.msra.gmra.mrb[12].mxu0 %vm1745_vm2, %v1150_v43  ;;  %v1844_v49 = vsel %vm1745_vm2, %v1447_v56, 0  ;;  %v1891_v50 = vsel %vm1745_vm2, %v1448_v62, 0 }
 0x2d5   : > { %3040 = vmatprep.mubr.msk.bf16.mxu1 %vm3214_vm1, %v3213_v16  ;;  %3046 = vmatprep.mubr.msk.bf16.mxu0 %vm3214_vm1, %v3213_v16  ;;  %v1151_v6 = vpack.c.bf16 %v1147_v0, %v1079_v4  ;;  %v1152_v7 = vpack.c.bf16 %v1148_v3, %v1080_v5 }
 0x2d6   : > { %3039 = vmatpush3.bf16.xpose.msra.mxu1 %v1844_v49  ;;  %3045 = vmatpush3.bf16.xpose.msra.mxu0 %v1891_v50 }
 0x2d7   : > { %3050 = vmatprep.subr.bf16.mxu1 %v3213_v16  ;;  %3056 = vmatprep.subr.bf16.mxu0 %v3213_v16 }
 0x2dd   : > { %3041 = vmatmul.mubr.msk.bf16.vlgmr.msra.gmra.mrb[4].mxu1 %vm1745_vm2, %v1151_v6  ;;  %3047 = vmatmul.mubr.msk.bf16.vlgmr.msra.gmra.mrb[16].mxu0 %vm1745_vm2, %v1152_v7 }
 0x2de   : > { %3052 = vmatprep.mubr.msk.bf16.mxu1 %vm3214_vm1, %v3213_v16  ;;  %3058 = vmatprep.mubr.msk.bf16.mxu0 %vm3214_vm1, %v3213_v16 }
 0x3a7   : > { %v1786_v8 = vpop.f32.mrb[0].mxu1  ;;  %v1833_v10 = vpop.f32.mrb[12].mxu0 }
 0x3a8   : > { %v3030_v11 = vpop.f32.mrb[1].mxu1  ;;  %v3036_v12 = vpop.f32.mrb[13].mxu0  ;;  %v1935_v13 = vsel %vm1934_vm3, %v1786_v8, -inf  ;;  %v1941_v21 = vsel %vm1934_vm3, %v1833_v10, -inf }
 0x3a9   : > { %1936 = vmax.xlane.f32.xlu0 %v1935_v13  ;;  %v1789_v14 = vpop.f32.mrb[2].mxu1  ;;  %v1836_v15 = vpop.f32.mrb[14].mxu0 }
 0x3aa   : > { %v3031_v18 = vpop.f32.mrb[3].mxu1  ;;  %v3037_v19 = vpop.f32.mrb[15].mxu0  ;;  %v1938_v20 = vsel %vm1934_vm3, %v1789_v14, -inf  ;;  %v1944_v24 = vsel %vm1934_vm3, %v1836_v15, -inf }
 0x3ab   : > { %1939 = vmax.xlane.f32.xlu1 %v1938_v20 }
 0x3ad   : > { %1942 = vmax.xlane.f32.xlu0 %v1941_v21 }
 0x3b0   : > { %v1880_v22 = vpop.f32.mrb[4].mxu1  ;;  %v1927_v23 = vpop.f32.mrb[16].mxu0 }
 0x3b1   : > { %v3042_v25 = vpop.f32.mrb[5].mxu1  ;;  %v3048_v26 = vpop.f32.mrb[17].mxu0  ;;  %1945 = vmax.xlane.f32.xlu0 %v1944_v24  ;;  %v1947_v29 = vsel %vm1934_vm3, %v1880_v22, -inf  ;;  %v1953_v30 = vsel %vm1934_vm3, %v1927_v23, -inf }
 0x3b2   : > { %v3567_v27 = vpop.f32.mrb[6].mxu1  ;;  %v3569_v58 = vpop.f32.mrb[18].mxu0 }
 0x3b3   : > { %v3043_v59 = vpop.f32.mrb[7].mxu1  ;;  %v3049_v28 = vpop.f32.mrb[19].mxu0  ;;  %v1950_v61 = vsel %vm1934_vm3, %v3567_v27, -inf  ;;  %v1956_v57 = vsel %vm1934_vm3, %v3569_v58, -inf }
 0x3b5   : > { %1948 = vmax.xlane.f32.xlu0 %v1947_v29 }
 0x3b9   : > { %1954 = vmax.xlane.f32.xlu0 %v1953_v30 }
 0x3bc   : > { %1453 = vrot.lane.b32.xlu1 %v3577_v32, %s3215_s28 }
 0x3c0   : > { %1457 = vrot.lane.b32.xlu1 %v3582_v60, %s3216_s20 }
 0x3cf   : > { %1451 = vrot.lane.b32.xlu0 %v3582_v60, %s3215_s28  ;;  %s3222_s28 = smov 24  }
 0x3d3   : > { %1463 = vrot.lane.b32.xlu0 %v3582_v60, %s3217_s21 }
 0x3e4   : > { %1951 = vmax.xlane.f32.xlu1 %v1950_v61 }
 0x3e8   : > { %1957 = vmax.xlane.f32.xlu1 %v1956_v57 }
 0x3f9   : > { %1459 = vrot.lane.b32.xlu1 %v3577_v32, %s3216_s20 }
 0x436   : > { %v1937_v55 = vpop.xlane.xlu0 %1936 }
 0x437   : > { %v1959_v33 = vsub.f32 %v1786_v8, %v1937_v55 }
 0x438   : > { %v1940_v47 = vpop.xlane.xlu1 %1939 }
 0x439   : > { %v1967_v35 = vmul.f32 1.442695, %v1959_v33  ;;  %v1960_v36 = vsub.f32 %v1789_v14, %v1940_v47 }
 0x43a   : > { %v1943_v37 = vpop.xlane.xlu0 %1942 }
 0x43b   : > { %3165 = vpow2.f32 %v1967_v35  ;;  %v1969_v38 = vmul.f32 1.442695, %v1960_v36  ;;  %v1961_v63 = vsub.f32 %v1833_v10, %v1943_v37 }
 0x43c   : > { %v1454_v6 = vpop.permute.xlu1 %1453 }
 0x43d   : > { %3167 = vpow2.f32 %v1969_v38  ;;  %v1971_v42 = vmul.f32 1.442695, %v1961_v63 }
 0x43e   : > { %v1946_v44 = vpop.xlane.xlu0 %1945 }
 0x43f   : > { %3169 = vpow2.f32 %v1971_v42  ;;  %v1962_v39 = vsub.f32 %v1836_v15, %v1946_v44 }
 0x440   : > { %v1458_v7 = vpop.permute.xlu1 %1457 }
 0x441   : > { %v1973_v40 = vmul.f32 1.442695, %v1962_v39  ;;  %v1469_v24 = vcombine.low %v3582_v60, %v1458_v7  ;;  %v1470_v26 = vcombine.high %v3582_v60, %v1458_v7 }
 0x442   : > { %v1949_v45 = vpop.xlane.xlu0 %1948 }
 0x443   : > { %3171 = vpow2.f32 %v1973_v40  ;;  %v1963_v43 = vsub.f32 %v1880_v22, %v1949_v45  ;;  %v1484_v29 = vrot.slane %v1470_v26, %v3435_v9 }
 0x445   : > { %v3596_v46 = vpop.eup %3165  ;;  %v1975_v48 = vmul.f32 1.442695, %v1963_v43 }
 0x446   : > { %v1955_v51 = vpop.xlane.xlu0 %1954  ;;  %v1983_v52 = vsel %vm1934_vm3, %v3596_v46, 0.0 }
 0x447   : > { %v3600_v53 = vpop.eup %3167  ;;  %3173 = vpow2.f32 %v1975_v48  ;;  %v1965_v54 = vsub.f32 %v1927_v23, %v1955_v51  ;;  %1984 = vadd.xlane.f32.xlu0 %v1983_v52 }
 0x448   : > { %v1986_v56 = vsel %vm1934_vm3, %v3600_v53, 0.0 }
 0x449   : > { %v3604_v62 = vpop.eup %3169  ;;  %v1979_v34 = vmul.f32 1.442695, %v1965_v54  ;;  %1987 = vadd.xlane.f32.xlu1 %v1986_v56 }
 0x44a   : > { %v1989_v41 = vsel %vm1934_vm3, %v3604_v62, 0.0  ;;  %v1452_v21 = vpop.permute.xlu0 %1451 }
 0x44b   : > { %3175 = vpow2.f32 %v1979_v34  ;;  %1990 = vadd.xlane.f32.xlu0 %v1989_v41 }
 0x44d   : > { %v3608_v49 = vpop.eup %3171 }
 0x44e   : > { %v1992_v50 = vsel %vm1934_vm3, %v3608_v49, 0.0  ;;  %v1464_v22 = vpop.permute.xlu0 %1463 }
 0x44f   : > { %1993 = vadd.xlane.f32.xlu1 %v1992_v50  ;;  %v1485_v23 = vcombine.low %v1452_v21, %v1464_v22  ;;  %v1486_v25 = vcombine.high %v1452_v21, %v1464_v22 }
 0x451   : > { %v3612_v0 = vpop.eup %3173  ;;  %v1500_v59 = vrot.slane %v1486_v25, %v3435_v9 }
 0x452   : > { %v1995_v3 = vsel %vm1934_vm3, %v3612_v0, 0.0 }
 0x453   : > { %1996 = vadd.xlane.f32.xlu0 %v1995_v3  ;;  %v1517_v61 = vcombine.low %v1484_v29, %v1500_v59  ;;  %v1518_v57 = vcombine.high %v1484_v29, %v1500_v59 }
 0x455   : > { %v3616_v4 = vpop.eup %3175  ;;  %v1525_v60 = vrot.slane %v1517_v61, %v3437_v17  ;;  %v1532_v35 = vrot.slane %v1518_v57, %v3437_v17 }
 0x456   : > { %v2001_v5 = vsel %vm1934_vm3, %v3616_v4, 0.0 }
 0x457   : > { %2002 = vadd.xlane.f32.xlu0 %v2001_v5  ;;  %v1621_v39 = vcombine.low %v1525_v60, %v1532_v35  ;;  %v2916_v40 = vcombine.high %v1525_v60, %v1532_v35 }
 0x459   : > { %v1628_v50 = vrot.slane %v1621_v39, %v3435_v9  ;;  %v1636_v3 = vrot.slane %v2916_v40, %v3435_v9 }
 0x460   : > { %1465 = vrot.lane.b32.xlu1 %v3577_v32, %s3217_s21 }
 0x471   : > { %v1952_v8 = vpop.xlane.xlu1 %1951 }
 0x472   : > { %v1964_v10 = vsub.f32 %v3567_v27, %v1952_v8  ;;  %v1493_v27 = vrot.slane %v1485_v23, %v3435_v9 }
 0x474   : > { %v1977_v11 = vmul.f32 1.442695, %v1964_v10 }
 0x475   : > { %v1958_v12 = vpop.xlane.xlu1 %1957 }
 0x476   : > { %3177 = vpow2.f32 %v1977_v11  ;;  %v1966_v13 = vsub.f32 %v3569_v58, %v1958_v12  ;;  %v1477_v58 = vrot.slane %v1469_v24, %v3435_v9 }
 0x478   : > { %v1981_v14 = vmul.f32 1.442695, %v1966_v13  ;;  %v1501_v30 = vcombine.low %v1477_v58, %v1493_v27  ;;  %v1502_v31 = vcombine.high %v1477_v58, %v1493_v27 }
 0x479   : > { %v1460_v28 = vpop.permute.xlu1 %1459 }
 0x47a   : > { %3179 = vpow2.f32 %v1981_v14  ;;  %v1509_v33 = vrot.slane %v1501_v30, %v3437_v17  ;;  %v1516_v47 = vrot.slane %v1502_v31, %v3437_v17  ;;  %v1537_v63 = vcombine.low %v3577_v32, %v1460_v28 }
 0x47b   : > { %v1538_v42 = vcombine.high %v3577_v32, %v1460_v28  ;;  %v1654_v30 = vcombine.high %v1628_v50, %v1636_v3 }
 0x47c   : > { %v1605_v38 = vcombine.low %v1509_v33, %v1516_v47  ;;  %v2915_v44 = vcombine.high %v1509_v33, %v1516_v47  ;;  %v1545_v52 = vrot.slane %v1537_v63, %v3435_v9 }
 0x47d   : > { %v1552_v54 = vrot.slane %v1538_v42, %v3435_v9  ;;  %v1668_v42 = vrot.slane %v1654_v30, %v3437_v17 }
 0x47e   : > { %v1612_v51 = vrot.slane %v1605_v38, %v3435_v9  ;;  %v1620_v32 = vrot.slane %v2915_v44, %v3435_v9 }
 0x480   : > { %v3624_v15 = vpop.eup %3177  ;;  %v1637_v14 = vcombine.low %v1612_v51, %v1620_v32  ;;  %v1638_v29 = vcombine.high %v1612_v51, %v1620_v32 }
 0x481   : > { %v1998_v18 = vsel %vm1934_vm3, %v3624_v15, 0.0 }
 0x482   : > { %v1645_v59 = vrot.slane %v1637_v14, %v3437_v17  ;;  %v1652_v63 = vrot.slane %v1638_v29, %v3437_v17 }
 0x484   : > { %v3628_v19 = vpop.eup %3179  ;;  %1999 = vadd.xlane.f32.xlu1 %v1998_v18  ;;  %v1653_v18 = vcombine.low %v1628_v50, %v1636_v3  ;;  %v1671_v32 = vcombine.low %v1652_v63, %v1668_v42  ;;  %v1672_v50 = vcombine.high %v1652_v63, %v1668_v42 }
 0x485   : > { %v2004_v20 = vsel %vm1934_vm3, %v3628_v19, 0.0 }
 0x486   : > { %2005 = vadd.xlane.f32.xlu0 %v2004_v20  ;;  %v1661_v28 = vrot.slane %v1653_v18, %v3437_v17 }
 0x488   : > { %v1669_v44 = vcombine.low %v1645_v59, %v1661_v28  ;;  %v1670_v40 = vcombine.high %v1645_v59, %v1661_v28 }
 0x4d4   : > { %v1985_v37 = vpop.xlane.xlu0 %1984 }
 0x4d5   : > { %3181 = vrcp.f32 %v1985_v37 }
 0x4d6   : > { %v1988_v55 = vpop.xlane.xlu1 %1987 }
 0x4d7   : > { %3183 = vrcp.f32 %v1988_v55 }
 0x4d8   : > { %v1991_v56 = vpop.xlane.xlu0 %1990 }
 0x4dc   : > { %v1994_v36 = vpop.xlane.xlu1 %1993 }
 0x4dd   : > { %3185 = vrcp.f32 %v1994_v36 }
 0x4de   : > { %3187 = vrcp.f32 %v1991_v56 }
 0x4df   : > { %v3182_v58 = vpop.eup %3181 }
 0x4e0   : > { %v1466_v45 = vpop.permute.xlu1 %1465 }
 0x4e1   : > { %v1553_v43 = vcombine.low %v1454_v6, %v1466_v45  ;;  %v1554_v48 = vcombine.high %v1454_v6, %v1466_v45  ;;  %v3184_v31 = vpop.eup %3183 }
 0x4e3   : > { %v1561_v34 = vrot.slane %v1553_v43, %v3435_v9  ;;  %v1568_v41 = vrot.slane %v1554_v48, %v3435_v9  ;;  %v2016_v43 = vmul.f32 %v3184_v31, %v3600_v53 }
 0x4e5   : > { %v1569_v5 = vcombine.low %v1545_v52, %v1561_v34  ;;  %v1570_v6 = vcombine.high %v1545_v52, %v1561_v34  ;;  %v1585_v7 = vcombine.low %v1552_v54, %v1568_v41  ;;  %v1586_v8 = vcombine.high %v1552_v54, %v1568_v41 }
 0x4e6   : > { %v2015_v34 = vmul.f32 %v3182_v58, %v3596_v46  ;;  %v1997_v46 = vpop.xlane.xlu0 %1996 }
 0x4e7   : > { %v1577_v10 = vrot.slane %v1569_v5, %v3437_v17  ;;  %v1584_v11 = vrot.slane %v1570_v6, %v3437_v17  ;;  %v1593_v12 = vrot.slane %v1585_v7, %v3437_v17  ;;  %v1600_v13 = vrot.slane %v1586_v8, %v3437_v17  ;;  %v3186_v47 = vpop.eup %3185 }
 0x4e8   : > { %v3188_v38 = vpop.eup %3187  ;;  %v2018_v48 = vmul.f32 %v3186_v47, %v3608_v49  ;;  %v2023_v3 = vpack.c.bf16 %v2016_v43, %v2015_v34  ;;  %3189 = vrcp.f32 %v1997_v46 }
 0x4e9   : > { %v1673_v20 = vcombine.low %v1577_v10, %v1584_v11  ;;  %v2917_v21 = vcombine.high %v1577_v10, %v1584_v11  ;;  %v1689_v22 = vcombine.low %v1593_v12, %v1600_v13  ;;  %v2918_v23 = vcombine.high %v1593_v12, %v1600_v13 }
 0x4ea   : > { %v2017_v41 = vmul.f32 %v3188_v38, %v3604_v62  ;;  %v2003_v62 = vpop.xlane.xlu0 %2002 }
 0x4eb   : > { %v1680_v24 = vrot.slane %v1673_v20, %v3435_v9  ;;  %v1688_v25 = vrot.slane %v2917_v21, %v3435_v9  ;;  %v1696_v26 = vrot.slane %v1689_v22, %v3435_v9  ;;  %v1704_v27 = vrot.slane %v2918_v23, %v3435_v9 }
 0x4ec   : > { %v2024_v5 = vpack.c.bf16 %v2018_v48, %v2017_v41  ;;  %3191 = vrcp.f32 %v2003_v62 }
 0x4ed   : > { %v1705_v61 = vcombine.low %v1680_v24, %v1688_v25  ;;  %v1721_v57 = vcombine.low %v1696_v26, %v1704_v27  ;;  %v1706_v55 = vcombine.high %v1680_v24, %v1688_v25  ;;  %v1722_v33 = vcombine.high %v1696_v26, %v1704_v27 }
 0x4ef   : > { %v1713_v60 = vrot.slane %v1705_v61, %v3437_v17  ;;  %v1729_v35 = vrot.slane %v1721_v57, %v3437_v17  ;;  %v1720_v36 = vrot.slane %v1706_v55, %v3437_v17  ;;  %v1736_v37 = vrot.slane %v1722_v33, %v3437_v17 }
 0x4f1   : > { %v1737_v39 = vcombine.low %v1713_v60, %v1729_v35  ;;  %v1738_v45 = vcombine.high %v1713_v60, %v1729_v35  ;;  %v1739_v54 = vcombine.low %v1720_v36, %v1736_v37  ;;  %v1740_v56 = vcombine.high %v1720_v36, %v1736_v37 }
 0x4f2   : > { %v3190_v8 = vpop.eup %3189 }
 0x4f3   : > { %v1741_v51 = vpack.c.bf16 %v1737_v39, %v1669_v44  ;;  %v1742_v52 = vpack.c.bf16 %v1738_v45, %v1670_v40  ;;  %v1743_v53 = vpack.c.bf16 %v1739_v54, %v1671_v32  ;;  %v1744_v49 = vpack.c.bf16 %v1740_v56, %v1672_v50 }
 0x4f4   : > { %v2019_v12 = vmul.f32 %v3190_v8, %v3612_v0 }
 0x4f5   : > { %3051 = vmatpush3.bf16.msra.mxu1 %v1741_v51  ;;  %3057 = vmatpush3.bf16.msra.mxu0 %v1742_v52 }
 0x4f6   : > { %3062 = vmatprep.subr.bf16.mxu1 %v3213_v16  ;;  %3068 = vmatprep.subr.bf16.mxu0 %v3213_v16  ;;  %v3192_v10 = vpop.eup %3191 }
 0x4f7   : > { %v2021_v18 = vmul.f32 %v3192_v10, %v3616_v4 }
 0x4f8   : > { %3053 = vmatmul.mubr.msk.bf16.vlgmr.msra.gmra.mrb[8].mxu1 %vm1934_vm3, %v2023_v3  ;;  %3059 = vmatmul.mubr.msk.bf16.vlgmr.msra.gmra.mrb[20].mxu0 %vm1934_vm3, %v2024_v5 }
 0x4f9   : > { %3063 = vmatpush3.bf16.msra.mxu1 %v1743_v53  ;;  %3069 = vmatpush3.bf16.msra.mxu0 %v1744_v49 }
 0x4fa   : > { %3064 = vmatprep.mubr.msk.bf16.mxu1 %vm3214_vm1, %v3213_v16  ;;  %3070 = vmatprep.mubr.msk.bf16.mxu0 %vm3214_vm1, %v3213_v16 }
 0x4fb   : > { %3074 = vmatprep.subr.bf16.mxu1 %v3213_v16  ;;  %3082 = vmatprep.subr.bf16.mxu0 %v3213_v16 }
 0x511   : > { %v2000_v6 = vpop.xlane.xlu1 %1999 }
 0x512   : > { %3193 = vrcp.f32 %v2000_v6 }
 0x513   : > { %v2006_v7 = vpop.xlane.xlu0 %2005 }
 0x514   : > { %3195 = vrcp.f32 %v2006_v7 }
 0x51c   : > { %v3194_v11 = vpop.eup %3193 }
 0x51d   : > { %v2020_v13 = vmul.f32 %v3194_v11, %v3624_v15 }
 0x51e   : > { %v3196_v14 = vpop.eup %3195 }
 0x51f   : > { %v2022_v20 = vmul.f32 %v3196_v14, %v3628_v19  ;;  %v2025_v21 = vpack.c.bf16 %v2020_v13, %v2019_v12 }
 0x521   : > { %3065 = vmatmul.mubr.msk.bf16.vlgmr.msra.gmra.mrb[12].mxu1 %vm1934_vm3, %v2025_v21  ;;  %v2026_v22 = vpack.c.bf16 %v2022_v20, %v2021_v18 }
 0x522   : > { %3078 = vmatprep.mubr.msk.bf16.mxu1 %vm3214_vm1, %v3213_v16 }
 0x523   : > { %3071 = vmatmul.mubr.msk.bf16.vlgmr.msra.gmra.mrb[24].mxu0 %vm1934_vm3, %v2026_v22 }
 0x524   : > { %3086 = vmatprep.mubr.msk.bf16.mxu0 %vm3214_vm1, %v3213_v16 }
 0x5cb   : > { %v2064_v0 = vpop.f32.mrb[8].mxu1  ;;  %v2108_v23 = vpop.f32.mrb[20].mxu0 }
 0x5cc   : > { %v3054_v15 = vpop.f32.mrb[9].mxu1  ;;  %v3060_v24 = vpop.f32.mrb[21].mxu0 }
 0x5cd   : > { %v2067_v25 = vpop.f32.mrb[10].mxu1  ;;  %v2111_v4 = vpop.f32.mrb[22].mxu0 }
 0x5ce   : > { %v3055_v26 = vpop.f32.mrb[11].mxu1  ;;  %v3061_v19 = vpop.f32.mrb[23].mxu0 }
 0x5f4   : > { %v2152_v27 = vpop.f32.mrb[12].mxu1 }
 0x5f5   : > { %v2203_v58 = vcombine.low %v2064_v0, %v2152_v27  ;;  %v2204_v59 = vcombine.high %v2064_v0, %v2152_v27  ;;  %v3066_v28 = vpop.f32.mrb[13].mxu1 }
 0x5f6   : > { %v2155_v29 = vpop.f32.mrb[14].mxu1  ;;  %v2196_v30 = vpop.f32.mrb[24].mxu0 }
 0x5f7   : > { %v2271_v31 = vcombine.low %v2067_v25, %v2155_v29  ;;  %v2272_v61 = vcombine.high %v2067_v25, %v2155_v29  ;;  %v3067_v57 = vpop.f32.mrb[15].mxu1  ;;  %v3072_v55 = vpop.f32.mrb[25].mxu0  ;;  %v2219_v33 = vcombine.low %v2108_v23, %v2196_v30  ;;  %v2220_v47 = vcombine.high %v2108_v23, %v2196_v30  ;;  %v3149_v23 = vld [vmem:[%s3826_s9] sm:$0xff]  }
 0x5f8   : > { %v2199_v60 = vpop.f32.mrb[26].mxu0  ;;  %v2211_v38 = vrot.slane %v2203_v58, %v3435_v9  ;;  %v2218_v63 = vrot.slane %v2204_v59, %v3435_v9  ;;  %3075 = vmatpush3.bf16.msra.mxu1 %v3149_v23 }
 0x5f9   : > { %v2287_v35 = vcombine.low %v2111_v4, %v2199_v60  ;;  %v2288_v36 = vcombine.high %v2111_v4, %v2199_v60  ;;  %v3073_v37 = vpop.f32.mrb[27].mxu0  ;;  %v2227_v42 = vrot.slane %v2219_v33, %v3435_v9  ;;  %v2234_v44 = vrot.slane %v2220_v47, %v3435_v9  ;;  %3076 = vmatprep.subr.bf16.mxu1 %v3213_v16 }
 0x5fa   : > { %v2279_v39 = vrot.slane %v2271_v31, %v3435_v9  ;;  %v2286_v40 = vrot.slane %v2272_v61, %v3435_v9 }
 0x5fb   : > { %v2295_v45 = vrot.slane %v2287_v35, %v3435_v9  ;;  %v2302_v43 = vrot.slane %v2288_v36, %v3435_v9  ;;  %v2235_v48 = vcombine.low %v2211_v38, %v2227_v42  ;;  %v2236_v51 = vcombine.high %v2211_v38, %v2227_v42  ;;  %v3150_v35 = vld [vmem:[%s3826_s9 + $0x8] sm:$0xff]  }
 0x5fc   : > { %v2251_v52 = vcombine.low %v2218_v63, %v2234_v44  ;;  %v2252_v54 = vcombine.high %v2218_v63, %v2234_v44  ;;  %3077 = vmatpush3.bf16.msra.mxu1 %v3150_v35  ;;  %v2936_v35 = vld [vmem:[%s3829_s12] ss:$0 sm:$0xff] }
 0x5fd   : > { %v2303_v56 = vcombine.low %v2279_v39, %v2295_v45  ;;  %v2304_v34 = vcombine.high %v2279_v39, %v2295_v45  ;;  %v2319_v41 = vcombine.low %v2286_v40, %v2302_v43  ;;  %v2320_v32 = vcombine.high %v2286_v40, %v2302_v43  ;;  %3090 = vmatprep.subr.bf16.mxu1 %v3213_v16 }
 0x5fe   : > { %v2243_v50 = vrot.slane %v2235_v48, %v3437_v17  ;;  %v2250_v3 = vrot.slane %v2236_v51, %v3437_v17  ;;  %v2259_v5 = vrot.slane %v2251_v52, %v3437_v17  ;;  %v2266_v53 = vrot.slane %v2252_v54, %v3437_v17 }
 0x5ff   : > { %v2311_v49 = vrot.slane %v2303_v56, %v3437_v17  ;;  %v2318_v46 = vrot.slane %v2304_v34, %v3437_v17  ;;  %v2327_v62 = vrot.slane %v2319_v41, %v3437_v17  ;;  %v2334_v6 = vrot.slane %v2320_v32, %v3437_v17 }
 0x600   : > { %v2339_v7 = vcombine.low %v2243_v50, %v2250_v3  ;;  %v2927_v8 = vcombine.high %v2243_v50, %v2250_v3  ;;  %v2355_v10 = vcombine.low %v2259_v5, %v2266_v53  ;;  %v2928_v11 = vcombine.high %v2259_v5, %v2266_v53 }
 0x601   : > { %v2407_v12 = vcombine.low %v2311_v49, %v2318_v46  ;;  %v2929_v13 = vcombine.high %v2311_v49, %v2318_v46  ;;  %v2423_v14 = vcombine.low %v2327_v62, %v2334_v6  ;;  %v2930_v18 = vcombine.high %v2327_v62, %v2334_v6 }
 0x602   : > { %v2346_v20 = vrot.slane %v2339_v7, %v3435_v9  ;;  %v2354_v21 = vrot.slane %v2927_v8, %v3435_v9  ;;  %v2362_v22 = vrot.slane %v2355_v10, %v3435_v9  ;;  %v2370_v0 = vrot.slane %v2928_v11, %v3435_v9  ;;  %v2931_v7 = vld [vmem:[%s3827_s10] ss:$0 sm:$0xff] }
 0x603   : > { %v2414_v15 = vrot.slane %v2407_v12, %v3435_v9  ;;  %v2422_v24 = vrot.slane %v2929_v13, %v3435_v9  ;;  %v2430_v25 = vrot.slane %v2423_v14, %v3435_v9  ;;  %v2438_v4 = vrot.slane %v2930_v18, %v3435_v9 }
 0x604   : > { %v2372_v26 = vcombine.high %v2346_v20, %v2354_v21  ;;  %v2388_v19 = vcombine.high %v2362_v22, %v2370_v0  ;;  %v2371_v27 = vcombine.low %v2346_v20, %v2354_v21  ;;  %v2387_v58 = vcombine.low %v2362_v22, %v2370_v0 }
 0x605   : > { %v2440_v59 = vcombine.high %v2414_v15, %v2422_v24  ;;  %v2456_v28 = vcombine.high %v2430_v25, %v2438_v4  ;;  %v2439_v29 = vcombine.low %v2414_v15, %v2422_v24  ;;  %v2455_v30 = vcombine.low %v2430_v25, %v2438_v4 }
 0x606   : > { %v2386_v31 = vrot.slane %v2372_v26, %v3437_v17  ;;  %v2402_v61 = vrot.slane %v2388_v19, %v3437_v17  ;;  %v2379_v57 = vrot.slane %v2371_v27, %v3437_v17  ;;  %v2395_v55 = vrot.slane %v2387_v58, %v3437_v17  ;;  %v3151_v27 = vld [vmem:[%s3830_s13] sm:$0xff]   ;;  %v3152_v58 = vld [vmem:[%s3830_s13 + $0x8] sm:$0xff]  }
 0x607   : > { %v2454_v9 = vrot.slane %v2440_v59, %v3437_v17  ;;  %v2470_v33 = vrot.slane %v2456_v28, %v3437_v17  ;;  %v2447_v47 = vrot.slane %v2439_v29, %v3437_v17  ;;  %v2463_v60 = vrot.slane %v2455_v30, %v3437_v17  ;;  %3083 = vmatpush3.bf16.msra.mxu0 %v3151_v27 }
 0x608   : > { %v2405_v36 = vcombine.low %v2386_v31, %v2402_v61  ;;  %v2403_v37 = vcombine.low %v2379_v57, %v2395_v55  ;;  %v2404_v38 = vcombine.high %v2379_v57, %v2395_v55  ;;  %v2406_v63 = vcombine.high %v2386_v31, %v2402_v61  ;;  %3084 = vmatprep.subr.bf16.mxu0 %v3213_v16 }
 0x609   : > { %v2473_v42 = vcombine.low %v2454_v9, %v2470_v33  ;;  %v2472_v44 = vcombine.high %v2447_v47, %v2463_v60  ;;  %v2471_v39 = vcombine.low %v2447_v47, %v2463_v60  ;;  %v2474_v40 = vcombine.high %v2454_v9, %v2470_v33  ;;  %v2935_v9 = vld [vmem:[%s3828_s11] ss:$0 sm:$0xff] }
 0x60b   : > { %v3133_v45 = vpack.i.bf16 %v2473_v42, %v2405_v36  ;;  %v3128_v43 = vpack.i.bf16 %v2472_v44, %v2404_v38  ;;  %v3138_v48 = vpack.i.bf16 %v2474_v40, %v2406_v63  ;;  %3085 = vmatpush3.bf16.msra.mxu0 %v3152_v58  ;;  %v3153_v42 = vld [vmem:[%s3832_s15] sm:$0xff]   ;;  %v3154_v44 = vld [vmem:[%s3832_s15 + $0x8] sm:$0xff]   ;;  %v3156_v40 = vld [vmem:[%s3832_s15 + $0x18] sm:$0xff]  }
 0x60d   : > { %3134 = vrot.lane.b32.xlu1 %v3133_v45, %s3220_s26  ;;  %3129 = vrot.lane.b32.xlu0 %v3128_v43, %s3221_s27  ;;  %v3157_v45 = vld [vmem:[%s3832_s15 + $0x20] sm:$0xff]   ;;  %v3158_v43 = vld [vmem:[%s3832_s15 + $0x28] sm:$0xff]  }
 0x611   : > { %3139 = vrot.lane.b32.xlu1 %v3138_v48, %s3222_s28  ;;  %v3159_v48 = vld [vmem:[%s3832_s15 + $0x30] sm:$0xff]  }
 0x67f   : > { %v3135_v17 = vpop.permute.xlu1 %3134  ;;  %v3130_v51 = vpop.permute.xlu0 %3129 }
 0x680   : > { %v3132_v52 = vunpack.i.h.bf16 %v3130_v51  ;;  %v3131_v54 = vunpack.i.l.bf16 %v3130_v51  ;;  %v3137_v56 = vunpack.i.h.bf16 %v3135_v17  ;;  %v3136_v34 = vunpack.i.l.bf16 %v3135_v17  ;;  %v3160_v17 = vld [vmem:[%s3832_s15 + $0x38] sm:$0xff]   ;;  %v2937_v51 = vld [vmem:[%s3831_s14] ss:$0 sm:$0xff] }
 0x682   : > { %v2499_v41 = vsel %vm1745_vm2, %v2403_v37, %v3131_v54  ;;  %v2500_v32 = vsel %vm1745_vm2, %v2471_v39, %v3132_v52  ;;  %v3155_v39 = vld [vmem:[%s3832_s15 + $0x10] sm:$0xff]  }
 0x683   : > { %v3140_v50 = vpop.permute.xlu1 %3139  ;;  %v2501_v53 = vsel %vm1934_vm3, %v2499_v41, %v3136_v34  ;;  %v2502_v49 = vsel %vm1934_vm3, %v2500_v32, %v3137_v56 }
 0x684   : > { %v3142_v3 = vunpack.i.h.bf16 %v3140_v50  ;;  %v3141_v5 = vunpack.i.l.bf16 %v3140_v50 }
 0x686   : > { %v2504_v46 = vsel %vm2503_vm4, %v2501_v53, %v3141_v5  ;;  %v2505_v62 = vsel %vm2503_vm4, %v2502_v49, %v3142_v3 }
 0x687   : > { %v2506_v6 = vpack.c.bf16 %v2505_v62, %v2504_v46 }
 0x689   : > { %3079 = vmatmul.mubr.msk.bf16.vlgmr.msra.gmra.mrb[16].mxu1 %vm610_vm0, %v2506_v6 }
 0x68a   : > { %3106 = vmatprep.mubr.msk.bf16.mxu1 %vm3214_vm1, %v3213_v16  ;;  %3091 = vmatpush3.bf16.msra.mxu1 %v3153_v42 }
 0x68b   : > { %3092 = vmatprep.subr.bf16.mxu1 %v3213_v16 }
 0x68e   : > { %3093 = vmatpush3.bf16.msra.mxu1 %v3154_v44 }
 0x68f   : > { %3094 = vmatprep.subr.bf16.mxu1 %v3213_v16 }
 0x692   : > { %3095 = vmatpush3.bf16.msra.mxu1 %v3155_v39 }
 0x693   : > { %3096 = vmatprep.subr.bf16.mxu1 %v3213_v16 }
 0x696   : > { %3097 = vmatpush3.bf16.msra.mxu1 %v3156_v40 }
 0x697   : > { %3098 = vmatprep.subr.bf16.mxu1 %v3213_v16 }
 0x69a   : > { %3099 = vmatpush3.bf16.msra.mxu1 %v3157_v45 }
 0x69b   : > { %3100 = vmatprep.subr.bf16.mxu1 %v3213_v16 }
 0x69e   : > { %3101 = vmatpush3.bf16.msra.mxu1 %v3158_v43 }
 0x69f   : > { %3102 = vmatprep.subr.bf16.mxu1 %v3213_v16 }
 0x6a2   : > { %3103 = vmatpush3.bf16.msra.mxu1 %v3159_v48 }
 0x6a3   : > { %3104 = vmatprep.subr.bf16.mxu1 %v3213_v16 }
 0x6a6   : > { %3105 = vmatpush3.bf16.msra.mxu1 %v3160_v17 }
 0x75c   : > { %v2562_v8 = vpop.f32.mrb[16].mxu1 }
 0x75d   : > { %v2563_v10 = vadd.f32 %v2931_v7, %v2562_v8  ;;  %v3080_v11 = vpop.f32.mrb[17].mxu1 }
 0x75e   : > { %v2565_v12 = vpop.f32.mrb[18].mxu1 }
 0x75f   : > { %v3743_v13 = vadd.f32 %v3339_v1, %v2563_v10  ;;  %v2566_v14 = vadd.f32 %v2931_v7, %v2565_v12  ;;  %v3081_v18 = vpop.f32.mrb[19].mxu1 }
 0x761   : > { %v3746_v20 = vadd.f32 %v3341_v2, %v2566_v14  ;;  %v2573_v21 = vsel %vm610_vm0, %v3743_v13, 0.0 }
 0x762   : > { %2574 = vadd.xlane.f32.xlu1 %v2573_v21 }
 0x763   : > { %v2576_v22 = vsel %vm610_vm0, %v3746_v20, 0.0 }
 0x764   : > { %2577 = vadd.xlane.f32.xlu0 %v2576_v22 }
 0x7ef   : > { %v2575_v0 = vpop.xlane.xlu1 %2574 }
 0x7f0   : > { %v2579_v23 = vmul.f32 0.03125, %v2575_v0 }
 0x7f1   : > { %v2578_v15 = vpop.xlane.xlu0 %2577 }
 0x7f2   : > { %v2581_v24 = vsub.f32 %v3743_v13, %v2579_v23  ;;  %v2580_v1 = vmul.f32 0.03125, %v2578_v15  ;;  %v2949_v15 = vld [vmem:[%s3833_s16] ss:$0 sm:$0xff] }
 0x7f4   : > { %v2582_v25 = vsub.f32 %v3746_v20, %v2580_v1  ;;  %v2583_v4 = vmul.f32 %v2581_v24, %v2581_v24 }
 0x7f6   : > { %v2585_v2 = vsel %vm610_vm0, %v2583_v4, 0.0  ;;  %v2584_v26 = vmul.f32 %v2582_v25, %v2582_v25 }
 0x7f7   : > { %2586 = vadd.xlane.f32.xlu0 %v2585_v2 }
 0x7f8   : > { %v2588_v19 = vsel %vm610_vm0, %v2584_v26, 0.0 }
 0x7fb   : > { %2589 = vadd.xlane.f32.xlu0 %v2588_v19 }
 0x884   : > { %v2587_v59 = vpop.xlane.xlu0 %2586 }
 0x885   : > { %v2591_v28 = vmul.f32 0.03125, %v2587_v59 }
 0x887   : > { %v2593_v29 = vadd.f32 1e-05, %v2591_v28 }
 0x888   : > { %v2590_v30 = vpop.xlane.xlu0 %2589 }
 0x889   : > { %3197 = vrsqrt.f32 %v2593_v29  ;;  %v2592_v31 = vmul.f32 0.03125, %v2590_v30 }
 0x88b   : > { %v2594_v61 = vadd.f32 1e-05, %v2592_v31 }
 0x88d   : > { %3199 = vrsqrt.f32 %v2594_v61 }
 0x893   : > { %v3198_v57 = vpop.eup %3197 }
 0x894   : > { %v2597_v55 = vmul.f32 %v3198_v57, %v2581_v24 }
 0x896   : > { %v2605_v47 = vmul.f32 %v2935_v9, %v2597_v55 }
 0x897   : > { %v3200_v33 = vpop.eup %3199 }
 0x898   : > { %v2598_v60 = vmul.f32 %v3200_v33, %v2582_v25  ;;  %v2613_v37 = vadd.f32 %v2936_v35, %v2605_v47 }
 0x89a   : > { %v2606_v36 = vmul.f32 %v2935_v9, %v2598_v60 }
 0x89c   : > { %v2614_v38 = vadd.f32 %v2936_v35, %v2606_v36 }
 0x89e   : > { %v2619_v63 = vpack.c.bf16 %v2614_v38, %v2613_v37 }
 0x8a0   : > { %3087 = vmatmul.mubr.msk.bf16.vlgmr.msra.gmra.mrb[28].mxu0 %vm610_vm0, %v2619_v63 }
 0x973   : > { %v2676_v52 = vpop.f32.mrb[28].mxu0 }
 0x974   : > { %v2677_v54 = vadd.f32 %v2937_v51, %v2676_v52  ;;  %v3088_v56 = vpop.f32.mrb[29].mxu0 }
 0x975   : > { %v2679_v34 = vpop.f32.mrb[30].mxu0 }
 0x976   : > { %v2683_v41 = vmul.f32 %v2677_v54, %v2677_v54  ;;  %v2680_v32 = vadd.f32 %v2937_v51, %v2679_v34  ;;  %v3089_v50 = vpop.f32.mrb[31].mxu0 }
 0x978   : > { %v2685_v3 = vmul.f32 %v2683_v41, %v2677_v54  ;;  %v2684_v5 = vmul.f32 %v2680_v32, %v2680_v32 }
 0x97a   : > { %v2687_v53 = vmul.f32 0.044715, %v2685_v3  ;;  %v2686_v49 = vmul.f32 %v2684_v5, %v2680_v32 }
 0x97c   : > { %v2689_v46 = vadd.f32 %v2687_v53, %v2677_v54  ;;  %v2688_v62 = vmul.f32 0.044715, %v2686_v49 }
 0x97e   : > { %v2691_v6 = vmul.f32 0.7978846, %v2689_v46  ;;  %v2690_v16 = vadd.f32 %v2688_v62, %v2680_v32 }
 0x980   : > { %3201 = vtanh.f32 %v2691_v6  ;;  %v2692_v7 = vmul.f32 0.7978846, %v2690_v16 }
 0x982   : > { %3203 = vtanh.f32 %v2692_v7 }
 0x98a   : > { %v3202_v8 = vpop.eup %3201 }
 0x98b   : > { %v2695_v10 = vadd.f32 1.0, %v3202_v8 }
 0x98c   : > { %v3204_v11 = vpop.eup %3203 }
 0x98d   : > { %v2697_v12 = vmul.f32 0.5, %v2695_v10  ;;  %v2696_v14 = vadd.f32 1.0, %v3204_v11 }
 0x98f   : > { %v2698_v18 = vmul.f32 0.5, %v2696_v14  ;;  %v2699_v21 = vmul.f32 %v2697_v12, %v2677_v54 }
 0x991   : > { %v2700_v22 = vmul.f32 %v2698_v18, %v2680_v32 }
 0x993   : > { %v2717_v0 = vpack.c.bf16 %v2700_v22, %v2699_v21 }
 0x995   : > { %3107 = vmatmul.mubr.bf16.vlgmr.msra.gmra.mrb[20].mxu1 %v2717_v0 }
 0xa68   : > { %v2800_v23 = vpop.f32.mrb[20].mxu1 }
 0xa69   : > { %v2807_v24 = vadd.f32 %v2800_v23, %v3743_v13  ;;  %v3108_v1 = vpop.f32.mrb[21].mxu1 }
 0xa6a   : > { %v2803_v25 = vpop.f32.mrb[22].mxu1 }
 0xa6b   : > { %v2816_v4 = vadd.f32 %v2949_v15, %v2807_v24  ;;  %v2808_v2 = vadd.f32 %v2803_v25, %v3746_v20  ;;  %v3109_v26 = vpop.f32.mrb[23].mxu1 }
 0xa6d   : > { %v2956_v19 = vpack.c.bf16 %v2816_v4, %v2816_v4  ;;  %v2817_v27 = vadd.f32 %v2949_v15, %v2808_v2 }
 0xa6f   : > { %2827 = vst.msk [vmem:[%s602_s2] sm:$0xf] %vm2826_vm5, %v2956_v19  ;;  %v2957_v58 = vpack.c.bf16 %v2817_v27, %v2817_v27 }
 0xa71   : > { %2828 = vst.msk [vmem:[%s602_s2 + $0x4] sm:$0xf] %vm2826_vm5, %v2957_v58 }
 0xa72 PF: > { %s29_s0 = sadd.s32 1, %s3211_s0  }
 0xa73   : > { %p26_p4 = scmp.ge.s32.totalorder %s29_s0, 4  }
 0xa75   :  { %28 = sbr.rel (!%p26_p4) target bundleno = 5 (0x5), region = 126 }

// kernel: image_to_text_forward.9
= control target key start
LH: loop header
LB: loop body
LE: loop exit
PB: predicated region body
PF: predicated region fallthrough
CT: control target
= control target key end

     0   :  { %s4662_s6 = smov 1   ;;  %s4663_s10 = smov 2   ;;  %s5356_s0 = inlined_call_operand.smem [shape: u32[31], index: -1, kind: input, shape index: {}] }
   0x1   :  { %s4709_s5 = sld [smem:[%s5356_s0]]   ;;  %s4664_s14 = smov 3  }
   0x2   :  { %s4714_s9 = sld [smem:[%s5356_s0 + %s4662_s6]]   ;;  %s4665_s18 = smov 4  }
   0x3   :  { %s4719_s13 = sld [smem:[%s5356_s0 + %s4663_s10]]   ;;  %s4666_s22 = smov 5  }
   0x4   :  { %s4724_s17 = sld [smem:[%s5356_s0 + %s4664_s14]]   ;;  %s4667_s26 = smov 6  }
   0x5   :  { %s4729_s21 = sld [smem:[%s5356_s0 + %s4665_s18]]   ;;  %s4668_s30 = smov 7  }
   0x6   :  { %s4734_s25 = sld [smem:[%s5356_s0 + %s4666_s22]]   ;;  %s4669_s4 = smov 8  }
   0x7   :  { %s4739_s29 = sld [smem:[%s5356_s0 + %s4667_s26]]   ;;  %s4670_s10 = smov 9  }
   0x8   :  { %s4744_s3 = sld [smem:[%s5356_s0 + %s4668_s30]]   ;;  %s4671_s15 = smov 10  }
   0x9   :  { %s4749_s8 = sld [smem:[%s5356_s0 + %s4669_s4]]   ;;  %s4672_s20 = smov 11  }
   0xa   :  { %s4754_s14 = sld [smem:[%s5356_s0 + %s4670_s10]]   ;;  %s4673_s26 = smov 12  }
   0xb   :  { %s4759_s19 = sld [smem:[%s5356_s0 + %s4671_s15]]   ;;  %s4674_s1 = smov 13  }
   0xc   :  { %s4764_s24 = sld [smem:[%s5356_s0 + %s4672_s20]]   ;;  %s4675_s7 = smov 14  }
   0xd   :  { %s4769_s30 = sld [smem:[%s5356_s0 + %s4673_s26]]   ;;  %s4676_s15 = smov 15  }
   0xe   :  { %s4774_s6 = sld [smem:[%s5356_s0 + %s4674_s1]]   ;;  %s4677_s22 = smov 16  }
   0xf   :  { %s4779_s12 = sld [smem:[%s5356_s0 + %s4675_s7]]   ;;  %s4678_s28 = smov 17  }
  0x10   :  { %s4784_s20 = sld [smem:[%s5356_s0 + %s4676_s15]]   ;;  %s4679_s7 = smov 18  }
  0x11   :  { %s4789_s27 = sld [smem:[%s5356_s0 + %s4677_s22]]   ;;  %s4680_s15 = smov 19  }
  0x12   :  { %s4794_s4 = sld [smem:[%s5356_s0 + %s4678_s28]]   ;;  %s4681_s22 = smov 20  }
  0x13   :  { %5360 = sst [smem:[#allocation2_spill]] %s4769_s30  ;;  %s4682_s28 = smov 21  }
  0x14   :  { %5361 = sst [smem:[#allocation3_spill]] %s4774_s6 }
  0x15   :  { %s4799_s6 = sld [smem:[%s5356_s0 + %s4679_s7]]   ;;  %s4683_s7 = smov 22  }
  0x16   :  { %5362 = sst [smem:[#allocation4_spill]] %s4784_s20 }
  0x17   :  { %s4804_s20 = sld [smem:[%s5356_s0 + %s4680_s15]]   ;;  %s4684_s15 = smov 23  }
  0x18   :  { %5363 = sst [smem:[#allocation5_spill]] %s4794_s4 }
  0x19   :  { %s4809_s30 = sld [smem:[%s5356_s0 + %s4681_s22]]   ;;  %s4685_s22 = smov 24  }
  0x1a   :  { %s4814_s4 = sld [smem:[%s5356_s0 + %s4682_s28]]   ;;  %s4686_s28 = smov 25  }
  0x1b   :  { %5364 = sst [smem:[#allocation6_spill]] %s4799_s6 }
  0x1c   :  { %s4819_s6 = sld [smem:[%s5356_s0 + %s4683_s7]]   ;;  %s4687_s7 = smov 26  }
  0x1d   :  { %5365 = sst [smem:[#allocation7_spill]] %s4804_s20 }
  0x1e   :  { %s4824_s20 = sld [smem:[%s5356_s0 + %s4684_s15]]   ;;  %s4688_s15 = smov 27  }
  0x1f   :  { %5366 = sst [smem:[#allocation8_spill]] %s4809_s30 }
  0x20   :  { %5367 = sst [smem:[#allocation9_spill]] %s4814_s4 }
  0x21   :  { %s4829_s30 = sld [smem:[%s5356_s0 + %s4685_s22]]   ;;  %s4689_s22 = smov 30  }
  0x22   :  { %5368 = sst [smem:[#allocation10_spill]] %s4819_s6 }
  0x23   :  { %s4834_s4 = sld [smem:[%s5356_s0 + %s4686_s28]]   ;;  %s4851_s28 = smov 0  }
  0x24   :  { %5369 = sst [smem:[#allocation11_spill]] %s4824_s20 }
  0x25   :  { %s4839_s6 = sld [smem:[%s5356_s0 + %s4687_s7]]  }
  0x26   :  { %s4844_s20 = sld [smem:[%s5356_s0 + %s4688_s15]]  }
  0x27   :  { %5370 = sst [smem:[#allocation12_spill]] %s4829_s30 }
  0x28   :  { %s4849_s30 = sld [smem:[%s5356_s0 + %s4689_s22]]  }
  0x29 LB: > { %s4184_s1 = sadd.s32 4294967295, %s4660_s28   ;;  %p4188_p0 = scmp.ge.s32.totalorder %s4660_s28, 1  ;;  %s4660_s28 = sphi %s4851_s28, %s71_s28  }
  0x2a   : > { %p852_p1 = scmp.lt.s32.totalorder %s4660_s28, 3 }
  0x2c   : > { %p853_p2 = pnand %p4188_p0, %p852_p1 }
  0x2d   : > { %p933_p3 = scmp.lt.s32.totalorder (!%p853_p2), %s4184_s1, 1  ;;  %vm953_vm0 = vcmask (!%p853_p2), 261120   ;;  %v4587_v8 = vld [vmem:[%s4729_s21] sm:$0xff] (!%p853_p2)   ;;  %v4690_v9 = vmov (!%p853_p2), 0.0   ;;  %vm4691_vm1 = vmmov (!%p853_p2), 0   ;;  %v4588_v10 = vld [vmem:[%s4729_s21 + $0x8] sm:$0xff] (!%p853_p2)   ;;  %v1196_v42 = vlaneseq (!%p853_p2) }
  0x2e   : > { %856 = sbr.rel (%p853_p2) target bundleno = 4496 (0x1190), region = 140  ;;  %4352 = vmatprep.subr.bf16.mxu0 (!%p853_p2), %v4690_v9  ;;  %4356 = vmatprep.mubr.msk.bf16.mxu0 (!%p853_p2), %vm4691_vm1, %v4690_v9  ;;  %v4193_v15 = vld [vmem:[%s4719_s13] ss:$0 sm:$0xff] (!%p853_p2)  ;;  %v4590_v22 = vld [vmem:[%s4739_s29 + $0x8] sm:$0xff] (!%p853_p2)   ;;  %s4692_s11 = smov (!%p853_p2), 104   ;;  %vm1637_vm3 = vcmask (!%p853_p2), 64512  }
  0x2f   : > { %4353 = vmatpush3.bf16.msra.mxu0 (!%p853_p2), %v4587_v8  ;;  %4376 = vmatprep.subr.bf16.mxu1 (!%p853_p2), %v4690_v9  ;;  %v4194_v17 = vld [vmem:[%s4724_s17] ss:$0 sm:$0xff] (!%p853_p2)  ;;  %v4592_v24 = vld [vmem:[%s4749_s8 + $0x8] sm:$0xff] (!%p853_p2)   ;;  %s4693_s15 = smov (!%p853_p2), 120   ;;  %s4694_s16 = smov (!%p853_p2), 112   ;;  %v4914_v43 = vshrl.u32 (!%p853_p2), %v1196_v42, 7 }
  0x30   : > { %4354 = vmatprep.subr.bf16.mxu0 (!%p853_p2), %v4690_v9  ;;  %4378 = vmatprep.mubr.msk.bf16.mxu1 (!%p853_p2), %vm4691_vm1, %v4690_v9  ;;  %v4589_v20 = vld [vmem:[%s4739_s29] sm:$0xff] (!%p853_p2)   ;;  %v4916_v44 = vand.u32 (!%p853_p2), 127, %v1196_v42  ;;  %v4695_v45 = vmov (!%p853_p2), 1983009808   ;;  %v4696_v47 = vmov (!%p853_p2), 1934713408  }
  0x31   : > { %v4591_v23 = vld [vmem:[%s4749_s8] sm:$0xff] (!%p853_p2)   ;;  %v1194_v46 = vunpack.c.l.s4 (!%p853_p2), %v4695_v45  ;;  %v1226_v48 = vunpack.c.l.s4 (!%p853_p2), %v4696_v47  ;;  %vm1873_vm4 = vcmask (!%p853_p2), 1043456   ;;  %s4698_s18 = smov (!%p853_p2), 16   ;;  %s4699_s22 = smov (!%p853_p2), 8   ;;  %vm2204_vm5 = vcmask (!%p853_p2), 130048  }
  0x32   : > { %v4199_v29 = vld [vmem:[%s4744_s3] ss:$0 sm:$0xff] (!%p853_p2)  ;;  %vm1635_vm2 = vcmp.le.s32.totalorder (!%p853_p2), %v4916_v44, %v4914_v43  ;;  %s4700_s23 = smov (!%p853_p2), 24   ;;  %vm2206_vm6 = vcmask (!%p853_p2), 195584   ;;  %s5371_s26 = sld [smem:[#allocation5_spill]] (!%p853_p2)  ;;  %vm4089_vm7 = vcmask (!%p853_p2), 257024  }
  0x33   : > { %4355 = vmatpush3.bf16.msra.mxu0 (!%p853_p2), %v4588_v10  ;;  %v4195_v33 = vld [vmem:[%s4734_s25] ss:$0 sm:$0xff] (!%p853_p2)  ;;  %v1195_v49 = vunpack.c.0.s8 (!%p853_p2), %v1194_v46  ;;  %v1227_v52 = vunpack.c.0.s8 (!%p853_p2), %v1226_v48 }
  0x34   : > { %4360 = vmatprep.subr.bf16.mxu0 (!%p853_p2), %v4690_v9 }
  0x35   : > { %s5383_s1 = smov (!%p933_p3, %s4184_s1), 1  ;;  %v4921_v53 = vsub.s32 %v1195_v49, %v4914_v43  ;;  %v4924_v59 = vsub.s32 %v1227_v52, %v4914_v43 }
  0x36   : > { %s4189_s0 = sshll.u32 %s5383_s1, 2  ;;  %s4283_s2 = sshll.u32 %s5383_s1, 3 }
  0x37   : > { %s936_s7 = scalar_lea.vmem %s4709_s5, %s4189_s0  ;;  %s4867_s10 = scalar_lea.vmem %s4714_s9, %s4283_s2 }
  0x38   : > { %v947_v0 = vld [vmem:[%s936_s7] sm:$0xf]  ;;  %s5372_s2 = sld [smem:[#allocation2_spill]]  ;;  %s5373_s7 = sld [smem:[#allocation3_spill]] }
  0x39   : > { %v4869_v1 = vunpack.c.l.bf16 %v947_v0 }
  0x3b   : > { %v954_v2 = vsel %vm953_vm0, %v4869_v1, 0.0 }
  0x3c   : > { %955 = vadd.xlane.f32.xlu0 %v954_v2 }
  0xc9   : > { %v956_v3 = vpop.xlane.xlu0 %955 }
  0xca   : > { %v958_v4 = vmul.f32 0.03125, %v956_v3 }
  0xcc   : > { %v959_v5 = vsub.f32 %v4869_v1, %v958_v4 }
  0xce   : > { %v960_v6 = vmul.f32 %v959_v5, %v959_v5 }
  0xd0   : > { %v961_v7 = vsel %vm953_vm0, %v960_v6, 0.0 }
  0xd1   : > { %962 = vadd.xlane.f32.xlu0 %v961_v7 }
 0x15e   : > { %v963_v11 = vpop.xlane.xlu0 %962 }
 0x15f   : > { %v964_v12 = vmul.f32 0.03125, %v963_v11 }
 0x161   : > { %v965_v13 = vadd.f32 1e-05, %v964_v12 }
 0x163   : > { %4614 = vrsqrt.f32 %v965_v13 }
 0x16d   : > { %v4615_v14 = vpop.eup %4614 }
 0x16e   : > { %v967_v16 = vmul.f32 %v4615_v14, %v959_v5 }
 0x170   : > { %v974_v18 = vmul.f32 %v4193_v15, %v967_v16 }
 0x172   : > { %v981_v19 = vadd.f32 %v4194_v17, %v974_v18 }
 0x174   : > { %v986_v21 = vpack.c.bf16 %v981_v19, %v981_v19 }
 0x176   : > { %4357 = vmatmul.mubr.msk.bf16.vlgmr.msra.gmra.mrb[0].mxu0 %vm953_vm0, %v986_v21 }
 0x177   : > { %4361 = vmatpush3.bf16.msra.mxu0 %v4589_v20  ;;  %4364 = vmatprep.mubr.msk.bf16.mxu0 %vm4691_vm1, %v4690_v9 }
 0x178   : > { %4362 = vmatprep.subr.bf16.mxu0 %v4690_v9 }
 0x17b   : > { %4363 = vmatpush3.bf16.msra.mxu0 %v4590_v22 }
 0x17c   : > { %4368 = vmatprep.subr.bf16.mxu0 %v4690_v9 }
 0x17e   : > { %4365 = vmatmul.mubr.msk.bf16.vlgmr.msra.gmra.mrb[4].mxu0 %vm953_vm0, %v986_v21 }
 0x17f   : > { %4369 = vmatpush3.bf16.msra.mxu0 %v4591_v23  ;;  %4372 = vmatprep.mubr.msk.bf16.mxu0 %vm4691_vm1, %v4690_v9 }
 0x180   : > { %4370 = vmatprep.subr.bf16.mxu0 %v4690_v9 }
 0x183   : > { %4371 = vmatpush3.bf16.msra.mxu0 %v4592_v24 }
 0x184   : > { %4382 = vmatprep.subr.bf16.mxu0 %v4690_v9 }
 0x186   : > { %4373 = vmatmul.mubr.msk.bf16.vlgmr.msra.gmra.mrb[8].mxu0 %vm953_vm0, %v986_v21 }
 0x187   : > { %4384 = vmatprep.mubr.msk.bf16.mxu0 %vm4691_vm1, %v4690_v9 }
 0x249   : > { %v1043_v25 = vpop.f32.mrb[0].mxu0 }
 0x24a   : > { %v4358_v26 = vpop.f32.mrb[1].mxu0  ;;  %v1044_v36 = vadd.f32 %v4195_v33, %v1043_v25 }
 0x24b   : > { %v1046_v27 = vpop.f32.mrb[2].mxu0 }
 0x24c   : > { %v4359_v28 = vpop.f32.mrb[3].mxu0  ;;  %v1180_v38 = vmul.f32 0.35355338, %v1044_v36 }
 0x251   : > { %v1106_v30 = vpop.f32.mrb[4].mxu0 }
 0x252   : > { %v1107_v31 = vadd.f32 %v4199_v29, %v1106_v30  ;;  %v4366_v32 = vpop.f32.mrb[5].mxu0 }
 0x253   : > { %v1109_v34 = vpop.f32.mrb[6].mxu0 }
 0x254   : > { %1338 = vrot.lane.b32.xlu0 %v1107_v31, %s4692_s11  ;;  %1332 = vrot.lane.b32.xlu1 %v1107_v31, %s4693_s15  ;;  %v4367_v35 = vpop.f32.mrb[7].mxu0 }
 0x258   : > { %1335 = vrot.lane.b32.xlu1 %v1107_v31, %s4694_s16 }
 0x259   : > { %v4909_v37 = vpop.f32.mrb[8].mxu0 }
 0x25a   : > { %v4374_v39 = vpop.f32.mrb[9].mxu0 }
 0x25b   : > { %v1172_v40 = vpop.f32.mrb[10].mxu0 }
 0x25c   : > { %1182 = vrot.lane.b32.xlu1 %v1180_v38, %s4693_s15  ;;  %v4375_v41 = vpop.f32.mrb[11].mxu0 }
 0x260   : > { %1185 = vrot.lane.b32.xlu1 %v1180_v38, %s4694_s16 }
 0x264   : > { %1188 = vrot.lane.b32.xlu1 %v1180_v38, %s4692_s11 }
 0x2c6   : > { %v1339_v50 = vpop.permute.xlu0 %1338  ;;  %v1333_v51 = vpop.permute.xlu1 %1332 }
 0x2c7   : > { %v1357_v54 = vcombine.low %v1333_v51, %v1339_v50  ;;  %v1358_v55 = vcombine.high %v1333_v51, %v1339_v50 }
 0x2c9   : > { %v1365_v60 = vrot.slane %v1357_v54, %v4921_v53  ;;  %v1372_v61 = vrot.slane %v1358_v55, %v4921_v53 }
 0x2ca   : > { %v1336_v56 = vpop.permute.xlu1 %1335 }
 0x2cb   : > { %v1341_v57 = vcombine.low %v1107_v31, %v1336_v56  ;;  %v1342_v58 = vcombine.high %v1107_v31, %v1336_v56 }
 0x2cd   : > { %v1349_v62 = vrot.slane %v1341_v57, %v4921_v53  ;;  %v1356_v63 = vrot.slane %v1342_v58, %v4921_v53 }
 0x2ce   : > { %v1183_v0 = vpop.permute.xlu1 %1182 }
 0x2cf   : > { %v1373_v2 = vcombine.low %v1349_v62, %v1365_v60  ;;  %v1374_v3 = vcombine.high %v1349_v62, %v1365_v60  ;;  %v1389_v4 = vcombine.low %v1356_v63, %v1372_v61  ;;  %v1390_v5 = vcombine.high %v1356_v63, %v1372_v61 }
 0x2d1   : > { %v1381_v6 = vrot.slane %v1373_v2, %v4924_v59  ;;  %v1388_v7 = vrot.slane %v1374_v3, %v4924_v59  ;;  %v1397_v8 = vrot.slane %v1389_v4, %v4924_v59  ;;  %v1404_v10 = vrot.slane %v1390_v5, %v4924_v59 }
 0x2d2   : > { %v1186_v11 = vpop.permute.xlu1 %1185 }
 0x2d3   : > { %v1409_v12 = vcombine.low %v1381_v6, %v1388_v7  ;;  %v4209_v13 = vcombine.high %v1381_v6, %v1388_v7  ;;  %v1425_v14 = vcombine.low %v1397_v8, %v1404_v10  ;;  %v4210_v15 = vcombine.high %v1397_v8, %v1404_v10 }
 0x2d4   : > { %v1191_v16 = vcombine.low %v1180_v38, %v1186_v11  ;;  %v1192_v17 = vcombine.high %v1180_v38, %v1186_v11 }
 0x2d5   : > { %v1416_v18 = vrot.slane %v1409_v12, %v4921_v53  ;;  %v1424_v19 = vrot.slane %v4209_v13, %v4921_v53  ;;  %v1432_v20 = vrot.slane %v1425_v14, %v4921_v53  ;;  %v1440_v21 = vrot.slane %v4210_v15, %v4921_v53 }
 0x2d6   : > { %v1189_v22 = vpop.permute.xlu1 %1188  ;;  %v1199_v27 = vrot.slane %v1191_v16, %v4921_v53  ;;  %v1206_v28 = vrot.slane %v1192_v17, %v4921_v53 }
 0x2d7   : > { %v1207_v23 = vcombine.low %v1183_v0, %v1189_v22  ;;  %v1208_v24 = vcombine.high %v1183_v0, %v1189_v22  ;;  %v1441_v25 = vcombine.low %v1416_v18, %v1424_v19  ;;  %v1457_v26 = vcombine.low %v1432_v20, %v1440_v21 }
 0x2d8   : > { %v1442_v33 = vcombine.high %v1416_v18, %v1424_v19  ;;  %v1458_v34 = vcombine.high %v1432_v20, %v1440_v21 }
 0x2d9   : > { %v1215_v29 = vrot.slane %v1207_v23, %v4921_v53  ;;  %v1222_v30 = vrot.slane %v1208_v24, %v4921_v53  ;;  %v1449_v31 = vrot.slane %v1441_v25, %v4924_v59  ;;  %v1465_v32 = vrot.slane %v1457_v26, %v4924_v59 }
 0x2da   : > { %v1456_v50 = vrot.slane %v1442_v33, %v4924_v59  ;;  %v1472_v51 = vrot.slane %v1458_v34, %v4924_v59  ;;  %v4697_v24 = vmov -1e+30  }
 0x2db   : > { %v1223_v35 = vcombine.low %v1199_v27, %v1215_v29  ;;  %v1224_v36 = vcombine.high %v1199_v27, %v1215_v29  ;;  %v1239_v38 = vcombine.low %v1206_v28, %v1222_v30  ;;  %v1240_v39 = vcombine.high %v1206_v28, %v1222_v30 }
 0x2dc   : > { %v1473_v40 = vcombine.low %v1449_v31, %v1465_v32  ;;  %v1474_v41 = vcombine.high %v1449_v31, %v1465_v32  ;;  %v1475_v3 = vcombine.low %v1456_v50, %v1472_v51  ;;  %v1476_v4 = vcombine.high %v1456_v50, %v1472_v51  ;;  %v4203_v51 = vld [vmem:[%s4754_s14] ss:$0 sm:$0xff] }
 0x2dd   : > { %v1231_v42 = vrot.slane %v1223_v35, %v4924_v59  ;;  %v1238_v45 = vrot.slane %v1224_v36, %v4924_v59  ;;  %v1247_v46 = vrot.slane %v1239_v38, %v4924_v59  ;;  %v1254_v47 = vrot.slane %v1240_v39, %v4924_v59 }
 0x2de   : > { %v1477_v48 = vpack.c.bf16 %v1473_v40, %v1473_v40  ;;  %v1478_v49 = vpack.c.bf16 %v1474_v41, %v1474_v41  ;;  %v1479_v12 = vpack.c.bf16 %v1475_v3, %v1475_v3  ;;  %v1480_v13 = vpack.c.bf16 %v1476_v4, %v1476_v4 }
 0x2df   : > { %v1259_v52 = vcombine.low %v1231_v42, %v1238_v45  ;;  %v4207_v54 = vcombine.high %v1231_v42, %v1238_v45  ;;  %v1275_v55 = vcombine.low %v1247_v46, %v1254_v47  ;;  %v4208_v56 = vcombine.high %v1247_v46, %v1254_v47 }
 0x2e0   : > { %v1642_v57 = vsel %vm1637_vm3, %v1477_v48, 0  ;;  %v1688_v58 = vsel %vm1637_vm3, %v1478_v49, 0  ;;  %v1734_v18 = vsel %vm1637_vm3, %v1479_v12, 0  ;;  %v1780_v19 = vsel %vm1637_vm3, %v1480_v13, 0 }
 0x2e1   : > { %v1266_v60 = vrot.slane %v1259_v52, %v4921_v53  ;;  %v1274_v61 = vrot.slane %v4207_v54, %v4921_v53  ;;  %v1282_v62 = vrot.slane %v1275_v55, %v4921_v53  ;;  %v1290_v63 = vrot.slane %v4208_v56, %v4921_v53  ;;  %4377 = vmatpush3.bf16.xpose.msra.mxu1 %v1642_v57 }
 0x2e2   : > { %4383 = vmatpush3.bf16.xpose.msra.mxu0 %v1688_v58  ;;  %4388 = vmatprep.subr.bf16.mxu1 %v4690_v9  ;;  %v1636_v25 = vsel %vm1635_vm2, 0.0, %v4697_v24  ;;  %v1170_v52 = vadd.f32 %v4203_v51, %v4909_v37 }
 0x2e3   : > { %4394 = vmatprep.subr.bf16.mxu0 %v4690_v9  ;;  %v1291_v0 = vcombine.low %v1266_v60, %v1274_v61  ;;  %v1307_v2 = vcombine.low %v1282_v62, %v1290_v63  ;;  %v1292_v5 = vcombine.high %v1266_v60, %v1274_v61  ;;  %v1308_v6 = vcombine.high %v1282_v62, %v1290_v63 }
 0x2e5   : > { %v1299_v7 = vrot.slane %v1291_v0, %v4924_v59  ;;  %v1315_v8 = vrot.slane %v1307_v2, %v4924_v59  ;;  %v1306_v16 = vrot.slane %v1292_v5, %v4924_v59  ;;  %v1322_v17 = vrot.slane %v1308_v6, %v4924_v59 }
 0x2e7   : > { %v1323_v10 = vcombine.low %v1299_v7, %v1315_v8  ;;  %v1324_v11 = vcombine.high %v1299_v7, %v1315_v8  ;;  %v1325_v20 = vcombine.low %v1306_v16, %v1322_v17  ;;  %v1326_v21 = vcombine.high %v1306_v16, %v1322_v17 }
 0x2e9   : > { %v1327_v14 = vpack.c.bf16 %v1323_v10, %v1323_v10  ;;  %v1328_v15 = vpack.c.bf16 %v1324_v11, %v1324_v11  ;;  %v1329_v22 = vpack.c.bf16 %v1325_v20, %v1325_v20  ;;  %v1330_v23 = vpack.c.bf16 %v1326_v21, %v1326_v21 }
 0x2eb   : > { %4379 = vmatmul.mubr.msk.bf16.vlgmr.msra.gmra.mrb[0].mxu1 %vm1637_vm3, %v1327_v14  ;;  %4385 = vmatmul.mubr.msk.bf16.vlgmr.msra.gmra.mrb[12].mxu0 %vm1637_vm3, %v1328_v15 }
 0x2ec   : > { %4389 = vmatpush3.bf16.xpose.msra.mxu1 %v1734_v18  ;;  %4395 = vmatpush3.bf16.xpose.msra.mxu0 %v1780_v19 }
 0x2ed   : > { %4390 = vmatprep.mubr.msk.bf16.mxu1 %vm4691_vm1, %v4690_v9  ;;  %4396 = vmatprep.mubr.msk.bf16.mxu0 %vm4691_vm1, %v4690_v9 }
 0x2ee   : > { %4400 = vmatprep.subr.bf16.mxu1 %v4690_v9  ;;  %4406 = vmatprep.subr.bf16.mxu0 %v4690_v9 }
 0x2f3   : > { %4391 = vmatmul.mubr.msk.bf16.vlgmr.msra.gmra.mrb[4].mxu1 %vm1637_vm3, %v1329_v22  ;;  %4397 = vmatmul.mubr.msk.bf16.vlgmr.msra.gmra.mrb[16].mxu0 %vm1637_vm3, %v1330_v23 }
 0x2f4   : > { %4402 = vmatprep.mubr.msk.bf16.mxu1 %vm4691_vm1, %v4690_v9  ;;  %4408 = vmatprep.mubr.msk.bf16.mxu0 %vm4691_vm1, %v4690_v9 }
 0x3be   : > { %v1678_v26 = vpop.f32.mrb[0].mxu1  ;;  %v1724_v27 = vpop.f32.mrb[12].mxu0 }
 0x3bf   : > { %v1679_v28 = vadd.f32 %v1678_v26, %v1636_v25  ;;  %v1725_v29 = vadd.f32 %v1724_v27, %v1636_v25  ;;  %v4380_v30 = vpop.f32.mrb[1].mxu1  ;;  %v4386_v31 = vpop.f32.mrb[13].mxu0 }
 0x3c0   : > { %v1681_v32 = vpop.f32.mrb[2].mxu1  ;;  %v1727_v33 = vpop.f32.mrb[14].mxu0 }
 0x3c1   : > { %v4381_v34 = vpop.f32.mrb[3].mxu1  ;;  %v4387_v35 = vpop.f32.mrb[15].mxu0  ;;  %v1822_v36 = vsel %vm1637_vm3, %v1679_v28, -inf  ;;  %v1825_v38 = vsel %vm1637_vm3, %v1725_v29, -inf }
 0x3c2   : > { %1823 = vmax.xlane.f32.xlu1 %v1822_v36  ;;  %1826 = vmax.xlane.f32.xlu0 %v1825_v38 }
 0x3c6   : > { %v1770_v39 = vpop.f32.mrb[4].mxu1  ;;  %v1816_v43 = vpop.f32.mrb[16].mxu0 }
 0x3c7   : > { %v1771_v44 = vadd.f32 %v1770_v39, %v1636_v25  ;;  %v1817_v40 = vadd.f32 %v1816_v43, %v1636_v25  ;;  %v4392_v41 = vpop.f32.mrb[5].mxu1  ;;  %v4398_v42 = vpop.f32.mrb[17].mxu0 }
 0x3c8   : > { %v1773_v45 = vpop.f32.mrb[6].mxu1  ;;  %v1819_v46 = vpop.f32.mrb[18].mxu0 }
 0x3c9   : > { %v4393_v47 = vpop.f32.mrb[7].mxu1  ;;  %v4399_v48 = vpop.f32.mrb[19].mxu0  ;;  %v1828_v49 = vsel %vm1637_vm3, %v1771_v44, -inf  ;;  %v1831_v50 = vsel %vm1637_vm3, %v1817_v40, -inf }
 0x3ca   : > { %1829 = vmax.xlane.f32.xlu1 %v1828_v49 }
 0x3ce   : > { %1832 = vmax.xlane.f32.xlu1 %v1831_v50 }
 0x3df   : > { %1485 = vrot.lane.b32.xlu1 %v1170_v52, %s4694_s16 }
 0x44f   : > { %v1824_v54 = vpop.xlane.xlu1 %1823  ;;  %v1827_v55 = vpop.xlane.xlu0 %1826 }
 0x450   : > { %v1834_v56 = vsub.f32 %v1679_v28, %v1824_v54  ;;  %v1835_v57 = vsub.f32 %v1725_v29, %v1827_v55 }
 0x452   : > { %v1838_v58 = vmul.f32 1.442695, %v1834_v56  ;;  %v1840_v60 = vmul.f32 1.442695, %v1835_v57 }
 0x454   : > { %4616 = vpow2.f32 %v1838_v58 }
 0x455   : > { %4618 = vpow2.f32 %v1840_v60 }
 0x457   : > { %v1830_v0 = vpop.xlane.xlu1 %1829 }
 0x458   : > { %v1836_v3 = vsub.f32 %v1771_v44, %v1830_v0 }
 0x45a   : > { %v1842_v5 = vmul.f32 1.442695, %v1836_v3 }
 0x45b   : > { %v1833_v2 = vpop.xlane.xlu1 %1832 }
 0x45c   : > { %v1837_v4 = vsub.f32 %v1817_v40, %v1833_v2  ;;  %4620 = vpow2.f32 %v1842_v5 }
 0x45e   : > { %v4988_v61 = vpop.eup %4616  ;;  %v1844_v6 = vmul.f32 1.442695, %v1837_v4 }
 0x45f   : > { %v4990_v62 = vpop.eup %4618  ;;  %v1846_v63 = vsel %vm1637_vm3, %v4988_v61, 0.0  ;;  %v1486_v12 = vpop.permute.xlu1 %1485 }
 0x460   : > { %1847 = vadd.xlane.f32.xlu0 %v1846_v63  ;;  %v1849_v37 = vsel %vm1637_vm3, %v4990_v62, 0.0  ;;  %4622 = vpow2.f32 %v1844_v6  ;;  %v1491_v15 = vcombine.low %v1170_v52, %v1486_v12  ;;  %v1492_v16 = vcombine.high %v1170_v52, %v1486_v12 }
 0x461   : > { %1850 = vadd.xlane.f32.xlu1 %v1849_v37 }
 0x462   : > { %v1499_v21 = vrot.slane %v1491_v15, %v4921_v53  ;;  %v1506_v22 = vrot.slane %v1492_v16, %v4921_v53 }
 0x466   : > { %v4998_v7 = vpop.eup %4620 }
 0x467   : > { %v1852_v10 = vsel %vm1637_vm3, %v4998_v7, 0.0 }
 0x46a   : > { %v5000_v8 = vpop.eup %4622 }
 0x46b   : > { %v1855_v11 = vsel %vm1637_vm3, %v5000_v8, 0.0 }
 0x472   : > { %1488 = vrot.lane.b32.xlu1 %v1170_v52, %s4692_s11 }
 0x476   : > { %1482 = vrot.lane.b32.xlu0 %v1170_v52, %s4693_s15 }
 0x495   : > { %1853 = vadd.xlane.f32.xlu0 %v1852_v10 }
 0x496   : > { %1856 = vadd.xlane.f32.xlu1 %v1855_v11 }
 0x4ed   : > { %v1848_v13 = vpop.xlane.xlu0 %1847 }
 0x4ee   : > { %v1851_v14 = vpop.xlane.xlu1 %1850  ;;  %4624 = vrcp.f32 %v1848_v13 }
 0x4ef   : > { %4626 = vrcp.f32 %v1851_v14 }
 0x4f1   : > { %v1483_v17 = vpop.permute.xlu0 %1482 }
 0x4f2   : > { %v1489_v18 = vpop.permute.xlu1 %1488 }
 0x4f3   : > { %v1507_v19 = vcombine.low %v1483_v17, %v1489_v18  ;;  %v1508_v20 = vcombine.high %v1483_v17, %v1489_v18  ;;  %v4593_v17 = vld [vmem:[%s4759_s19] sm:$0xff]  }
 0x4f5   : > { %v1515_v23 = vrot.slane %v1507_v19, %v4921_v53  ;;  %v1522_v24 = vrot.slane %v1508_v20, %v4921_v53 }
 0x4f7   : > { %v1523_v25 = vcombine.low %v1499_v21, %v1515_v23  ;;  %v1524_v26 = vcombine.high %v1499_v21, %v1515_v23  ;;  %v1539_v27 = vcombine.low %v1506_v22, %v1522_v24  ;;  %v1540_v28 = vcombine.high %v1506_v22, %v1522_v24 }
 0x4f8   : > { %v4625_v48 = vpop.eup %4624 }
 0x4f9   : > { %v1531_v29 = vrot.slane %v1523_v25, %v4924_v59  ;;  %v1538_v30 = vrot.slane %v1524_v26, %v4924_v59  ;;  %v1547_v31 = vrot.slane %v1539_v27, %v4924_v59  ;;  %v1554_v32 = vrot.slane %v1540_v28, %v4924_v59  ;;  %v4627_v51 = vpop.eup %4626 }
 0x4fa   : > { %v1862_v57 = vmul.f32 %v4625_v48, %v4988_v61  ;;  %v1863_v58 = vmul.f32 %v4627_v51, %v4990_v62 }
 0x4fb   : > { %v1559_v33 = vcombine.low %v1531_v29, %v1538_v30  ;;  %v4211_v34 = vcombine.high %v1531_v29, %v1538_v30  ;;  %v1575_v35 = vcombine.low %v1547_v31, %v1554_v32  ;;  %v4212_v36 = vcombine.high %v1547_v31, %v1554_v32 }
 0x4fc   : > { %v1866_v4 = vpack.c.bf16 %v1862_v57, %v1862_v57  ;;  %v1867_v5 = vpack.c.bf16 %v1863_v58, %v1863_v58 }
 0x4fd   : > { %v1566_v38 = vrot.slane %v1559_v33, %v4921_v53  ;;  %v1574_v39 = vrot.slane %v4211_v34, %v4921_v53  ;;  %v1582_v43 = vrot.slane %v1575_v35, %v4921_v53  ;;  %v1590_v44 = vrot.slane %v4212_v36, %v4921_v53 }
 0x4ff   : > { %v1591_v40 = vcombine.low %v1566_v38, %v1574_v39  ;;  %v1592_v41 = vcombine.high %v1566_v38, %v1574_v39  ;;  %v1607_v42 = vcombine.low %v1582_v43, %v1590_v44  ;;  %v1608_v45 = vcombine.high %v1582_v43, %v1590_v44 }
 0x501   : > { %v1599_v46 = vrot.slane %v1591_v40, %v4924_v59  ;;  %v1606_v47 = vrot.slane %v1592_v41, %v4924_v59  ;;  %v1615_v49 = vrot.slane %v1607_v42, %v4924_v59  ;;  %v1622_v50 = vrot.slane %v1608_v45, %v4924_v59  ;;  %v4594_v45 = vld [vmem:[%s4759_s19 + $0x8] sm:$0xff]  }
 0x503   : > { %v1623_v52 = vcombine.low %v1599_v46, %v1615_v49  ;;  %v1624_v54 = vcombine.high %v1599_v46, %v1615_v49  ;;  %v1625_v55 = vcombine.low %v1606_v47, %v1622_v50  ;;  %v1626_v56 = vcombine.high %v1606_v47, %v1622_v50 }
 0x505   : > { %v1627_v60 = vpack.c.bf16 %v1623_v52, %v1623_v52  ;;  %v1628_v63 = vpack.c.bf16 %v1624_v54, %v1624_v54  ;;  %v1629_v2 = vpack.c.bf16 %v1625_v55, %v1625_v55  ;;  %v1630_v3 = vpack.c.bf16 %v1626_v56, %v1626_v56 }
 0x507   : > { %v1875_v37 = vsel %vm1873_vm4, %v1627_v60, 0  ;;  %v1921_v0 = vsel %vm1873_vm4, %v1628_v63, 0  ;;  %v1967_v61 = vsel %vm1873_vm4, %v1629_v2, 0  ;;  %v2013_v62 = vsel %vm1873_vm4, %v1630_v3, 0 }
 0x508   : > { %4401 = vmatpush3.bf16.msra.mxu1 %v1875_v37  ;;  %4407 = vmatpush3.bf16.msra.mxu0 %v1921_v0 }
 0x509   : > { %4412 = vmatprep.subr.bf16.mxu1 %v4690_v9  ;;  %4418 = vmatprep.subr.bf16.mxu0 %v4690_v9 }
 0x50b   : > { %4403 = vmatmul.mubr.msk.bf16.vlgmr.msra.gmra.mrb[8].mxu1 %vm1637_vm3, %v1866_v4  ;;  %4409 = vmatmul.mubr.msk.bf16.vlgmr.msra.gmra.mrb[20].mxu0 %vm1637_vm3, %v1867_v5 }
 0x50c   : > { %4413 = vmatpush3.bf16.msra.mxu1 %v1967_v61  ;;  %4419 = vmatpush3.bf16.msra.mxu0 %v2013_v62 }
 0x50d   : > { %4414 = vmatprep.mubr.msk.bf16.mxu1 %vm4691_vm1, %v4690_v9  ;;  %4420 = vmatprep.mubr.msk.bf16.mxu0 %vm4691_vm1, %v4690_v9 }
 0x50e   : > { %4424 = vmatprep.subr.bf16.mxu1 %v4690_v9  ;;  %4432 = vmatprep.subr.bf16.mxu0 %v4690_v9 }
 0x522   : > { %v1854_v6 = vpop.xlane.xlu0 %1853 }
 0x523   : > { %4628 = vrcp.f32 %v1854_v6  ;;  %v1857_v10 = vpop.xlane.xlu1 %1856 }
 0x524   : > { %4630 = vrcp.f32 %v1857_v10 }
 0x52d   : > { %v4629_v11 = vpop.eup %4628 }
 0x52e   : > { %v4631_v12 = vpop.eup %4630  ;;  %v1864_v13 = vmul.f32 %v4629_v11, %v4998_v7 }
 0x52f   : > { %v1865_v14 = vmul.f32 %v4631_v12, %v5000_v8 }
 0x530   : > { %v1868_v15 = vpack.c.bf16 %v1864_v13, %v1864_v13 }
 0x531   : > { %v1869_v16 = vpack.c.bf16 %v1865_v14, %v1865_v14 }
 0x532   : > { %4415 = vmatmul.mubr.msk.bf16.vlgmr.msra.gmra.mrb[12].mxu1 %vm1637_vm3, %v1868_v15 }
 0x533   : > { %4421 = vmatmul.mubr.msk.bf16.vlgmr.msra.gmra.mrb[24].mxu0 %vm1637_vm3, %v1869_v16  ;;  %4428 = vmatprep.mubr.msk.bf16.mxu1 %vm4691_vm1, %v4690_v9 }
 0x534   : > { %4436 = vmatprep.mubr.msk.bf16.mxu0 %vm4691_vm1, %v4690_v9  ;;  %4425 = vmatpush3.bf16.msra.mxu1 %v4593_v17 }
 0x535   : > { %4426 = vmatprep.subr.bf16.mxu1 %v4690_v9 }
 0x538   : > { %4427 = vmatpush3.bf16.msra.mxu1 %v4594_v45  ;;  %v4227_v45 = vld [vmem:[%s5372_s2] ss:$0 sm:$0xff]  ;;  %s5376_s2 = sld [smem:[#allocation7_spill]] }
 0x539   : > { %4440 = vmatprep.subr.bf16.mxu1 %v4690_v9 }
 0x5de   : > { %v1911_v18 = vpop.f32.mrb[8].mxu1  ;;  %v1957_v7 = vpop.f32.mrb[20].mxu0 }
 0x5df   : > { %v4404_v19 = vpop.f32.mrb[9].mxu1  ;;  %v4410_v8 = vpop.f32.mrb[21].mxu0 }
 0x5e0   : > { %v1914_v20 = vpop.f32.mrb[10].mxu1  ;;  %v1960_v21 = vpop.f32.mrb[22].mxu0 }
 0x5e1   : > { %v4405_v22 = vpop.f32.mrb[11].mxu1  ;;  %v4411_v23 = vpop.f32.mrb[23].mxu0 }
 0x605   : > { %v2003_v24 = vpop.f32.mrb[12].mxu1 }
 0x606   : > { %v2055_v25 = vcombine.low %v1911_v18, %v2003_v24  ;;  %v2056_v26 = vcombine.high %v1911_v18, %v2003_v24  ;;  %v2049_v27 = vpop.f32.mrb[24].mxu0  ;;  %v4416_v28 = vpop.f32.mrb[13].mxu1  ;;  %v4223_v18 = vld [vmem:[%s4764_s24] ss:$0 sm:$0xff] }
 0x607   : > { %v2071_v29 = vcombine.low %v1957_v7, %v2049_v27  ;;  %v2072_v30 = vcombine.high %v1957_v7, %v2049_v27  ;;  %v4422_v31 = vpop.f32.mrb[25].mxu0  ;;  %v2006_v32 = vpop.f32.mrb[14].mxu1  ;;  %v4595_v24 = vld [vmem:[%s4789_s27] sm:$0xff]  }
 0x608   : > { %v2063_v33 = vrot.slane %v2055_v25, %v4921_v53  ;;  %v2070_v34 = vrot.slane %v2056_v26, %v4921_v53  ;;  %v2052_v35 = vpop.f32.mrb[26].mxu0  ;;  %v4417_v36 = vpop.f32.mrb[15].mxu1  ;;  %v4596_v25 = vld [vmem:[%s4789_s27 + $0x8] sm:$0xff]   ;;  %v5085_v26 = vld [vmem:[%s4867_s10] sm:$0xff]   ;;  %s5374_s10 = sld [smem:[#allocation6_spill]] }
 0x609   : > { %v2079_v38 = vrot.slane %v2071_v29, %v4921_v53  ;;  %v2086_v39 = vrot.slane %v2072_v30, %v4921_v53  ;;  %v4423_v43 = vpop.f32.mrb[27].mxu0  ;;  %v4598_v31 = vld [vmem:[%s4779_s12] sm:$0xff]   ;;  %v4599_v32 = vld [vmem:[%s4779_s12 + $0x8] sm:$0xff]  }
 0x60a   : > { %4433 = vmatpush3.bf16.msra.mxu0 %v4598_v31 }
 0x60b   : > { %v2087_v44 = vcombine.low %v2063_v33, %v2079_v38  ;;  %v2088_v40 = vcombine.high %v2063_v33, %v2079_v38  ;;  %v2103_v41 = vcombine.low %v2070_v34, %v2086_v39  ;;  %v2104_v42 = vcombine.high %v2070_v34, %v2086_v39  ;;  %4434 = vmatprep.subr.bf16.mxu0 %v4690_v9  ;;  %v4233_v33 = vld [vmem:[%s5371_s26] ss:$0 sm:$0xff]  ;;  %s5375_s26 = sld [smem:[#allocation4_spill]] }
 0x60d   : > { %v2095_v46 = vrot.slane %v2087_v44, %v4924_v59  ;;  %v2102_v47 = vrot.slane %v2088_v40, %v4924_v59  ;;  %v2111_v48 = vrot.slane %v2103_v41, %v4924_v59  ;;  %v2118_v49 = vrot.slane %v2104_v42, %v4924_v59 }
 0x60e   : > { %4435 = vmatpush3.bf16.msra.mxu0 %v4599_v32 }
 0x60f   : > { %v2123_v50 = vcombine.low %v2095_v46, %v2102_v47  ;;  %v4221_v51 = vcombine.high %v2095_v46, %v2102_v47  ;;  %v2139_v52 = vcombine.low %v2111_v48, %v2118_v49  ;;  %v4222_v54 = vcombine.high %v2111_v48, %v2118_v49  ;;  %4448 = vmatprep.subr.bf16.mxu0 %v4690_v9  ;;  %v4228_v47 = vld [vmem:[%s5373_s7] ss:$0 sm:$0xff] }
 0x611   : > { %v2130_v55 = vrot.slane %v2123_v50, %v4921_v53  ;;  %v2138_v56 = vrot.slane %v4221_v51, %v4921_v53  ;;  %v2146_v57 = vrot.slane %v2139_v52, %v4921_v53  ;;  %v2154_v58 = vrot.slane %v4222_v54, %v4921_v53  ;;  %v4600_v50 = vld [vmem:[%s5374_s10] sm:$0xff]  }
 0x613   : > { %v2156_v60 = vcombine.high %v2130_v55, %v2138_v56  ;;  %v2172_v63 = vcombine.high %v2146_v57, %v2154_v58  ;;  %v2155_v37 = vcombine.low %v2130_v55, %v2138_v56  ;;  %v2171_v0 = vcombine.low %v2146_v57, %v2154_v58 }
 0x615   : > { %v2170_v2 = vrot.slane %v2156_v60, %v4924_v59  ;;  %v2186_v3 = vrot.slane %v2172_v63, %v4924_v59  ;;  %v2163_v4 = vrot.slane %v2155_v37, %v4924_v59  ;;  %v2179_v5 = vrot.slane %v2171_v0, %v4924_v59 }
 0x617   : > { %v2189_v61 = vcombine.low %v2170_v2, %v2186_v3  ;;  %v2188_v62 = vcombine.high %v2163_v4, %v2179_v5  ;;  %v2190_v6 = vcombine.high %v2170_v2, %v2186_v3  ;;  %v2187_v10 = vcombine.low %v2163_v4, %v2179_v5 }
 0x619   : > { %2196 = vrot.lane.b32.xlu1 %v2189_v61, %s4698_s18  ;;  %2192 = vrot.lane.b32.xlu0 %v2188_v62, %s4699_s22 }
 0x61d   : > { %2200 = vrot.lane.b32.xlu0 %v2190_v6, %s4700_s23 }
 0x68b   : > { %v2193_v11 = vpop.permute.xlu0 %2192  ;;  %v2197_v12 = vpop.permute.xlu1 %2196 }
 0x68c   : > { %v2203_v13 = vsel %vm1637_vm3, %v2187_v10, %v2193_v11 }
 0x68d   : > { %v2205_v15 = vsel %vm2204_vm5, %v2203_v13, %v2197_v12 }
 0x68f   : > { %v2201_v14 = vpop.permute.xlu0 %2200 }
 0x690   : > { %v2207_v16 = vsel %vm2206_vm6, %v2205_v15, %v2201_v14 }
 0x691   : > { %v2208_v17 = vpack.c.bf16 %v2207_v16, %v2207_v16 }
 0x693   : > { %4429 = vmatmul.mubr.msk.bf16.vlgmr.msra.gmra.mrb[16].mxu1 %vm953_vm0, %v2208_v17 }
 0x694   : > { %4444 = vmatprep.mubr.msk.bf16.mxu1 %vm4691_vm1, %v4690_v9  ;;  %4441 = vmatpush3.bf16.msra.mxu1 %v4595_v24 }
 0x695   : > { %4442 = vmatprep.subr.bf16.mxu1 %v4690_v9 }
 0x698   : > { %4443 = vmatpush3.bf16.msra.mxu1 %v4596_v25 }
 0x699   : > { %4456 = vmatprep.subr.bf16.mxu1 %v4690_v9 }
 0x69b   : > { %4445 = vmatmul.mubr.msk.bf16.vlgmr.msra.gmra.mrb[20].mxu1 %vm953_vm0, %v5085_v26 }
 0x69c   : > { %4458 = vmatprep.mubr.msk.bf16.mxu1 %vm4691_vm1, %v4690_v9 }
 0x766   : > { %v2264_v7 = vpop.f32.mrb[16].mxu1 }
 0x767   : > { %v2265_v19 = vadd.f32 %v4223_v18, %v2264_v7  ;;  %v4430_v8 = vpop.f32.mrb[17].mxu1 }
 0x768   : > { %v2267_v20 = vpop.f32.mrb[18].mxu1 }
 0x769   : > { %v5077_v21 = vadd.f32 %v2265_v19, %v4869_v1  ;;  %v4431_v22 = vpop.f32.mrb[19].mxu1 }
 0x76b   : > { %v2273_v23 = vsel %vm953_vm0, %v5077_v21, 0.0 }
 0x76c   : > { %2274 = vadd.xlane.f32.xlu1 %v2273_v23 }
 0x76e   : > { %v2432_v34 = vpop.f32.mrb[20].mxu1 }
 0x76f   : > { %v2433_v35 = vadd.f32 %v4233_v33, %v2432_v34  ;;  %v4446_v36 = vpop.f32.mrb[21].mxu1 }
 0x770   : > { %v2435_v38 = vpop.f32.mrb[22].mxu1 }
 0x771   : > { %v2436_v39 = vadd.f32 %v4233_v33, %v2435_v38  ;;  %v4447_v43 = vpop.f32.mrb[23].mxu1 }
 0x77d   : > { %2663 = vrot.lane.b32.xlu1 %v2436_v39, %s4693_s15 }
 0x781   : > { %2667 = vrot.lane.b32.xlu1 %v2433_v35, %s4694_s16 }
 0x785   : > { %2673 = vrot.lane.b32.xlu1 %v2433_v35, %s4692_s11 }
 0x7f9   : > { %v2275_v1 = vpop.xlane.xlu1 %2274 }
 0x7fa   : > { %v2276_v27 = vmul.f32 0.03125, %v2275_v1 }
 0x7fc   : > { %v2277_v28 = vsub.f32 %v5077_v21, %v2276_v27 }
 0x7fd   : > { %v2664_v54 = vpop.permute.xlu1 %2663 }
 0x7fe   : > { %v2278_v29 = vmul.f32 %v2277_v28, %v2277_v28 }
 0x800   : > { %v2279_v30 = vsel %vm953_vm0, %v2278_v29, 0.0 }
 0x801   : > { %2280 = vadd.xlane.f32.xlu0 %v2279_v30  ;;  %v2668_v56 = vpop.permute.xlu1 %2667 }
 0x802   : > { %v2679_v2 = vcombine.low %v2433_v35, %v2668_v56  ;;  %v2680_v3 = vcombine.high %v2433_v35, %v2668_v56 }
 0x804   : > { %v2687_v11 = vrot.slane %v2679_v2, %v4921_v53  ;;  %v2694_v12 = vrot.slane %v2680_v3, %v4921_v53 }
 0x805   : > { %v2674_v58 = vpop.permute.xlu1 %2673 }
 0x817   : > { %2661 = vrot.lane.b32.xlu0 %v2433_v35, %s4693_s15 }
 0x81b   : > { %2669 = vrot.lane.b32.xlu0 %v2436_v39, %s4694_s16 }
 0x81f   : > { %2675 = vrot.lane.b32.xlu0 %v2436_v39, %s4692_s11 }
 0x88e   : > { %v2281_v44 = vpop.xlane.xlu0 %2280 }
 0x88f   : > { %v2282_v40 = vmul.f32 0.03125, %v2281_v44 }
 0x891   : > { %v2283_v41 = vadd.f32 1e-05, %v2282_v40 }
 0x892   : > { %v2662_v52 = vpop.permute.xlu0 %2661 }
 0x893   : > { %4632 = vrsqrt.f32 %v2283_v41  ;;  %v2695_v4 = vcombine.low %v2662_v52, %v2674_v58  ;;  %v2696_v5 = vcombine.high %v2662_v52, %v2674_v58 }
 0x895   : > { %v2703_v13 = vrot.slane %v2695_v4, %v4921_v53  ;;  %v2710_v14 = vrot.slane %v2696_v5, %v4921_v53 }
 0x896   : > { %v2670_v55 = vpop.permute.xlu0 %2669 }
 0x897   : > { %v2747_v60 = vcombine.low %v2436_v39, %v2670_v55  ;;  %v2748_v63 = vcombine.high %v2436_v39, %v2670_v55  ;;  %v2711_v7 = vcombine.low %v2687_v11, %v2703_v13  ;;  %v2712_v19 = vcombine.high %v2687_v11, %v2703_v13 }
 0x898   : > { %v2727_v8 = vcombine.low %v2694_v12, %v2710_v14  ;;  %v2728_v20 = vcombine.high %v2694_v12, %v2710_v14 }
 0x899   : > { %v2755_v61 = vrot.slane %v2747_v60, %v4921_v53  ;;  %v2762_v62 = vrot.slane %v2748_v63, %v4921_v53  ;;  %v2719_v1 = vrot.slane %v2711_v7, %v4924_v59  ;;  %v2726_v27 = vrot.slane %v2712_v19, %v4924_v59 }
 0x89a   : > { %v2676_v57 = vpop.permute.xlu0 %2675  ;;  %v2742_v29 = vrot.slane %v2728_v20, %v4924_v59 }
 0x89b   : > { %v2763_v37 = vcombine.low %v2664_v54, %v2676_v57  ;;  %v2764_v0 = vcombine.high %v2664_v54, %v2676_v57  ;;  %v2815_v34 = vcombine.low %v2719_v1, %v2726_v27  ;;  %v4244_v35 = vcombine.high %v2719_v1, %v2726_v27 }
 0x89d   : > { %v4633_v42 = vpop.eup %4632  ;;  %v2771_v6 = vrot.slane %v2763_v37, %v4921_v53  ;;  %v2778_v10 = vrot.slane %v2764_v0, %v4921_v53  ;;  %v2822_v41 = vrot.slane %v2815_v34, %v4921_v53 }
 0x89e   : > { %v2285_v46 = vmul.f32 %v4633_v42, %v2277_v28  ;;  %v2735_v28 = vrot.slane %v2727_v8, %v4924_v59  ;;  %v2830_v42 = vrot.slane %v4244_v35, %v4921_v53 }
 0x89f   : > { %v2779_v15 = vcombine.low %v2755_v61, %v2771_v6  ;;  %v2780_v16 = vcombine.high %v2755_v61, %v2771_v6  ;;  %v2795_v17 = vcombine.low %v2762_v62, %v2778_v10  ;;  %v2796_v18 = vcombine.high %v2762_v62, %v2778_v10 }
 0x8a0   : > { %v2292_v48 = vmul.f32 %v4227_v45, %v2285_v46  ;;  %v2831_v36 = vcombine.low %v2735_v28, %v2742_v29  ;;  %v4245_v38 = vcombine.high %v2735_v28, %v2742_v29  ;;  %v2848_v52 = vcombine.high %v2822_v41, %v2830_v42 }
 0x8a1   : > { %v2787_v22 = vrot.slane %v2779_v15, %v4924_v59  ;;  %v2794_v23 = vrot.slane %v2780_v16, %v4924_v59  ;;  %v2803_v24 = vrot.slane %v2795_v17, %v4924_v59  ;;  %v2810_v25 = vrot.slane %v2796_v18, %v4924_v59  ;;  %v4229_v18 = vld [vmem:[%s5375_s26] ss:$0 sm:$0xff] }
 0x8a2   : > { %v2299_v49 = vadd.f32 %v4228_v47, %v2292_v48  ;;  %v2838_v45 = vrot.slane %v2831_v36, %v4921_v53  ;;  %v2846_v46 = vrot.slane %v4245_v38, %v4921_v53  ;;  %v4601_v47 = vld [vmem:[%s5374_s10 + $0x8] sm:$0xff]   ;;  %v2847_v48 = vcombine.low %v2822_v41, %v2830_v42 }
 0x8a3   : > { %v2883_v30 = vcombine.low %v2787_v22, %v2794_v23  ;;  %v4246_v31 = vcombine.high %v2787_v22, %v2794_v23  ;;  %v2899_v32 = vcombine.low %v2803_v24, %v2810_v25  ;;  %v4247_v33 = vcombine.high %v2803_v24, %v2810_v25  ;;  %v4238_v24 = vld [vmem:[%s5376_s2] ss:$0 sm:$0xff] }
 0x8a4   : > { %v2304_v51 = vpack.c.bf16 %v2299_v49, %v2299_v49  ;;  %v2863_v49 = vcombine.low %v2838_v45, %v2846_v46  ;;  %v2864_v54 = vcombine.high %v2838_v45, %v2846_v46  ;;  %v2855_v57 = vrot.slane %v2847_v48, %v4924_v59 }
 0x8a5   : > { %v2890_v39 = vrot.slane %v2883_v30, %v4921_v53  ;;  %v2898_v43 = vrot.slane %v4246_v31, %v4921_v53  ;;  %v2906_v44 = vrot.slane %v2899_v32, %v4921_v53  ;;  %v2914_v40 = vrot.slane %v4247_v33, %v4921_v53 }
 0x8a6   : > { %4437 = vmatmul.mubr.msk.bf16.vlgmr.msra.gmra.mrb[28].mxu0 %vm953_vm0, %v2304_v51  ;;  %v2871_v58 = vrot.slane %v2863_v49, %v4924_v59  ;;  %v2862_v37 = vrot.slane %v2848_v52, %v4924_v59  ;;  %v2878_v0 = vrot.slane %v2864_v54, %v4924_v59 }
 0x8a7   : > { %4449 = vmatpush3.bf16.msra.mxu0 %v4600_v50  ;;  %4452 = vmatprep.mubr.msk.bf16.mxu0 %vm4691_vm1, %v4690_v9  ;;  %v2915_v50 = vcombine.low %v2890_v39, %v2898_v43  ;;  %v2931_v51 = vcombine.low %v2906_v44, %v2914_v40  ;;  %v2916_v55 = vcombine.high %v2890_v39, %v2898_v43 }
 0x8a8   : > { %4450 = vmatprep.subr.bf16.mxu0 %v4690_v9  ;;  %v2932_v56 = vcombine.high %v2906_v44, %v2914_v40  ;;  %v2879_v4 = vcombine.low %v2855_v57, %v2871_v58  ;;  %v2880_v61 = vcombine.high %v2855_v57, %v2871_v58  ;;  %v2881_v6 = vcombine.low %v2862_v37, %v2878_v0 }
 0x8a9   : > { %v2923_v60 = vrot.slane %v2915_v50, %v4924_v59  ;;  %v2939_v63 = vrot.slane %v2931_v51, %v4924_v59  ;;  %v2930_v2 = vrot.slane %v2916_v55, %v4924_v59  ;;  %v2882_v11 = vcombine.high %v2862_v37, %v2878_v0 }
 0x8aa   : > { %v2946_v3 = vrot.slane %v2932_v56, %v4924_v59 }
 0x8ab   : > { %4451 = vmatpush3.bf16.msra.mxu0 %v4601_v47  ;;  %v2947_v5 = vcombine.low %v2923_v60, %v2939_v63  ;;  %v2948_v62 = vcombine.high %v2923_v60, %v2939_v63 }
 0x8ac   : > { %4462 = vmatprep.subr.bf16.mxu0 %v4690_v9  ;;  %v2949_v10 = vcombine.low %v2930_v2, %v2946_v3 }
 0x8ad   : > { %v2951_v12 = vpack.c.bf16 %v2947_v5, %v2879_v4  ;;  %v2952_v13 = vpack.c.bf16 %v2948_v62, %v2880_v61 }
 0x8ae   : > { %4453 = vmatmul.mubr.msk.bf16.vlgmr.msra.gmra.mrb[32].mxu0 %vm953_vm0, %v5085_v26  ;;  %v2950_v26 = vcombine.high %v2930_v2, %v2946_v3  ;;  %v5150_v14 = vpack.c.bf16 %v2949_v10, %v2881_v6 }
 0x8af   : > { %4464 = vmatprep.mubr.msk.bf16.mxu0 %vm4691_vm1, %v4690_v9  ;;  %v3255_v16 = vsel %vm1637_vm3, %v2951_v12, 0  ;;  %v3301_v17 = vsel %vm1637_vm3, %v2952_v13, 0 }
 0x8b0   : > { %v5152_v15 = vpack.c.bf16 %v2950_v26, %v2882_v11  ;;  %4457 = vmatpush3.bf16.xpose.msra.mxu1 %v3255_v16  ;;  %v3347_v26 = vsel %vm1637_vm3, %v5150_v14, 0 }
 0x8b1   : > { %4468 = vmatprep.subr.bf16.mxu1 %v4690_v9 }
 0x8b2   : > { %v3393_v12 = vsel %vm1637_vm3, %v5152_v15, 0 }
 0x8b4   : > { %4463 = vmatpush3.bf16.xpose.msra.mxu0 %v3301_v17 }
 0x8b5   : > { %4474 = vmatprep.subr.bf16.mxu0 %v4690_v9 }
 0x979   : > { %v2361_v7 = vpop.f32.mrb[28].mxu0 }
 0x97a   : > { %v2362_v19 = vadd.f32 %v4229_v18, %v2361_v7  ;;  %v4438_v8 = vpop.f32.mrb[29].mxu0 }
 0x97b   : > { %v2364_v20 = vpop.f32.mrb[30].mxu0 }
 0x97c   : > { %v2508_v22 = vmul.f32 0.35355338, %v2362_v19  ;;  %v4439_v23 = vpop.f32.mrb[31].mxu0 }
 0x97e   : > { %2513 = vrot.lane.b32.xlu0 %v2508_v22, %s4694_s16  ;;  %2510 = vrot.lane.b32.xlu1 %v2508_v22, %s4693_s15 }
 0x981   : > { %v2496_v25 = vpop.f32.mrb[32].mxu0 }
 0x982   : > { %2516 = vrot.lane.b32.xlu1 %v2508_v22, %s4692_s11  ;;  %v5163_v1 = vadd.f32 %v4238_v24, %v2496_v25  ;;  %v4454_v27 = vpop.f32.mrb[33].mxu0 }
 0x983   : > { %v2499_v28 = vpop.f32.mrb[34].mxu0 }
 0x984   : > { %v5165_v29 = vadd.f32 %v4238_v24, %v2499_v28  ;;  %v4455_v30 = vpop.f32.mrb[35].mxu0 }
 0x986   : > { %2957 = vrot.lane.b32.xlu1 %v5163_v1, %s4693_s15 }
 0x9f0   : > { %v2514_v31 = vpop.permute.xlu0 %2513  ;;  %v2511_v32 = vpop.permute.xlu1 %2510 }
 0x9f1   : > { %v2519_v33 = vcombine.low %v2508_v22, %v2514_v31  ;;  %v2520_v34 = vcombine.high %v2508_v22, %v2514_v31 }
 0x9f3   : > { %v2527_v39 = vrot.slane %v2519_v33, %v4921_v53  ;;  %v2534_v43 = vrot.slane %v2520_v34, %v4921_v53 }
 0x9f4   : > { %v2517_v35 = vpop.permute.xlu1 %2516 }
 0x9f5   : > { %v2535_v36 = vcombine.low %v2511_v32, %v2517_v35  ;;  %v2536_v38 = vcombine.high %v2511_v32, %v2517_v35 }
 0x9f7   : > { %v2543_v44 = vrot.slane %v2535_v36, %v4921_v53  ;;  %v2550_v40 = vrot.slane %v2536_v38, %v4921_v53 }
 0x9f9   : > { %v2551_v41 = vcombine.low %v2527_v39, %v2543_v44  ;;  %v2552_v42 = vcombine.high %v2527_v39, %v2543_v44  ;;  %v2567_v45 = vcombine.low %v2534_v43, %v2550_v40  ;;  %v2568_v46 = vcombine.high %v2534_v43, %v2550_v40  ;;  %v2958_v39 = vpop.permute.xlu1 %2957 }
 0x9fb   : > { %v2559_v47 = vrot.slane %v2551_v41, %v4924_v59  ;;  %v2566_v48 = vrot.slane %v2552_v42, %v4924_v59  ;;  %v2575_v49 = vrot.slane %v2567_v45, %v4924_v59  ;;  %v2582_v50 = vrot.slane %v2568_v46, %v4924_v59 }
 0x9fd   : > { %v2587_v51 = vcombine.low %v2559_v47, %v2566_v48  ;;  %v4242_v52 = vcombine.high %v2559_v47, %v2566_v48  ;;  %v2603_v54 = vcombine.low %v2575_v49, %v2582_v50  ;;  %v4243_v55 = vcombine.high %v2575_v49, %v2582_v50 }
 0x9ff   : > { %v2594_v56 = vrot.slane %v2587_v51, %v4921_v53  ;;  %v2602_v57 = vrot.slane %v4242_v52, %v4921_v53  ;;  %v2610_v58 = vrot.slane %v2603_v54, %v4921_v53  ;;  %v2618_v60 = vrot.slane %v4243_v55, %v4921_v53 }
 0xa01   : > { %v2619_v63 = vcombine.low %v2594_v56, %v2602_v57  ;;  %v2635_v37 = vcombine.low %v2610_v58, %v2618_v60  ;;  %v2620_v0 = vcombine.high %v2594_v56, %v2602_v57  ;;  %v2636_v2 = vcombine.high %v2610_v58, %v2618_v60 }
 0xa03   : > { %v2627_v3 = vrot.slane %v2619_v63, %v4924_v59  ;;  %v2643_v4 = vrot.slane %v2635_v37, %v4924_v59  ;;  %v2634_v10 = vrot.slane %v2620_v0, %v4924_v59  ;;  %v2650_v11 = vrot.slane %v2636_v2, %v4924_v59 }
 0xa05   : > { %v2651_v5 = vcombine.low %v2627_v3, %v2643_v4  ;;  %v2652_v61 = vcombine.high %v2627_v3, %v2643_v4  ;;  %v2653_v13 = vcombine.low %v2634_v10, %v2650_v11  ;;  %v2654_v16 = vcombine.high %v2634_v10, %v2650_v11 }
 0xa07   : > { %v2655_v62 = vpack.c.bf16 %v2651_v5, %v2651_v5  ;;  %v2656_v6 = vpack.c.bf16 %v2652_v61, %v2652_v61  ;;  %v2657_v17 = vpack.c.bf16 %v2653_v13, %v2653_v13  ;;  %v2658_v18 = vpack.c.bf16 %v2654_v16, %v2654_v16 }
 0xa09   : > { %4459 = vmatmul.mubr.msk.bf16.vlgmr.msra.gmra.mrb[24].mxu1 %vm1637_vm3, %v2655_v62  ;;  %4465 = vmatmul.mubr.msk.bf16.vlgmr.msra.gmra.mrb[36].mxu0 %vm1637_vm3, %v2656_v6 }
 0xa0a   : > { %4469 = vmatpush3.bf16.xpose.msra.mxu1 %v3347_v26  ;;  %4475 = vmatpush3.bf16.xpose.msra.mxu0 %v3393_v12 }
 0xa0b   : > { %4470 = vmatprep.mubr.msk.bf16.mxu1 %vm4691_vm1, %v4690_v9  ;;  %4476 = vmatprep.mubr.msk.bf16.mxu0 %vm4691_vm1, %v4690_v9 }
 0xa0c   : > { %4480 = vmatprep.subr.bf16.mxu1 %v4690_v9  ;;  %4486 = vmatprep.subr.bf16.mxu0 %v4690_v9 }
 0xa11   : > { %4471 = vmatmul.mubr.msk.bf16.vlgmr.msra.gmra.mrb[28].mxu1 %vm1637_vm3, %v2657_v17  ;;  %4477 = vmatmul.mubr.msk.bf16.vlgmr.msra.gmra.mrb[40].mxu0 %vm1637_vm3, %v2658_v18 }
 0xa12   : > { %4482 = vmatprep.mubr.msk.bf16.mxu1 %vm4691_vm1, %v4690_v9  ;;  %4488 = vmatprep.mubr.msk.bf16.mxu0 %vm4691_vm1, %v4690_v9 }
 0xadc   : > { %v3291_v14 = vpop.f32.mrb[24].mxu1  ;;  %v3337_v15 = vpop.f32.mrb[36].mxu0 }
 0xadd   : > { %v4460_v7 = vpop.f32.mrb[25].mxu1  ;;  %v4466_v19 = vpop.f32.mrb[37].mxu0  ;;  %v3435_v8 = vsel %vm2204_vm5, %v3291_v14, -inf  ;;  %v3438_v20 = vsel %vm2204_vm5, %v3337_v15, -inf }
 0xade   : > { %3436 = vmax.xlane.f32.xlu0 %v3435_v8  ;;  %v3294_v22 = vpop.f32.mrb[26].mxu1  ;;  %3439 = vmax.xlane.f32.xlu1 %v3438_v20  ;;  %v3340_v23 = vpop.f32.mrb[38].mxu0 }
 0xadf   : > { %v4461_v24 = vpop.f32.mrb[27].mxu1  ;;  %v4467_v25 = vpop.f32.mrb[39].mxu0 }
 0xae4   : > { %v3383_v27 = vpop.f32.mrb[28].mxu1  ;;  %v3429_v28 = vpop.f32.mrb[40].mxu0 }
 0xae5   : > { %v4472_v30 = vpop.f32.mrb[29].mxu1  ;;  %v4478_v31 = vpop.f32.mrb[41].mxu0  ;;  %v3441_v32 = vsel %vm2204_vm5, %v3383_v27, -inf  ;;  %v3444_v38 = vsel %vm2204_vm5, %v3429_v28, -inf }
 0xae6   : > { %3442 = vmax.xlane.f32.xlu0 %v3441_v32  ;;  %v3386_v33 = vpop.f32.mrb[30].mxu1  ;;  %v3432_v34 = vpop.f32.mrb[42].mxu0 }
 0xae7   : > { %v4473_v35 = vpop.f32.mrb[31].mxu1  ;;  %v4479_v36 = vpop.f32.mrb[43].mxu0 }
 0xaea   : > { %3445 = vmax.xlane.f32.xlu0 %v3444_v38 }
 0xaef   : > { %2963 = vrot.lane.b32.xlu1 %v5163_v1, %s4694_s16 }
 0xaf3   : > { %2965 = vrot.lane.b32.xlu1 %v5165_v29, %s4694_s16  ;;  %s5379_s16 = sld [smem:[#allocation12_spill]] }
 0xb00   : > { %2959 = vrot.lane.b32.xlu0 %v5165_v29, %s4693_s15  ;;  %s5378_s15 = sld [smem:[#allocation9_spill]] }
 0xb6b   : > { %v3437_v43 = vpop.xlane.xlu0 %3436  ;;  %v3440_v44 = vpop.xlane.xlu1 %3439 }
 0xb6c   : > { %v3447_v40 = vsub.f32 %v3291_v14, %v3437_v43  ;;  %v3448_v41 = vsub.f32 %v3337_v15, %v3440_v44 }
 0xb6e   : > { %v3451_v42 = vmul.f32 1.442695, %v3447_v40  ;;  %v3453_v45 = vmul.f32 1.442695, %v3448_v41 }
 0xb6f   : > { %v2964_v37 = vpop.permute.xlu1 %2963 }
 0xb70   : > { %4634 = vpow2.f32 %v3451_v42  ;;  %v2975_v62 = vcombine.low %v5163_v1, %v2964_v37  ;;  %v2976_v6 = vcombine.high %v5163_v1, %v2964_v37 }
 0xb71   : > { %4636 = vpow2.f32 %v3453_v45 }
 0xb72   : > { %v2990_v7 = vrot.slane %v2976_v6, %v4921_v53 }
 0xb73   : > { %v3443_v50 = vpop.xlane.xlu0 %3442  ;;  %v2966_v0 = vpop.permute.xlu1 %2965 }
 0xb74   : > { %v3449_v54 = vsub.f32 %v3383_v27, %v3443_v50  ;;  %v3043_v5 = vcombine.low %v5165_v29, %v2966_v0  ;;  %v3044_v61 = vcombine.high %v5165_v29, %v2966_v0 }
 0xb76   : > { %v3455_v56 = vmul.f32 1.442695, %v3449_v54  ;;  %v3051_v17 = vrot.slane %v3043_v5, %v4921_v53  ;;  %v3058_v18 = vrot.slane %v3044_v61, %v4921_v53 }
 0xb77   : > { %v3446_v51 = vpop.xlane.xlu0 %3445 }
 0xb78   : > { %v3450_v52 = vsub.f32 %v3429_v28, %v3446_v51 }
 0xb7a   : > { %v5213_v46 = vpop.eup %4634  ;;  %v3457_v55 = vmul.f32 1.442695, %v3450_v52 }
 0xb7b   : > { %v5215_v47 = vpop.eup %4636  ;;  %v3459_v48 = vsel %vm2204_vm5, %v5213_v46, 0.0  ;;  %v2960_v2 = vpop.permute.xlu0 %2959 }
 0xb7c   : > { %3460 = vadd.xlane.f32.xlu1 %v3459_v48  ;;  %v3462_v49 = vsel %vm2204_vm5, %v5215_v47, 0.0  ;;  %4638 = vpow2.f32 %v3457_v55 }
 0xb7d   : > { %3463 = vadd.xlane.f32.xlu0 %v3462_v49  ;;  %4640 = vpow2.f32 %v3455_v56 }
 0xb86   : > { %v5225_v57 = vpop.eup %4638 }
 0xb87   : > { %v5227_v58 = vpop.eup %4640  ;;  %v3468_v60 = vsel %vm2204_vm5, %v5225_v57, 0.0 }
 0xb88   : > { %v3465_v63 = vsel %vm2204_vm5, %v5227_v58, 0.0 }
 0xb8d   : > { %2971 = vrot.lane.b32.xlu1 %v5165_v29, %s4692_s11  ;;  %v2983_v29 = vrot.slane %v2975_v62, %v4921_v53 }
 0xb93   : > { %2969 = vrot.lane.b32.xlu0 %v5163_v1, %s4692_s11  ;;  %s5377_s11 = sld [smem:[#allocation8_spill]] }
 0xbb1   : > { %3469 = vadd.xlane.f32.xlu1 %v3468_v60 }
 0xbb2   : > { %3466 = vadd.xlane.f32.xlu0 %v3465_v63 }
 0xc09   : > { %v3461_v3 = vpop.xlane.xlu1 %3460 }
 0xc0a   : > { %v3464_v4 = vpop.xlane.xlu0 %3463  ;;  %4642 = vrcp.f32 %v3461_v3 }
 0xc0b   : > { %4644 = vrcp.f32 %v3464_v4 }
 0xc0d   : > { %v2972_v10 = vpop.permute.xlu1 %2971 }
 0xc0e   : > { %v3059_v11 = vcombine.low %v2960_v2, %v2972_v10  ;;  %v3060_v26 = vcombine.high %v2960_v2, %v2972_v10  ;;  %v2970_v12 = vpop.permute.xlu0 %2969 }
 0xc0f   : > { %v2991_v13 = vcombine.low %v2958_v39, %v2970_v12  ;;  %v2992_v16 = vcombine.high %v2958_v39, %v2970_v12 }
 0xc10   : > { %v3067_v14 = vrot.slane %v3059_v11, %v4921_v53  ;;  %v3074_v15 = vrot.slane %v3060_v26, %v4921_v53 }
 0xc11   : > { %v2999_v1 = vrot.slane %v2991_v13, %v4921_v53  ;;  %v3006_v19 = vrot.slane %v2992_v16, %v4921_v53 }
 0xc12   : > { %v3075_v8 = vcombine.low %v3051_v17, %v3067_v14  ;;  %v3076_v20 = vcombine.high %v3051_v17, %v3067_v14  ;;  %v3091_v22 = vcombine.low %v3058_v18, %v3074_v15  ;;  %v3092_v23 = vcombine.high %v3058_v18, %v3074_v15 }
 0xc13   : > { %v3007_v24 = vcombine.low %v2983_v29, %v2999_v1  ;;  %v3008_v25 = vcombine.high %v2983_v29, %v2999_v1  ;;  %v3023_v27 = vcombine.low %v2990_v7, %v3006_v19  ;;  %v3024_v28 = vcombine.high %v2990_v7, %v3006_v19 }
 0xc14   : > { %v3083_v30 = vrot.slane %v3075_v8, %v4924_v59  ;;  %v3090_v31 = vrot.slane %v3076_v20, %v4924_v59  ;;  %v3099_v32 = vrot.slane %v3091_v22, %v4924_v59  ;;  %v3106_v33 = vrot.slane %v3092_v23, %v4924_v59  ;;  %v4643_v11 = vpop.eup %4642 }
 0xc15   : > { %v3015_v34 = vrot.slane %v3007_v24, %v4924_v59  ;;  %v3022_v35 = vrot.slane %v3008_v25, %v4924_v59  ;;  %v3031_v36 = vrot.slane %v3023_v27, %v4924_v59  ;;  %v3038_v40 = vrot.slane %v3024_v28, %v4924_v59  ;;  %v4645_v16 = vpop.eup %4644 }
 0xc16   : > { %v3179_v38 = vcombine.low %v3083_v30, %v3090_v31  ;;  %v4250_v39 = vcombine.high %v3083_v30, %v3090_v31  ;;  %v3195_v43 = vcombine.low %v3099_v32, %v3106_v33  ;;  %v4251_v44 = vcombine.high %v3099_v32, %v3106_v33 }
 0xc17   : > { %v3111_v41 = vcombine.low %v3015_v34, %v3022_v35  ;;  %v4248_v42 = vcombine.high %v3015_v34, %v3022_v35  ;;  %v3127_v54 = vcombine.low %v3031_v36, %v3038_v40  ;;  %v4249_v55 = vcombine.high %v3031_v36, %v3038_v40 }
 0xc18   : > { %v3186_v45 = vrot.slane %v3179_v38, %v4921_v53  ;;  %v3194_v48 = vrot.slane %v4250_v39, %v4921_v53  ;;  %v3202_v49 = vrot.slane %v3195_v43, %v4921_v53  ;;  %v3210_v50 = vrot.slane %v4251_v44, %v4921_v53  ;;  %v4602_v39 = vld [vmem:[%s5377_s11] sm:$0xff]  }
 0xc19   : > { %v3118_v51 = vrot.slane %v3111_v41, %v4921_v53  ;;  %v3126_v52 = vrot.slane %v4248_v42, %v4921_v53  ;;  %v3134_v63 = vrot.slane %v3127_v54, %v4921_v53  ;;  %v3142_v3 = vrot.slane %v4249_v55, %v4921_v53 }
 0xc1a   : > { %v3211_v56 = vcombine.low %v3186_v45, %v3194_v48  ;;  %v3212_v60 = vcombine.high %v3186_v45, %v3194_v48  ;;  %v3227_v0 = vcombine.low %v3202_v49, %v3210_v50  ;;  %v3228_v5 = vcombine.high %v3202_v49, %v3210_v50 }
 0xc1b   : > { %v3143_v37 = vcombine.low %v3118_v51, %v3126_v52  ;;  %v3144_v2 = vcombine.high %v3118_v51, %v3126_v52  ;;  %v3159_v6 = vcombine.low %v3134_v63, %v3142_v3  ;;  %v3160_v10 = vcombine.high %v3134_v63, %v3142_v3 }
 0xc1c   : > { %v3219_v4 = vrot.slane %v3211_v56, %v4924_v59  ;;  %v3235_v61 = vrot.slane %v3227_v0, %v4924_v59  ;;  %v3226_v12 = vrot.slane %v3212_v60, %v4924_v59  ;;  %v3242_v13 = vrot.slane %v3228_v5, %v4924_v59 }
 0xc1d   : > { %v3151_v62 = vrot.slane %v3143_v37, %v4924_v59  ;;  %v3158_v26 = vrot.slane %v3144_v2, %v4924_v59  ;;  %v3167_v17 = vrot.slane %v3159_v6, %v4924_v59  ;;  %v3174_v15 = vrot.slane %v3160_v10, %v4924_v59 }
 0xc1e   : > { %v3243_v18 = vcombine.low %v3219_v4, %v3235_v61  ;;  %v3244_v14 = vcombine.high %v3219_v4, %v3235_v61  ;;  %v3475_v1 = vmul.f32 %v4643_v11, %v5213_v46  ;;  %v3476_v19 = vmul.f32 %v4645_v16, %v5215_v47  ;;  %v4603_v11 = vld [vmem:[%s5377_s11 + $0x8] sm:$0xff]  }
 0xc1f   : > { %v3175_v29 = vcombine.low %v3151_v62, %v3167_v17  ;;  %v3176_v7 = vcombine.high %v3151_v62, %v3167_v17  ;;  %v3245_v8 = vcombine.low %v3226_v12, %v3242_v13  ;;  %v3246_v20 = vcombine.high %v3226_v12, %v3242_v13 }
 0xc20   : > { %v3177_v24 = vcombine.low %v3158_v26, %v3174_v15  ;;  %v3178_v25 = vcombine.high %v3158_v26, %v3174_v15  ;;  %v3479_v27 = vpack.c.bf16 %v3475_v1, %v3475_v1  ;;  %v3480_v28 = vpack.c.bf16 %v3476_v19, %v3476_v19 }
 0xc21   : > { %v3247_v22 = vpack.c.bf16 %v3243_v18, %v3175_v29  ;;  %v3248_v23 = vpack.c.bf16 %v3244_v14, %v3176_v7 }
 0xc22   : > { %v3249_v30 = vpack.c.bf16 %v3245_v8, %v3177_v24  ;;  %v3250_v31 = vpack.c.bf16 %v3246_v20, %v3178_v25 }
 0xc23   : > { %4481 = vmatpush3.bf16.msra.mxu1 %v3247_v22  ;;  %4487 = vmatpush3.bf16.msra.mxu0 %v3248_v23 }
 0xc24   : > { %4492 = vmatprep.subr.bf16.mxu1 %v4690_v9  ;;  %4498 = vmatprep.subr.bf16.mxu0 %v4690_v9 }
 0xc26   : > { %4483 = vmatmul.mubr.msk.bf16.vlgmr.msra.gmra.mrb[32].mxu1 %vm2204_vm5, %v3479_v27  ;;  %4489 = vmatmul.mubr.msk.bf16.vlgmr.msra.gmra.mrb[44].mxu0 %vm2204_vm5, %v3480_v28 }
 0xc27   : > { %4493 = vmatpush3.bf16.msra.mxu1 %v3249_v30  ;;  %4499 = vmatpush3.bf16.msra.mxu0 %v3250_v31 }
 0xc28   : > { %4494 = vmatprep.mubr.msk.bf16.mxu1 %vm4691_vm1, %v4690_v9  ;;  %4500 = vmatprep.mubr.msk.bf16.mxu0 %vm4691_vm1, %v4690_v9 }
 0xc29   : > { %4504 = vmatprep.subr.bf16.mxu1 %v4690_v9  ;;  %4512 = vmatprep.subr.bf16.mxu0 %v4690_v9 }
 0xc3e   : > { %v3470_v46 = vpop.xlane.xlu1 %3469 }
 0xc3f   : > { %4646 = vrcp.f32 %v3470_v46  ;;  %v3467_v47 = vpop.xlane.xlu0 %3466 }
 0xc40   : > { %4648 = vrcp.f32 %v3467_v47 }
 0xc49   : > { %v4647_v32 = vpop.eup %4646 }
 0xc4a   : > { %v4649_v33 = vpop.eup %4648  ;;  %v3478_v34 = vmul.f32 %v4647_v32, %v5225_v57 }
 0xc4b   : > { %v3477_v35 = vmul.f32 %v4649_v33, %v5227_v58 }
 0xc4c   : > { %v3482_v36 = vpack.c.bf16 %v3478_v34, %v3478_v34 }
 0xc4d   : > { %v3481_v38 = vpack.c.bf16 %v3477_v35, %v3477_v35 }
 0xc4e   : > { %4501 = vmatmul.mubr.msk.bf16.vlgmr.msra.gmra.mrb[48].mxu0 %vm2204_vm5, %v3482_v36 }
 0xc4f   : > { %4495 = vmatmul.mubr.msk.bf16.vlgmr.msra.gmra.mrb[36].mxu1 %vm2204_vm5, %v3481_v38  ;;  %4516 = vmatprep.mubr.msk.bf16.mxu0 %vm4691_vm1, %v4690_v9  ;;  %v4262_v38 = vld [vmem:[%s5378_s15] ss:$0 sm:$0xff] }
 0xc50   : > { %4508 = vmatprep.mubr.msk.bf16.mxu1 %vm4691_vm1, %v4690_v9  ;;  %4505 = vmatpush3.bf16.msra.mxu1 %v4602_v39 }
 0xc51   : > { %4506 = vmatprep.subr.bf16.mxu1 %v4690_v9 }
 0xc54   : > { %4507 = vmatpush3.bf16.msra.mxu1 %v4603_v11  ;;  %v4612_v11 = vld [vmem:[%s4839_s6 + $0x30] sm:$0xff]  }
 0xc55   : > { %4520 = vmatprep.subr.bf16.mxu1 %v4690_v9 }
 0xcf9   : > { %v3520_v43 = vpop.f32.mrb[32].mxu1  ;;  %v3563_v57 = vpop.f32.mrb[44].mxu0 }
 0xcfa   : > { %v4484_v44 = vpop.f32.mrb[33].mxu1  ;;  %v4490_v58 = vpop.f32.mrb[45].mxu0 }
 0xcfb   : > { %v3523_v40 = vpop.f32.mrb[34].mxu1  ;;  %v3566_v41 = vpop.f32.mrb[46].mxu0 }
 0xcfc   : > { %v4485_v42 = vpop.f32.mrb[35].mxu1  ;;  %v4491_v45 = vpop.f32.mrb[47].mxu0 }
 0xd21   : > { %v3649_v48 = vpop.f32.mrb[48].mxu0 }
 0xd22   : > { %v3606_v49 = vpop.f32.mrb[36].mxu1  ;;  %v3671_v50 = vcombine.low %v3563_v57, %v3649_v48  ;;  %v3672_v51 = vcombine.high %v3563_v57, %v3649_v48  ;;  %v4502_v52 = vpop.f32.mrb[49].mxu0 }
 0xd23   : > { %v3655_v54 = vcombine.low %v3520_v43, %v3606_v49  ;;  %v3656_v55 = vcombine.high %v3520_v43, %v3606_v49  ;;  %v4496_v56 = vpop.f32.mrb[37].mxu1  ;;  %v3652_v60 = vpop.f32.mrb[50].mxu0 }
 0xd24   : > { %v3679_v63 = vrot.slane %v3671_v50, %v4921_v53  ;;  %v3686_v37 = vrot.slane %v3672_v51, %v4921_v53  ;;  %v3609_v0 = vpop.f32.mrb[38].mxu1  ;;  %v4503_v2 = vpop.f32.mrb[51].mxu0  ;;  %v4604_v51 = vld [vmem:[%s5379_s16] sm:$0xff]  }
 0xd25   : > { %v3663_v3 = vrot.slane %v3655_v54, %v4921_v53  ;;  %v3670_v4 = vrot.slane %v3656_v55, %v4921_v53  ;;  %v4497_v5 = vpop.f32.mrb[39].mxu1  ;;  %4513 = vmatpush3.bf16.msra.mxu0 %v4604_v51 }
 0xd26   : > { %4514 = vmatprep.subr.bf16.mxu0 %v4690_v9  ;;  %v4607_v5 = vld [vmem:[%s4839_s6 + $0x8] sm:$0xff]  }
 0xd27   : > { %v3687_v61 = vcombine.low %v3663_v3, %v3679_v63  ;;  %v3688_v62 = vcombine.high %v3663_v3, %v3679_v63  ;;  %v3703_v6 = vcombine.low %v3670_v4, %v3686_v37  ;;  %v3704_v10 = vcombine.high %v3670_v4, %v3686_v37  ;;  %v4606_v4 = vld [vmem:[%s4839_s6] sm:$0xff]  }
 0xd29   : > { %v3695_v26 = vrot.slane %v3687_v61, %v4924_v59  ;;  %v3702_v12 = vrot.slane %v3688_v62, %v4924_v59  ;;  %v3711_v13 = vrot.slane %v3703_v6, %v4924_v59  ;;  %v3718_v16 = vrot.slane %v3704_v10, %v4924_v59  ;;  %v4608_v61 = vld [vmem:[%s4839_s6 + $0x10] sm:$0xff]   ;;  %v4609_v62 = vld [vmem:[%s4839_s6 + $0x18] sm:$0xff]   ;;  %v4610_v6 = vld [vmem:[%s4839_s6 + $0x20] sm:$0xff]  }
 0xd2a   : > { %v4611_v10 = vld [vmem:[%s4839_s6 + $0x28] sm:$0xff]  }
 0xd2b   : > { %v3723_v17 = vcombine.low %v3695_v26, %v3702_v12  ;;  %v4260_v18 = vcombine.high %v3695_v26, %v3702_v12  ;;  %v3739_v14 = vcombine.low %v3711_v13, %v3718_v16  ;;  %v4261_v15 = vcombine.high %v3711_v13, %v3718_v16  ;;  %v4613_v26 = vld [vmem:[%s4839_s6 + $0x38] sm:$0xff]   ;;  %v4268_v12 = vld [vmem:[%s4834_s4] ss:$0 sm:$0xff] }
 0xd2d   : > { %v3730_v29 = vrot.slane %v3723_v17, %v4921_v53  ;;  %v3738_v7 = vrot.slane %v4260_v18, %v4921_v53  ;;  %v3746_v1 = vrot.slane %v3739_v14, %v4921_v53  ;;  %v3754_v19 = vrot.slane %v4261_v15, %v4921_v53 }
 0xd2f   : > { %v3756_v8 = vcombine.high %v3730_v29, %v3738_v7  ;;  %v3772_v20 = vcombine.high %v3746_v1, %v3754_v19  ;;  %v3755_v22 = vcombine.low %v3730_v29, %v3738_v7  ;;  %v3771_v23 = vcombine.low %v3746_v1, %v3754_v19 }
 0xd31   : > { %v3770_v24 = vrot.slane %v3756_v8, %v4924_v59  ;;  %v3786_v25 = vrot.slane %v3772_v20, %v4924_v59  ;;  %v3763_v27 = vrot.slane %v3755_v22, %v4924_v59  ;;  %v3779_v28 = vrot.slane %v3771_v23, %v4924_v59 }
 0xd33   : > { %v3789_v30 = vcombine.low %v3770_v24, %v3786_v25  ;;  %v3788_v31 = vcombine.high %v3763_v27, %v3779_v28  ;;  %v3790_v46 = vcombine.high %v3770_v24, %v3786_v25  ;;  %v3787_v47 = vcombine.low %v3763_v27, %v3779_v28  ;;  %v4280_v25 = vld [vmem:[%s4844_s20] ss:$0 sm:$0xff] }
 0xd35   : > { %3796 = vrot.lane.b32.xlu1 %v3789_v30, %s4698_s18  ;;  %3792 = vrot.lane.b32.xlu0 %v3788_v31, %s4699_s22  ;;  %s5380_s18 = sld [smem:[#allocation10_spill]]  ;;  %s5381_s22 = sld [smem:[#allocation11_spill]] }
 0xd39   : > { %3800 = vrot.lane.b32.xlu0 %v3790_v46, %s4700_s23  ;;  %s945_s23 = scalar_lea.vmem %s4849_s30, %s4189_s0 }
 0xd3b   : > { %v4266_v60 = vld [vmem:[%s5380_s18] ss:$0 sm:$0xff] }
 0xd3c   : > { %v4267_v37 = vld [vmem:[%s5381_s22] ss:$0 sm:$0xff] }
 0xda7   : > { %v3793_v53 = vpop.permute.xlu0 %3792  ;;  %v3797_v32 = vpop.permute.xlu1 %3796 }
 0xda8   : > { %v3803_v33 = vsel %vm1637_vm3, %v3787_v47, %v3793_v53 }
 0xda9   : > { %v3804_v35 = vsel %vm2204_vm5, %v3803_v33, %v3797_v32 }
 0xdab   : > { %v3801_v34 = vpop.permute.xlu0 %3800 }
 0xdac   : > { %v3805_v59 = vsel %vm2206_vm6, %v3804_v35, %v3801_v34 }
 0xdad   : > { %v3806_v36 = vpack.c.bf16 %v3805_v59, %v3805_v59 }
 0xdaf   : > { %4509 = vmatmul.mubr.msk.bf16.vlgmr.msra.gmra.mrb[40].mxu1 %vm953_vm0, %v3806_v36 }
 0xdb0   : > { %4536 = vmatprep.mubr.msk.bf16.mxu1 %vm4691_vm1, %v4690_v9  ;;  %4521 = vmatpush3.bf16.msra.mxu1 %v4606_v4 }
 0xdb1   : > { %4522 = vmatprep.subr.bf16.mxu1 %v4690_v9 }
 0xdb4   : > { %4523 = vmatpush3.bf16.msra.mxu1 %v4607_v5 }
 0xdb5   : > { %4524 = vmatprep.subr.bf16.mxu1 %v4690_v9 }
 0xdb8   : > { %4525 = vmatpush3.bf16.msra.mxu1 %v4608_v61 }
 0xdb9   : > { %4526 = vmatprep.subr.bf16.mxu1 %v4690_v9 }
 0xdbc   : > { %4527 = vmatpush3.bf16.msra.mxu1 %v4609_v62 }
 0xdbd   : > { %4528 = vmatprep.subr.bf16.mxu1 %v4690_v9 }
 0xdc0   : > { %4529 = vmatpush3.bf16.msra.mxu1 %v4610_v6 }
 0xdc1   : > { %4530 = vmatprep.subr.bf16.mxu1 %v4690_v9 }
 0xdc4   : > { %4531 = vmatpush3.bf16.msra.mxu1 %v4611_v10 }
 0xdc5   : > { %4532 = vmatprep.subr.bf16.mxu1 %v4690_v9 }
 0xdc8   : > { %4533 = vmatpush3.bf16.msra.mxu1 %v4612_v11 }
 0xdc9   : > { %4534 = vmatprep.subr.bf16.mxu1 %v4690_v9 }
 0xdcc   : > { %4535 = vmatpush3.bf16.msra.mxu1 %v4613_v26 }
 0xe82   : > { %v3862_v39 = vpop.f32.mrb[40].mxu1 }
 0xe83   : > { %v3863_v43 = vadd.f32 %v4262_v38, %v3862_v39  ;;  %v4510_v57 = vpop.f32.mrb[41].mxu1 }
 0xe84   : > { %v3865_v44 = vpop.f32.mrb[42].mxu1 }
 0xe85   : > { %v5320_v58 = vadd.f32 %v3863_v43, %v5077_v21  ;;  %v4511_v40 = vpop.f32.mrb[43].mxu1  ;;  %v4605_v21 = vld [vmem:[%s5379_s16 + $0x8] sm:$0xff]  }
 0xe86   : > { %4515 = vmatpush3.bf16.msra.mxu0 %v4605_v21 }
 0xe87   : > { %v3871_v41 = vsel %vm953_vm0, %v5320_v58, 0.0 }
 0xe88   : > { %3872 = vadd.xlane.f32.xlu1 %v3871_v41 }
 0xf15   : > { %v3873_v42 = vpop.xlane.xlu1 %3872 }
 0xf16   : > { %v3874_v45 = vmul.f32 0.03125, %v3873_v42 }
 0xf18   : > { %v3875_v48 = vsub.f32 %v5320_v58, %v3874_v45 }
 0xf1a   : > { %v3876_v49 = vmul.f32 %v3875_v48, %v3875_v48 }
 0xf1c   : > { %v3877_v50 = vsel %vm953_vm0, %v3876_v49, 0.0 }
 0xf1d   : > { %3878 = vadd.xlane.f32.xlu0 %v3877_v50 }
 0xfaa   : > { %v3879_v52 = vpop.xlane.xlu0 %3878 }
 0xfab   : > { %v3880_v54 = vmul.f32 0.03125, %v3879_v52 }
 0xfad   : > { %v3881_v55 = vadd.f32 1e-05, %v3880_v54 }
 0xfaf   : > { %4650 = vrsqrt.f32 %v3881_v55 }
 0xfb9   : > { %v4651_v56 = vpop.eup %4650 }
 0xfba   : > { %v3883_v63 = vmul.f32 %v4651_v56, %v3875_v48 }
 0xfbc   : > { %v3890_v0 = vmul.f32 %v4266_v60, %v3883_v63 }
 0xfbe   : > { %v3897_v2 = vadd.f32 %v4267_v37, %v3890_v0 }
 0xfc0   : > { %v3902_v3 = vpack.c.bf16 %v3897_v2, %v3897_v2 }
 0xfc2   : > { %4517 = vmatmul.mubr.msk.bf16.vlgmr.msra.gmra.mrb[52].mxu0 %vm953_vm0, %v3902_v3 }
0x1095   : > { %v3959_v13 = vpop.f32.mrb[52].mxu0 }
0x1096   : > { %v3960_v16 = vadd.f32 %v4268_v12, %v3959_v13  ;;  %v4518_v17 = vpop.f32.mrb[53].mxu0 }
0x1097   : > { %v3962_v18 = vpop.f32.mrb[54].mxu0 }
0x1098   : > { %v3965_v14 = vmul.f32 %v3960_v16, %v3960_v16  ;;  %v4519_v15 = vpop.f32.mrb[55].mxu0 }
0x109a   : > { %v3966_v29 = vmul.f32 %v3965_v14, %v3960_v16 }
0x109c   : > { %v3967_v7 = vmul.f32 0.044715, %v3966_v29 }
0x109e   : > { %v3968_v1 = vadd.f32 %v3967_v7, %v3960_v16 }
0x10a0   : > { %v3969_v19 = vmul.f32 0.7978846, %v3968_v1 }
0x10a2   : > { %4652 = vtanh.f32 %v3969_v19 }
0x10ac   : > { %v4653_v8 = vpop.eup %4652 }
0x10ad   : > { %v3971_v20 = vadd.f32 1.0, %v4653_v8 }
0x10af   : > { %v3972_v22 = vmul.f32 0.5, %v3971_v20 }
0x10b1   : > { %v3973_v9 = vmul.f32 %v3972_v22, %v3960_v16 }
0x10b3   : > { %v3990_v23 = vpack.c.bf16 %v3973_v9, %v3973_v9 }
0x10b5   : > { %4537 = vmatmul.mubr.bf16.vlgmr.msra.gmra.mrb[44].mxu1 %v3990_v23 }
0x1188   : > { %v4073_v24 = vpop.f32.mrb[44].mxu1 }
0x1189   : > { %v4079_v27 = vadd.f32 %v4073_v24, %v5320_v58  ;;  %v4538_v28 = vpop.f32.mrb[45].mxu1 }
0x118a   : > { %v4076_v30 = vpop.f32.mrb[46].mxu1 }
0x118b   : > { %v4087_v31 = vadd.f32 %v4280_v25, %v4079_v27  ;;  %v4539_v46 = vpop.f32.mrb[47].mxu1 }
0x118d   : > { %v4088_v47 = vpack.c.bf16 %v4087_v31, %v4087_v31 }
0x118f   : > { %4090 = vst.msk [vmem:[%s945_s23] sm:$0xf] %vm4089_vm7, %v4088_v47 }
0x1190 PF: > { %s71_s28 = sadd.s32 1, %s4660_s28  }
0x1191   : > { %p68_p4 = scmp.ge.s32.totalorder %s71_s28, 4  }
0x1193   :  { %70 = sbr.rel (!%p68_p4) target bundleno = 41 (0x29), region = 203 }

// kernel: image_to_text_forward.11
= control target key start
LH: loop header
LB: loop body
LE: loop exit
PB: predicated region body
PF: predicated region fallthrough
CT: control target
= control target key end

     0   :  { %v117_v0 = vmov 0.0   ;;  %vm118_vm0 = vmmov 0   ;;  %vm45_vm1 = vcmask 261120   ;;  %s157_s1 = inlined_call_operand.vmem [shape: bf16[32,128], index: 1, kind: input, shape index: {}]   ;;  %s158_s0 = inlined_call_operand.vmem [shape: bf16[16,32], index: 0, kind: input, shape index: {}]   ;;  %s159_s2 = inlined_call_operand.vmem [shape: f32[1,128], index: 2, kind: input, shape index: {}]   ;;  %s160_s3 = inlined_call_operand.vmem [shape: f32[16,128], index: 3, kind: output, shape index: {}]  }
   0x1   :  { %104 = vmatprep.subr.bf16.mxu0 %v117_v0  ;;  %v114_v1 = vld [vmem:[%s157_s1] sm:$0xff]   ;;  %108 = vmatprep.mubr.msk.bf16.mxu0 %vm118_vm0, %v117_v0  ;;  %v115_v2 = vld [vmem:[%s157_s1 + $0x8] sm:$0xff]  }
   0x2   :  { %105 = vmatpush3.bf16.msra.mxu0 %v114_v1  ;;  %v116_v3 = vld [vmem:[%s158_s0] sm:$0xff]  }
   0x3   :  { %106 = vmatprep.subr.bf16.mxu0 %v117_v0  ;;  %v96_v4 = vld [vmem:[%s159_s2] ss:$0 sm:$0xff] }
   0x6   :  { %107 = vmatpush3.bf16.msra.mxu0 %v115_v2 }
   0x9   :  { %109 = vmatmul.mubr.msk.bf16.vlgmr.msra.gmra.mrb[0].mxu0 %vm45_vm1, %v116_v3 }
  0xdc   :  { %v83_v5 = vpop.f32.mrb[0].mxu0 }
  0xdd   :  { %v84_v6 = vadd.f32 %v96_v4, %v83_v5  ;;  %v110_v7 = vpop.f32.mrb[1].mxu0 }
  0xde   :  { %v86_v8 = vpop.f32.mrb[2].mxu0 }
  0xdf   :  { %90 = vst [vmem:[%s160_s3] sm:$0xff] %v84_v6  ;;  %v87_v9 = vadd.f32 %v96_v4, %v86_v8  ;;  %v111_v10 = vpop.f32.mrb[3].mxu0 }
  0xe1   :  { %91 = vst [vmem:[%s160_s3 + $0x8] sm:$0xff] %v87_v9 }

// kernel: image_to_text_forward.10
= control target key start
LH: loop header
LB: loop body
LE: loop exit
PB: predicated region body
PF: predicated region fallthrough
CT: control target
= control target key end

     0   :  { %s5665_s6 = smov 1   ;;  %s5666_s10 = smov 2   ;;  %s6614_s0 = inlined_call_operand.smem [shape: u32[31], index: -1, kind: input, shape index: {}] }
   0x1   :  { %s5729_s5 = sld [smem:[%s6614_s0]]   ;;  %s5667_s14 = smov 3  }
   0x2   :  { %s5734_s9 = sld [smem:[%s6614_s0 + %s5665_s6]]   ;;  %s5668_s18 = smov 4  }
   0x3   :  { %s5739_s13 = sld [smem:[%s6614_s0 + %s5666_s10]]   ;;  %s5669_s22 = smov 5  }
   0x4   :  { %s5744_s17 = sld [smem:[%s6614_s0 + %s5667_s14]]   ;;  %s5670_s26 = smov 6  }
   0x5   :  { %s5749_s21 = sld [smem:[%s6614_s0 + %s5668_s18]]   ;;  %s5671_s30 = smov 7  }
   0x6   :  { %s5754_s25 = sld [smem:[%s6614_s0 + %s5669_s22]]   ;;  %s5672_s4 = smov 8  }
   0x7   :  { %s5759_s29 = sld [smem:[%s6614_s0 + %s5670_s26]]   ;;  %s5673_s10 = smov 9  }
   0x8   :  { %s5764_s3 = sld [smem:[%s6614_s0 + %s5671_s30]]   ;;  %s5674_s15 = smov 10  }
   0x9   :  { %6633 = sst [smem:[#allocation33_spill]] %s5739_s13  ;;  %s5675_s20 = smov 11  }
   0xa   :  { %6634 = sst [smem:[#allocation34_spill]] %s5744_s17  ;;  %s5676_s26 = smov 12  }
   0xb   :  { %6635 = sst [smem:[#allocation35_spill]] %s5749_s21  ;;  %s5677_s1 = smov 13  }
   0xc   :  { %6636 = sst [smem:[#allocation36_spill]] %s5754_s25  ;;  %s5678_s7 = smov 14  }
   0xd   :  { %6637 = sst [smem:[#allocation37_spill]] %s5759_s29  ;;  %s5680_s22 = smov 16  }
   0xe   :  { %s5769_s8 = sld [smem:[%s6614_s0 + %s5672_s4]]   ;;  %s5681_s28 = smov 17  }
   0xf   :  { %s5774_s14 = sld [smem:[%s6614_s0 + %s5673_s10]]  }
  0x10   :  { %s5779_s19 = sld [smem:[%s6614_s0 + %s5674_s15]]   ;;  %s5679_s15 = smov 15  }
  0x11   :  { %s5784_s24 = sld [smem:[%s6614_s0 + %s5675_s20]]  }
  0x12   :  { %s5789_s30 = sld [smem:[%s6614_s0 + %s5676_s26]]  }
  0x13   :  { %s5794_s6 = sld [smem:[%s6614_s0 + %s5677_s1]]  }
  0x14   :  { %6638 = sst [smem:[#allocation38_spill]] %s5769_s8 }
  0x15   :  { %s5799_s12 = sld [smem:[%s6614_s0 + %s5678_s7]]   ;;  %s5682_s7 = smov 18  }
  0x16   :  { %6639 = sst [smem:[#allocation39_spill]] %s5779_s19 }
  0x17   :  { %s5804_s20 = sld [smem:[%s6614_s0 + %s5679_s15]]   ;;  %s5683_s15 = smov 19  }
  0x18   :  { %s5809_s27 = sld [smem:[%s6614_s0 + %s5680_s22]]   ;;  %s5684_s22 = smov 20  }
  0x19   :  { %s5814_s4 = sld [smem:[%s6614_s0 + %s5681_s28]]   ;;  %s5685_s28 = smov 21  }
  0x1a   :  { %s5824_s19 = sld [smem:[%s6614_s0 + %s5683_s15]]   ;;  %s5687_s15 = smov 23  }
  0x1b   :  { %6640 = sst [smem:[#allocation40_spill]] %s5799_s12 }
  0x1c   :  { %s5819_s12 = sld [smem:[%s6614_s0 + %s5682_s7]]   ;;  %s5686_s7 = smov 22  }
  0x1d   :  { %s5834_s25 = sld [smem:[%s6614_s0 + %s5685_s28]]   ;;  %s5689_s28 = smov 25  }
  0x1e   :  { %6641 = sst [smem:[#allocation41_spill]] %s5809_s27 }
  0x1f   :  { %s5829_s27 = sld [smem:[%s6614_s0 + %s5684_s22]]   ;;  %s5688_s22 = smov 24  }
  0x20   :  { %s5844_s8 = sld [smem:[%s6614_s0 + %s5687_s15]]   ;;  %s5691_s15 = smov 27  }
  0x21   :  { %s5854_s29 = sld [smem:[%s6614_s0 + %s5689_s28]]   ;;  %s5693_s28 = smov 29  }
  0x22   :  { %6642 = sst [smem:[#allocation42_spill]] %s5819_s12 }
  0x23   :  { %s5839_s12 = sld [smem:[%s6614_s0 + %s5686_s7]]   ;;  %s5690_s7 = smov 26  }
  0x24   :  { %s5859_s17 = sld [smem:[%s6614_s0 + %s5690_s7]]   ;;  %s5694_s7 = smov 30  }
  0x25   :  { %6643 = sst [smem:[#allocation43_spill]] %s5829_s27 }
  0x26   :  { %s5849_s27 = sld [smem:[%s6614_s0 + %s5688_s22]]   ;;  %s5692_s22 = smov 28  }
  0x27   :  { %s5864_s13 = sld [smem:[%s6614_s0 + %s5691_s15]]  }
  0x28   :  { %s5874_s21 = sld [smem:[%s6614_s0 + %s5693_s28]]  }
  0x2a   :  { %6645 = sst [smem:[#allocation45_spill]] %s5859_s17 }
  0x2b   :  { %s5879_s17 = sld [smem:[%s6614_s0 + %s5694_s7]]  }
  0x2c   :  { %6644 = sst [smem:[#allocation44_spill]] %s5849_s27 }
  0x2d   :  { %s5869_s27 = sld [smem:[%s6614_s0 + %s5692_s22]]  }
  0x2e   :  { %66 = vsyncpa [#allocation3], 0 }
  0x2f   :  { %67 = vsyncpa [#allocation5], 0 }
  0x30   :  { %68 = vsyncpa [#allocation8], 0 }
  0x31   :  { %69 = vsyncpa [#allocation11], 0 }
  0x32   :  { %70 = vsyncpa [#allocation14], 0 }
  0x33   :  { %71 = vsyncpa [#allocation17], 0 }
  0x34   :  { %72 = vsyncpa [#allocation20], 0 }
  0x35   :  { %73 = vsyncpa [#allocation23], 0  ;;  %s5881_s15 = smov 0  }
  0x36 LB: > { %s5695_s0 = smov [#allocation4]   ;;  %s5887_s18 = sadd.s32 4294967295, %s5663_s15   ;;  %s5663_s15 = sphi %s5881_s15, %s79_s15  }
  0x37   : > { %s792_s16 = sshll.u32 %s5695_s0, 4  ;;  %p4550_p0 = scmp.ge.s32.totalorder %s5663_s15, 1  ;;  %s5892_s16 = int_to_ptr.vmem [resolvable:$true] %s792_s16 }
  0x38   : > { %p750_p1 = scmp.lt.s32.totalorder %s5663_s15, 3  ;;  %p6625_p2 = scmp.eq.s32.totalorder %s5887_s18, 0 }
  0x39   : > { %s5696_s23 = smov [#allocation7]   ;;  %s5697_s28 = smov [#allocation10]  }
  0x3a   : > { %p5894_p3 = pnand %p4550_p0, %p750_p1  ;;  %s817_s26 = sshll.u32 %s5696_s23, 4  ;;  %s5900_s26 = int_to_ptr.vmem [resolvable:$true] %s817_s26 }
  0x3b   : > { %s842_s1 = sshll.u32 %s5697_s28, 4  ;;  %s5698_s7 = smov [#allocation13]   ;;  %s5908_s1 = int_to_ptr.vmem [resolvable:$true] %s842_s1 }
  0x3c   : > { %s6646_s22 = scalar_select %p5894_p3, 1, 0 }
  0x3d   : > { %p4996_p4 = pneg %p5894_p3  ;;  %s870_s10 = sshll.u32 %s5698_s7, 4  ;;  %s5910_s10 = int_to_ptr.vmem [resolvable:$true] %s870_s10 }
  0x3e   : > { %s5205_s11 = scalar_lea.hbm %s5774_s14, 16 }
  0x3f   : > { %p5904_p5 = pnand %p6625_p2, %p4996_p4  ;;  %p5206_p6 = scmp.ne.s32.totalorder %s5774_s14, %s5205_s11 }
  0x40   : > { %p5212_p10 = scmp.lt.u32.totalorder %s5205_s11, %s5774_s14 }
  0x41   : > { %p5916_p7 = pneg %p5904_p5 }
  0x43   : > { %p5208_p8 = pnand %p5916_p7, %p5206_p6 }
  0x45   : > { %p5209_p9 = pneg %p5208_p8 }
  0x47   : > { %p5214_p11 = pnand %p5212_p10, %p5209_p9 }
  0x49   : > { %5217 = shalt.err (!%p5214_p11)
}
  0x4a   : > { %s5218_s23 = scalar_lea.vmem %s5892_s16, 16  ;;  %s5225_s28 = scalar_lea.vmem %s5892_s16, 32 }
  0x4b   : > { %p5219_p12 = scmp.ne.s32.totalorder %s5892_s16, %s5218_s23  ;;  %p5226_p1 = scmp.lt.s32.totalorder %s5892_s16, %s5892_s16 }
  0x4c   : > { %p5227_p4 = scmp.lt.s32.totalorder %s5225_s28, %s5218_s23 }
  0x4d   : > { %p5221_p13 = pnand %p5219_p12, %p5916_p7 }
  0x4e   : > { %p5228_p2 = por %p5227_p4, %p5226_p1 }
  0x4f   : > { %p5222_p0 = pneg %p5221_p13 }
  0x51   : > { %p5229_p6 = pnand %p5228_p2, %p5222_p0 }
  0x53   : > { %5232 = shalt.err (!%p5229_p6)
}
  0x54   : > { %5002 = dma.hbm_to_vmem [thread:$0]  (!%p5904_p5), %s5774_s14, 16, %s5892_s16, [#allocation5]  }
  0x55   : > { %s5233_s7 = scalar_lea.hbm %s5789_s30, 16 }
  0x56   : > { %p5234_p8 = scmp.ne.s32.totalorder %s5789_s30, %s5233_s7  ;;  %p5240_p11 = scmp.lt.u32.totalorder %s5233_s7, %s5789_s30 }
  0x58   : > { %p5236_p9 = pnand %p5234_p8, %p5916_p7 }
  0x5a   : > { %p5237_p10 = pneg %p5236_p9 }
  0x5c   : > { %p5242_p12 = pnand %p5240_p11, %p5237_p10 }
  0x5e   : > { %5245 = shalt.err (!%p5242_p12)
}
  0x5f   : > { %s5246_s11 = scalar_lea.vmem %s5900_s26, 16  ;;  %s5253_s23 = scalar_lea.vmem %s5900_s26, 32 }
  0x60   : > { %p5247_p2 = scmp.ne.s32.totalorder %s5900_s26, %s5246_s11  ;;  %p5254_p1 = scmp.lt.s32.totalorder %s5900_s26, %s5900_s26 }
  0x61   : > { %p5255_p4 = scmp.lt.s32.totalorder %s5253_s23, %s5246_s11 }
  0x62   : > { %p5249_p13 = pnand %p5247_p2, %p5916_p7 }
  0x63   : > { %p5256_p6 = por %p5255_p4, %p5254_p1 }
  0x64   : > { %p5250_p0 = pneg %p5249_p13 }
  0x66   : > { %p5257_p8 = pnand %p5256_p6, %p5250_p0 }
  0x68   : > { %5260 = shalt.err (!%p5257_p8)
}
  0x69   : > { %5008 = dma.hbm_to_vmem [thread:$0]  (!%p5904_p5), %s5789_s30, 16, %s5900_s26, [#allocation8]  }
  0x6a   : > { %s5261_s16 = scalar_lea.hbm %s5804_s20, 16 }
  0x6b   : > { %p5262_p9 = scmp.ne.s32.totalorder %s5804_s20, %s5261_s16  ;;  %p5268_p12 = scmp.lt.u32.totalorder %s5261_s16, %s5804_s20 }
  0x6d   : > { %p5264_p10 = pnand %p5262_p9, %p5916_p7 }
  0x6f   : > { %p5265_p11 = pneg %p5264_p10 }
  0x71   : > { %p5270_p2 = pnand %p5268_p12, %p5265_p11 }
  0x73   : > { %5273 = shalt.err (!%p5270_p2)
}
  0x74   : > { %s5274_s28 = scalar_lea.vmem %s5908_s1, 16  ;;  %s5281_s7 = scalar_lea.vmem %s5908_s1, 32 }
  0x75   : > { %p5275_p13 = scmp.ne.s32.totalorder %s5908_s1, %s5274_s28  ;;  %p5282_p4 = scmp.lt.s32.totalorder %s5908_s1, %s5908_s1 }
  0x76   : > { %p5283_p6 = scmp.lt.s32.totalorder %s5281_s7, %s5274_s28 }
  0x77   : > { %p5277_p0 = pnand %p5275_p13, %p5916_p7 }
  0x78   : > { %p5284_p8 = por %p5283_p6, %p5282_p4 }
  0x79   : > { %p5278_p1 = pneg %p5277_p0 }
  0x7b   : > { %p5285_p9 = pnand %p5284_p8, %p5278_p1 }
  0x7d   : > { %5288 = shalt.err (!%p5285_p9)
}
  0x7e   : > { %5014 = dma.hbm_to_vmem [thread:$0]  (!%p5904_p5), %s5804_s20, 16, %s5908_s1, [#allocation11]  }
  0x7f   : > { %s5289_s26 = scalar_lea.hbm %s5824_s19, 16 }
  0x80   : > { %p5290_p10 = scmp.ne.s32.totalorder %s5824_s19, %s5289_s26  ;;  %p5296_p2 = scmp.lt.u32.totalorder %s5289_s26, %s5824_s19 }
  0x82   : > { %p5292_p11 = pnand %p5290_p10, %p5916_p7 }
  0x84   : > { %p5293_p12 = pneg %p5292_p11 }
  0x86   : > { %p5298_p13 = pnand %p5296_p2, %p5293_p12 }
  0x88   : > { %5301 = shalt.err (!%p5298_p13)
}
  0x89   : > { %s5302_s11 = scalar_lea.vmem %s5910_s10, 16  ;;  %s5309_s23 = scalar_lea.vmem %s5910_s10, 32 }
  0x8a   : > { %p5303_p0 = scmp.ne.s32.totalorder %s5910_s10, %s5302_s11  ;;  %p5310_p6 = scmp.lt.s32.totalorder %s5910_s10, %s5910_s10 }
  0x8b   : > { %p5311_p8 = scmp.lt.s32.totalorder %s5309_s23, %s5302_s11 }
  0x8c   : > { %p5305_p1 = pnand %p5303_p0, %p5916_p7 }
  0x8d   : > { %p5312_p9 = por %p5311_p8, %p5310_p6 }
  0x8e   : > { %p5306_p4 = pneg %p5305_p1 }
  0x90   : > { %p5313_p10 = pnand %p5312_p9, %p5306_p4 }
  0x92   : > { %5316 = shalt.err (!%p5313_p10)
}
  0x93   : > { %5020 = dma.hbm_to_vmem [thread:$0]  (!%p5904_p5), %s5824_s19, 16, %s5910_s10, [#allocation14]  }
  0x94   : > { %s5699_s1 = smov [#allocation16]   ;;  %s5700_s28 = smov [#allocation19]  }
  0x95   : > { %s895_s16 = sshll.u32 %s5699_s1, 4  ;;  %s920_s7 = sshll.u32 %s5700_s28, 4  ;;  %s896_s16 = int_to_ptr.vmem [resolvable:$true] %s895_s16  ;;  %s921_s7 = int_to_ptr.vmem [resolvable:$true] %s920_s7 }
  0x96   : > { %s5317_s26 = scalar_lea.hbm %s5839_s12, 16 }
  0x97   : > { %p5318_p11 = scmp.ne.s32.totalorder %s5839_s12, %s5317_s26  ;;  %p5324_p13 = scmp.lt.u32.totalorder %s5317_s26, %s5839_s12 }
  0x99   : > { %p5320_p12 = pnand %p5318_p11, %p5916_p7 }
  0x9b   : > { %p5321_p2 = pneg %p5320_p12 }
  0x9d   : > { %p5326_p0 = pnand %p5324_p13, %p5321_p2 }
  0x9f   : > { %5329 = shalt.err (!%p5326_p0)
}
  0xa0   : > { %s5330_s11 = scalar_lea.vmem %s896_s16, 16  ;;  %s5337_s10 = scalar_lea.vmem %s896_s16, 32 }
  0xa1   : > { %p5331_p1 = scmp.ne.s32.totalorder %s896_s16, %s5330_s11  ;;  %p5338_p8 = scmp.lt.s32.totalorder %s896_s16, %s896_s16 }
  0xa2   : > { %p5339_p9 = scmp.lt.s32.totalorder %s5337_s10, %s5330_s11 }
  0xa3   : > { %p5333_p4 = pnand %p5331_p1, %p5916_p7 }
  0xa4   : > { %p5340_p10 = por %p5339_p9, %p5338_p8 }
  0xa5   : > { %p5334_p6 = pneg %p5333_p4 }
  0xa7   : > { %p5341_p3 = pnand %p5340_p10, %p5334_p6 }
  0xa9   : > { %5344 = shalt.err (!%p5341_p3)
}
  0xaa   : > { %5026 = dma.hbm_to_vmem [thread:$0]  (!%p5904_p5), %s5839_s12, 16, %s896_s16, [#allocation17]  }
  0xab   : > { %s5345_s23 = scalar_lea.hbm %s5854_s29, 16 }
  0xac   : > { %p5346_p11 = scmp.ne.s32.totalorder %s5854_s29, %s5345_s23  ;;  %p5352_p13 = scmp.lt.u32.totalorder %s5345_s23, %s5854_s29 }
  0xae   : > { %p5348_p12 = pnand %p5346_p11, %p5916_p7 }
  0xb0   : > { %p5349_p2 = pneg %p5348_p12 }
  0xb2   : > { %p5354_p0 = pnand %p5352_p13, %p5349_p2 }
  0xb4   : > { %5357 = shalt.err (!%p5354_p0)
}
  0xb5   : > { %s5358_s1 = scalar_lea.vmem %s921_s7, 16  ;;  %s5365_s28 = scalar_lea.vmem %s921_s7, 32 }
  0xb6   : > { %p5359_p3 = scmp.ne.s32.totalorder %s921_s7, %s5358_s1  ;;  %p5366_p6 = scmp.lt.s32.totalorder %s921_s7, %s921_s7 }
  0xb7   : > { %p5367_p8 = scmp.lt.s32.totalorder %s5365_s28, %s5358_s1 }
  0xb8   : > { %p5361_p1 = pnand %p5359_p3, %p5916_p7 }
  0xb9   : > { %p5368_p9 = por %p5367_p8, %p5366_p6 }
  0xba   : > { %p5362_p4 = pneg %p5361_p1 }
  0xbc   : > { %p5369_p10 = pnand %p5368_p9, %p5362_p4 }
  0xbe   : > { %5372 = shalt.err (!%p5369_p10)
}
  0xbf   : > { %5032 = dma.hbm_to_vmem [thread:$0]  (!%p5904_p5), %s5854_s29, 16, %s921_s7, [#allocation20]  }
  0xc0   : > { %s5701_s16 = smov [#allocation22]   ;;  %s5702_s11 = smov [#allocation2]  }
  0xc1   : > { %s945_s26 = sshll.u32 %s5701_s16, 4  ;;  %s778_s10 = sshll.u32 %s5702_s11, 4  ;;  %s946_s26 = int_to_ptr.vmem [resolvable:$true] %s945_s26  ;;  %s779_s10 = int_to_ptr.vmem [resolvable:$true] %s778_s10 }
  0xc2   : > { %s5373_s23 = scalar_lea.hbm %s5869_s27, 16 }
  0xc3   : > { %p5374_p11 = scmp.ne.s32.totalorder %s5869_s27, %s5373_s23  ;;  %p5380_p13 = scmp.lt.u32.totalorder %s5373_s23, %s5869_s27 }
  0xc5   : > { %p5376_p12 = pnand %p5374_p11, %p5916_p7 }
  0xc7   : > { %p5377_p2 = pneg %p5376_p12 }
  0xc9   : > { %p5382_p0 = pnand %p5380_p13, %p5377_p2 }
  0xcb   : > { %5385 = shalt.err (!%p5382_p0)
}
  0xcc   : > { %s5386_s1 = scalar_lea.vmem %s946_s26, 16  ;;  %s5393_s7 = scalar_lea.vmem %s946_s26, 32 }
  0xcd   : > { %p5387_p3 = scmp.ne.s32.totalorder %s946_s26, %s5386_s1  ;;  %p5394_p6 = scmp.lt.s32.totalorder %s946_s26, %s946_s26 }
  0xce   : > { %p5395_p8 = scmp.lt.s32.totalorder %s5393_s7, %s5386_s1 }
  0xcf   : > { %p5389_p1 = pnand %p5387_p3, %p5916_p7 }
  0xd0   : > { %p5396_p9 = por %p5395_p8, %p5394_p6 }
  0xd1   : > { %p5390_p4 = pneg %p5389_p1 }
  0xd3   : > { %p5397_p10 = pnand %p5396_p9, %p5390_p4 }
  0xd5   : > { %5400 = shalt.err (!%p5397_p10)
}
  0xd6   : > { %5038 = dma.hbm_to_vmem [thread:$0]  (!%p5904_p5), %s5869_s27, 16, %s946_s26, [#allocation23]  }
  0xd7   : > { %s5401_s28 = scalar_lea.hbm %s5764_s3, 16 }
  0xd8   : > { %p5402_p11 = scmp.ne.s32.totalorder %s5764_s3, %s5401_s28  ;;  %p5408_p13 = scmp.lt.u32.totalorder %s5401_s28, %s5764_s3 }
  0xda   : > { %p5404_p12 = pnand %p5402_p11, %p5916_p7 }
  0xdc   : > { %p5405_p2 = pneg %p5404_p12 }
  0xde   : > { %p5410_p0 = pnand %p5408_p13, %p5405_p2 }
  0xe0   : > { %5413 = shalt.err (!%p5410_p0)
}
  0xe1   : > { %s5414_s16 = scalar_lea.vmem %s779_s10, 16  ;;  %s5421_s11 = scalar_lea.vmem %s779_s10, 32 }
  0xe2   : > { %p5415_p3 = scmp.ne.s32.totalorder %s779_s10, %s5414_s16  ;;  %p5422_p6 = scmp.lt.s32.totalorder %s779_s10, %s779_s10 }
  0xe3   : > { %p5423_p8 = scmp.lt.s32.totalorder %s5421_s11, %s5414_s16 }
  0xe4   : > { %p5417_p1 = pnand %p5415_p3, %p5916_p7 }
  0xe5   : > { %p5424_p9 = por %p5423_p8, %p5422_p6 }
  0xe6   : > { %p5418_p4 = pneg %p5417_p1 }
  0xe8   : > { %p5425_p10 = pnand %p5424_p9, %p5418_p4 }
  0xea   : > { %5428 = shalt.err (!%p5425_p10)
}
  0xeb   : > { %4999 = dma.hbm_to_vmem [thread:$0]  (!%p5904_p5), %s5764_s3, 16, %s779_s10, [#allocation3]  }
  0xec   : > { %s5703_s26 = smov [#allocation6]   ;;  %s5704_s1 = smov [#allocation9]  }
  0xed   : > { %s806_s23 = sshll.u32 %s5703_s26, 4  ;;  %s828_s7 = sshll.u32 %s5704_s1, 4  ;;  %s807_s23 = int_to_ptr.vmem [resolvable:$true] %s806_s23  ;;  %s829_s7 = int_to_ptr.vmem [resolvable:$true] %s828_s7 }
  0xee   : > { %s5429_s28 = scalar_lea.hbm %s5784_s24, 16 }
  0xef   : > { %p5430_p11 = scmp.ne.s32.totalorder %s5784_s24, %s5429_s28  ;;  %p5436_p13 = scmp.lt.u32.totalorder %s5429_s28, %s5784_s24 }
  0xf1   : > { %p5432_p12 = pnand %p5430_p11, %p5916_p7 }
  0xf3   : > { %p5433_p2 = pneg %p5432_p12 }
  0xf5   : > { %p5438_p0 = pnand %p5436_p13, %p5433_p2 }
  0xf7   : > { %5441 = shalt.err (!%p5438_p0)
}
  0xf8   : > { %s5442_s16 = scalar_lea.vmem %s807_s23, 16  ;;  %s5449_s10 = scalar_lea.vmem %s807_s23, 32 }
  0xf9   : > { %p5443_p3 = scmp.ne.s32.totalorder %s807_s23, %s5442_s16  ;;  %p5450_p6 = scmp.lt.s32.totalorder %s807_s23, %s807_s23 }
  0xfa   : > { %p5451_p8 = scmp.lt.s32.totalorder %s5449_s10, %s5442_s16 }
  0xfb   : > { %p5445_p1 = pnand %p5443_p3, %p5916_p7 }
  0xfc   : > { %p5452_p9 = por %p5451_p8, %p5450_p6 }
  0xfd   : > { %p5446_p4 = pneg %p5445_p1 }
  0xff   : > { %p5453_p10 = pnand %p5452_p9, %p5446_p4 }
 0x101   : > { %5456 = shalt.err (!%p5453_p10)
}
 0x102   : > { %5005 = dma.hbm_to_vmem [thread:$0]  (!%p5904_p5), %s5784_s24, 16, %s807_s23, [#allocation5]  }
 0x103   : > { %s5457_s11 = scalar_lea.hbm %s5794_s6, 16 }
 0x104   : > { %p5458_p11 = scmp.ne.s32.totalorder %s5794_s6, %s5457_s11  ;;  %p5464_p13 = scmp.lt.u32.totalorder %s5457_s11, %s5794_s6 }
 0x106   : > { %p5460_p12 = pnand %p5458_p11, %p5916_p7 }
 0x108   : > { %p5461_p2 = pneg %p5460_p12 }
 0x10a   : > { %p5466_p0 = pnand %p5464_p13, %p5461_p2 }
 0x10c   : > { %5469 = shalt.err (!%p5466_p0)
}
 0x10d   : > { %s5470_s26 = scalar_lea.vmem %s829_s7, 16  ;;  %s5477_s1 = scalar_lea.vmem %s829_s7, 32 }
 0x10e   : > { %p5471_p3 = scmp.ne.s32.totalorder %s829_s7, %s5470_s26  ;;  %p5478_p6 = scmp.lt.s32.totalorder %s829_s7, %s829_s7 }
 0x10f   : > { %p5479_p8 = scmp.lt.s32.totalorder %s5477_s1, %s5470_s26 }
 0x110   : > { %p5473_p1 = pnand %p5471_p3, %p5916_p7 }
 0x111   : > { %p5480_p9 = por %p5479_p8, %p5478_p6 }
 0x112   : > { %p5474_p4 = pneg %p5473_p1 }
 0x114   : > { %p5481_p10 = pnand %p5480_p9, %p5474_p4 }
 0x116   : > { %5484 = shalt.err (!%p5481_p10)
}
 0x117   : > { %5011 = dma.hbm_to_vmem [thread:$0]  (!%p5904_p5), %s5794_s6, 16, %s829_s7, [#allocation8]  }
 0x118   : > { %s5705_s23 = smov [#allocation12]   ;;  %s5706_s16 = smov [#allocation15]  }
 0x119   : > { %s856_s28 = sshll.u32 %s5705_s23, 4  ;;  %s884_s10 = sshll.u32 %s5706_s16, 4  ;;  %s857_s28 = int_to_ptr.vmem [resolvable:$true] %s856_s28  ;;  %s885_s10 = int_to_ptr.vmem [resolvable:$true] %s884_s10 }
 0x11a   : > { %s5485_s11 = scalar_lea.hbm %s5814_s4, 16 }
 0x11b   : > { %p5486_p11 = scmp.ne.s32.totalorder %s5814_s4, %s5485_s11  ;;  %p5492_p13 = scmp.lt.u32.totalorder %s5485_s11, %s5814_s4 }
 0x11d   : > { %p5488_p12 = pnand %p5486_p11, %p5916_p7 }
 0x11f   : > { %p5489_p2 = pneg %p5488_p12 }
 0x121   : > { %p5494_p0 = pnand %p5492_p13, %p5489_p2 }
 0x123   : > { %5497 = shalt.err (!%p5494_p0)
}
 0x124   : > { %s5498_s26 = scalar_lea.vmem %s857_s28, 16  ;;  %s5505_s7 = scalar_lea.vmem %s857_s28, 32 }
 0x125   : > { %p5499_p3 = scmp.ne.s32.totalorder %s857_s28, %s5498_s26  ;;  %p5506_p6 = scmp.lt.s32.totalorder %s857_s28, %s857_s28 }
 0x126   : > { %p5507_p8 = scmp.lt.s32.totalorder %s5505_s7, %s5498_s26 }
 0x127   : > { %p5501_p1 = pnand %p5499_p3, %p5916_p7 }
 0x128   : > { %p5508_p9 = por %p5507_p8, %p5506_p6 }
 0x129   : > { %p5502_p4 = pneg %p5501_p1 }
 0x12b   : > { %p5509_p10 = pnand %p5508_p9, %p5502_p4 }
 0x12d   : > { %5512 = shalt.err (!%p5509_p10)
}
 0x12e   : > { %5017 = dma.hbm_to_vmem [thread:$0]  (!%p5904_p5), %s5814_s4, 16, %s857_s28, [#allocation11]  }
 0x12f   : > { %s5513_s1 = scalar_lea.hbm %s5834_s25, 16 }
 0x130   : > { %p5514_p11 = scmp.ne.s32.totalorder %s5834_s25, %s5513_s1  ;;  %p5520_p13 = scmp.lt.u32.totalorder %s5513_s1, %s5834_s25 }
 0x132   : > { %p5516_p12 = pnand %p5514_p11, %p5916_p7 }
 0x134   : > { %p5517_p2 = pneg %p5516_p12 }
 0x136   : > { %p5522_p0 = pnand %p5520_p13, %p5517_p2 }
 0x138   : > { %5525 = shalt.err (!%p5522_p0)
}
 0x139   : > { %s5526_s23 = scalar_lea.vmem %s885_s10, 16  ;;  %s5533_s16 = scalar_lea.vmem %s885_s10, 32 }
 0x13a   : > { %p5527_p3 = scmp.ne.s32.totalorder %s885_s10, %s5526_s23  ;;  %p5534_p6 = scmp.lt.s32.totalorder %s885_s10, %s885_s10 }
 0x13b   : > { %p5535_p8 = scmp.lt.s32.totalorder %s5533_s16, %s5526_s23 }
 0x13c   : > { %p5529_p1 = pnand %p5527_p3, %p5916_p7 }
 0x13d   : > { %p5536_p9 = por %p5535_p8, %p5534_p6 }
 0x13e   : > { %p5530_p4 = pneg %p5529_p1 }
 0x140   : > { %p5537_p10 = pnand %p5536_p9, %p5530_p4 }
 0x142   : > { %5540 = shalt.err (!%p5537_p10)
}
 0x143   : > { %5023 = dma.hbm_to_vmem [thread:$0]  (!%p5904_p5), %s5834_s25, 16, %s885_s10, [#allocation14]  }
 0x144   : > { %s5707_s28 = smov [#allocation18]   ;;  %s5708_s26 = smov [#allocation21]  }
 0x145   : > { %s906_s11 = sshll.u32 %s5707_s28, 4  ;;  %s934_s7 = sshll.u32 %s5708_s26, 4  ;;  %s907_s11 = int_to_ptr.vmem [resolvable:$true] %s906_s11  ;;  %s935_s7 = int_to_ptr.vmem [resolvable:$true] %s934_s7 }
 0x146   : > { %s5541_s1 = scalar_lea.hbm %s5844_s8, 16 }
 0x147   : > { %p5542_p11 = scmp.ne.s32.totalorder %s5844_s8, %s5541_s1  ;;  %p5548_p13 = scmp.lt.u32.totalorder %s5541_s1, %s5844_s8 }
 0x149   : > { %p5544_p12 = pnand %p5542_p11, %p5916_p7 }
 0x14b   : > { %p5545_p2 = pneg %p5544_p12 }
 0x14d   : > { %p5550_p0 = pnand %p5548_p13, %p5545_p2 }
 0x14f   : > { %5553 = shalt.err (!%p5550_p0)
}
 0x150   : > { %s5554_s23 = scalar_lea.vmem %s907_s11, 16  ;;  %s5561_s10 = scalar_lea.vmem %s907_s11, 32 }
 0x151   : > { %p5555_p3 = scmp.ne.s32.totalorder %s907_s11, %s5554_s23  ;;  %p5562_p6 = scmp.lt.s32.totalorder %s907_s11, %s907_s11 }
 0x152   : > { %p5563_p8 = scmp.lt.s32.totalorder %s5561_s10, %s5554_s23 }
 0x153   : > { %p5557_p1 = pnand %p5555_p3, %p5916_p7 }
 0x154   : > { %p5564_p9 = por %p5563_p8, %p5562_p6 }
 0x155   : > { %p5558_p4 = pneg %p5557_p1 }
 0x157   : > { %p5565_p10 = pnand %p5564_p9, %p5558_p4 }
 0x159   : > { %5568 = shalt.err (!%p5565_p10)
}
 0x15a   : > { %5029 = dma.hbm_to_vmem [thread:$0]  (!%p5904_p5), %s5844_s8, 16, %s907_s11, [#allocation17]  }
 0x15b   : > { %s5569_s16 = scalar_lea.hbm %s5864_s13, 16 }
 0x15c   : > { %p5570_p11 = scmp.ne.s32.totalorder %s5864_s13, %s5569_s16  ;;  %p5576_p13 = scmp.lt.u32.totalorder %s5569_s16, %s5864_s13 }
 0x15e   : > { %p5572_p12 = pnand %p5570_p11, %p5916_p7 }
 0x160   : > { %p5573_p2 = pneg %p5572_p12 }
 0x162   : > { %p5578_p0 = pnand %p5576_p13, %p5573_p2 }
 0x164   : > { %5581 = shalt.err (!%p5578_p0)
}
 0x165   : > { %s5582_s28 = scalar_lea.vmem %s935_s7, 16  ;;  %s5589_s26 = scalar_lea.vmem %s935_s7, 32 }
 0x166   : > { %p5583_p3 = scmp.ne.s32.totalorder %s935_s7, %s5582_s28  ;;  %p5590_p6 = scmp.lt.s32.totalorder %s935_s7, %s935_s7 }
 0x167   : > { %p5591_p8 = scmp.lt.s32.totalorder %s5589_s26, %s5582_s28 }
 0x168   : > { %p5585_p1 = pnand %p5583_p3, %p5916_p7 }
 0x169   : > { %p5592_p9 = por %p5591_p8, %p5590_p6 }
 0x16a   : > { %p5586_p4 = pneg %p5585_p1 }
 0x16c   : > { %p5593_p10 = pnand %p5592_p9, %p5586_p4 }
 0x16e   : > { %5596 = shalt.err (!%p5593_p10)
}
 0x16f   : > { %5035 = dma.hbm_to_vmem [thread:$0]  (!%p5904_p5), %s5864_s13, 16, %s935_s7, [#allocation20]  }
 0x170   : > { %s5709_s11 = smov [#allocation24]   ;;  %s5597_s23 = scalar_lea.hbm %s5874_s21, 16 }
 0x171   : > { %s956_s1 = sshll.u32 %s5709_s11, 4  ;;  %p5598_p11 = scmp.ne.s32.totalorder %s5874_s21, %s5597_s23  ;;  %s957_s1 = int_to_ptr.vmem [resolvable:$true] %s956_s1 }
 0x172   : > { %p5604_p13 = scmp.lt.u32.totalorder %s5597_s23, %s5874_s21 }
 0x173   : > { %p5600_p12 = pnand %p5598_p11, %p5916_p7 }
 0x175   : > { %p5601_p2 = pneg %p5600_p12 }
 0x177   : > { %p5606_p0 = pnand %p5604_p13, %p5601_p2 }
 0x179   : > { %5609 = shalt.err (!%p5606_p0)
}
 0x17a   : > { %s5610_s10 = scalar_lea.vmem %s957_s1, 16  ;;  %s5617_s16 = scalar_lea.vmem %s957_s1, 32 }
 0x17b   : > { %p5611_p3 = scmp.ne.s32.totalorder %s957_s1, %s5610_s10  ;;  %p5618_p6 = scmp.lt.s32.totalorder %s957_s1, %s957_s1 }
 0x17c   : > { %p5619_p8 = scmp.lt.s32.totalorder %s5617_s16, %s5610_s10 }
 0x17d   : > { %p5613_p1 = pnand %p5611_p3, %p5916_p7 }
 0x17e   : > { %p5620_p9 = por %p5619_p8, %p5618_p6 }
 0x17f   : > { %p5614_p4 = pneg %p5613_p1 }
 0x181   : > { %p5621_p10 = pnand %p5620_p9, %p5614_p4 }
 0x183   : > { %5624 = shalt.err (!%p5621_p10)
}
 0x184   : > { %5041 = dma.hbm_to_vmem [thread:$0]  (!%p5904_p5), %s5874_s21, 16, %s957_s1, [#allocation23]  }
 0x185   : > { %p6649_p11 = scmp.ne.s32.totalorder %s6646_s22, 0 }
 0x186   : > { %p6650_p12 = scmp.eq.s32.totalorder (!%p6649_p11), %s5887_s18, 0 }
 0x187   : > { %984 = sbr.rel (%p6649_p11) target bundleno = 5179 (0x143b), region = 140 }
 0x18e   : > { %5630 = dma.done.wait (%p6650_p12), [#allocation3], 16   ;;  %p6651_p2 = pmov %p6650_p12 }
 0x190   : > { %5632 = vsyncadd (%p6651_p2), [#allocation3], 4294967280  ;;  %p6652_p7 = pmov %p6651_p2 }
 0x191   : > { %p6653_p13 = pmov %p6651_p2 }
 0x192   : > { %5634 = dma.done.wait (%p6652_p7), [#allocation5], 32  }
 0x193   : > { %5636 = vsyncadd (%p6653_p13), [#allocation5], 4294967264  ;;  %p6654_p0 = pmov %p6651_p2 }
 0x195   : > { %5638 = dma.done.wait (%p6654_p0), [#allocation8], 32   ;;  %p6655_p5 = pmov %p6654_p0 }
 0x196   : > { %p6656_p3 = pmov %p6654_p0 }
 0x197   : > { %5640 = vsyncadd (%p6655_p5), [#allocation8], 4294967264 }
 0x198   : > { %5642 = dma.done.wait (%p6656_p3), [#allocation11], 32   ;;  %p6657_p1 = pmov %p6654_p0 }
 0x199   : > { %p6658_p4 = pmov %p6654_p0 }
 0x19a   : > { %5644 = vsyncadd (%p6657_p1), [#allocation11], 4294967264 }
 0x19b   : > { %5646 = dma.done.wait (%p6658_p4), [#allocation14], 32   ;;  %p6659_p6 = pmov %p6654_p0 }
 0x19c   : > { %p6660_p8 = pmov %p6654_p0 }
 0x19d   : > { %5648 = vsyncadd (%p6659_p6), [#allocation14], 4294967264 }
 0x19e   : > { %5650 = dma.done.wait (%p6660_p8), [#allocation17], 32   ;;  %p6661_p9 = pmov %p6654_p0 }
 0x19f   : > { %p6662_p10 = pmov %p6654_p0 }
 0x1a0   : > { %5652 = vsyncadd (%p6661_p9), [#allocation17], 4294967264 }
 0x1a1   : > { %5654 = dma.done.wait (%p6662_p10), [#allocation20], 32   ;;  %p6663_p11 = pmov %p6654_p0 }
 0x1a2   : > { %p6664_p12 = pmov %p6654_p0 }
 0x1a3   : > { %5656 = vsyncadd (%p6663_p11), [#allocation20], 4294967264 }
 0x1a4   : > { %5658 = dma.done.wait (%p6664_p12), [#allocation23], 32   ;;  %p6665_p2 = pmov %p6654_p0 }
 0x1a5   : > { %p1121_p7 = scmp.lt.s32.totalorder %s5887_s18, 1  ;;  %s6666_s22 = sld [smem:[#allocation35_spill]]  ;;  %vm1141_vm0 = vcmask 261120   ;;  %v5710_v9 = vmov 0.0   ;;  %vm5711_vm1 = vmmov 0   ;;  %v1384_v42 = vlaneseq }
 0x1a6   : > { %5660 = vsyncadd (%p6665_p2), [#allocation23], 4294967264  ;;  %s6667_s26 = sld [smem:[#allocation33_spill]]  ;;  %4748 = vmatprep.subr.bf16.mxu0 %v5710_v9  ;;  %s6668_s11 = sld [smem:[#allocation34_spill]]  ;;  %4752 = vmatprep.mubr.msk.bf16.mxu0 %vm5711_vm1, %v5710_v9  ;;  %v4593_v29 = vld [vmem:[#allocation2] ss:$0 sm:$0xff] }
 0x1a7   : > { %s6684_s18 = smov (!%p1121_p7, %s5887_s18), 1  ;;  %s6669_s1 = sld [smem:[#allocation37_spill]]  ;;  %4772 = vmatprep.subr.bf16.mxu1 %v5710_v9  ;;  %4774 = vmatprep.mubr.msk.bf16.mxu1 %vm5711_vm1, %v5710_v9  ;;  %v6182_v43 = vshrl.u32 %v1384_v42, 7  ;;  %v6184_v44 = vand.u32 127, %v1384_v42  ;;  %v5715_v45 = vmov 1983009808  }
 0x1a8   : > { %s6627_s2 = sshll.u32 %s6684_s18, 2  ;;  %s4679_s0 = sshll.u32 %s6684_s18, 3  ;;  %v1382_v46 = vunpack.c.l.s4 %v5715_v45  ;;  %v5716_v47 = vmov 1934713408   ;;  %vm1825_vm3 = vcmask 64512   ;;  %vm2061_vm4 = vcmask 1043456  }
 0x1a9   : > { %s1124_s7 = scalar_lea.vmem %s5729_s5, %s6627_s2  ;;  %s6136_s28 = scalar_lea.vmem %s5734_s9, %s4679_s0  ;;  %vm1823_vm2 = vcmp.le.s32.totalorder %v6184_v44, %v6182_v43  ;;  %v1414_v48 = vunpack.c.l.s4 %v5716_v47  ;;  %vm2392_vm5 = vcmask 130048   ;;  %vm2394_vm6 = vcmask 195584  }
 0x1aa   : > { %v1135_v0 = vld [vmem:[%s1124_s7] sm:$0xf]  ;;  %s6670_s23 = sld [smem:[#allocation38_spill]]  ;;  %s6671_s10 = sld [smem:[#allocation36_spill]]  ;;  %v1383_v49 = vunpack.c.0.s8 %v1382_v46  ;;  %vm4306_vm7 = vcmask 257024  }
 0x1ab   : > { %v6138_v1 = vunpack.c.l.bf16 %v1135_v0  ;;  %v5136_v8 = vld [vmem:[%s6666_s22] sm:$0xff]   ;;  %v5137_v10 = vld [vmem:[%s6666_s22 + $0x8] sm:$0xff]   ;;  %s6628_s16 = smov 104   ;;  %s5713_s0 = smov 120   ;;  %v1415_v52 = vunpack.c.0.s8 %v1414_v48 }
 0x1ac   : > { %4749 = vmatpush3.bf16.msra.mxu0 %v5136_v8  ;;  %v4587_v15 = vld [vmem:[%s6667_s26] ss:$0 sm:$0xff]  ;;  %s5714_s7 = smov 112   ;;  %v6189_v53 = vsub.s32 %v1383_v49, %v6182_v43  ;;  %s6672_s26 = sld [smem:[#allocation39_spill]] }
 0x1ad   : > { %v1142_v2 = vsel %vm1141_vm0, %v6138_v1, 0.0  ;;  %4750 = vmatprep.subr.bf16.mxu0 %v5710_v9  ;;  %v4588_v17 = vld [vmem:[%s6668_s11] ss:$0 sm:$0xff]  ;;  %v5139_v22 = vld [vmem:[%s6669_s1 + $0x8] sm:$0xff]   ;;  %v6192_v59 = vsub.s32 %v1415_v52, %v6182_v43  ;;  %s5718_s11 = smov 16   ;;  %s6630_s2 = smov 24  }
 0x1ae   : > { %1143 = vadd.xlane.f32.xlu0 %v1142_v2  ;;  %v5138_v20 = vld [vmem:[%s6669_s1] sm:$0xff]  }
 0x1b0   : > { %4751 = vmatpush3.bf16.msra.mxu0 %v5137_v10  ;;  %v5140_v23 = vld [vmem:[%s6670_s23] sm:$0xff]   ;;  %v5141_v24 = vld [vmem:[%s6670_s23 + $0x8] sm:$0xff]  }
 0x1b1   : > { %4756 = vmatprep.subr.bf16.mxu0 %v5710_v9  ;;  %v4589_v33 = vld [vmem:[%s6671_s10] ss:$0 sm:$0xff]  ;;  %s6631_s10 = smov 8  }
 0x23b   : > { %v1144_v3 = vpop.xlane.xlu0 %1143 }
 0x23c   : > { %v1146_v4 = vmul.f32 0.03125, %v1144_v3 }
 0x23e   : > { %v1147_v5 = vsub.f32 %v6138_v1, %v1146_v4 }
 0x240   : > { %v1148_v6 = vmul.f32 %v1147_v5, %v1147_v5 }
 0x242   : > { %v1149_v7 = vsel %vm1141_vm0, %v1148_v6, 0.0 }
 0x243   : > { %1150 = vadd.xlane.f32.xlu0 %v1149_v7 }
 0x2d0   : > { %v1151_v11 = vpop.xlane.xlu0 %1150 }
 0x2d1   : > { %v1152_v12 = vmul.f32 0.03125, %v1151_v11 }
 0x2d3   : > { %v1153_v13 = vadd.f32 1e-05, %v1152_v12 }
 0x2d5   : > { %5163 = vrsqrt.f32 %v1153_v13 }
 0x2df   : > { %v5164_v14 = vpop.eup %5163 }
 0x2e0   : > { %v1155_v16 = vmul.f32 %v5164_v14, %v1147_v5 }
 0x2e2   : > { %v1162_v18 = vmul.f32 %v4587_v15, %v1155_v16 }
 0x2e4   : > { %v1169_v19 = vadd.f32 %v4588_v17, %v1162_v18 }
 0x2e6   : > { %v1174_v21 = vpack.c.bf16 %v1169_v19, %v1169_v19 }
 0x2e8   : > { %4753 = vmatmul.mubr.msk.bf16.vlgmr.msra.gmra.mrb[0].mxu0 %vm1141_vm0, %v1174_v21 }
 0x2e9   : > { %4757 = vmatpush3.bf16.msra.mxu0 %v5138_v20  ;;  %4760 = vmatprep.mubr.msk.bf16.mxu0 %vm5711_vm1, %v5710_v9 }
 0x2ea   : > { %4758 = vmatprep.subr.bf16.mxu0 %v5710_v9 }
 0x2ed   : > { %4759 = vmatpush3.bf16.msra.mxu0 %v5139_v22 }
 0x2ee   : > { %4764 = vmatprep.subr.bf16.mxu0 %v5710_v9 }
 0x2f0   : > { %4761 = vmatmul.mubr.msk.bf16.vlgmr.msra.gmra.mrb[4].mxu0 %vm1141_vm0, %v1174_v21 }
 0x2f1   : > { %4765 = vmatpush3.bf16.msra.mxu0 %v5140_v23  ;;  %4768 = vmatprep.mubr.msk.bf16.mxu0 %vm5711_vm1, %v5710_v9 }
 0x2f2   : > { %4766 = vmatprep.subr.bf16.mxu0 %v5710_v9 }
 0x2f5   : > { %4767 = vmatpush3.bf16.msra.mxu0 %v5141_v24 }
 0x2f6   : > { %4778 = vmatprep.subr.bf16.mxu0 %v5710_v9 }
 0x2f8   : > { %4769 = vmatmul.mubr.msk.bf16.vlgmr.msra.gmra.mrb[8].mxu0 %vm1141_vm0, %v1174_v21 }
 0x2f9   : > { %4780 = vmatprep.mubr.msk.bf16.mxu0 %vm5711_vm1, %v5710_v9 }
 0x3bb   : > { %v1231_v25 = vpop.f32.mrb[0].mxu0 }
 0x3bc   : > { %v4754_v26 = vpop.f32.mrb[1].mxu0  ;;  %v1232_v36 = vadd.f32 %v4589_v33, %v1231_v25 }
 0x3bd   : > { %v1234_v27 = vpop.f32.mrb[2].mxu0 }
 0x3be   : > { %v4755_v28 = vpop.f32.mrb[3].mxu0  ;;  %v1368_v38 = vmul.f32 0.35355338, %v1232_v36 }
 0x3c3   : > { %v1294_v30 = vpop.f32.mrb[4].mxu0 }
 0x3c4   : > { %v1295_v31 = vadd.f32 %v4593_v29, %v1294_v30  ;;  %v4762_v32 = vpop.f32.mrb[5].mxu0 }
 0x3c5   : > { %v1297_v34 = vpop.f32.mrb[6].mxu0 }
 0x3c6   : > { %1526 = vrot.lane.b32.xlu0 %v1295_v31, %s6628_s16  ;;  %1520 = vrot.lane.b32.xlu1 %v1295_v31, %s5713_s0  ;;  %v4763_v35 = vpop.f32.mrb[7].mxu0 }
 0x3ca   : > { %1523 = vrot.lane.b32.xlu1 %v1295_v31, %s5714_s7 }
 0x3cb   : > { %v6177_v37 = vpop.f32.mrb[8].mxu0 }
 0x3cc   : > { %v4770_v39 = vpop.f32.mrb[9].mxu0 }
 0x3cd   : > { %v1360_v40 = vpop.f32.mrb[10].mxu0 }
 0x3ce   : > { %1370 = vrot.lane.b32.xlu1 %v1368_v38, %s5713_s0  ;;  %v4771_v41 = vpop.f32.mrb[11].mxu0 }
 0x3d2   : > { %1373 = vrot.lane.b32.xlu1 %v1368_v38, %s5714_s7 }
 0x3d6   : > { %1376 = vrot.lane.b32.xlu1 %v1368_v38, %s6628_s16 }
 0x438   : > { %v1527_v50 = vpop.permute.xlu0 %1526  ;;  %v1521_v51 = vpop.permute.xlu1 %1520 }
 0x439   : > { %v1545_v54 = vcombine.low %v1521_v51, %v1527_v50  ;;  %v1546_v55 = vcombine.high %v1521_v51, %v1527_v50 }
 0x43b   : > { %v1553_v60 = vrot.slane %v1545_v54, %v6189_v53  ;;  %v1560_v61 = vrot.slane %v1546_v55, %v6189_v53 }
 0x43c   : > { %v1524_v56 = vpop.permute.xlu1 %1523 }
 0x43d   : > { %v1529_v57 = vcombine.low %v1295_v31, %v1524_v56  ;;  %v1530_v58 = vcombine.high %v1295_v31, %v1524_v56 }
 0x43f   : > { %v1537_v62 = vrot.slane %v1529_v57, %v6189_v53  ;;  %v1544_v63 = vrot.slane %v1530_v58, %v6189_v53 }
 0x440   : > { %v1371_v0 = vpop.permute.xlu1 %1370 }
 0x441   : > { %v1561_v2 = vcombine.low %v1537_v62, %v1553_v60  ;;  %v1562_v3 = vcombine.high %v1537_v62, %v1553_v60  ;;  %v1577_v4 = vcombine.low %v1544_v63, %v1560_v61  ;;  %v1578_v5 = vcombine.high %v1544_v63, %v1560_v61 }
 0x443   : > { %v1569_v6 = vrot.slane %v1561_v2, %v6192_v59  ;;  %v1576_v7 = vrot.slane %v1562_v3, %v6192_v59  ;;  %v1585_v8 = vrot.slane %v1577_v4, %v6192_v59  ;;  %v1592_v10 = vrot.slane %v1578_v5, %v6192_v59 }
 0x444   : > { %v1374_v11 = vpop.permute.xlu1 %1373 }
 0x445   : > { %v1597_v12 = vcombine.low %v1569_v6, %v1576_v7  ;;  %v4603_v13 = vcombine.high %v1569_v6, %v1576_v7  ;;  %v1613_v14 = vcombine.low %v1585_v8, %v1592_v10  ;;  %v4604_v15 = vcombine.high %v1585_v8, %v1592_v10 }
 0x446   : > { %v1379_v16 = vcombine.low %v1368_v38, %v1374_v11  ;;  %v1380_v17 = vcombine.high %v1368_v38, %v1374_v11 }
 0x447   : > { %v1604_v18 = vrot.slane %v1597_v12, %v6189_v53  ;;  %v1612_v19 = vrot.slane %v4603_v13, %v6189_v53  ;;  %v1620_v20 = vrot.slane %v1613_v14, %v6189_v53  ;;  %v1628_v21 = vrot.slane %v4604_v15, %v6189_v53 }
 0x448   : > { %v1377_v22 = vpop.permute.xlu1 %1376  ;;  %v1387_v27 = vrot.slane %v1379_v16, %v6189_v53  ;;  %v1394_v28 = vrot.slane %v1380_v17, %v6189_v53 }
 0x449   : > { %v1395_v23 = vcombine.low %v1371_v0, %v1377_v22  ;;  %v1396_v24 = vcombine.high %v1371_v0, %v1377_v22  ;;  %v1629_v25 = vcombine.low %v1604_v18, %v1612_v19  ;;  %v1645_v26 = vcombine.low %v1620_v20, %v1628_v21 }
 0x44a   : > { %v1630_v33 = vcombine.high %v1604_v18, %v1612_v19  ;;  %v1646_v34 = vcombine.high %v1620_v20, %v1628_v21 }
 0x44b   : > { %v1403_v29 = vrot.slane %v1395_v23, %v6189_v53  ;;  %v1410_v30 = vrot.slane %v1396_v24, %v6189_v53  ;;  %v1637_v31 = vrot.slane %v1629_v25, %v6192_v59  ;;  %v1653_v32 = vrot.slane %v1645_v26, %v6192_v59 }
 0x44c   : > { %v1644_v50 = vrot.slane %v1630_v33, %v6192_v59  ;;  %v1660_v51 = vrot.slane %v1646_v34, %v6192_v59  ;;  %v5717_v24 = vmov -1e+30  }
 0x44d   : > { %v1411_v35 = vcombine.low %v1387_v27, %v1403_v29  ;;  %v1412_v36 = vcombine.high %v1387_v27, %v1403_v29  ;;  %v1427_v38 = vcombine.low %v1394_v28, %v1410_v30  ;;  %v1428_v39 = vcombine.high %v1394_v28, %v1410_v30 }
 0x44e   : > { %v1661_v40 = vcombine.low %v1637_v31, %v1653_v32  ;;  %v1662_v41 = vcombine.high %v1637_v31, %v1653_v32  ;;  %v1663_v3 = vcombine.low %v1644_v50, %v1660_v51  ;;  %v1664_v4 = vcombine.high %v1644_v50, %v1660_v51  ;;  %v4597_v51 = vld [vmem:[#allocation4] ss:$0 sm:$0xff] }
 0x44f   : > { %v1419_v42 = vrot.slane %v1411_v35, %v6192_v59  ;;  %v1426_v45 = vrot.slane %v1412_v36, %v6192_v59  ;;  %v1435_v46 = vrot.slane %v1427_v38, %v6192_v59  ;;  %v1442_v47 = vrot.slane %v1428_v39, %v6192_v59 }
 0x450   : > { %v1665_v48 = vpack.c.bf16 %v1661_v40, %v1661_v40  ;;  %v1666_v49 = vpack.c.bf16 %v1662_v41, %v1662_v41  ;;  %v1667_v12 = vpack.c.bf16 %v1663_v3, %v1663_v3  ;;  %v1668_v13 = vpack.c.bf16 %v1664_v4, %v1664_v4 }
 0x451   : > { %v1447_v52 = vcombine.low %v1419_v42, %v1426_v45  ;;  %v4601_v54 = vcombine.high %v1419_v42, %v1426_v45  ;;  %v1463_v55 = vcombine.low %v1435_v46, %v1442_v47  ;;  %v4602_v56 = vcombine.high %v1435_v46, %v1442_v47 }
 0x452   : > { %v1830_v57 = vsel %vm1825_vm3, %v1665_v48, 0  ;;  %v1876_v58 = vsel %vm1825_vm3, %v1666_v49, 0  ;;  %v1922_v18 = vsel %vm1825_vm3, %v1667_v12, 0  ;;  %v1968_v19 = vsel %vm1825_vm3, %v1668_v13, 0 }
 0x453   : > { %v1454_v60 = vrot.slane %v1447_v52, %v6189_v53  ;;  %v1462_v61 = vrot.slane %v4601_v54, %v6189_v53  ;;  %v1470_v62 = vrot.slane %v1463_v55, %v6189_v53  ;;  %v1478_v63 = vrot.slane %v4602_v56, %v6189_v53  ;;  %4773 = vmatpush3.bf16.xpose.msra.mxu1 %v1830_v57 }
 0x454   : > { %4779 = vmatpush3.bf16.xpose.msra.mxu0 %v1876_v58  ;;  %4784 = vmatprep.subr.bf16.mxu1 %v5710_v9  ;;  %v1824_v25 = vsel %vm1823_vm2, 0.0, %v5717_v24  ;;  %v1358_v52 = vadd.f32 %v4597_v51, %v6177_v37 }
 0x455   : > { %4790 = vmatprep.subr.bf16.mxu0 %v5710_v9  ;;  %v1479_v0 = vcombine.low %v1454_v60, %v1462_v61  ;;  %v1495_v2 = vcombine.low %v1470_v62, %v1478_v63  ;;  %v1480_v5 = vcombine.high %v1454_v60, %v1462_v61  ;;  %v1496_v6 = vcombine.high %v1470_v62, %v1478_v63 }
 0x457   : > { %v1487_v7 = vrot.slane %v1479_v0, %v6192_v59  ;;  %v1503_v8 = vrot.slane %v1495_v2, %v6192_v59  ;;  %v1494_v16 = vrot.slane %v1480_v5, %v6192_v59  ;;  %v1510_v17 = vrot.slane %v1496_v6, %v6192_v59 }
 0x459   : > { %v1511_v10 = vcombine.low %v1487_v7, %v1503_v8  ;;  %v1512_v11 = vcombine.high %v1487_v7, %v1503_v8  ;;  %v1513_v20 = vcombine.low %v1494_v16, %v1510_v17  ;;  %v1514_v21 = vcombine.high %v1494_v16, %v1510_v17 }
 0x45b   : > { %v1515_v14 = vpack.c.bf16 %v1511_v10, %v1511_v10  ;;  %v1516_v15 = vpack.c.bf16 %v1512_v11, %v1512_v11  ;;  %v1517_v22 = vpack.c.bf16 %v1513_v20, %v1513_v20  ;;  %v1518_v23 = vpack.c.bf16 %v1514_v21, %v1514_v21 }
 0x45d   : > { %4775 = vmatmul.mubr.msk.bf16.vlgmr.msra.gmra.mrb[0].mxu1 %vm1825_vm3, %v1515_v14  ;;  %4781 = vmatmul.mubr.msk.bf16.vlgmr.msra.gmra.mrb[12].mxu0 %vm1825_vm3, %v1516_v15 }
 0x45e   : > { %4785 = vmatpush3.bf16.xpose.msra.mxu1 %v1922_v18  ;;  %4791 = vmatpush3.bf16.xpose.msra.mxu0 %v1968_v19 }
 0x45f   : > { %4786 = vmatprep.mubr.msk.bf16.mxu1 %vm5711_vm1, %v5710_v9  ;;  %4792 = vmatprep.mubr.msk.bf16.mxu0 %vm5711_vm1, %v5710_v9 }
 0x460   : > { %4796 = vmatprep.subr.bf16.mxu1 %v5710_v9  ;;  %4802 = vmatprep.subr.bf16.mxu0 %v5710_v9 }
 0x465   : > { %4787 = vmatmul.mubr.msk.bf16.vlgmr.msra.gmra.mrb[4].mxu1 %vm1825_vm3, %v1517_v22  ;;  %4793 = vmatmul.mubr.msk.bf16.vlgmr.msra.gmra.mrb[16].mxu0 %vm1825_vm3, %v1518_v23 }
 0x466   : > { %4798 = vmatprep.mubr.msk.bf16.mxu1 %vm5711_vm1, %v5710_v9  ;;  %4804 = vmatprep.mubr.msk.bf16.mxu0 %vm5711_vm1, %v5710_v9 }
 0x530   : > { %v1866_v26 = vpop.f32.mrb[0].mxu1  ;;  %v1912_v27 = vpop.f32.mrb[12].mxu0 }
 0x531   : > { %v1867_v28 = vadd.f32 %v1866_v26, %v1824_v25  ;;  %v1913_v29 = vadd.f32 %v1912_v27, %v1824_v25  ;;  %v4776_v30 = vpop.f32.mrb[1].mxu1  ;;  %v4782_v31 = vpop.f32.mrb[13].mxu0 }
 0x532   : > { %v1869_v32 = vpop.f32.mrb[2].mxu1  ;;  %v1915_v33 = vpop.f32.mrb[14].mxu0 }
 0x533   : > { %v4777_v34 = vpop.f32.mrb[3].mxu1  ;;  %v4783_v35 = vpop.f32.mrb[15].mxu0  ;;  %v2010_v36 = vsel %vm1825_vm3, %v1867_v28, -inf  ;;  %v2013_v38 = vsel %vm1825_vm3, %v1913_v29, -inf }
 0x534   : > { %2011 = vmax.xlane.f32.xlu1 %v2010_v36  ;;  %2014 = vmax.xlane.f32.xlu0 %v2013_v38 }
 0x538   : > { %v1958_v39 = vpop.f32.mrb[4].mxu1  ;;  %v2004_v40 = vpop.f32.mrb[16].mxu0 }
 0x539   : > { %v1959_v43 = vadd.f32 %v1958_v39, %v1824_v25  ;;  %v2005_v44 = vadd.f32 %v2004_v40, %v1824_v25  ;;  %v4788_v41 = vpop.f32.mrb[5].mxu1  ;;  %v4794_v42 = vpop.f32.mrb[17].mxu0 }
 0x53a   : > { %v1961_v45 = vpop.f32.mrb[6].mxu1  ;;  %v2007_v46 = vpop.f32.mrb[18].mxu0 }
 0x53b   : > { %v4789_v47 = vpop.f32.mrb[7].mxu1  ;;  %v4795_v48 = vpop.f32.mrb[19].mxu0  ;;  %v2016_v49 = vsel %vm1825_vm3, %v1959_v43, -inf  ;;  %v2019_v50 = vsel %vm1825_vm3, %v2005_v44, -inf }
 0x53c   : > { %2017 = vmax.xlane.f32.xlu1 %v2016_v49 }
 0x540   : > { %2020 = vmax.xlane.f32.xlu1 %v2019_v50 }
 0x551   : > { %1673 = vrot.lane.b32.xlu1 %v1358_v52, %s5714_s7 }
 0x5c1   : > { %v2012_v54 = vpop.xlane.xlu1 %2011  ;;  %v2015_v55 = vpop.xlane.xlu0 %2014 }
 0x5c2   : > { %v2022_v56 = vsub.f32 %v1867_v28, %v2012_v54  ;;  %v2023_v57 = vsub.f32 %v1913_v29, %v2015_v55 }
 0x5c4   : > { %v2026_v58 = vmul.f32 1.442695, %v2022_v56  ;;  %v2028_v60 = vmul.f32 1.442695, %v2023_v57 }
 0x5c6   : > { %5165 = vpow2.f32 %v2026_v58 }
 0x5c7   : > { %5167 = vpow2.f32 %v2028_v60 }
 0x5c9   : > { %v2018_v0 = vpop.xlane.xlu1 %2017 }
 0x5ca   : > { %v2024_v3 = vsub.f32 %v1959_v43, %v2018_v0 }
 0x5cc   : > { %v2030_v5 = vmul.f32 1.442695, %v2024_v3 }
 0x5cd   : > { %v2021_v2 = vpop.xlane.xlu1 %2020 }
 0x5ce   : > { %v2025_v4 = vsub.f32 %v2005_v44, %v2021_v2  ;;  %5169 = vpow2.f32 %v2030_v5 }
 0x5d0   : > { %v6255_v61 = vpop.eup %5165  ;;  %v2032_v6 = vmul.f32 1.442695, %v2025_v4 }
 0x5d1   : > { %v6257_v62 = vpop.eup %5167  ;;  %v2034_v63 = vsel %vm1825_vm3, %v6255_v61, 0.0  ;;  %v1674_v12 = vpop.permute.xlu1 %1673 }
 0x5d2   : > { %2035 = vadd.xlane.f32.xlu0 %v2034_v63  ;;  %v2037_v37 = vsel %vm1825_vm3, %v6257_v62, 0.0  ;;  %5171 = vpow2.f32 %v2032_v6  ;;  %v1679_v15 = vcombine.low %v1358_v52, %v1674_v12  ;;  %v1680_v16 = vcombine.high %v1358_v52, %v1674_v12 }
 0x5d3   : > { %2038 = vadd.xlane.f32.xlu1 %v2037_v37 }
 0x5d4   : > { %v1687_v21 = vrot.slane %v1679_v15, %v6189_v53  ;;  %v1694_v22 = vrot.slane %v1680_v16, %v6189_v53 }
 0x5d8   : > { %v6265_v7 = vpop.eup %5169 }
 0x5d9   : > { %v2040_v10 = vsel %vm1825_vm3, %v6265_v7, 0.0 }
 0x5dc   : > { %v6267_v8 = vpop.eup %5171 }
 0x5dd   : > { %v2043_v11 = vsel %vm1825_vm3, %v6267_v8, 0.0 }
 0x5e4   : > { %1676 = vrot.lane.b32.xlu1 %v1358_v52, %s6628_s16  ;;  %s6673_s16 = sld [smem:[#allocation41_spill]] }
 0x5e8   : > { %1670 = vrot.lane.b32.xlu0 %v1358_v52, %s5713_s0 }
 0x607   : > { %2041 = vadd.xlane.f32.xlu0 %v2040_v10 }
 0x608   : > { %2044 = vadd.xlane.f32.xlu1 %v2043_v11 }
 0x65f   : > { %v2036_v13 = vpop.xlane.xlu0 %2035 }
 0x660   : > { %v2039_v14 = vpop.xlane.xlu1 %2038  ;;  %5173 = vrcp.f32 %v2036_v13 }
 0x661   : > { %5175 = vrcp.f32 %v2039_v14 }
 0x663   : > { %v1671_v17 = vpop.permute.xlu0 %1670 }
 0x664   : > { %v1677_v18 = vpop.permute.xlu1 %1676 }
 0x665   : > { %v1695_v19 = vcombine.low %v1671_v17, %v1677_v18  ;;  %v1696_v20 = vcombine.high %v1671_v17, %v1677_v18  ;;  %v5142_v17 = vld [vmem:[%s6672_s26] sm:$0xff]  }
 0x667   : > { %v1703_v23 = vrot.slane %v1695_v19, %v6189_v53  ;;  %v1710_v24 = vrot.slane %v1696_v20, %v6189_v53 }
 0x669   : > { %v1711_v25 = vcombine.low %v1687_v21, %v1703_v23  ;;  %v1712_v26 = vcombine.high %v1687_v21, %v1703_v23  ;;  %v1727_v27 = vcombine.low %v1694_v22, %v1710_v24  ;;  %v1728_v28 = vcombine.high %v1694_v22, %v1710_v24 }
 0x66a   : > { %v5174_v48 = vpop.eup %5173 }
 0x66b   : > { %v1719_v29 = vrot.slane %v1711_v25, %v6192_v59  ;;  %v1726_v30 = vrot.slane %v1712_v26, %v6192_v59  ;;  %v1735_v31 = vrot.slane %v1727_v27, %v6192_v59  ;;  %v1742_v32 = vrot.slane %v1728_v28, %v6192_v59  ;;  %v5176_v51 = vpop.eup %5175 }
 0x66c   : > { %v2050_v57 = vmul.f32 %v5174_v48, %v6255_v61  ;;  %v2051_v58 = vmul.f32 %v5176_v51, %v6257_v62 }
 0x66d   : > { %v1747_v33 = vcombine.low %v1719_v29, %v1726_v30  ;;  %v4605_v34 = vcombine.high %v1719_v29, %v1726_v30  ;;  %v1763_v35 = vcombine.low %v1735_v31, %v1742_v32  ;;  %v4606_v36 = vcombine.high %v1735_v31, %v1742_v32 }
 0x66e   : > { %v2054_v4 = vpack.c.bf16 %v2050_v57, %v2050_v57  ;;  %v2055_v5 = vpack.c.bf16 %v2051_v58, %v2051_v58 }
 0x66f   : > { %v1754_v38 = vrot.slane %v1747_v33, %v6189_v53  ;;  %v1762_v39 = vrot.slane %v4605_v34, %v6189_v53  ;;  %v1770_v40 = vrot.slane %v1763_v35, %v6189_v53  ;;  %v1778_v43 = vrot.slane %v4606_v36, %v6189_v53 }
 0x671   : > { %v1779_v44 = vcombine.low %v1754_v38, %v1762_v39  ;;  %v1780_v41 = vcombine.high %v1754_v38, %v1762_v39  ;;  %v1795_v42 = vcombine.low %v1770_v40, %v1778_v43  ;;  %v1796_v45 = vcombine.high %v1770_v40, %v1778_v43 }
 0x673   : > { %v1787_v46 = vrot.slane %v1779_v44, %v6192_v59  ;;  %v1794_v47 = vrot.slane %v1780_v41, %v6192_v59  ;;  %v1803_v49 = vrot.slane %v1795_v42, %v6192_v59  ;;  %v1810_v50 = vrot.slane %v1796_v45, %v6192_v59  ;;  %v5143_v45 = vld [vmem:[%s6672_s26 + $0x8] sm:$0xff]  }
 0x675   : > { %v1811_v52 = vcombine.low %v1787_v46, %v1803_v49  ;;  %v1812_v54 = vcombine.high %v1787_v46, %v1803_v49  ;;  %v1813_v55 = vcombine.low %v1794_v47, %v1810_v50  ;;  %v1814_v56 = vcombine.high %v1794_v47, %v1810_v50 }
 0x677   : > { %v1815_v60 = vpack.c.bf16 %v1811_v52, %v1811_v52  ;;  %v1816_v63 = vpack.c.bf16 %v1812_v54, %v1812_v54  ;;  %v1817_v2 = vpack.c.bf16 %v1813_v55, %v1813_v55  ;;  %v1818_v3 = vpack.c.bf16 %v1814_v56, %v1814_v56 }
 0x679   : > { %v2063_v37 = vsel %vm2061_vm4, %v1815_v60, 0  ;;  %v2109_v0 = vsel %vm2061_vm4, %v1816_v63, 0  ;;  %v2155_v61 = vsel %vm2061_vm4, %v1817_v2, 0  ;;  %v2201_v62 = vsel %vm2061_vm4, %v1818_v3, 0 }
 0x67a   : > { %4797 = vmatpush3.bf16.msra.mxu1 %v2063_v37  ;;  %4803 = vmatpush3.bf16.msra.mxu0 %v2109_v0 }
 0x67b   : > { %4808 = vmatprep.subr.bf16.mxu1 %v5710_v9  ;;  %4814 = vmatprep.subr.bf16.mxu0 %v5710_v9 }
 0x67d   : > { %4799 = vmatmul.mubr.msk.bf16.vlgmr.msra.gmra.mrb[8].mxu1 %vm1825_vm3, %v2054_v4  ;;  %4805 = vmatmul.mubr.msk.bf16.vlgmr.msra.gmra.mrb[20].mxu0 %vm1825_vm3, %v2055_v5 }
 0x67e   : > { %4809 = vmatpush3.bf16.msra.mxu1 %v2155_v61  ;;  %4815 = vmatpush3.bf16.msra.mxu0 %v2201_v62 }
 0x67f   : > { %4810 = vmatprep.mubr.msk.bf16.mxu1 %vm5711_vm1, %v5710_v9  ;;  %4816 = vmatprep.mubr.msk.bf16.mxu0 %vm5711_vm1, %v5710_v9 }
 0x680   : > { %4820 = vmatprep.subr.bf16.mxu1 %v5710_v9  ;;  %4828 = vmatprep.subr.bf16.mxu0 %v5710_v9 }
 0x694   : > { %v2042_v6 = vpop.xlane.xlu0 %2041 }
 0x695   : > { %5177 = vrcp.f32 %v2042_v6  ;;  %v2045_v10 = vpop.xlane.xlu1 %2044 }
 0x696   : > { %5179 = vrcp.f32 %v2045_v10 }
 0x69f   : > { %v5178_v11 = vpop.eup %5177 }
 0x6a0   : > { %v5180_v12 = vpop.eup %5179  ;;  %v2052_v13 = vmul.f32 %v5178_v11, %v6265_v7 }
 0x6a1   : > { %v2053_v14 = vmul.f32 %v5180_v12, %v6267_v8 }
 0x6a2   : > { %v2056_v15 = vpack.c.bf16 %v2052_v13, %v2052_v13 }
 0x6a3   : > { %v2057_v16 = vpack.c.bf16 %v2053_v14, %v2053_v14 }
 0x6a4   : > { %4811 = vmatmul.mubr.msk.bf16.vlgmr.msra.gmra.mrb[12].mxu1 %vm1825_vm3, %v2056_v15 }
 0x6a5   : > { %4817 = vmatmul.mubr.msk.bf16.vlgmr.msra.gmra.mrb[24].mxu0 %vm1825_vm3, %v2057_v16  ;;  %4824 = vmatprep.mubr.msk.bf16.mxu1 %vm5711_vm1, %v5710_v9 }
 0x6a6   : > { %4832 = vmatprep.mubr.msk.bf16.mxu0 %vm5711_vm1, %v5710_v9  ;;  %4821 = vmatpush3.bf16.msra.mxu1 %v5142_v17 }
 0x6a7   : > { %4822 = vmatprep.subr.bf16.mxu1 %v5710_v9 }
 0x6aa   : > { %4823 = vmatpush3.bf16.msra.mxu1 %v5143_v45  ;;  %v4621_v45 = vld [vmem:[#allocation7] ss:$0 sm:$0xff] }
 0x6ab   : > { %4836 = vmatprep.subr.bf16.mxu1 %v5710_v9 }
 0x750   : > { %v2099_v18 = vpop.f32.mrb[8].mxu1  ;;  %v2145_v7 = vpop.f32.mrb[20].mxu0 }
 0x751   : > { %v4800_v19 = vpop.f32.mrb[9].mxu1  ;;  %v4806_v8 = vpop.f32.mrb[21].mxu0 }
 0x752   : > { %v2102_v20 = vpop.f32.mrb[10].mxu1  ;;  %v2148_v21 = vpop.f32.mrb[22].mxu0 }
 0x753   : > { %v4801_v22 = vpop.f32.mrb[11].mxu1  ;;  %v4807_v23 = vpop.f32.mrb[23].mxu0 }
 0x777   : > { %v2191_v24 = vpop.f32.mrb[12].mxu1 }
 0x778   : > { %v2243_v25 = vcombine.low %v2099_v18, %v2191_v24  ;;  %v2244_v26 = vcombine.high %v2099_v18, %v2191_v24  ;;  %v2237_v27 = vpop.f32.mrb[24].mxu0  ;;  %v4812_v28 = vpop.f32.mrb[13].mxu1  ;;  %v4617_v18 = vld [vmem:[#allocation6] ss:$0 sm:$0xff] }
 0x779   : > { %v2259_v29 = vcombine.low %v2145_v7, %v2237_v27  ;;  %v2260_v30 = vcombine.high %v2145_v7, %v2237_v27  ;;  %v4818_v31 = vpop.f32.mrb[25].mxu0  ;;  %v2194_v32 = vpop.f32.mrb[14].mxu1  ;;  %v5144_v24 = vld [vmem:[%s6673_s16] sm:$0xff]  }
 0x77a   : > { %v2251_v33 = vrot.slane %v2243_v25, %v6189_v53  ;;  %v2258_v34 = vrot.slane %v2244_v26, %v6189_v53  ;;  %v2240_v35 = vpop.f32.mrb[26].mxu0  ;;  %v4813_v36 = vpop.f32.mrb[15].mxu1  ;;  %v5145_v25 = vld [vmem:[%s6673_s16 + $0x8] sm:$0xff]   ;;  %v6351_v26 = vld [vmem:[%s6136_s28] sm:$0xff]   ;;  %s6675_s28 = sld [smem:[#allocation42_spill]] }
 0x77b   : > { %v2267_v38 = vrot.slane %v2259_v29, %v6189_v53  ;;  %v2274_v39 = vrot.slane %v2260_v30, %v6189_v53  ;;  %v4819_v40 = vpop.f32.mrb[27].mxu0 }
 0x77d   : > { %v2275_v43 = vcombine.low %v2251_v33, %v2267_v38  ;;  %v2276_v44 = vcombine.high %v2251_v33, %v2267_v38  ;;  %v2291_v41 = vcombine.low %v2258_v34, %v2274_v39  ;;  %v2292_v42 = vcombine.high %v2258_v34, %v2274_v39  ;;  %v4627_v33 = vld [vmem:[#allocation12] ss:$0 sm:$0xff] }
 0x77f   : > { %v2283_v46 = vrot.slane %v2275_v43, %v6192_v59  ;;  %v2290_v47 = vrot.slane %v2276_v44, %v6192_v59  ;;  %v2299_v48 = vrot.slane %v2291_v41, %v6192_v59  ;;  %v2306_v49 = vrot.slane %v2292_v42, %v6192_v59 }
 0x781   : > { %v2311_v50 = vcombine.low %v2283_v46, %v2290_v47  ;;  %v4615_v51 = vcombine.high %v2283_v46, %v2290_v47  ;;  %v2327_v52 = vcombine.low %v2299_v48, %v2306_v49  ;;  %v4616_v54 = vcombine.high %v2299_v48, %v2306_v49  ;;  %v4622_v47 = vld [vmem:[#allocation9] ss:$0 sm:$0xff] }
 0x783   : > { %v2318_v55 = vrot.slane %v2311_v50, %v6189_v53  ;;  %v2326_v56 = vrot.slane %v4615_v51, %v6189_v53  ;;  %v2334_v57 = vrot.slane %v2327_v52, %v6189_v53  ;;  %v2342_v58 = vrot.slane %v4616_v54, %v6189_v53  ;;  %v5149_v50 = vld [vmem:[%s6675_s28] sm:$0xff]  }
 0x785   : > { %v2344_v60 = vcombine.high %v2318_v55, %v2326_v56  ;;  %v2360_v63 = vcombine.high %v2334_v57, %v2342_v58  ;;  %v2343_v37 = vcombine.low %v2318_v55, %v2326_v56  ;;  %v2359_v0 = vcombine.low %v2334_v57, %v2342_v58 }
 0x787   : > { %v2358_v2 = vrot.slane %v2344_v60, %v6192_v59  ;;  %v2374_v3 = vrot.slane %v2360_v63, %v6192_v59  ;;  %v2351_v4 = vrot.slane %v2343_v37, %v6192_v59  ;;  %v2367_v5 = vrot.slane %v2359_v0, %v6192_v59 }
 0x789   : > { %v2377_v61 = vcombine.low %v2358_v2, %v2374_v3  ;;  %v2376_v62 = vcombine.high %v2351_v4, %v2367_v5  ;;  %v2378_v6 = vcombine.high %v2358_v2, %v2374_v3  ;;  %v2375_v10 = vcombine.low %v2351_v4, %v2367_v5 }
 0x78b   : > { %2384 = vrot.lane.b32.xlu1 %v2377_v61, %s5718_s11  ;;  %2380 = vrot.lane.b32.xlu0 %v2376_v62, %s6631_s10  ;;  %s6676_s10 = smov 104  }
 0x78f   : > { %2388 = vrot.lane.b32.xlu0 %v2378_v6, %s6630_s2  ;;  %s6674_s2 = sld [smem:[#allocation40_spill]] }
 0x795   : > { %v5147_v31 = vld [vmem:[%s6674_s2] sm:$0xff]   ;;  %v5148_v32 = vld [vmem:[%s6674_s2 + $0x8] sm:$0xff]  }
 0x796   : > { %4829 = vmatpush3.bf16.msra.mxu0 %v5147_v31 }
 0x797   : > { %4830 = vmatprep.subr.bf16.mxu0 %v5710_v9 }
 0x79a   : > { %4831 = vmatpush3.bf16.msra.mxu0 %v5148_v32 }
 0x79b   : > { %4844 = vmatprep.subr.bf16.mxu0 %v5710_v9 }
 0x7fd   : > { %v2381_v11 = vpop.permute.xlu0 %2380  ;;  %v2385_v12 = vpop.permute.xlu1 %2384 }
 0x7fe   : > { %v2391_v13 = vsel %vm1825_vm3, %v2375_v10, %v2381_v11 }
 0x7ff   : > { %v2393_v15 = vsel %vm2392_vm5, %v2391_v13, %v2385_v12 }
 0x801   : > { %v2389_v14 = vpop.permute.xlu0 %2388 }
 0x802   : > { %v2395_v16 = vsel %vm2394_vm6, %v2393_v15, %v2389_v14 }
 0x803   : > { %v2396_v17 = vpack.c.bf16 %v2395_v16, %v2395_v16 }
 0x805   : > { %4825 = vmatmul.mubr.msk.bf16.vlgmr.msra.gmra.mrb[16].mxu1 %vm1141_vm0, %v2396_v17 }
 0x806   : > { %4840 = vmatprep.mubr.msk.bf16.mxu1 %vm5711_vm1, %v5710_v9  ;;  %4837 = vmatpush3.bf16.msra.mxu1 %v5144_v24 }
 0x807   : > { %4838 = vmatprep.subr.bf16.mxu1 %v5710_v9 }
 0x80a   : > { %4839 = vmatpush3.bf16.msra.mxu1 %v5145_v25 }
 0x80b   : > { %4852 = vmatprep.subr.bf16.mxu1 %v5710_v9 }
 0x80d   : > { %4841 = vmatmul.mubr.msk.bf16.vlgmr.msra.gmra.mrb[20].mxu1 %vm1141_vm0, %v6351_v26 }
 0x80e   : > { %4854 = vmatprep.mubr.msk.bf16.mxu1 %vm5711_vm1, %v5710_v9 }
 0x8d8   : > { %v2452_v7 = vpop.f32.mrb[16].mxu1 }
 0x8d9   : > { %v2453_v19 = vadd.f32 %v4617_v18, %v2452_v7  ;;  %v4826_v8 = vpop.f32.mrb[17].mxu1 }
 0x8da   : > { %v2455_v20 = vpop.f32.mrb[18].mxu1 }
 0x8db   : > { %v6343_v21 = vadd.f32 %v2453_v19, %v6138_v1  ;;  %v4827_v22 = vpop.f32.mrb[19].mxu1 }
 0x8dd   : > { %v2461_v23 = vsel %vm1141_vm0, %v6343_v21, 0.0 }
 0x8de   : > { %2462 = vadd.xlane.f32.xlu1 %v2461_v23 }
 0x8e0   : > { %v2620_v34 = vpop.f32.mrb[20].mxu1 }
 0x8e1   : > { %v2621_v35 = vadd.f32 %v4627_v33, %v2620_v34  ;;  %v4842_v36 = vpop.f32.mrb[21].mxu1 }
 0x8e2   : > { %v2623_v38 = vpop.f32.mrb[22].mxu1 }
 0x8e3   : > { %v2624_v39 = vadd.f32 %v4627_v33, %v2623_v38  ;;  %v4843_v40 = vpop.f32.mrb[23].mxu1 }
 0x8ef   : > { %2851 = vrot.lane.b32.xlu1 %v2624_v39, %s5713_s0 }
 0x8f3   : > { %2855 = vrot.lane.b32.xlu1 %v2621_v35, %s5714_s7 }
 0x8f7   : > { %2861 = vrot.lane.b32.xlu1 %v2621_v35, %s6676_s10 }
 0x96b   : > { %v2463_v1 = vpop.xlane.xlu1 %2462 }
 0x96c   : > { %v2464_v27 = vmul.f32 0.03125, %v2463_v1 }
 0x96e   : > { %v2465_v28 = vsub.f32 %v6343_v21, %v2464_v27 }
 0x96f   : > { %v2852_v54 = vpop.permute.xlu1 %2851 }
 0x970   : > { %v2466_v29 = vmul.f32 %v2465_v28, %v2465_v28 }
 0x972   : > { %v2467_v30 = vsel %vm1141_vm0, %v2466_v29, 0.0 }
 0x973   : > { %2468 = vadd.xlane.f32.xlu0 %v2467_v30  ;;  %v2856_v56 = vpop.permute.xlu1 %2855 }
 0x974   : > { %v2867_v2 = vcombine.low %v2621_v35, %v2856_v56  ;;  %v2868_v3 = vcombine.high %v2621_v35, %v2856_v56 }
 0x976   : > { %v2875_v11 = vrot.slane %v2867_v2, %v6189_v53  ;;  %v2882_v12 = vrot.slane %v2868_v3, %v6189_v53 }
 0x977   : > { %v2862_v58 = vpop.permute.xlu1 %2861 }
 0x989   : > { %2849 = vrot.lane.b32.xlu0 %v2621_v35, %s5713_s0 }
 0x98d   : > { %2857 = vrot.lane.b32.xlu0 %v2624_v39, %s5714_s7 }
 0x991   : > { %2863 = vrot.lane.b32.xlu0 %v2624_v39, %s6676_s10 }
 0xa00   : > { %v2469_v43 = vpop.xlane.xlu0 %2468 }
 0xa01   : > { %v2470_v44 = vmul.f32 0.03125, %v2469_v43 }
 0xa03   : > { %v2471_v41 = vadd.f32 1e-05, %v2470_v44 }
 0xa04   : > { %v2850_v52 = vpop.permute.xlu0 %2849 }
 0xa05   : > { %5181 = vrsqrt.f32 %v2471_v41  ;;  %v2883_v4 = vcombine.low %v2850_v52, %v2862_v58  ;;  %v2884_v5 = vcombine.high %v2850_v52, %v2862_v58 }
 0xa07   : > { %v2891_v13 = vrot.slane %v2883_v4, %v6189_v53  ;;  %v2898_v14 = vrot.slane %v2884_v5, %v6189_v53 }
 0xa08   : > { %v2858_v55 = vpop.permute.xlu0 %2857 }
 0xa09   : > { %v2935_v60 = vcombine.low %v2624_v39, %v2858_v55  ;;  %v2936_v63 = vcombine.high %v2624_v39, %v2858_v55  ;;  %v2899_v7 = vcombine.low %v2875_v11, %v2891_v13  ;;  %v2900_v19 = vcombine.high %v2875_v11, %v2891_v13 }
 0xa0a   : > { %v2915_v8 = vcombine.low %v2882_v12, %v2898_v14  ;;  %v2916_v20 = vcombine.high %v2882_v12, %v2898_v14 }
 0xa0b   : > { %v2943_v61 = vrot.slane %v2935_v60, %v6189_v53  ;;  %v2950_v62 = vrot.slane %v2936_v63, %v6189_v53  ;;  %v2907_v1 = vrot.slane %v2899_v7, %v6192_v59  ;;  %v2914_v27 = vrot.slane %v2900_v19, %v6192_v59 }
 0xa0c   : > { %v2864_v57 = vpop.permute.xlu0 %2863  ;;  %v2930_v29 = vrot.slane %v2916_v20, %v6192_v59 }
 0xa0d   : > { %v2951_v37 = vcombine.low %v2852_v54, %v2864_v57  ;;  %v2952_v0 = vcombine.high %v2852_v54, %v2864_v57  ;;  %v3003_v34 = vcombine.low %v2907_v1, %v2914_v27  ;;  %v4638_v35 = vcombine.high %v2907_v1, %v2914_v27 }
 0xa0f   : > { %v5182_v42 = vpop.eup %5181  ;;  %v2959_v6 = vrot.slane %v2951_v37, %v6189_v53  ;;  %v2966_v10 = vrot.slane %v2952_v0, %v6189_v53  ;;  %v3010_v41 = vrot.slane %v3003_v34, %v6189_v53 }
 0xa10   : > { %v2473_v46 = vmul.f32 %v5182_v42, %v2465_v28  ;;  %v2923_v28 = vrot.slane %v2915_v8, %v6192_v59  ;;  %v3018_v42 = vrot.slane %v4638_v35, %v6189_v53 }
 0xa11   : > { %v2967_v15 = vcombine.low %v2943_v61, %v2959_v6  ;;  %v2968_v16 = vcombine.high %v2943_v61, %v2959_v6  ;;  %v2983_v17 = vcombine.low %v2950_v62, %v2966_v10  ;;  %v2984_v18 = vcombine.high %v2950_v62, %v2966_v10 }
 0xa12   : > { %v2480_v48 = vmul.f32 %v4621_v45, %v2473_v46  ;;  %v3019_v36 = vcombine.low %v2923_v28, %v2930_v29  ;;  %v4639_v38 = vcombine.high %v2923_v28, %v2930_v29  ;;  %v3036_v52 = vcombine.high %v3010_v41, %v3018_v42 }
 0xa13   : > { %v2975_v22 = vrot.slane %v2967_v15, %v6192_v59  ;;  %v2982_v23 = vrot.slane %v2968_v16, %v6192_v59  ;;  %v2991_v24 = vrot.slane %v2983_v17, %v6192_v59  ;;  %v2998_v25 = vrot.slane %v2984_v18, %v6192_v59  ;;  %v4623_v18 = vld [vmem:[#allocation10] ss:$0 sm:$0xff] }
 0xa14   : > { %v2487_v49 = vadd.f32 %v4622_v47, %v2480_v48  ;;  %v3026_v45 = vrot.slane %v3019_v36, %v6189_v53  ;;  %v3034_v46 = vrot.slane %v4639_v38, %v6189_v53  ;;  %v5150_v47 = vld [vmem:[%s6675_s28 + $0x8] sm:$0xff]   ;;  %v3035_v48 = vcombine.low %v3010_v41, %v3018_v42 }
 0xa15   : > { %v3071_v30 = vcombine.low %v2975_v22, %v2982_v23  ;;  %v4640_v31 = vcombine.high %v2975_v22, %v2982_v23  ;;  %v3087_v32 = vcombine.low %v2991_v24, %v2998_v25  ;;  %v4641_v33 = vcombine.high %v2991_v24, %v2998_v25  ;;  %v4632_v24 = vld [vmem:[#allocation13] ss:$0 sm:$0xff] }
 0xa16   : > { %v2492_v51 = vpack.c.bf16 %v2487_v49, %v2487_v49  ;;  %v3051_v49 = vcombine.low %v3026_v45, %v3034_v46  ;;  %v3052_v54 = vcombine.high %v3026_v45, %v3034_v46  ;;  %v3043_v57 = vrot.slane %v3035_v48, %v6192_v59 }
 0xa17   : > { %v3078_v39 = vrot.slane %v3071_v30, %v6189_v53  ;;  %v3086_v40 = vrot.slane %v4640_v31, %v6189_v53  ;;  %v3094_v43 = vrot.slane %v3087_v32, %v6189_v53  ;;  %v3102_v44 = vrot.slane %v4641_v33, %v6189_v53 }
 0xa18   : > { %4833 = vmatmul.mubr.msk.bf16.vlgmr.msra.gmra.mrb[28].mxu0 %vm1141_vm0, %v2492_v51  ;;  %v3059_v58 = vrot.slane %v3051_v49, %v6192_v59  ;;  %v3050_v37 = vrot.slane %v3036_v52, %v6192_v59  ;;  %v3066_v0 = vrot.slane %v3052_v54, %v6192_v59 }
 0xa19   : > { %4845 = vmatpush3.bf16.msra.mxu0 %v5149_v50  ;;  %4848 = vmatprep.mubr.msk.bf16.mxu0 %vm5711_vm1, %v5710_v9  ;;  %v3103_v50 = vcombine.low %v3078_v39, %v3086_v40  ;;  %v3119_v51 = vcombine.low %v3094_v43, %v3102_v44  ;;  %v3104_v55 = vcombine.high %v3078_v39, %v3086_v40 }
 0xa1a   : > { %4846 = vmatprep.subr.bf16.mxu0 %v5710_v9  ;;  %v3120_v56 = vcombine.high %v3094_v43, %v3102_v44  ;;  %v3067_v4 = vcombine.low %v3043_v57, %v3059_v58  ;;  %v3068_v61 = vcombine.high %v3043_v57, %v3059_v58  ;;  %v3069_v6 = vcombine.low %v3050_v37, %v3066_v0 }
 0xa1b   : > { %v3111_v60 = vrot.slane %v3103_v50, %v6192_v59  ;;  %v3127_v63 = vrot.slane %v3119_v51, %v6192_v59  ;;  %v3118_v2 = vrot.slane %v3104_v55, %v6192_v59  ;;  %v3070_v11 = vcombine.high %v3050_v37, %v3066_v0 }
 0xa1c   : > { %v3134_v3 = vrot.slane %v3120_v56, %v6192_v59 }
 0xa1d   : > { %4847 = vmatpush3.bf16.msra.mxu0 %v5150_v47  ;;  %v3135_v5 = vcombine.low %v3111_v60, %v3127_v63  ;;  %v3136_v62 = vcombine.high %v3111_v60, %v3127_v63 }
 0xa1e   : > { %4858 = vmatprep.subr.bf16.mxu0 %v5710_v9  ;;  %v3137_v10 = vcombine.low %v3118_v2, %v3134_v3  ;;  %v3138_v12 = vcombine.high %v3118_v2, %v3134_v3 }
 0xa1f   : > { %v3140_v13 = vpack.c.bf16 %v3136_v62, %v3068_v61 }
 0xa20   : > { %4849 = vmatmul.mubr.msk.bf16.vlgmr.msra.gmra.mrb[32].mxu0 %vm1141_vm0, %v6351_v26  ;;  %v3139_v26 = vpack.c.bf16 %v3135_v5, %v3067_v4  ;;  %v6413_v14 = vpack.c.bf16 %v3137_v10, %v3069_v6  ;;  %v6415_v15 = vpack.c.bf16 %v3138_v12, %v3070_v11 }
 0xa21   : > { %4860 = vmatprep.mubr.msk.bf16.mxu0 %vm5711_vm1, %v5710_v9  ;;  %v3489_v17 = vsel %vm1825_vm3, %v3140_v13, 0 }
 0xa22   : > { %v3443_v16 = vsel %vm1825_vm3, %v3139_v26, 0  ;;  %v3535_v12 = vsel %vm1825_vm3, %v6413_v14, 0  ;;  %v3581_v26 = vsel %vm1825_vm3, %v6415_v15, 0 }
 0xa23   : > { %4853 = vmatpush3.bf16.xpose.msra.mxu1 %v3443_v16 }
 0xa24   : > { %4864 = vmatprep.subr.bf16.mxu1 %v5710_v9 }
 0xa26   : > { %4859 = vmatpush3.bf16.xpose.msra.mxu0 %v3489_v17 }
 0xa27   : > { %4870 = vmatprep.subr.bf16.mxu0 %v5710_v9 }
 0xaeb   : > { %v2549_v7 = vpop.f32.mrb[28].mxu0 }
 0xaec   : > { %v2550_v19 = vadd.f32 %v4623_v18, %v2549_v7  ;;  %v4834_v8 = vpop.f32.mrb[29].mxu0 }
 0xaed   : > { %v2552_v20 = vpop.f32.mrb[30].mxu0 }
 0xaee   : > { %v2696_v22 = vmul.f32 0.35355338, %v2550_v19  ;;  %v4835_v23 = vpop.f32.mrb[31].mxu0 }
 0xaf0   : > { %2701 = vrot.lane.b32.xlu0 %v2696_v22, %s5714_s7  ;;  %2698 = vrot.lane.b32.xlu1 %v2696_v22, %s5713_s0 }
 0xaf3   : > { %v2684_v25 = vpop.f32.mrb[32].mxu0 }
 0xaf4   : > { %2704 = vrot.lane.b32.xlu1 %v2696_v22, %s6676_s10  ;;  %v6424_v1 = vadd.f32 %v4632_v24, %v2684_v25  ;;  %v4850_v27 = vpop.f32.mrb[33].mxu0 }
 0xaf5   : > { %v2687_v28 = vpop.f32.mrb[34].mxu0 }
 0xaf6   : > { %v6426_v29 = vadd.f32 %v4632_v24, %v2687_v28  ;;  %v4851_v30 = vpop.f32.mrb[35].mxu0 }
 0xaf8   : > { %3145 = vrot.lane.b32.xlu1 %v6424_v1, %s5713_s0 }
 0xb62   : > { %v2702_v31 = vpop.permute.xlu0 %2701  ;;  %v2699_v32 = vpop.permute.xlu1 %2698 }
 0xb63   : > { %v2707_v33 = vcombine.low %v2696_v22, %v2702_v31  ;;  %v2708_v34 = vcombine.high %v2696_v22, %v2702_v31 }
 0xb65   : > { %v2715_v39 = vrot.slane %v2707_v33, %v6189_v53  ;;  %v2722_v40 = vrot.slane %v2708_v34, %v6189_v53 }
 0xb66   : > { %v2705_v35 = vpop.permute.xlu1 %2704 }
 0xb67   : > { %v2723_v36 = vcombine.low %v2699_v32, %v2705_v35  ;;  %v2724_v38 = vcombine.high %v2699_v32, %v2705_v35 }
 0xb69   : > { %v2731_v43 = vrot.slane %v2723_v36, %v6189_v53  ;;  %v2738_v44 = vrot.slane %v2724_v38, %v6189_v53 }
 0xb6b   : > { %v2739_v41 = vcombine.low %v2715_v39, %v2731_v43  ;;  %v2740_v42 = vcombine.high %v2715_v39, %v2731_v43  ;;  %v2755_v45 = vcombine.low %v2722_v40, %v2738_v44  ;;  %v2756_v46 = vcombine.high %v2722_v40, %v2738_v44  ;;  %v3146_v39 = vpop.permute.xlu1 %3145 }
 0xb6d   : > { %v2747_v47 = vrot.slane %v2739_v41, %v6192_v59  ;;  %v2754_v48 = vrot.slane %v2740_v42, %v6192_v59  ;;  %v2763_v49 = vrot.slane %v2755_v45, %v6192_v59  ;;  %v2770_v50 = vrot.slane %v2756_v46, %v6192_v59 }
 0xb6f   : > { %v2775_v51 = vcombine.low %v2747_v47, %v2754_v48  ;;  %v4636_v52 = vcombine.high %v2747_v47, %v2754_v48  ;;  %v2791_v54 = vcombine.low %v2763_v49, %v2770_v50  ;;  %v4637_v55 = vcombine.high %v2763_v49, %v2770_v50 }
 0xb71   : > { %v2782_v56 = vrot.slane %v2775_v51, %v6189_v53  ;;  %v2790_v57 = vrot.slane %v4636_v52, %v6189_v53  ;;  %v2798_v58 = vrot.slane %v2791_v54, %v6189_v53  ;;  %v2806_v60 = vrot.slane %v4637_v55, %v6189_v53 }
 0xb73   : > { %v2807_v63 = vcombine.low %v2782_v56, %v2790_v57  ;;  %v2823_v37 = vcombine.low %v2798_v58, %v2806_v60  ;;  %v2808_v0 = vcombine.high %v2782_v56, %v2790_v57  ;;  %v2824_v2 = vcombine.high %v2798_v58, %v2806_v60 }
 0xb75   : > { %v2815_v3 = vrot.slane %v2807_v63, %v6192_v59  ;;  %v2831_v4 = vrot.slane %v2823_v37, %v6192_v59  ;;  %v2822_v10 = vrot.slane %v2808_v0, %v6192_v59  ;;  %v2838_v11 = vrot.slane %v2824_v2, %v6192_v59 }
 0xb77   : > { %v2839_v5 = vcombine.low %v2815_v3, %v2831_v4  ;;  %v2840_v61 = vcombine.high %v2815_v3, %v2831_v4  ;;  %v2841_v13 = vcombine.low %v2822_v10, %v2838_v11  ;;  %v2842_v16 = vcombine.high %v2822_v10, %v2838_v11 }
 0xb79   : > { %v2843_v62 = vpack.c.bf16 %v2839_v5, %v2839_v5  ;;  %v2844_v6 = vpack.c.bf16 %v2840_v61, %v2840_v61  ;;  %v2845_v17 = vpack.c.bf16 %v2841_v13, %v2841_v13  ;;  %v2846_v18 = vpack.c.bf16 %v2842_v16, %v2842_v16 }
 0xb7b   : > { %4855 = vmatmul.mubr.msk.bf16.vlgmr.msra.gmra.mrb[24].mxu1 %vm1825_vm3, %v2843_v62  ;;  %4861 = vmatmul.mubr.msk.bf16.vlgmr.msra.gmra.mrb[36].mxu0 %vm1825_vm3, %v2844_v6 }
 0xb7c   : > { %4865 = vmatpush3.bf16.xpose.msra.mxu1 %v3535_v12  ;;  %4871 = vmatpush3.bf16.xpose.msra.mxu0 %v3581_v26 }
 0xb7d   : > { %4866 = vmatprep.mubr.msk.bf16.mxu1 %vm5711_vm1, %v5710_v9  ;;  %4872 = vmatprep.mubr.msk.bf16.mxu0 %vm5711_vm1, %v5710_v9 }
 0xb7e   : > { %4876 = vmatprep.subr.bf16.mxu1 %v5710_v9  ;;  %4882 = vmatprep.subr.bf16.mxu0 %v5710_v9 }
 0xb83   : > { %4867 = vmatmul.mubr.msk.bf16.vlgmr.msra.gmra.mrb[28].mxu1 %vm1825_vm3, %v2845_v17  ;;  %4873 = vmatmul.mubr.msk.bf16.vlgmr.msra.gmra.mrb[40].mxu0 %vm1825_vm3, %v2846_v18 }
 0xb84   : > { %4878 = vmatprep.mubr.msk.bf16.mxu1 %vm5711_vm1, %v5710_v9  ;;  %4884 = vmatprep.mubr.msk.bf16.mxu0 %vm5711_vm1, %v5710_v9 }
 0xc4e   : > { %v3479_v14 = vpop.f32.mrb[24].mxu1  ;;  %v3525_v15 = vpop.f32.mrb[36].mxu0 }
 0xc4f   : > { %v4856_v7 = vpop.f32.mrb[25].mxu1  ;;  %v4862_v19 = vpop.f32.mrb[37].mxu0  ;;  %v3623_v8 = vsel %vm2392_vm5, %v3479_v14, -inf  ;;  %v3626_v20 = vsel %vm2392_vm5, %v3525_v15, -inf }
 0xc50   : > { %3624 = vmax.xlane.f32.xlu0 %v3623_v8  ;;  %v3482_v22 = vpop.f32.mrb[26].mxu1  ;;  %3627 = vmax.xlane.f32.xlu1 %v3626_v20  ;;  %v3528_v23 = vpop.f32.mrb[38].mxu0 }
 0xc51   : > { %v4857_v24 = vpop.f32.mrb[27].mxu1  ;;  %v4863_v25 = vpop.f32.mrb[39].mxu0 }
 0xc56   : > { %v3571_v27 = vpop.f32.mrb[28].mxu1  ;;  %v3617_v28 = vpop.f32.mrb[40].mxu0 }
 0xc57   : > { %v4868_v30 = vpop.f32.mrb[29].mxu1  ;;  %v4874_v31 = vpop.f32.mrb[41].mxu0  ;;  %v3629_v32 = vsel %vm2392_vm5, %v3571_v27, -inf  ;;  %v3632_v38 = vsel %vm2392_vm5, %v3617_v28, -inf }
 0xc58   : > { %3630 = vmax.xlane.f32.xlu0 %v3629_v32  ;;  %v3574_v33 = vpop.f32.mrb[30].mxu1  ;;  %v3620_v34 = vpop.f32.mrb[42].mxu0 }
 0xc59   : > { %v4869_v35 = vpop.f32.mrb[31].mxu1  ;;  %v4875_v36 = vpop.f32.mrb[43].mxu0 }
 0xc5c   : > { %3633 = vmax.xlane.f32.xlu0 %v3632_v38 }
 0xc61   : > { %3151 = vrot.lane.b32.xlu1 %v6424_v1, %s5714_s7 }
 0xc65   : > { %3153 = vrot.lane.b32.xlu1 %v6426_v29, %s5714_s7  ;;  %s6678_s7 = smov 8  }
 0xc72   : > { %3147 = vrot.lane.b32.xlu0 %v6426_v29, %s5713_s0  ;;  %s6677_s0 = sld [smem:[#allocation43_spill]] }
 0xcdd   : > { %v3625_v40 = vpop.xlane.xlu0 %3624  ;;  %v3628_v43 = vpop.xlane.xlu1 %3627 }
 0xcde   : > { %v3635_v44 = vsub.f32 %v3479_v14, %v3625_v40  ;;  %v3636_v41 = vsub.f32 %v3525_v15, %v3628_v43 }
 0xce0   : > { %v3639_v42 = vmul.f32 1.442695, %v3635_v44  ;;  %v3641_v45 = vmul.f32 1.442695, %v3636_v41 }
 0xce1   : > { %v3152_v37 = vpop.permute.xlu1 %3151 }
 0xce2   : > { %5183 = vpow2.f32 %v3639_v42  ;;  %v3163_v62 = vcombine.low %v6424_v1, %v3152_v37  ;;  %v3164_v6 = vcombine.high %v6424_v1, %v3152_v37 }
 0xce3   : > { %5185 = vpow2.f32 %v3641_v45 }
 0xce4   : > { %v3178_v7 = vrot.slane %v3164_v6, %v6189_v53 }
 0xce5   : > { %v3631_v50 = vpop.xlane.xlu0 %3630  ;;  %v3154_v0 = vpop.permute.xlu1 %3153 }
 0xce6   : > { %v3637_v54 = vsub.f32 %v3571_v27, %v3631_v50  ;;  %v3231_v5 = vcombine.low %v6426_v29, %v3154_v0  ;;  %v3232_v61 = vcombine.high %v6426_v29, %v3154_v0 }
 0xce8   : > { %v3643_v56 = vmul.f32 1.442695, %v3637_v54  ;;  %v3239_v17 = vrot.slane %v3231_v5, %v6189_v53  ;;  %v3246_v18 = vrot.slane %v3232_v61, %v6189_v53 }
 0xce9   : > { %v3634_v51 = vpop.xlane.xlu0 %3633 }
 0xcea   : > { %v3638_v52 = vsub.f32 %v3617_v28, %v3634_v51 }
 0xcec   : > { %v6474_v46 = vpop.eup %5183  ;;  %v3645_v55 = vmul.f32 1.442695, %v3638_v52 }
 0xced   : > { %v6476_v47 = vpop.eup %5185  ;;  %v3647_v48 = vsel %vm2392_vm5, %v6474_v46, 0.0  ;;  %v3148_v2 = vpop.permute.xlu0 %3147 }
 0xcee   : > { %3648 = vadd.xlane.f32.xlu1 %v3647_v48  ;;  %v3650_v49 = vsel %vm2392_vm5, %v6476_v47, 0.0  ;;  %5187 = vpow2.f32 %v3645_v55 }
 0xcef   : > { %3651 = vadd.xlane.f32.xlu0 %v3650_v49  ;;  %5189 = vpow2.f32 %v3643_v56 }
 0xcf8   : > { %v6486_v57 = vpop.eup %5187 }
 0xcf9   : > { %v6488_v58 = vpop.eup %5189  ;;  %v3656_v60 = vsel %vm2392_vm5, %v6486_v57, 0.0 }
 0xcfa   : > { %v3653_v63 = vsel %vm2392_vm5, %v6488_v58, 0.0 }
 0xcff   : > { %3159 = vrot.lane.b32.xlu1 %v6426_v29, %s6676_s10  ;;  %v3171_v29 = vrot.slane %v3163_v62, %v6189_v53 }
 0xd05   : > { %3157 = vrot.lane.b32.xlu0 %v6424_v1, %s6676_s10  ;;  %s6679_s10 = smov 24  }
 0xd23   : > { %3657 = vadd.xlane.f32.xlu1 %v3656_v60 }
 0xd24   : > { %3654 = vadd.xlane.f32.xlu0 %v3653_v63 }
 0xd7b   : > { %v3649_v3 = vpop.xlane.xlu1 %3648 }
 0xd7c   : > { %v3652_v4 = vpop.xlane.xlu0 %3651  ;;  %5191 = vrcp.f32 %v3649_v3 }
 0xd7d   : > { %5193 = vrcp.f32 %v3652_v4 }
 0xd7f   : > { %v3160_v10 = vpop.permute.xlu1 %3159 }
 0xd80   : > { %v3247_v11 = vcombine.low %v3148_v2, %v3160_v10  ;;  %v3248_v12 = vcombine.high %v3148_v2, %v3160_v10  ;;  %v3158_v26 = vpop.permute.xlu0 %3157 }
 0xd81   : > { %v3179_v13 = vcombine.low %v3146_v39, %v3158_v26  ;;  %v3180_v16 = vcombine.high %v3146_v39, %v3158_v26 }
 0xd82   : > { %v3255_v14 = vrot.slane %v3247_v11, %v6189_v53  ;;  %v3262_v15 = vrot.slane %v3248_v12, %v6189_v53 }
 0xd83   : > { %v3187_v1 = vrot.slane %v3179_v13, %v6189_v53  ;;  %v3194_v19 = vrot.slane %v3180_v16, %v6189_v53 }
 0xd84   : > { %v3263_v8 = vcombine.low %v3239_v17, %v3255_v14  ;;  %v3264_v20 = vcombine.high %v3239_v17, %v3255_v14  ;;  %v3279_v22 = vcombine.low %v3246_v18, %v3262_v15  ;;  %v3280_v23 = vcombine.high %v3246_v18, %v3262_v15 }
 0xd85   : > { %v3195_v24 = vcombine.low %v3171_v29, %v3187_v1  ;;  %v3196_v25 = vcombine.high %v3171_v29, %v3187_v1  ;;  %v3211_v27 = vcombine.low %v3178_v7, %v3194_v19  ;;  %v3212_v28 = vcombine.high %v3178_v7, %v3194_v19 }
 0xd86   : > { %v3271_v30 = vrot.slane %v3263_v8, %v6192_v59  ;;  %v3278_v31 = vrot.slane %v3264_v20, %v6192_v59  ;;  %v3287_v32 = vrot.slane %v3279_v22, %v6192_v59  ;;  %v3294_v33 = vrot.slane %v3280_v23, %v6192_v59  ;;  %v5192_v11 = vpop.eup %5191 }
 0xd87   : > { %v3203_v34 = vrot.slane %v3195_v24, %v6192_v59  ;;  %v3210_v35 = vrot.slane %v3196_v25, %v6192_v59  ;;  %v3219_v36 = vrot.slane %v3211_v27, %v6192_v59  ;;  %v3226_v44 = vrot.slane %v3212_v28, %v6192_v59  ;;  %v5194_v16 = vpop.eup %5193 }
 0xd88   : > { %v3367_v38 = vcombine.low %v3271_v30, %v3278_v31  ;;  %v4644_v39 = vcombine.high %v3271_v30, %v3278_v31  ;;  %v3383_v40 = vcombine.low %v3287_v32, %v3294_v33  ;;  %v4645_v43 = vcombine.high %v3287_v32, %v3294_v33 }
 0xd89   : > { %v3299_v41 = vcombine.low %v3203_v34, %v3210_v35  ;;  %v4642_v42 = vcombine.high %v3203_v34, %v3210_v35  ;;  %v3315_v54 = vcombine.low %v3219_v36, %v3226_v44  ;;  %v4643_v55 = vcombine.high %v3219_v36, %v3226_v44 }
 0xd8a   : > { %v3374_v45 = vrot.slane %v3367_v38, %v6189_v53  ;;  %v3382_v48 = vrot.slane %v4644_v39, %v6189_v53  ;;  %v3390_v49 = vrot.slane %v3383_v40, %v6189_v53  ;;  %v3398_v50 = vrot.slane %v4645_v43, %v6189_v53  ;;  %v5151_v39 = vld [vmem:[%s6677_s0] sm:$0xff]  }
 0xd8b   : > { %v3306_v51 = vrot.slane %v3299_v41, %v6189_v53  ;;  %v3314_v52 = vrot.slane %v4642_v42, %v6189_v53  ;;  %v3322_v63 = vrot.slane %v3315_v54, %v6189_v53  ;;  %v3330_v3 = vrot.slane %v4643_v55, %v6189_v53 }
 0xd8c   : > { %v3399_v56 = vcombine.low %v3374_v45, %v3382_v48  ;;  %v3400_v60 = vcombine.high %v3374_v45, %v3382_v48  ;;  %v3415_v0 = vcombine.low %v3390_v49, %v3398_v50  ;;  %v3416_v5 = vcombine.high %v3390_v49, %v3398_v50 }
 0xd8d   : > { %v3331_v37 = vcombine.low %v3306_v51, %v3314_v52  ;;  %v3332_v2 = vcombine.high %v3306_v51, %v3314_v52  ;;  %v3347_v6 = vcombine.low %v3322_v63, %v3330_v3  ;;  %v3348_v10 = vcombine.high %v3322_v63, %v3330_v3 }
 0xd8e   : > { %v3407_v4 = vrot.slane %v3399_v56, %v6192_v59  ;;  %v3423_v61 = vrot.slane %v3415_v0, %v6192_v59  ;;  %v3414_v26 = vrot.slane %v3400_v60, %v6192_v59  ;;  %v3430_v13 = vrot.slane %v3416_v5, %v6192_v59 }
 0xd8f   : > { %v3339_v62 = vrot.slane %v3331_v37, %v6192_v59  ;;  %v3346_v12 = vrot.slane %v3332_v2, %v6192_v59  ;;  %v3355_v17 = vrot.slane %v3347_v6, %v6192_v59  ;;  %v3362_v15 = vrot.slane %v3348_v10, %v6192_v59 }
 0xd90   : > { %v3431_v18 = vcombine.low %v3407_v4, %v3423_v61  ;;  %v3432_v14 = vcombine.high %v3407_v4, %v3423_v61  ;;  %v3663_v1 = vmul.f32 %v5192_v11, %v6474_v46  ;;  %v3664_v19 = vmul.f32 %v5194_v16, %v6476_v47  ;;  %v5152_v11 = vld [vmem:[%s6677_s0 + $0x8] sm:$0xff]  }
 0xd91   : > { %v3363_v29 = vcombine.low %v3339_v62, %v3355_v17  ;;  %v3364_v7 = vcombine.high %v3339_v62, %v3355_v17  ;;  %v3433_v8 = vcombine.low %v3414_v26, %v3430_v13  ;;  %v3434_v20 = vcombine.high %v3414_v26, %v3430_v13 }
 0xd92   : > { %v3365_v24 = vcombine.low %v3346_v12, %v3362_v15  ;;  %v3366_v25 = vcombine.high %v3346_v12, %v3362_v15  ;;  %v3667_v27 = vpack.c.bf16 %v3663_v1, %v3663_v1  ;;  %v3668_v28 = vpack.c.bf16 %v3664_v19, %v3664_v19 }
 0xd93   : > { %v3435_v22 = vpack.c.bf16 %v3431_v18, %v3363_v29  ;;  %v3436_v23 = vpack.c.bf16 %v3432_v14, %v3364_v7 }
 0xd94   : > { %v3437_v30 = vpack.c.bf16 %v3433_v8, %v3365_v24  ;;  %v3438_v31 = vpack.c.bf16 %v3434_v20, %v3366_v25 }
 0xd95   : > { %4877 = vmatpush3.bf16.msra.mxu1 %v3435_v22  ;;  %4883 = vmatpush3.bf16.msra.mxu0 %v3436_v23 }
 0xd96   : > { %4888 = vmatprep.subr.bf16.mxu1 %v5710_v9  ;;  %4894 = vmatprep.subr.bf16.mxu0 %v5710_v9 }
 0xd98   : > { %4879 = vmatmul.mubr.msk.bf16.vlgmr.msra.gmra.mrb[32].mxu1 %vm2392_vm5, %v3667_v27  ;;  %4885 = vmatmul.mubr.msk.bf16.vlgmr.msra.gmra.mrb[44].mxu0 %vm2392_vm5, %v3668_v28 }
 0xd99   : > { %4889 = vmatpush3.bf16.msra.mxu1 %v3437_v30  ;;  %4895 = vmatpush3.bf16.msra.mxu0 %v3438_v31 }
 0xd9a   : > { %4890 = vmatprep.mubr.msk.bf16.mxu1 %vm5711_vm1, %v5710_v9  ;;  %4896 = vmatprep.mubr.msk.bf16.mxu0 %vm5711_vm1, %v5710_v9 }
 0xd9b   : > { %4900 = vmatprep.subr.bf16.mxu1 %v5710_v9  ;;  %4908 = vmatprep.subr.bf16.mxu0 %v5710_v9 }
 0xdb0   : > { %v3658_v46 = vpop.xlane.xlu1 %3657 }
 0xdb1   : > { %5195 = vrcp.f32 %v3658_v46  ;;  %v3655_v47 = vpop.xlane.xlu0 %3654 }
 0xdb2   : > { %5197 = vrcp.f32 %v3655_v47 }
 0xdbb   : > { %v5196_v32 = vpop.eup %5195 }
 0xdbc   : > { %v5198_v33 = vpop.eup %5197  ;;  %v3666_v34 = vmul.f32 %v5196_v32, %v6486_v57 }
 0xdbd   : > { %v3665_v35 = vmul.f32 %v5198_v33, %v6488_v58 }
 0xdbe   : > { %v3670_v36 = vpack.c.bf16 %v3666_v34, %v3666_v34 }
 0xdbf   : > { %v3669_v38 = vpack.c.bf16 %v3665_v35, %v3665_v35 }
 0xdc0   : > { %4897 = vmatmul.mubr.msk.bf16.vlgmr.msra.gmra.mrb[48].mxu0 %vm2392_vm5, %v3670_v36 }
 0xdc1   : > { %4891 = vmatmul.mubr.msk.bf16.vlgmr.msra.gmra.mrb[36].mxu1 %vm2392_vm5, %v3669_v38  ;;  %4912 = vmatprep.mubr.msk.bf16.mxu0 %vm5711_vm1, %v5710_v9  ;;  %v4656_v38 = vld [vmem:[#allocation15] ss:$0 sm:$0xff] }
 0xdc2   : > { %4904 = vmatprep.mubr.msk.bf16.mxu1 %vm5711_vm1, %v5710_v9  ;;  %4901 = vmatpush3.bf16.msra.mxu1 %v5151_v39 }
 0xdc3   : > { %4902 = vmatprep.subr.bf16.mxu1 %v5710_v9 }
 0xdc6   : > { %4903 = vmatpush3.bf16.msra.mxu1 %v5152_v11 }
 0xdc7   : > { %4916 = vmatprep.subr.bf16.mxu1 %v5710_v9 }
 0xe6b   : > { %v3708_v40 = vpop.f32.mrb[32].mxu1  ;;  %v3751_v57 = vpop.f32.mrb[44].mxu0 }
 0xe6c   : > { %v4880_v43 = vpop.f32.mrb[33].mxu1  ;;  %v4886_v58 = vpop.f32.mrb[45].mxu0 }
 0xe6d   : > { %v3711_v44 = vpop.f32.mrb[34].mxu1  ;;  %v3754_v41 = vpop.f32.mrb[46].mxu0 }
 0xe6e   : > { %v4881_v42 = vpop.f32.mrb[35].mxu1  ;;  %v4887_v45 = vpop.f32.mrb[47].mxu0 }
 0xe93   : > { %v3837_v48 = vpop.f32.mrb[48].mxu0 }
 0xe94   : > { %v3794_v49 = vpop.f32.mrb[36].mxu1  ;;  %v3859_v50 = vcombine.low %v3751_v57, %v3837_v48  ;;  %v3860_v51 = vcombine.high %v3751_v57, %v3837_v48  ;;  %v4898_v52 = vpop.f32.mrb[49].mxu0 }
 0xe95   : > { %v3843_v54 = vcombine.low %v3708_v40, %v3794_v49  ;;  %v3844_v55 = vcombine.high %v3708_v40, %v3794_v49  ;;  %v4892_v56 = vpop.f32.mrb[37].mxu1  ;;  %v3840_v60 = vpop.f32.mrb[50].mxu0 }
 0xe96   : > { %v3867_v63 = vrot.slane %v3859_v50, %v6189_v53  ;;  %v3874_v37 = vrot.slane %v3860_v51, %v6189_v53  ;;  %v3797_v0 = vpop.f32.mrb[38].mxu1  ;;  %v4899_v2 = vpop.f32.mrb[51].mxu0  ;;  %v4660_v60 = vld [vmem:[#allocation16] ss:$0 sm:$0xff] }
 0xe97   : > { %v3851_v3 = vrot.slane %v3843_v54, %v6189_v53  ;;  %v3858_v4 = vrot.slane %v3844_v55, %v6189_v53  ;;  %v4893_v5 = vpop.f32.mrb[39].mxu1 }
 0xe99   : > { %v3875_v61 = vcombine.low %v3851_v3, %v3867_v63  ;;  %v3876_v62 = vcombine.high %v3851_v3, %v3867_v63  ;;  %v3891_v6 = vcombine.low %v3858_v4, %v3874_v37  ;;  %v3892_v10 = vcombine.high %v3858_v4, %v3874_v37  ;;  %v4661_v37 = vld [vmem:[#allocation18] ss:$0 sm:$0xff] }
 0xe9b   : > { %v3883_v12 = vrot.slane %v3875_v61, %v6192_v59  ;;  %v3890_v26 = vrot.slane %v3876_v62, %v6192_v59  ;;  %v3899_v13 = vrot.slane %v3891_v6, %v6192_v59  ;;  %v3906_v16 = vrot.slane %v3892_v10, %v6192_v59 }
 0xe9d   : > { %v3911_v17 = vcombine.low %v3883_v12, %v3890_v26  ;;  %v4654_v18 = vcombine.high %v3883_v12, %v3890_v26  ;;  %v3927_v14 = vcombine.low %v3899_v13, %v3906_v16  ;;  %v4655_v15 = vcombine.high %v3899_v13, %v3906_v16  ;;  %v4662_v26 = vld [vmem:[#allocation19] ss:$0 sm:$0xff] }
 0xe9f   : > { %v3918_v29 = vrot.slane %v3911_v17, %v6189_v53  ;;  %v3926_v7 = vrot.slane %v4654_v18, %v6189_v53  ;;  %v3934_v1 = vrot.slane %v3927_v14, %v6189_v53  ;;  %v3942_v19 = vrot.slane %v4655_v15, %v6189_v53 }
 0xea1   : > { %v3944_v8 = vcombine.high %v3918_v29, %v3926_v7  ;;  %v3960_v20 = vcombine.high %v3934_v1, %v3942_v19  ;;  %v3943_v22 = vcombine.low %v3918_v29, %v3926_v7  ;;  %v3959_v23 = vcombine.low %v3934_v1, %v3942_v19 }
 0xea3   : > { %v3958_v24 = vrot.slane %v3944_v8, %v6192_v59  ;;  %v3974_v25 = vrot.slane %v3960_v20, %v6192_v59  ;;  %v3951_v27 = vrot.slane %v3943_v22, %v6192_v59  ;;  %v3967_v28 = vrot.slane %v3959_v23, %v6192_v59 }
 0xea5   : > { %v3977_v30 = vcombine.low %v3958_v24, %v3974_v25  ;;  %v3976_v31 = vcombine.high %v3951_v27, %v3967_v28  ;;  %v3978_v46 = vcombine.high %v3958_v24, %v3974_v25  ;;  %v3975_v47 = vcombine.low %v3951_v27, %v3967_v28  ;;  %v4674_v25 = vld [vmem:[#allocation21] ss:$0 sm:$0xff] }
 0xea7   : > { %3984 = vrot.lane.b32.xlu1 %v3977_v30, %s5718_s11  ;;  %3980 = vrot.lane.b32.xlu0 %v3976_v31, %s6678_s7  ;;  %s6680_s11 = sld [smem:[#allocation44_spill]]  ;;  %s6681_s7 = sld [smem:[#allocation45_spill]] }
 0xeab   : > { %3988 = vrot.lane.b32.xlu0 %v3978_v46, %s6679_s10  ;;  %s6682_s10 = sshll.u32 %s6684_s18, 2 }
 0xeac   : > { %s1133_s0 = scalar_lea.vmem %s5879_s17, %s6682_s10 }
 0xead   : > { %v5153_v51 = vld [vmem:[%s6680_s11] sm:$0xff]   ;;  %v5154_v52 = vld [vmem:[%s6680_s11 + $0x8] sm:$0xff]   ;;  %v5157_v61 = vld [vmem:[%s6681_s7 + $0x10] sm:$0xff]  }
 0xeae   : > { %4909 = vmatpush3.bf16.msra.mxu0 %v5153_v51  ;;  %v5155_v4 = vld [vmem:[%s6681_s7] sm:$0xff]   ;;  %v5156_v5 = vld [vmem:[%s6681_s7 + $0x8] sm:$0xff]   ;;  %v5158_v62 = vld [vmem:[%s6681_s7 + $0x18] sm:$0xff]  }
 0xeaf   : > { %4910 = vmatprep.subr.bf16.mxu0 %v5710_v9  ;;  %v5159_v6 = vld [vmem:[%s6681_s7 + $0x20] sm:$0xff]   ;;  %v5160_v10 = vld [vmem:[%s6681_s7 + $0x28] sm:$0xff]   ;;  %v5161_v11 = vld [vmem:[%s6681_s7 + $0x30] sm:$0xff]  }
 0xeb0   : > { %v5162_v12 = vld [vmem:[%s6681_s7 + $0x38] sm:$0xff]  }
 0xeb2   : > { %4911 = vmatpush3.bf16.msra.mxu0 %v5154_v52 }
 0xf19   : > { %v3981_v53 = vpop.permute.xlu0 %3980  ;;  %v3985_v32 = vpop.permute.xlu1 %3984 }
 0xf1a   : > { %v3991_v33 = vsel %vm1825_vm3, %v3975_v47, %v3981_v53 }
 0xf1b   : > { %v3992_v35 = vsel %vm2392_vm5, %v3991_v33, %v3985_v32 }
 0xf1d   : > { %v3989_v34 = vpop.permute.xlu0 %3988 }
 0xf1e   : > { %v3993_v36 = vsel %vm2394_vm6, %v3992_v35, %v3989_v34 }
 0xf1f   : > { %v3994_v59 = vpack.c.bf16 %v3993_v36, %v3993_v36 }
 0xf21   : > { %4905 = vmatmul.mubr.msk.bf16.vlgmr.msra.gmra.mrb[40].mxu1 %vm1141_vm0, %v3994_v59 }
 0xf22   : > { %4932 = vmatprep.mubr.msk.bf16.mxu1 %vm5711_vm1, %v5710_v9  ;;  %4917 = vmatpush3.bf16.msra.mxu1 %v5155_v4 }
 0xf23   : > { %4918 = vmatprep.subr.bf16.mxu1 %v5710_v9 }
 0xf26   : > { %4919 = vmatpush3.bf16.msra.mxu1 %v5156_v5 }
 0xf27   : > { %4920 = vmatprep.subr.bf16.mxu1 %v5710_v9 }
 0xf2a   : > { %4921 = vmatpush3.bf16.msra.mxu1 %v5157_v61 }
 0xf2b   : > { %4922 = vmatprep.subr.bf16.mxu1 %v5710_v9 }
 0xf2e   : > { %4923 = vmatpush3.bf16.msra.mxu1 %v5158_v62 }
 0xf2f   : > { %4924 = vmatprep.subr.bf16.mxu1 %v5710_v9 }
 0xf32   : > { %4925 = vmatpush3.bf16.msra.mxu1 %v5159_v6 }
 0xf33   : > { %4926 = vmatprep.subr.bf16.mxu1 %v5710_v9 }
 0xf36   : > { %4927 = vmatpush3.bf16.msra.mxu1 %v5160_v10 }
 0xf37   : > { %4928 = vmatprep.subr.bf16.mxu1 %v5710_v9 }
 0xf3a   : > { %4929 = vmatpush3.bf16.msra.mxu1 %v5161_v11 }
 0xf3b   : > { %4930 = vmatprep.subr.bf16.mxu1 %v5710_v9 }
 0xf3e   : > { %4931 = vmatpush3.bf16.msra.mxu1 %v5162_v12 }
 0xff4   : > { %v4050_v39 = vpop.f32.mrb[40].mxu1 }
 0xff5   : > { %v4051_v40 = vadd.f32 %v4656_v38, %v4050_v39  ;;  %v4906_v57 = vpop.f32.mrb[41].mxu1 }
 0xff6   : > { %v4053_v43 = vpop.f32.mrb[42].mxu1 }
 0xff7   : > { %v6580_v58 = vadd.f32 %v4051_v40, %v6343_v21  ;;  %v4907_v44 = vpop.f32.mrb[43].mxu1  ;;  %v4675_v40 = vld [vmem:[#allocation22] ss:$0 sm:$0xff]  ;;  %v4676_v43 = vld [vmem:[#allocation24] ss:$0 sm:$0xff] }
 0xff9   : > { %v4059_v41 = vsel %vm1141_vm0, %v6580_v58, 0.0 }
 0xffa   : > { %4060 = vadd.xlane.f32.xlu1 %v4059_v41 }
0x1087   : > { %v4061_v42 = vpop.xlane.xlu1 %4060 }
0x1088   : > { %v4062_v45 = vmul.f32 0.03125, %v4061_v42 }
0x108a   : > { %v4063_v48 = vsub.f32 %v6580_v58, %v4062_v45 }
0x108c   : > { %v4064_v49 = vmul.f32 %v4063_v48, %v4063_v48 }
0x108e   : > { %v4065_v50 = vsel %vm1141_vm0, %v4064_v49, 0.0 }
0x108f   : > { %4066 = vadd.xlane.f32.xlu0 %v4065_v50 }
0x111c   : > { %v4067_v21 = vpop.xlane.xlu0 %4066 }
0x111d   : > { %v4068_v54 = vmul.f32 0.03125, %v4067_v21 }
0x111f   : > { %v4069_v55 = vadd.f32 1e-05, %v4068_v54 }
0x1121   : > { %5199 = vrsqrt.f32 %v4069_v55 }
0x112b   : > { %v5200_v56 = vpop.eup %5199 }
0x112c   : > { %v4071_v63 = vmul.f32 %v5200_v56, %v4063_v48 }
0x112e   : > { %v4078_v0 = vmul.f32 %v4660_v60, %v4071_v63 }
0x1130   : > { %v4085_v2 = vadd.f32 %v4661_v37, %v4078_v0 }
0x1132   : > { %v4090_v3 = vpack.c.bf16 %v4085_v2, %v4085_v2 }
0x1134   : > { %4913 = vmatmul.mubr.msk.bf16.vlgmr.msra.gmra.mrb[52].mxu0 %vm1141_vm0, %v4090_v3 }
0x1207   : > { %v4147_v13 = vpop.f32.mrb[52].mxu0 }
0x1208   : > { %v4148_v16 = vadd.f32 %v4662_v26, %v4147_v13  ;;  %v4914_v17 = vpop.f32.mrb[53].mxu0 }
0x1209   : > { %v4150_v18 = vpop.f32.mrb[54].mxu0 }
0x120a   : > { %v4153_v14 = vmul.f32 %v4148_v16, %v4148_v16  ;;  %v4915_v15 = vpop.f32.mrb[55].mxu0 }
0x120c   : > { %v4154_v29 = vmul.f32 %v4153_v14, %v4148_v16 }
0x120e   : > { %v4155_v7 = vmul.f32 0.044715, %v4154_v29 }
0x1210   : > { %v4156_v1 = vadd.f32 %v4155_v7, %v4148_v16 }
0x1212   : > { %v4157_v19 = vmul.f32 0.7978846, %v4156_v1 }
0x1214   : > { %5201 = vtanh.f32 %v4157_v19 }
0x121e   : > { %v5202_v8 = vpop.eup %5201 }
0x121f   : > { %v4159_v20 = vadd.f32 1.0, %v5202_v8 }
0x1221   : > { %v4160_v22 = vmul.f32 0.5, %v4159_v20 }
0x1223   : > { %v4161_v23 = vmul.f32 %v4160_v22, %v4148_v16 }
0x1225   : > { %v4178_v24 = vpack.c.bf16 %v4161_v23, %v4161_v23 }
0x1227   : > { %4933 = vmatmul.mubr.bf16.vlgmr.msra.gmra.mrb[44].mxu1 %v4178_v24 }
0x12fa   : > { %v4261_v9 = vpop.f32.mrb[44].mxu1 }
0x12fb   : > { %v4267_v27 = vadd.f32 %v4261_v9, %v6580_v58  ;;  %v4934_v28 = vpop.f32.mrb[45].mxu1 }
0x12fc   : > { %v4264_v30 = vpop.f32.mrb[46].mxu1 }
0x12fd   : > { %v4935_v31 = vpop.f32.mrb[47].mxu1  ;;  %v4275_v46 = vadd.f32 %v4674_v25, %v4267_v27 }
0x12ff   : > { %v4278_v47 = vsel %vm1141_vm0, %v4275_v46, 0.0 }
0x1300   : > { %4279 = vadd.xlane.f32.xlu0 %v4278_v47 }
0x138d   : > { %v4280_v53 = vpop.xlane.xlu0 %4279 }
0x138e   : > { %v4281_v32 = vmul.f32 0.03125, %v4280_v53 }
0x1390   : > { %v4282_v33 = vsub.f32 %v4275_v46, %v4281_v32 }
0x1392   : > { %v4283_v34 = vmul.f32 %v4282_v33, %v4282_v33 }
0x1394   : > { %v4284_v35 = vsel %vm1141_vm0, %v4283_v34, 0.0 }
0x1395   : > { %4285 = vadd.xlane.f32.xlu1 %v4284_v35 }
0x1422   : > { %v4286_v36 = vpop.xlane.xlu1 %4285 }
0x1423   : > { %v4287_v59 = vmul.f32 0.03125, %v4286_v36 }
0x1425   : > { %v4288_v38 = vadd.f32 1e-05, %v4287_v59 }
0x1427   : > { %5203 = vrsqrt.f32 %v4288_v38 }
0x1431   : > { %v5204_v39 = vpop.eup %5203 }
0x1432   : > { %v4290_v57 = vmul.f32 %v5204_v39, %v4282_v33 }
0x1434   : > { %v4297_v58 = vmul.f32 %v4675_v40, %v4290_v57 }
0x1436   : > { %v4304_v44 = vadd.f32 %v4676_v43, %v4297_v58 }
0x1438   : > { %v4305_v41 = vpack.c.bf16 %v4304_v44, %v4304_v44 }
0x143a   : > { %4307 = vst.msk [vmem:[%s1133_s0] sm:$0xf] %vm4306_vm7, %v4305_v41 }
0x143b PF: > { %s79_s15 = sadd.s32 1, %s5663_s15  }
0x143c   : > { %p76_p13 = scmp.ge.s32.totalorder %s79_s15, 4  }
0x143e   :  { %78 = sbr.rel (!%p76_p13) target bundleno = 54 (0x36), region = 264 }
0x1445   :  { %4327 = vsyncpa [#allocation3], 1 }
0x1446   :  { %4329 = vsyncpa [#allocation3 + $0x1], 1 }
0x1447   :  { %4330 = vsyncpa [#allocation5], 1 }
0x1448   :  { %4331 = vsyncpa [#allocation8], 1 }
0x1449   :  { %4332 = vsyncpa [#allocation11], 1 }
0x144a   :  { %4333 = vsyncpa [#allocation14], 1 }
0x144b   :  { %4334 = vsyncpa [#allocation17], 1 }
0x144c   :  { %4335 = vsyncpa [#allocation20], 1 }
0x144d   :  { %4336 = vsyncpa [#allocation23], 1 }

</bundles_post_ra>
